<compile_context>
chip_gen: v5e
topology: v5e:2x2
jax: 0.10.0
libtpu: 0.0.40
codegen_flags: <defaults>
</compile_context>

<pallas_src>
import jax
import jax.numpy as jnp
from jax.experimental import pallas as pl
from jax.experimental.pallas import tpu as pltpu


def _round_up(x, m):
    return ((x + m - 1) // m) * m


def _leaky_relu(v, negative_slope=0.01):
    # nn.LeakyReLU() default negative_slope = 0.01
    return jnp.where(v > 0, v, negative_slope * v)


def _mlp_kernel(nz_ref,
                w1_ref, b1_ref,
                w2_ref, b2_ref,
                w3_ref, s3_ref, b3_ref,
                w4_ref, s4_ref, b4_ref,
                w5_ref, b5_ref,
                out_ref):
    def layer(h, w_ref, b_ref, scale_ref=None, act=True):
        w = w_ref[...]
        if w.dtype == jnp.int8:
            # int8 storage is only a DMA-bytes optimization; compute in bf16 on
            # the MXU on every generation (v7x MXU has no int path).
            w = w.astype(jnp.float32).astype(jnp.bfloat16)
        y = jnp.dot(h, w, preferred_element_type=jnp.float32)   # f32 accumulate
        if scale_ref is not None:
            y = y * scale_ref[...]        # per-output-channel dequant scale
        y = y + b_ref[...]
        if act:
            return _leaky_relu(y).astype(jnp.bfloat16)  # bf16 hidden activations
        return y                                         # final layer stays f32

    h = nz_ref[...].astype(jnp.bfloat16)               # [tm, noise]
    h = layer(h, w1_ref, b1_ref)                        # [tm, 256]
    h = layer(h, w2_ref, b2_ref)                        # [tm, 512]
    h = layer(h, w3_ref, b3_ref, s3_ref)                # [tm, 1024] (int8 w)
    h = layer(h, w4_ref, b4_ref, s4_ref)                # [tm, 512]  (int8 w)
    h = layer(h, w5_ref, b5_ref, act=False)             # [tm, 128]  lane-dense
    out_ref[...] = h.astype(out_ref.dtype)


def generator_forward(nz, params, pnl_size, *, row_tile=256):
    """Run the 5-layer MLP.

    nz: [market_size, noise_size] f32 noise.
    Returns [market_size, pnl_size] f32.
    """
    M, noise_size = nz.shape
    out_cols = params["w5"].shape[1]        # lane-padded to a multiple of 128

    # Row tile: multiple of 16 (bf16 intermediates), aims for >=2 grid steps so
    # the "parallel" row axis can shard across v7x's two TensorCores; capped at
    # row_tile for large batches.
    TM_MULT = 16
    if M <= 2 * row_tile:
        tm = max(TM_MULT, _round_up(pl.cdiv(M, 2), TM_MULT))
    else:
        tm = _round_up(row_tile, TM_MULT)
    grid_m = pl.cdiv(M, tm)
    M_pad = grid_m * tm
    if M_pad != M:
        nz = jnp.pad(nz, ((0, M_pad - M), (0, 0)))

    # Row-tiled specs for noise/output; full-array, constant-index specs for
    # weights/scales/biases so they are DMA'd once and stay resident in VMEM
    # across grid steps.
    param_order = ("w1", "b1", "w2", "b2", "w3", "s3", "b3",
                   "w4", "s4", "b4", "w5", "b5")
    in_specs = [pl.BlockSpec((tm, noise_size), lambda i: (i, 0),
                             memory_space=pltpu.VMEM)]
    flat_args = [nz]
    for name in param_order:
        arr = params[name]
        in_specs.append(pl.BlockSpec(arr.shape, lambda i: (0, 0),
                                     memory_space=pltpu.VMEM))
        flat_args.append(arr)

    out_spec = pl.BlockSpec((tm, out_cols), lambda i: (i, 0),
                            memory_space=pltpu.VMEM)

    # Advisory cost estimate (flops ~ 2*M*sum(fan_in*fan_out), bytes ~ weights
    # + activations); helps XLA schedule ops around the custom call.
    dims = [(noise_size, 256), (256, 512), (512, 1024), (1024, 512),
            (512, out_cols)]
    flops = 2 * M_pad * sum(a * b for a, b in dims)
    bytes_accessed = (
        sum(int(params[n].size) * params[n].dtype.itemsize for n in param_order)
        + M_pad * noise_size * 4 + M_pad * out_cols * 4)
    cost = pl.CostEstimate(flops=flops, transcendentals=0,
                           bytes_accessed=bytes_accessed)

    out_pad = pl.pallas_call(
        _mlp_kernel,
        out_shape=jax.ShapeDtypeStruct((M_pad, out_cols), jnp.float32),
        grid=(grid_m,),
        in_specs=in_specs,
        out_specs=out_spec,
        compiler_params=pltpu.CompilerParams(
            dimension_semantics=("parallel",)),   # megacore-shardable row axis
        cost_estimate=cost,
    )(*flat_args)

    return out_pad[:M, :pnl_size]


def _quantize_int8_per_col(w):
    """Symmetric per-output-channel int8 quantization of a [in, out] weight."""
    amax = jnp.max(jnp.abs(w), axis=0, keepdims=True)          # [1, out]
    scale = jnp.maximum(amax, 1e-8) / 127.0
    wq = jnp.clip(jnp.round(w / scale), -127, 127).astype(jnp.int8)
    return wq, scale.astype(jnp.float32)


def init_params(key, noise_size, pnl_size):
    """Init mirroring torch.nn.Linear defaults (U[-1/sqrt(fan_in), 1/sqrt(fan_in)]).

    Storage (documented reduced-precision tradeoff vs the f32 PyTorch module):
      * w1/w2/w5 bf16 [in, out]; w3/w4 int8 [in, out] + per-column f32 scales
      * biases f32 [1, out]
      * w5/b5 zero-padded to a lane-dense multiple of 128 output columns
    """
    pnl_pad = _round_up(max(pnl_size, 1), 128)
    dims = [(noise_size, 256), (256, 512), (512, 1024), (1024, 512),
            (512, pnl_size)]
    params = {}
    for i, (fan_in, fan_out) in enumerate(dims, start=1):
        key, kw, kb = jax.random.split(key, 3)
        bound = 1.0 / jnp.sqrt(jnp.float32(fan_in))
        w = jax.random.uniform(kw, (fan_in, fan_out), jnp.float32,
                               minval=-bound, maxval=bound)
        b = jax.random.uniform(kb, (1, fan_out), jnp.float32,
                               minval=-bound, maxval=bound)
        if i in (3, 4):
            wq, s = _quantize_int8_per_col(w)
            params[f"w{i}"] = wq
            params[f"s{i}"] = s
            params[f"b{i}"] = b
        elif i == 5:
            # Lane-dense final layer: pad output columns to 128 with zeros
            # (padded output columns are exactly zero and sliced off).
            w_pad = jnp.zeros((fan_in, pnl_pad), jnp.float32).at[:, :fan_out].set(w)
            b_pad = jnp.zeros((1, pnl_pad), jnp.float32).at[:, :fan_out].set(b)
            params[f"w{i}"] = w_pad.astype(jnp.bfloat16)
            params[f"b{i}"] = b_pad
        else:
            params[f"w{i}"] = w.astype(jnp.bfloat16)
            params[f"b{i}"] = b
    return params


def reference_forward(nz, params, pnl_size):
    """Pure-JAX reference with the same quantized-storage / f32-accumulate math."""
    h = nz.astype(jnp.bfloat16)
    for i in range(1, 6):
        w = params[f"w{i}"]
        if w.dtype == jnp.int8:
            w = w.astype(jnp.float32).astype(jnp.bfloat16)
        y = jnp.dot(h, w, preferred_element_type=jnp.float32)
        s = params.get(f"s{i}")
        if s is not None:
            y = y * s
        y = y + params[f"b{i}"]
        h = _leaky_relu(y).astype(jnp.bfloat16) if i < 5 else y
    return h[:, :pnl_size]


if __name__ == "__main__":
    # Shapes consistent with Generator(noise_size, pnl_size, market_size)
    noise_size = 32
    pnl_size = 8
    market_size = 8

    key = jax.random.PRNGKey(0)
    key, k_params, k_noise, k_noise_big = jax.random.split(key, 4)

    params = init_params(k_params, noise_size, pnl_size)

    # generate_noise_input(type='gaussian', mean=0.0, std=1.0):
    # noise ~ N(mean, std), shape [market_size, noise_size]
    # TODO(synk): module uses numpy RNG; generated here with jax.random instead.
    mean, std = 0.0, 1.0
    nz = mean + std * jax.random.normal(k_noise, (market_size, noise_size),
                                        jnp.float32)

    out = generator_forward(nz, params, pnl_size)
    out = jax.block_until_ready(out)
    ref = reference_forward(nz, params, pnl_size)
    assert out.shape == (market_size, pnl_size)
    assert jnp.allclose(out, ref, atol=1e-2, rtol=1e-2), "mismatch vs reference"

    # Second call with a larger, non-multiple-of-tile batch to exercise the
    # row grid (>=2 steps), padding, resident-weight path and int8 dequant.
    big_M = 200
    nz_big = mean + std * jax.random.normal(k_noise_big, (big_M, noise_size),
                                            jnp.float32)
    out_big = jax.block_until_ready(generator_forward(nz_big, params, pnl_size))
    ref_big = reference_forward(nz_big, params, pnl_size)
    assert out_big.shape == (big_M, pnl_size)
    assert jnp.allclose(out_big, ref_big, atol=1e-2, rtol=1e-2), \
        "mismatch vs reference (batched)"

    print("KERNEL_OK")
</pallas_src>

<mosaic_0001>
module attributes {stable_mosaic.version = 11 : i64} {
  func.func @_mlp_kernel(%arg0: i32, %arg1: memref<16x32xf32, #tpu.memory_space<vmem>>, %arg2: memref<32x256xbf16, #tpu.memory_space<vmem>>, %arg3: memref<1x256xf32, #tpu.memory_space<vmem>>, %arg4: memref<256x512xbf16, #tpu.memory_space<vmem>>, %arg5: memref<1x512xf32, #tpu.memory_space<vmem>>, %arg6: memref<512x1024xi8, #tpu.memory_space<vmem>>, %arg7: memref<1x1024xf32, #tpu.memory_space<vmem>>, %arg8: memref<1x1024xf32, #tpu.memory_space<vmem>>, %arg9: memref<1024x512xi8, #tpu.memory_space<vmem>>, %arg10: memref<1x512xf32, #tpu.memory_space<vmem>>, %arg11: memref<1x512xf32, #tpu.memory_space<vmem>>, %arg12: memref<512x128xbf16, #tpu.memory_space<vmem>>, %arg13: memref<1x128xf32, #tpu.memory_space<vmem>>, %arg14: memref<16x128xf32, #tpu.memory_space<vmem>>) attributes {dimension_semantics = [#tpu.dimension_semantics<parallel>], iteration_bounds = array<i64: 1>, scalar_prefetch = 0 : i64, scratch_operands = 0 : i64, tpu.core_type = #tpu.core_type<tc>, window_params = [{transform_indices = @transform_0, window_bounds = array<i64: 16, 32>}, {pipeline_mode = #tpu.pipeline_mode<synchronous>, transform_indices = @transform_1, window_bounds = array<i64: 32, 256>}, {pipeline_mode = #tpu.pipeline_mode<synchronous>, transform_indices = @transform_2, window_bounds = array<i64: 1, 256>}, {pipeline_mode = #tpu.pipeline_mode<synchronous>, transform_indices = @transform_3, window_bounds = array<i64: 256, 512>}, {pipeline_mode = #tpu.pipeline_mode<synchronous>, transform_indices = @transform_4, window_bounds = array<i64: 1, 512>}, {pipeline_mode = #tpu.pipeline_mode<synchronous>, transform_indices = @transform_5, window_bounds = array<i64: 512, 1024>}, {pipeline_mode = #tpu.pipeline_mode<synchronous>, transform_indices = @transform_6, window_bounds = array<i64: 1, 1024>}, {pipeline_mode = #tpu.pipeline_mode<synchronous>, transform_indices = @transform_7, window_bounds = array<i64: 1, 1024>}, {pipeline_mode = #tpu.pipeline_mode<synchronous>, transform_indices = @transform_8, window_bounds = array<i64: 1024, 512>}, {pipeline_mode = #tpu.pipeline_mode<synchronous>, transform_indices = @transform_9, window_bounds = array<i64: 1, 512>}, {pipeline_mode = #tpu.pipeline_mode<synchronous>, transform_indices = @transform_10, window_bounds = array<i64: 1, 512>}, {pipeline_mode = #tpu.pipeline_mode<synchronous>, transform_indices = @transform_11, window_bounds = array<i64: 512, 128>}, {pipeline_mode = #tpu.pipeline_mode<synchronous>, transform_indices = @transform_12, window_bounds = array<i64: 1, 128>}, {transform_indices = @transform_13, window_bounds = array<i64: 16, 128>}]} {
    %c0 = arith.constant 0 : index
    %c0_0 = arith.constant 0 : index
    %0 = vector.load %arg1[%c0, %c0_0] : memref<16x32xf32, #tpu.memory_space<vmem>>, vector<16x32xf32>
    %1 = arith.truncf %0 : vector<16x32xf32> to vector<16x32xbf16>
    %c0_1 = arith.constant 0 : index
    %c0_2 = arith.constant 0 : index
    %2 = vector.load %arg2[%c0_1, %c0_2] : memref<32x256xbf16, #tpu.memory_space<vmem>>, vector<32x256xbf16>
    %cst = arith.constant dense<0.000000e+00> : vector<16x256xf32>
    %3 = tpu.matmul %1, %2, %cst {dimension_numbers = #tpu.dot_dimension_numbers<[1], [0], [0], [1], [0, 0, 1, 1], [], []>} : vector<16x32xbf16>, vector<32x256xbf16>, vector<16x256xf32> -> vector<16x256xf32>
    %c0_3 = arith.constant 0 : index
    %c0_4 = arith.constant 0 : index
    %4 = vector.load %arg3[%c0_3, %c0_4] : memref<1x256xf32, #tpu.memory_space<vmem>>, vector<1x256xf32>
    %5 = vector.broadcast %4 : vector<1x256xf32> to vector<16x256xf32>
    %6 = arith.addf %3, %5 : vector<16x256xf32>
    %cst_5 = arith.constant 0.000000e+00 : f32
    %7 = vector.broadcast %cst_5 : f32 to vector<16x256xf32>
    %8 = arith.cmpf ogt, %6, %7 : vector<16x256xf32>
    %cst_6 = arith.constant 0.00999999977 : f32
    %9 = vector.broadcast %cst_6 : f32 to vector<16x256xf32>
    %10 = arith.mulf %9, %6 : vector<16x256xf32>
    %11 = arith.select %8, %6, %10 : vector<16x256xi1>, vector<16x256xf32>
    %12 = arith.truncf %11 : vector<16x256xf32> to vector<16x256xbf16>
    %c0_7 = arith.constant 0 : index
    %c0_8 = arith.constant 0 : index
    %13 = vector.load %arg4[%c0_7, %c0_8] : memref<256x512xbf16, #tpu.memory_space<vmem>>, vector<256x512xbf16>
    %cst_9 = arith.constant dense<0.000000e+00> : vector<16x512xf32>
    %14 = tpu.matmul %12, %13, %cst_9 {dimension_numbers = #tpu.dot_dimension_numbers<[1], [0], [0], [1], [0, 0, 1, 1], [], []>} : vector<16x256xbf16>, vector<256x512xbf16>, vector<16x512xf32> -> vector<16x512xf32>
    %c0_10 = arith.constant 0 : index
    %c0_11 = arith.constant 0 : index
    %15 = vector.load %arg5[%c0_10, %c0_11] : memref<1x512xf32, #tpu.memory_space<vmem>>, vector<1x512xf32>
    %16 = vector.broadcast %15 : vector<1x512xf32> to vector<16x512xf32>
    %17 = arith.addf %14, %16 : vector<16x512xf32>
    %cst_12 = arith.constant 0.000000e+00 : f32
    %18 = vector.broadcast %cst_12 : f32 to vector<16x512xf32>
    %19 = arith.cmpf ogt, %17, %18 : vector<16x512xf32>
    %cst_13 = arith.constant 0.00999999977 : f32
    %20 = vector.broadcast %cst_13 : f32 to vector<16x512xf32>
    %21 = arith.mulf %20, %17 : vector<16x512xf32>
    %22 = arith.select %19, %17, %21 : vector<16x512xi1>, vector<16x512xf32>
    %23 = arith.truncf %22 : vector<16x512xf32> to vector<16x512xbf16>
    %c0_14 = arith.constant 0 : index
    %c0_15 = arith.constant 0 : index
    %24 = vector.load %arg6[%c0_14, %c0_15] : memref<512x1024xi8, #tpu.memory_space<vmem>>, vector<512x1024xi8>
    %25 = arith.sitofp %24 : vector<512x1024xi8> to vector<512x1024xf32>
    %26 = arith.truncf %25 : vector<512x1024xf32> to vector<512x1024xbf16>
    %cst_16 = arith.constant dense<0.000000e+00> : vector<16x1024xf32>
    %27 = tpu.matmul %23, %26, %cst_16 {dimension_numbers = #tpu.dot_dimension_numbers<[1], [0], [0], [1], [0, 0, 1, 1], [], []>} : vector<16x512xbf16>, vector<512x1024xbf16>, vector<16x1024xf32> -> vector<16x1024xf32>
    %c0_17 = arith.constant 0 : index
    %c0_18 = arith.constant 0 : index
    %28 = vector.load %arg7[%c0_17, %c0_18] : memref<1x1024xf32, #tpu.memory_space<vmem>>, vector<1x1024xf32>
    %29 = vector.broadcast %28 : vector<1x1024xf32> to vector<16x1024xf32>
    %30 = arith.mulf %27, %29 : vector<16x1024xf32>
    %c0_19 = arith.constant 0 : index
    %c0_20 = arith.constant 0 : index
    %31 = vector.load %arg8[%c0_19, %c0_20] : memref<1x1024xf32, #tpu.memory_space<vmem>>, vector<1x1024xf32>
    %32 = vector.broadcast %31 : vector<1x1024xf32> to vector<16x1024xf32>
    %33 = arith.addf %30, %32 : vector<16x1024xf32>
    %cst_21 = arith.constant 0.000000e+00 : f32
    %34 = vector.broadcast %cst_21 : f32 to vector<16x1024xf32>
    %35 = arith.cmpf ogt, %33, %34 : vector<16x1024xf32>
    %cst_22 = arith.constant 0.00999999977 : f32
    %36 = vector.broadcast %cst_22 : f32 to vector<16x1024xf32>
    %37 = arith.mulf %36, %33 : vector<16x1024xf32>
    %38 = arith.select %35, %33, %37 : vector<16x1024xi1>, vector<16x1024xf32>
    %39 = arith.truncf %38 : vector<16x1024xf32> to vector<16x1024xbf16>
    %c0_23 = arith.constant 0 : index
    %c0_24 = arith.constant 0 : index
    %40 = vector.load %arg9[%c0_23, %c0_24] : memref<1024x512xi8, #tpu.memory_space<vmem>>, vector<1024x512xi8>
    %41 = arith.sitofp %40 : vector<1024x512xi8> to vector<1024x512xf32>
    %42 = arith.truncf %41 : vector<1024x512xf32> to vector<1024x512xbf16>
    %cst_25 = arith.constant dense<0.000000e+00> : vector<16x512xf32>
    %43 = tpu.matmul %39, %42, %cst_25 {dimension_numbers = #tpu.dot_dimension_numbers<[1], [0], [0], [1], [0, 0, 1, 1], [], []>} : vector<16x1024xbf16>, vector<1024x512xbf16>, vector<16x512xf32> -> vector<16x512xf32>
    %c0_26 = arith.constant 0 : index
    %c0_27 = arith.constant 0 : index
    %44 = vector.load %arg10[%c0_26, %c0_27] : memref<1x512xf32, #tpu.memory_space<vmem>>, vector<1x512xf32>
    %45 = vector.broadcast %44 : vector<1x512xf32> to vector<16x512xf32>
    %46 = arith.mulf %43, %45 : vector<16x512xf32>
    %c0_28 = arith.constant 0 : index
    %c0_29 = arith.constant 0 : index
    %47 = vector.load %arg11[%c0_28, %c0_29] : memref<1x512xf32, #tpu.memory_space<vmem>>, vector<1x512xf32>
    %48 = vector.broadcast %47 : vector<1x512xf32> to vector<16x512xf32>
    %49 = arith.addf %46, %48 : vector<16x512xf32>
    %cst_30 = arith.constant 0.000000e+00 : f32
    %50 = vector.broadcast %cst_30 : f32 to vector<16x512xf32>
    %51 = arith.cmpf ogt, %49, %50 : vector<16x512xf32>
    %cst_31 = arith.constant 0.00999999977 : f32
    %52 = vector.broadcast %cst_31 : f32 to vector<16x512xf32>
    %53 = arith.mulf %52, %49 : vector<16x512xf32>
    %54 = arith.select %51, %49, %53 : vector<16x512xi1>, vector<16x512xf32>
    %55 = arith.truncf %54 : vector<16x512xf32> to vector<16x512xbf16>
    %c0_32 = arith.constant 0 : index
    %c0_33 = arith.constant 0 : index
    %56 = vector.load %arg12[%c0_32, %c0_33] : memref<512x128xbf16, #tpu.memory_space<vmem>>, vector<512x128xbf16>
    %cst_34 = arith.constant dense<0.000000e+00> : vector<16x128xf32>
    %57 = tpu.matmul %55, %56, %cst_34 {dimension_numbers = #tpu.dot_dimension_numbers<[1], [0], [0], [1], [0, 0, 1, 1], [], []>} : vector<16x512xbf16>, vector<512x128xbf16>, vector<16x128xf32> -> vector<16x128xf32>
    %c0_35 = arith.constant 0 : index
    %c0_36 = arith.constant 0 : index
    %58 = vector.load %arg13[%c0_35, %c0_36] : memref<1x128xf32, #tpu.memory_space<vmem>>, vector<1x128xf32>
    %59 = vector.broadcast %58 : vector<1x128xf32> to vector<16x128xf32>
    %60 = arith.addf %57, %59 : vector<16x128xf32>
    %c0_37 = arith.constant 0 : index
    %c0_38 = arith.constant 0 : index
    %61 = vector.load %arg14[%c0_37, %c0_38] : memref<16x128xf32, #tpu.memory_space<vmem>>, vector<16x128xf32>
    tpu.vector_store %arg14[%c0_37, %c0_38], %60 {strides = array<i32>} : memref<16x128xf32, #tpu.memory_space<vmem>>, vector<16x128xf32>,
    return
  }
  func.func @transform_0(%arg0: i32) -> (i32, i32) {
    %c0_i32 = arith.constant 0 : i32
    %c0_i32_0 = arith.constant 0 : i32
    return %arg0, %c0_i32 : i32, i32
  }
  func.func @transform_1(%arg0: i32) -> (i32, i32) {
    %c0_i32 = arith.constant 0 : i32
    %c0_i32_0 = arith.constant 0 : i32
    %c0_i32_1 = arith.constant 0 : i32
    return %c0_i32, %c0_i32_0 : i32, i32
  }
  func.func @transform_2(%arg0: i32) -> (i32, i32) {
    %c0_i32 = arith.constant 0 : i32
    %c0_i32_0 = arith.constant 0 : i32
    %c0_i32_1 = arith.constant 0 : i32
    return %c0_i32, %c0_i32_0 : i32, i32
  }
  func.func @transform_3(%arg0: i32) -> (i32, i32) {
    %c0_i32 = arith.constant 0 : i32
    %c0_i32_0 = arith.constant 0 : i32
    %c0_i32_1 = arith.constant 0 : i32
    return %c0_i32, %c0_i32_0 : i32, i32
  }
  func.func @transform_4(%arg0: i32) -> (i32, i32) {
    %c0_i32 = arith.constant 0 : i32
    %c0_i32_0 = arith.constant 0 : i32
    %c0_i32_1 = arith.constant 0 : i32
    return %c0_i32, %c0_i32_0 : i32, i32
  }
  func.func @transform_5(%arg0: i32) -> (i32, i32) {
    %c0_i32 = arith.constant 0 : i32
    %c0_i32_0 = arith.constant 0 : i32
    %c0_i32_1 = arith.constant 0 : i32
    return %c0_i32, %c0_i32_0 : i32, i32
  }
  func.func @transform_6(%arg0: i32) -> (i32, i32) {
    %c0_i32 = arith.constant 0 : i32
    %c0_i32_0 = arith.constant 0 : i32
    %c0_i32_1 = arith.constant 0 : i32
    return %c0_i32, %c0_i32_0 : i32, i32
  }
  func.func @transform_7(%arg0: i32) -> (i32, i32) {
    %c0_i32 = arith.constant 0 : i32
    %c0_i32_0 = arith.constant 0 : i32
    %c0_i32_1 = arith.constant 0 : i32
    return %c0_i32, %c0_i32_0 : i32, i32
  }
  func.func @transform_8(%arg0: i32) -> (i32, i32) {
    %c0_i32 = arith.constant 0 : i32
    %c0_i32_0 = arith.constant 0 : i32
    %c0_i32_1 = arith.constant 0 : i32
    return %c0_i32, %c0_i32_0 : i32, i32
  }
  func.func @transform_9(%arg0: i32) -> (i32, i32) {
    %c0_i32 = arith.constant 0 : i32
    %c0_i32_0 = arith.constant 0 : i32
    %c0_i32_1 = arith.constant 0 : i32
    return %c0_i32, %c0_i32_0 : i32, i32
  }
  func.func @transform_10(%arg0: i32) -> (i32, i32) {
    %c0_i32 = arith.constant 0 : i32
    %c0_i32_0 = arith.constant 0 : i32
    %c0_i32_1 = arith.constant 0 : i32
    return %c0_i32, %c0_i32_0 : i32, i32
  }
  func.func @transform_11(%arg0: i32) -> (i32, i32) {
    %c0_i32 = arith.constant 0 : i32
    %c0_i32_0 = arith.constant 0 : i32
    %c0_i32_1 = arith.constant 0 : i32
    return %c0_i32, %c0_i32_0 : i32, i32
  }
  func.func @transform_12(%arg0: i32) -> (i32, i32) {
    %c0_i32 = arith.constant 0 : i32
    %c0_i32_0 = arith.constant 0 : i32
    %c0_i32_1 = arith.constant 0 : i32
    return %c0_i32, %c0_i32_0 : i32, i32
  }
  func.func @transform_13(%arg0: i32) -> (i32, i32) {
    %c0_i32 = arith.constant 0 : i32
    %c0_i32_0 = arith.constant 0 : i32
    return %arg0, %c0_i32 : i32, i32
  }
}

</mosaic_0001>

<bundles_post_ra>
// kernel: tpu_custom_call.1
= control target key start
LH: loop header
LB: loop body
LE: loop exit
PB: predicated region body
PF: predicated region fallthrough
CT: control target
= control target key end

     0   :  { %18 = vsyncpa [#allocation3], 0  ;;  %s6723_s0 = inlined_call_operand.hbm [shape: f32[16,32], index: 0, kind: input, shape index: {}]   ;;  %s6724_s1 = inlined_call_operand.hbm [shape: bf16[32,256], index: 1, kind: input, shape index: {}]   ;;  %s6725_s2 = inlined_call_operand.hbm [shape: f32[1,256], index: 2, kind: input, shape index: {}]   ;;  %s6726_s3 = inlined_call_operand.hbm [shape: bf16[256,512], index: 3, kind: input, shape index: {}]   ;;  %s6727_s4 = inlined_call_operand.hbm [shape: f32[1,512], index: 4, kind: input, shape index: {}]   ;;  %s6728_s5 = inlined_call_operand.hbm [shape: s8[512,1024], index: 5, kind: input, shape index: {}]   ;;  %s6729_s6 = inlined_call_operand.hbm [shape: f32[1,1024], index: 6, kind: input, shape index: {}]   ;;  %s6730_s7 = inlined_call_operand.hbm [shape: f32[1,1024], index: 7, kind: input, shape index: {}]   ;;  %s6731_s8 = inlined_call_operand.hbm [shape: s8[1024,512], index: 8, kind: input, shape index: {}]   ;;  %s6732_s9 = inlined_call_operand.vmem [shape: f32[1,512], index: 9, kind: input, shape index: {}]   ;;  %s6733_s10 = inlined_call_operand.vmem [shape: f32[1,512], index: 10, kind: input, shape index: {}]   ;;  %s6734_s11 = inlined_call_operand.hbm [shape: bf16[512,128], index: 11, kind: input, shape index: {}]   ;;  %s6735_s12 = inlined_call_operand.vmem [shape: f32[1,128], index: 12, kind: input, shape index: {}]   ;;  %s6736_s13 = inlined_call_operand.hbm [shape: f32[16,128], index: 13, kind: output, shape index: {}]  }
   0x1   :  { %19 = vsyncpa [#allocation6], 0 }
   0x2   :  { %20 = vsyncpa [#allocation9], 0 }
   0x3   :  { %21 = vsyncpa [#allocation12], 0 }
   0x4   :  { %22 = vsyncpa [#allocation15], 0 }
   0x5   :  { %23 = vsyncpa [#allocation18], 0 }
   0x6   :  { %24 = vsyncpa [#allocation4], 0  ;;  %s42_s27 = sshll.u32 %s6724_s1, 4  ;;  %s5854_s28 = smov [#allocation5]   ;;  %s43_s27 = int_to_ptr.hbm [resolvable:$true] %s42_s27 }
   0x7   :  { %s44_s29 = sshll.u32 %s5854_s28, 4  ;;  %s66_s15 = sshll.u32 %s6726_s3, 4  ;;  %s45_s29 = int_to_ptr.vmem [resolvable:$true] %s44_s29  ;;  %s67_s15 = int_to_ptr.hbm [resolvable:$true] %s66_s15 }
   0x8   :  { %s5855_s16 = smov 128   ;;  %s5856_s17 = smov 8  }
   0x9   :  { %50 = dma.hbm_to_vmem [thread:$0]  %s43_s27, 512, %s45_s29, [#allocation6], %s5855_s16, %s5855_s16, %s5856_s17  }
   0xa   :  { %s5857_s18 = smov [#allocation8]   ;;  %s5858_s20 = smov 256  }
   0xb   :  { %s68_s19 = sshll.u32 %s5857_s18, 4  ;;  %s5859_s1 = smov 16   ;;  %s69_s19 = int_to_ptr.vmem [resolvable:$true] %s68_s19 }
   0xc   :  { %74 = dma.hbm_to_vmem [thread:$0]  %s67_s15, 8192, %s69_s19, [#allocation9], %s5858_s20, %s5858_s20, %s5859_s1  }
   0xd   :  { %s90_s23 = sshll.u32 %s6728_s5, 4  ;;  %s5860_s24 = smov [#allocation11]   ;;  %s91_s23 = int_to_ptr.hbm [resolvable:$true] %s90_s23 }
   0xe   :  { %s92_s3 = sshll.u32 %s5860_s24, 4  ;;  %s115_s28 = sshll.u32 %s6730_s7, 4  ;;  %s93_s3 = int_to_ptr.vmem [resolvable:$true] %s92_s3  ;;  %s116_s28 = int_to_ptr.hbm [resolvable:$true] %s115_s28 }
   0xf   :  { %s5861_s27 = smov 1024   ;;  %s5862_s29 = smov 64  }
  0x10   :  { %98 = dma.hbm_to_vmem [thread:$0]  %s91_s23, 16384, %s93_s3, [#allocation12], %s5861_s27, %s5861_s27, %s5862_s29  }
  0x11   :  { %s5863_s30 = smov [#allocation14]   ;;  %s29_s19 = sshll.u32 %s6723_s0, 4  ;;  %s30_s19 = int_to_ptr.hbm [resolvable:$true] %s29_s19 }
  0x12   :  { %s117_s14 = sshll.u32 %s5863_s30, 4  ;;  %s56_s1 = sshll.u32 %s6725_s2, 4  ;;  %s118_s14 = int_to_ptr.vmem [resolvable:$true] %s117_s14  ;;  %s57_s1 = int_to_ptr.hbm [resolvable:$true] %s56_s1 }
  0x13   :  { %120 = dma.hbm_to_vmem [thread:$0]  %s116_s28, 128, %s118_s14, [#allocation15]  }
  0x14   :  { %s5864_s21 = smov [#allocation2]   ;;  %s5865_s22 = smov [#allocation7]  }
  0x15   :  { %s31_s7 = sshll.u32 %s5864_s21, 4  ;;  %s58_s23 = sshll.u32 %s5865_s22, 4  ;;  %s32_s7 = int_to_ptr.vmem [resolvable:$true] %s31_s7  ;;  %s59_s23 = int_to_ptr.vmem [resolvable:$true] %s58_s23 }
  0x16   :  { %37 = dma.hbm_to_vmem [thread:$0]  %s30_s19, 256, %s32_s7, [#allocation3], %s5855_s16, %s5855_s16, %s5856_s17  }
  0x17   :  { %s80_s0 = sshll.u32 %s6727_s4, 4  ;;  %s104_s2 = sshll.u32 %s6729_s6, 4  ;;  %s81_s0 = int_to_ptr.hbm [resolvable:$true] %s80_s0  ;;  %s105_s2 = int_to_ptr.hbm [resolvable:$true] %s104_s2 }
  0x18   :  { %61 = dma.hbm_to_vmem [thread:$0]  %s57_s1, 32, %s59_s23, [#allocation6]  }
  0x19   :  { %s5866_s28 = smov [#allocation10]   ;;  %s5867_s30 = smov [#allocation13]  }
  0x1a   :  { %s82_s27 = sshll.u32 %s5866_s28, 4  ;;  %s106_s14 = sshll.u32 %s5867_s30, 4  ;;  %s83_s27 = int_to_ptr.vmem [resolvable:$true] %s82_s27  ;;  %s107_s14 = int_to_ptr.vmem [resolvable:$true] %s106_s14 }
  0x1b   :  { %85 = dma.hbm_to_vmem [thread:$0]  %s81_s0, 64, %s83_s27, [#allocation9]  }
  0x1c   :  { %s125_s19 = sshll.u32 %s6731_s8, 4  ;;  %s5868_s4 = smov [#allocation16]   ;;  %s126_s19 = int_to_ptr.hbm [resolvable:$true] %s125_s19 }
  0x1d   :  { %109 = dma.hbm_to_vmem [thread:$0]  %s105_s2, 128, %s107_s14, [#allocation12]  }
  0x1e   :  { %s127_s5 = sshll.u32 %s5868_s4, 4  ;;  %s142_s6 = sshll.u32 %s6734_s11, 4  ;;  %s128_s5 = int_to_ptr.vmem [resolvable:$true] %s127_s5  ;;  %s143_s6 = int_to_ptr.hbm [resolvable:$true] %s142_s6 }
  0x1f   :  { %s5869_s21 = smov 512   ;;  %s5870_s7 = smov 32  }
  0x20   :  { %133 = dma.hbm_to_vmem [thread:$0]  %s126_s19, 16384, %s128_s5, [#allocation15], %s5869_s21, %s5869_s21, %s5870_s7  }
  0x21   :  { %s5871_s22 = smov [#allocation17]   ;;  %s5872_s24 = smov 4  }
  0x22   :  { %s144_s23 = sshll.u32 %s5871_s22, 4  ;;  %s145_s23 = int_to_ptr.vmem [resolvable:$true] %s144_s23 }
  0x23   :  { %150 = dma.hbm_to_vmem [thread:$0]  %s143_s6, 4096, %s145_s23, [#allocation18], %s5862_s29, %s5862_s29, %s5872_s24  }
  0x24   :  { %5840 = dma.done.wait [#allocation3], 256  }
  0x25   :  { %5841 = vsyncadd [#allocation3], 4294967040 }
  0x26   :  { %5842 = dma.done.wait [#allocation6], 544  }
  0x27   :  { %5843 = vsyncadd [#allocation6], 4294966752 }
  0x28   :  { %5844 = dma.done.wait [#allocation9], 8256  }
  0x29   :  { %5845 = vsyncadd [#allocation9], 4294959040 }
  0x2a   :  { %5846 = dma.done.wait [#allocation12], 16512  }
  0x2b   :  { %5847 = vsyncadd [#allocation12], 4294950784 }
  0x2c   :  { %5848 = dma.done.wait [#allocation15], 16512  }
  0x2d   :  { %5849 = vsyncadd [#allocation15], 4294950784 }
  0x2e   :  { %5850 = dma.done.wait [#allocation18], 4096  }
  0x2f   :  { %5851 = vsyncadd [#allocation18], 4294963200  ;;  %v5059_v0 = vld [vmem:[#allocation5 + $0x10] sm:$0xf]  ;;  %v5454_v1 = vld [vmem:[#allocation5 + $0x14] sm:$0xf0] }
  0x30   :  { %v5453_v2 = vld [vmem:[#allocation5 + $0x14] sm:$0xf]  ;;  %v5060_v3 = vor.u32 %v5454_v1, %v5059_v0  ;;  %v5061_v4 = vld [vmem:[#allocation5 + $0x18] sm:$0xf0]  ;;  %v5051_v5 = vld [vmem:[#allocation5] sm:$0xf] }
  0x31   :  { %v5452_v6 = vld [vmem:[#allocation5 + $0x4] sm:$0xf0]  ;;  %v5064_v7 = vor.u32 %v5453_v2, %v5061_v4  ;;  %v5451_v8 = vld [vmem:[#allocation5 + $0x4] sm:$0xf]  ;;  %v5053_v9 = vld [vmem:[#allocation5 + $0x8] sm:$0xf0] }
  0x32   :  { %v194_v10 = vld [vmem:[#allocation2] sm:$0xff]  ;;  %237 = vmatpush.bf16.msra.mxu0 %v5060_v3  ;;  %v5052_v11 = vor.u32 %v5452_v6, %v5051_v5  ;;  %v195_v12 = vld [vmem:[#allocation2 + $0x8] sm:$0xff]  ;;  %vm227_vm0 = vcmask 261120   ;;  %v5181_v13 = vld [vmem:[#allocation8 + $0xe0] sm:$0xf]  ;;  %v5056_v15 = vor.u32 %v5451_v8, %v5053_v9  ;;  %s5873_s0 = smov [#allocation19]  }
  0x33   :  { %v5485_v14 = vld [vmem:[#allocation8 + $0xec] sm:$0xf0]  ;;  %251 = vmatpush.bf16.msra.mxu1 %v5064_v7  ;;  %v5309_v17 = vld [vmem:[#allocation8 + $0x1e0] sm:$0xf]  ;;  %v5483_v19 = vld [vmem:[#allocation8 + $0xe4] sm:$0xf]  ;;  %v196_v24 = vpack.c.bf16 %v195_v12, %v194_v10 }
  0x34   :  { %v5182_v16 = vor.u32 %v5485_v14, %v5181_v13  ;;  %v5517_v18 = vld [vmem:[#allocation8 + $0x1ec] sm:$0xf0]  ;;  %v5183_v21 = vld [vmem:[#allocation8 + $0xf0] sm:$0xf0]  ;;  %v5515_v22 = vld [vmem:[#allocation8 + $0x1e4] sm:$0xf] }
  0x35   :  { %v5310_v20 = vor.u32 %v5517_v18, %v5309_v17  ;;  %v5311_v23 = vld [vmem:[#allocation8 + $0x1f0] sm:$0xf0]  ;;  %v5186_v25 = vor.u32 %v5483_v19, %v5183_v21  ;;  %v5165_v27 = vld [vmem:[#allocation8 + $0xc0] sm:$0xf]  ;;  %v5481_v28 = vld [vmem:[#allocation8 + $0xcc] sm:$0xf0] }
  0x36   :  { %667 = vmatpush.bf16.msra.mxu2 %v5182_v16  ;;  %v5314_v26 = vor.u32 %v5515_v22, %v5311_v23  ;;  %v5293_v29 = vld [vmem:[#allocation8 + $0x1c0] sm:$0xf]  ;;  %238 = vmatpush.bf16.msra.mxu0 %v5052_v11  ;;  %v5166_v30 = vor.u32 %v5481_v28, %v5165_v27  ;;  %v5513_v31 = vld [vmem:[#allocation8 + $0x1cc] sm:$0xf0]  ;;  %v5479_v32 = vld [vmem:[#allocation8 + $0xc4] sm:$0xf] }
  0x37   :  { %681 = vmatpush.bf16.msra.mxu3 %v5310_v20  ;;  %v5167_v33 = vld [vmem:[#allocation8 + $0xd0] sm:$0xf0]  ;;  %252 = vmatpush.bf16.msra.mxu1 %v5056_v15  ;;  %v5294_v34 = vor.u32 %v5513_v31, %v5293_v29  ;;  %v5511_v36 = vld [vmem:[#allocation8 + $0x1c4] sm:$0xf]  ;;  %v5149_v38 = vld [vmem:[#allocation8 + $0xa0] sm:$0xf] }
  0x38   :  { %v5170_v35 = vor.u32 %v5479_v32, %v5167_v33  ;;  %v5295_v37 = vld [vmem:[#allocation8 + $0x1d0] sm:$0xf0]  ;;  %v5477_v40 = vld [vmem:[#allocation8 + $0xac] sm:$0xf0]  ;;  %v5277_v41 = vld [vmem:[#allocation8 + $0x1a0] sm:$0xf] }
  0x39   :  { %v5298_v39 = vor.u32 %v5511_v36, %v5295_v37  ;;  %v5509_v42 = vld [vmem:[#allocation8 + $0x1ac] sm:$0xf0]  ;;  %5065 = vmatmul.msk.bf16.vlgmr.msra.gmra.mxu0 %vm227_vm0, %v196_v24  ;;  %v5150_v43 = vor.u32 %v5477_v40, %v5149_v38  ;;  %v5475_v44 = vld [vmem:[#allocation8 + $0xa4] sm:$0xf]  ;;  %v5151_v45 = vld [vmem:[#allocation8 + $0xb0] sm:$0xf0] }
  0x3a   :  { %695 = vmatpush.bf16.msrb.mxu0 %v5186_v25  ;;  %668 = vmatpush.bf16.msra.mxu2 %v5166_v30  ;;  %v5507_v46 = vld [vmem:[#allocation8 + $0x1a4] sm:$0xf]  ;;  %v5278_v47 = vor.u32 %v5509_v42, %v5277_v41  ;;  %v5279_v48 = vld [vmem:[#allocation8 + $0x1b0] sm:$0xf0]  ;;  %v5133_v49 = vld [vmem:[#allocation8 + $0x80] sm:$0xf]  ;;  %v5154_v51 = vor.u32 %v5475_v44, %v5151_v45 }
  0x3b   :  { %709 = vmatpush.bf16.msrb.mxu1 %v5314_v26  ;;  %682 = vmatpush.bf16.msra.mxu3 %v5294_v34  ;;  %v5473_v50 = vld [vmem:[#allocation8 + $0x8c] sm:$0xf0]  ;;  %v5261_v52 = vld [vmem:[#allocation8 + $0x180] sm:$0xf]  ;;  %v5282_v54 = vor.u32 %v5507_v46, %v5279_v48  ;;  %v5471_v55 = vld [vmem:[#allocation8 + $0x84] sm:$0xf] }
  0x3c   :  { %5066 = vmatmul.msk.bf16.vlgmr.msra.gmra.mxu1 %vm227_vm0, %v196_v24  ;;  %v5505_v53 = vld [vmem:[#allocation8 + $0x18c] sm:$0xf0]  ;;  %v5135_v56 = vld [vmem:[#allocation8 + $0x90] sm:$0xf0]  ;;  %v5134_v57 = vor.u32 %v5473_v50, %v5133_v49  ;;  %v5503_v58 = vld [vmem:[#allocation8 + $0x184] sm:$0xf] }
  0x3d   :  { %v5263_v59 = vld [vmem:[#allocation8 + $0x190] sm:$0xf0]  ;;  %v5262_v60 = vor.u32 %v5505_v53, %v5261_v52  ;;  %v5117_v61 = vld [vmem:[#allocation8 + $0x60] sm:$0xf]  ;;  %v5469_v62 = vld [vmem:[#allocation8 + $0x6c] sm:$0xf0]  ;;  %v5138_v63 = vor.u32 %v5471_v55, %v5135_v56 }
  0x3e   :  { %696 = vmatpush.bf16.msrb.mxu0 %v5170_v35  ;;  %669 = vmatpush.bf16.msra.mxu2 %v5150_v43  ;;  %v5245_v0 = vld [vmem:[#allocation8 + $0x160] sm:$0xf]  ;;  %v5501_v1 = vld [vmem:[#allocation8 + $0x16c] sm:$0xf0]  ;;  %v5266_v2 = vor.u32 %v5503_v58, %v5263_v59  ;;  %v5467_v3 = vld [vmem:[#allocation8 + $0x64] sm:$0xf]  ;;  %v5118_v5 = vor.u32 %v5469_v62, %v5117_v61 }
  0x3f   :  { %710 = vmatpush.bf16.msrb.mxu1 %v5298_v39  ;;  %683 = vmatpush.bf16.msra.mxu3 %v5278_v47  ;;  %v5119_v4 = vld [vmem:[#allocation8 + $0x70] sm:$0xf0]  ;;  %v5499_v6 = vld [vmem:[#allocation8 + $0x164] sm:$0xf]  ;;  %v5246_v8 = vor.u32 %v5501_v1, %v5245_v0  ;;  %v5101_v9 = vld [vmem:[#allocation8 + $0x40] sm:$0xf] }
  0x40   :  { %v5247_v7 = vld [vmem:[#allocation8 + $0x170] sm:$0xf0]  ;;  %v5465_v10 = vld [vmem:[#allocation8 + $0x4c] sm:$0xf0]  ;;  %v5122_v11 = vor.u32 %v5467_v3, %v5119_v4  ;;  %v5229_v12 = vld [vmem:[#allocation8 + $0x140] sm:$0xf] }
  0x41   :  { %v5497_v13 = vld [vmem:[#allocation8 + $0x14c] sm:$0xf0]  ;;  %v5250_v14 = vor.u32 %v5499_v6, %v5247_v7  ;;  %v5463_v15 = vld [vmem:[#allocation8 + $0x44] sm:$0xf]  ;;  %v5103_v16 = vld [vmem:[#allocation8 + $0x50] sm:$0xf0]  ;;  %v5102_v17 = vor.u32 %v5465_v10, %v5101_v9 }
  0x42   :  { %697 = vmatpush.bf16.msrb.mxu0 %v5154_v51  ;;  %670 = vmatpush.bf16.msra.mxu2 %v5134_v57  ;;  %v5495_v18 = vld [vmem:[#allocation8 + $0x144] sm:$0xf]  ;;  %v5231_v19 = vld [vmem:[#allocation8 + $0x150] sm:$0xf0]  ;;  %v5230_v20 = vor.u32 %v5497_v13, %v5229_v12  ;;  %v5085_v21 = vld [vmem:[#allocation8 + $0x20] sm:$0xf]  ;;  %v5106_v23 = vor.u32 %v5463_v15, %v5103_v16 }
  0x43   :  { %711 = vmatpush.bf16.msrb.mxu1 %v5282_v54  ;;  %684 = vmatpush.bf16.msra.mxu3 %v5262_v60  ;;  %v5461_v22 = vld [vmem:[#allocation8 + $0x2c] sm:$0xf0]  ;;  %v5213_v24 = vld [vmem:[#allocation8 + $0x120] sm:$0xf]  ;;  %v5234_v26 = vor.u32 %v5495_v18, %v5231_v19  ;;  %v5459_v27 = vld [vmem:[#allocation8 + $0x24] sm:$0xf] }
  0x44   :  { %v5493_v25 = vld [vmem:[#allocation8 + $0x12c] sm:$0xf0]  ;;  %v5087_v28 = vld [vmem:[#allocation8 + $0x30] sm:$0xf0]  ;;  %v5086_v29 = vor.u32 %v5461_v22, %v5085_v21  ;;  %v5491_v30 = vld [vmem:[#allocation8 + $0x124] sm:$0xf] }
  0x45   :  { %v5215_v31 = vld [vmem:[#allocation8 + $0x130] sm:$0xf0]  ;;  %v5214_v32 = vor.u32 %v5493_v25, %v5213_v24  ;;  %v5090_v33 = vor.u32 %v5459_v27, %v5087_v28  ;;  %v5069_v35 = vld [vmem:[#allocation8] sm:$0xf]  ;;  %v5457_v36 = vld [vmem:[#allocation8 + $0xc] sm:$0xf0] }
  0x46   :  { %698 = vmatpush.bf16.msrb.mxu0 %v5138_v63  ;;  %671 = vmatpush.bf16.msra.mxu2 %v5118_v5  ;;  %v5218_v34 = vor.u32 %v5491_v30, %v5215_v31  ;;  %v5197_v37 = vld [vmem:[#allocation8 + $0x100] sm:$0xf]  ;;  %v5070_v38 = vor.u32 %v5457_v36, %v5069_v35  ;;  %v5489_v39 = vld [vmem:[#allocation8 + $0x10c] sm:$0xf0]  ;;  %v5455_v40 = vld [vmem:[#allocation8 + $0x4] sm:$0xf] }
  0x47   :  { %712 = vmatpush.bf16.msrb.mxu1 %v5266_v2  ;;  %685 = vmatpush.bf16.msra.mxu3 %v5246_v8  ;;  %v5071_v41 = vld [vmem:[#allocation8 + $0x10] sm:$0xf0]  ;;  %v5198_v42 = vor.u32 %v5489_v39, %v5197_v37  ;;  %v5487_v44 = vld [vmem:[#allocation8 + $0x104] sm:$0xf]  ;;  %v5189_v47 = vld [vmem:[#allocation8 + $0xe8] sm:$0xf] }
  0x48   :  { %v5074_v43 = vor.u32 %v5455_v40, %v5071_v41  ;;  %v5199_v45 = vld [vmem:[#allocation8 + $0x110] sm:$0xf0]  ;;  %v5486_v48 = vld [vmem:[#allocation8 + $0xf4] sm:$0xf0]  ;;  %v5317_v49 = vld [vmem:[#allocation8 + $0x1e8] sm:$0xf] }
  0x49   :  { %v5202_v46 = vor.u32 %v5487_v44, %v5199_v45  ;;  %v5190_v50 = vor.u32 %v5486_v48, %v5189_v47  ;;  %v5518_v51 = vld [vmem:[#allocation8 + $0x1f4] sm:$0xf0]  ;;  %v5484_v52 = vld [vmem:[#allocation8 + $0xec] sm:$0xf]  ;;  %v5191_v53 = vld [vmem:[#allocation8 + $0xf8] sm:$0xf0] }
  0x4a   :  { %699 = vmatpush.bf16.msrb.mxu0 %v5122_v11  ;;  %672 = vmatpush.bf16.msra.mxu2 %v5102_v17  ;;  %v5318_v54 = vor.u32 %v5518_v51, %v5317_v49  ;;  %v5194_v55 = vor.u32 %v5484_v52, %v5191_v53  ;;  %v5516_v56 = vld [vmem:[#allocation8 + $0x1ec] sm:$0xf]  ;;  %v5319_v57 = vld [vmem:[#allocation8 + $0x1f8] sm:$0xf0]  ;;  %v5173_v58 = vld [vmem:[#allocation8 + $0xc8] sm:$0xf] }
  0x4b   :  { %713 = vmatpush.bf16.msrb.mxu1 %v5250_v14  ;;  %686 = vmatpush.bf16.msra.mxu3 %v5230_v20  ;;  %v5322_v59 = vor.u32 %v5516_v56, %v5319_v57  ;;  %v5482_v60 = vld [vmem:[#allocation8 + $0xd4] sm:$0xf0]  ;;  %v5301_v61 = vld [vmem:[#allocation8 + $0x1c8] sm:$0xf]  ;;  %v5480_v1 = vld [vmem:[#allocation8 + $0xcc] sm:$0xf] }
  0x4c   :  { %v5514_v62 = vld [vmem:[#allocation8 + $0x1d4] sm:$0xf0]  ;;  %v5174_v63 = vor.u32 %v5482_v60, %v5173_v58  ;;  %v5175_v2 = vld [vmem:[#allocation8 + $0xd8] sm:$0xf0]  ;;  %v5512_v3 = vld [vmem:[#allocation8 + $0x1cc] sm:$0xf] }
  0x4d   :  { %v5302_v0 = vor.u32 %v5514_v62, %v5301_v61  ;;  %v5178_v4 = vor.u32 %v5480_v1, %v5175_v2  ;;  %v5303_v5 = vld [vmem:[#allocation8 + $0x1d8] sm:$0xf0]  ;;  %v5157_v7 = vld [vmem:[#allocation8 + $0xa8] sm:$0xf]  ;;  %v5478_v8 = vld [vmem:[#allocation8 + $0xb4] sm:$0xf0] }
  0x4e   :  { %700 = vmatpush.bf16.msrb.mxu0 %v5106_v23  ;;  %673 = vmatpush.bf16.msra.mxu2 %v5086_v29  ;;  %v5306_v6 = vor.u32 %v5512_v3, %v5303_v5  ;;  %v5285_v9 = vld [vmem:[#allocation8 + $0x1a8] sm:$0xf]  ;;  %v5158_v10 = vor.u32 %v5478_v8, %v5157_v7  ;;  %v5510_v11 = vld [vmem:[#allocation8 + $0x1b4] sm:$0xf0]  ;;  %v5476_v12 = vld [vmem:[#allocation8 + $0xac] sm:$0xf] }
  0x4f   :  { %714 = vmatpush.bf16.msrb.mxu1 %v5234_v26  ;;  %687 = vmatpush.bf16.msra.mxu3 %v5214_v32  ;;  %v5159_v13 = vld [vmem:[#allocation8 + $0xb8] sm:$0xf0]  ;;  %v5286_v14 = vor.u32 %v5510_v11, %v5285_v9  ;;  %v5508_v16 = vld [vmem:[#allocation8 + $0x1ac] sm:$0xf]  ;;  %v5141_v19 = vld [vmem:[#allocation8 + $0x88] sm:$0xf] }
  0x50   :  { %v5162_v15 = vor.u32 %v5476_v12, %v5159_v13  ;;  %v5287_v17 = vld [vmem:[#allocation8 + $0x1b8] sm:$0xf0]  ;;  %v5474_v20 = vld [vmem:[#allocation8 + $0x94] sm:$0xf0]  ;;  %v5269_v21 = vld [vmem:[#allocation8 + $0x188] sm:$0xf] }
  0x51   :  { %v5290_v18 = vor.u32 %v5508_v16, %v5287_v17  ;;  %v5142_v22 = vor.u32 %v5474_v20, %v5141_v19  ;;  %v5506_v23 = vld [vmem:[#allocation8 + $0x194] sm:$0xf0]  ;;  %v5472_v24 = vld [vmem:[#allocation8 + $0x8c] sm:$0xf]  ;;  %v5143_v25 = vld [vmem:[#allocation8 + $0x98] sm:$0xf0] }
  0x52   :  { %701 = vmatpush.bf16.msrb.mxu0 %v5090_v33  ;;  %674 = vmatpush.bf16.msra.mxu2 %v5070_v38  ;;  %v5270_v26 = vor.u32 %v5506_v23, %v5269_v21  ;;  %v5146_v27 = vor.u32 %v5472_v24, %v5143_v25  ;;  %v5504_v28 = vld [vmem:[#allocation8 + $0x18c] sm:$0xf]  ;;  %v5271_v29 = vld [vmem:[#allocation8 + $0x198] sm:$0xf0]  ;;  %v5125_v31 = vld [vmem:[#allocation8 + $0x68] sm:$0xf] }
  0x53   :  { %715 = vmatpush.bf16.msrb.mxu1 %v5218_v34  ;;  %688 = vmatpush.bf16.msra.mxu3 %v5198_v42  ;;  %v5274_v30 = vor.u32 %v5504_v28, %v5271_v29  ;;  %v5470_v32 = vld [vmem:[#allocation8 + $0x74] sm:$0xf0]  ;;  %v5253_v33 = vld [vmem:[#allocation8 + $0x168] sm:$0xf]  ;;  %v5468_v36 = vld [vmem:[#allocation8 + $0x6c] sm:$0xf] }
  0x54   :  { %v5126_v34 = vor.u32 %v5470_v32, %v5125_v31  ;;  %v5502_v35 = vld [vmem:[#allocation8 + $0x174] sm:$0xf0]  ;;  %v5127_v37 = vld [vmem:[#allocation8 + $0x78] sm:$0xf0]  ;;  %v5500_v40 = vld [vmem:[#allocation8 + $0x16c] sm:$0xf] }
  0x55   :  { %v5254_v38 = vor.u32 %v5502_v35, %v5253_v33  ;;  %v5130_v39 = vor.u32 %v5468_v36, %v5127_v37  ;;  %v5255_v41 = vld [vmem:[#allocation8 + $0x178] sm:$0xf0]  ;;  %v5109_v42 = vld [vmem:[#allocation8 + $0x48] sm:$0xf]  ;;  %v5466_v44 = vld [vmem:[#allocation8 + $0x54] sm:$0xf0] }
  0x56   :  { %702 = vmatpush.bf16.msrb.mxu0 %v5074_v43  ;;  %723 = vmatpush.bf16.msrb.mxu2 %v5190_v50  ;;  %v5258_v43 = vor.u32 %v5500_v40, %v5255_v41  ;;  %v5237_v45 = vld [vmem:[#allocation8 + $0x148] sm:$0xf]  ;;  %v5464_v47 = vld [vmem:[#allocation8 + $0x4c] sm:$0xf]  ;;  %v5111_v48 = vld [vmem:[#allocation8 + $0x58] sm:$0xf0]  ;;  %v5110_v50 = vor.u32 %v5466_v44, %v5109_v42 }
  0x57   :  { %716 = vmatpush.bf16.msrb.mxu1 %v5202_v46  ;;  %737 = vmatpush.bf16.msrb.mxu3 %v5318_v54  ;;  %v5498_v46 = vld [vmem:[#allocation8 + $0x154] sm:$0xf0]  ;;  %v5496_v49 = vld [vmem:[#allocation8 + $0x14c] sm:$0xf]  ;;  %v5239_v51 = vld [vmem:[#allocation8 + $0x158] sm:$0xf0]  ;;  %v5114_v53 = vor.u32 %v5464_v47, %v5111_v48 }
  0x58   :  { %v5238_v52 = vor.u32 %v5498_v46, %v5237_v45  ;;  %v5093_v54 = vld [vmem:[#allocation8 + $0x28] sm:$0xf]  ;;  %v5242_v57 = vor.u32 %v5496_v49, %v5239_v51  ;;  %v5494_v58 = vld [vmem:[#allocation8 + $0x134] sm:$0xf0]  ;;  %v5095_v60 = vld [vmem:[#allocation8 + $0x38] sm:$0xf0] }
  0x59   :  { %v5221_v56 = vld [vmem:[#allocation8 + $0x128] sm:$0xf]  ;;  %v5492_v61 = vld [vmem:[#allocation8 + $0x12c] sm:$0xf]  ;;  %v5223_v62 = vld [vmem:[#allocation8 + $0x138] sm:$0xf0] }
  0x5a   :  { %751 = vmatpush.bf16.msra.mxu0 %v5194_v55  ;;  %724 = vmatpush.bf16.msrb.mxu2 %v5174_v63  ;;  %v5462_v55 = vld [vmem:[#allocation8 + $0x34] sm:$0xf0]  ;;  %v5985_v63 = vld [vmem:[#allocation7] sm:$0x3]  ;;  %v5222_v1 = vor.u32 %v5494_v58, %v5221_v56  ;;  %v5077_v3 = vld [vmem:[#allocation8 + $0x8] sm:$0xf] }
  0x5b   :  { %765 = vmatpush.bf16.msra.mxu1 %v5322_v59  ;;  %738 = vmatpush.bf16.msrb.mxu3 %v5302_v0  ;;  %v5460_v59 = vld [vmem:[#allocation8 + $0x2c] sm:$0xf]  ;;  %v5094_v0 = vor.u32 %v5462_v55, %v5093_v54  ;;  %v5205_v5 = vld [vmem:[#allocation8 + $0x108] sm:$0xf]  ;;  %v5490_v7 = vld [vmem:[#allocation8 + $0x114] sm:$0xf0] }
  0x5c   :  { %v5098_v2 = vor.u32 %v5460_v59, %v5095_v60  ;;  %v5456_v8 = vld [vmem:[#allocation8 + $0xc] sm:$0xf]  ;;  %v5079_v9 = vld [vmem:[#allocation8 + $0x18] sm:$0xf0]  ;;  %v203_v13 = vperm.slane %v5985_v63, 0  ;;  %v204_v16 = vperm.slane %v5985_v63, 1 }
  0x5d   :  { %v5207_v11 = vld [vmem:[#allocation8 + $0x118] sm:$0xf0]  ;;  %v863_v21 = vld [vmem:[#allocation11 + $0x1c0] sm:$0xff]  ;;  %s5029_s25 = sshll.u32 %s5873_s0, 4  ;;  %s5031_s28 = sshll.u32 %s6736_s13, 4  ;;  %s5030_s25 = int_to_ptr.vmem [resolvable:$true] %s5029_s25  ;;  %s5032_s28 = int_to_ptr.hbm [resolvable:$true] %s5031_s28 }
  0x5e   :  { %752 = vmatpush.bf16.msra.mxu0 %v5178_v4  ;;  %725 = vmatpush.bf16.msrb.mxu2 %v5158_v10  ;;  %v5458_v4 = vld [vmem:[#allocation8 + $0x14] sm:$0xf0]  ;;  %v5488_v10 = vld [vmem:[#allocation8 + $0x10c] sm:$0xf]  ;;  %v1175_v24 = vunpack.c.2.s8 %v863_v21  ;;  %v1183_v25 = vunpack.c.3.s8 %v863_v21  ;;  %v1167_v28 = vunpack.c.1.s8 %v863_v21  ;;  %v823_v48 = vld [vmem:[#allocation11 + $0x80] sm:$0xff] }
  0x5f   :  { %766 = vmatpush.bf16.msra.mxu1 %v5306_v6  ;;  %739 = vmatpush.bf16.msrb.mxu3 %v5286_v14  ;;  %v5226_v6 = vor.u32 %v5492_v61, %v5223_v62  ;;  %v5078_v12 = vor.u32 %v5458_v4, %v5077_v3  ;;  %v5206_v14 = vor.u32 %v5490_v7, %v5205_v5  ;;  %v847_v58 = vld [vmem:[#allocation11 + $0x140] sm:$0xff]  ;;  %v1015_v61 = vunpack.c.2.s8 %v823_v48 }
  0x60   :  { %v5210_v17 = vor.u32 %v5488_v10, %v5207_v11  ;;  %v1687_v32 = vcvt.s32.f32 %v1175_v24  ;;  %v1695_v33 = vcvt.s32.f32 %v1183_v25  ;;  %v5991_v35 = vcvt.s32.f32 %v1167_v28  ;;  %v927_v62 = vld [vmem:[#allocation11 + $0x3c0] sm:$0xff] }
  0x61   :  { %v1023_v3 = vunpack.c.3.s8 %v823_v48  ;;  %v6003_v4 = vcvt.s32.f32 %v1015_v61  ;;  %v1111_v5 = vunpack.c.2.s8 %v847_v58  ;;  %v1103_v25 = vunpack.c.1.s8 %v847_v58 }
  0x62   :  { %753 = vmatpush.bf16.msra.mxu0 %v5162_v15  ;;  %726 = vmatpush.bf16.msrb.mxu2 %v5142_v22  ;;  %v5082_v15 = vor.u32 %v5456_v8, %v5079_v9  ;;  %v831_v22 = vld [vmem:[#allocation11 + $0xc0] sm:$0xff]  ;;  %v2079_v51 = vpack.c.bf16 %v1695_v33, %v1687_v32  ;;  %v1119_v8 = vunpack.c.3.s8 %v847_v58  ;;  %v1431_v9 = vunpack.c.2.s8 %v927_v62 }
  0x63   :  { %767 = vmatpush.bf16.msra.mxu1 %v5290_v18  ;;  %740 = vmatpush.bf16.msrb.mxu3 %v5270_v26  ;;  %v1159_v26 = vunpack.c.0.s8 %v863_v21  ;;  %v1047_v29 = vunpack.c.2.s8 %v831_v22  ;;  %v1055_v36 = vunpack.c.3.s8 %v831_v22  ;;  %v1031_v42 = vunpack.c.0.s8 %v831_v22  ;;  %v839_v32 = vld [vmem:[#allocation11 + $0x100] sm:$0xff] }
  0x64   :  { %v1039_v45 = vunpack.c.1.s8 %v831_v22  ;;  %v1535_v11 = vcvt.s32.f32 %v1023_v3  ;;  %v1095_v21 = vunpack.c.0.s8 %v847_v58  ;;  %v815_v22 = vld [vmem:[#allocation11 + $0x40] sm:$0xff] }
  0x65   :  { %v1559_v37 = vcvt.s32.f32 %v1047_v29  ;;  %v1567_v40 = vcvt.s32.f32 %v1055_v36  ;;  %v991_v36 = vunpack.c.3.s8 %v815_v22 }
  0x66   :  { %754 = vmatpush.bf16.msra.mxu0 %v5146_v27  ;;  %727 = vmatpush.bf16.msrb.mxu2 %v5126_v34  ;;  %v5989_v34 = vcvt.s32.f32 %v1159_v26  ;;  %v1551_v60 = vcvt.s32.f32 %v1039_v45  ;;  %v1415_v26 = vunpack.c.0.s8 %v927_v62  ;;  %v1999_v29 = vpack.c.bf16 %v1535_v11, %v6003_v4 }
  0x67   :  { %768 = vmatpush.bf16.msra.mxu1 %v5274_v30  ;;  %741 = vmatpush.bf16.msrb.mxu3 %v5254_v38  ;;  %v855_v30 = vld [vmem:[#allocation11 + $0x180] sm:$0xff]  ;;  %v2015_v55 = vpack.c.bf16 %v1567_v40, %v1559_v37  ;;  %v1087_v45 = vunpack.c.3.s8 %v839_v32 }
  0x68   :  { %v1143_v38 = vunpack.c.2.s8 %v855_v30  ;;  %v1151_v41 = vunpack.c.3.s8 %v855_v30  ;;  %v1127_v46 = vunpack.c.0.s8 %v855_v30  ;;  %v1135_v47 = vunpack.c.1.s8 %v855_v30  ;;  %v919_v37 = vld [vmem:[#allocation11 + $0x380] sm:$0xff] }
  0x69   :  { %v6030_v58 = vcvt.s32.f32 %v1087_v45 }
  0x6a   :  { %755 = vmatpush.bf16.msra.mxu0 %v5130_v39  ;;  %728 = vmatpush.bf16.msrb.mxu2 %v5110_v50  ;;  %v5997_v56 = vcvt.s32.f32 %v1151_v41 }
  0x6b   :  { %769 = vmatpush.bf16.msra.mxu1 %v5258_v43  ;;  %742 = vmatpush.bf16.msrb.mxu3 %v5238_v52  ;;  %v2071_v52 = vpack.c.bf16 %v5991_v35, %v5989_v34  ;;  %v1927_v34 = vcvt.s32.f32 %v1415_v26  ;;  %v983_v35 = vunpack.c.2.s8 %v815_v22 }
  0x6e   :  { %756 = vmatpush.bf16.msra.mxu0 %v5114_v53  ;;  %729 = vmatpush.bf16.msrb.mxu2 %v5094_v0  ;;  %v5995_v53 = vcvt.s32.f32 %v1143_v38  ;;  %v5999_v0 = vcvt.s32.f32 %v1127_v46  ;;  %v6024_v38 = vcvt.s32.f32 %v1095_v21  ;;  %v6041_v21 = vld [vmem:[#allocation11 + $0x340] sm:$0xff] }
  0x6f   :  { %770 = vmatpush.bf16.msra.mxu1 %v5242_v57  ;;  %743 = vmatpush.bf16.msrb.mxu3 %v5222_v1  ;;  %v1543_v57 = vcvt.s32.f32 %v1031_v42  ;;  %v6001_v1 = vcvt.s32.f32 %v1135_v47 }
  0x71   :  { %v2055_v28 = vpack.c.bf16 %v6001_v1, %v5999_v0  ;;  %v1063_v0 = vunpack.c.0.s8 %v839_v32  ;;  %v1071_v1 = vunpack.c.1.s8 %v839_v32 }
  0x72   :  { %757 = vmatpush.bf16.msra.mxu0 %v5098_v2  ;;  %730 = vmatpush.bf16.msrb.mxu2 %v5078_v12  ;;  %v6009_v12 = vcvt.s32.f32 %v1111_v5 }
  0x73   :  { %771 = vmatpush.bf16.msra.mxu1 %v5226_v6  ;;  %744 = vmatpush.bf16.msrb.mxu3 %v5206_v14  ;;  %v6013_v14 = vcvt.s32.f32 %v1119_v8  ;;  %v807_v8 = vld [vmem:[#allocation11] sm:$0xff] }
  0x75   :  { %v2047_v33 = vpack.c.bf16 %v6013_v14, %v6009_v12  ;;  %v935_v12 = vunpack.c.0.s8 %v807_v8  ;;  %v943_v14 = vunpack.c.1.s8 %v807_v8 }
  0x76   :  { %758 = vmatpush.bf16.msra.mxu0 %v5082_v15  ;;  %v1943_v15 = vcvt.s32.f32 %v1431_v9 }
  0x77   :  { %772 = vmatpush.bf16.msra.mxu1 %v5210_v17  ;;  %v1007_v17 = vunpack.c.1.s8 %v823_v48 }
  0x79   :  { %v1519_v24 = vcvt.s32.f32 %v1007_v17 }
  0xb6   :  { %v240_v18 = vpop.f32.mrf.mxu0 }
  0xb7   :  { %v241_v19 = vadd.f32 %v240_v18, %v203_v13  ;;  %v2063_v18 = vpack.c.bf16 %v5997_v56, %v5995_v53 }
  0xb9   :  { %v254_v20 = vpop.f32.mrf.mxu1  ;;  %v263_v27 = vmul.f32 0.01, %v241_v19  ;;  %vm259_vm1 = vcmp.gt.f32.partialorder %v241_v19, 0.0 }
  0xba   :  { %v255_v23 = vadd.f32 %v254_v20, %v204_v16 }
  0xbb   :  { %v267_v39 = vsel %vm259_vm1, %v241_v19, %v263_v27  ;;  %v2007_v19 = vpack.c.bf16 %v1551_v60, %v1543_v57  ;;  %v895_v27 = vld [vmem:[#allocation11 + $0x2c0] sm:$0xff]  ;;  %v967_v57 = vunpack.c.0.s8 %v815_v22 }
  0xbc   :  { %vm260_vm2 = vcmp.gt.f32.partialorder %v255_v23, 0.0  ;;  %v264_v31 = vmul.f32 0.01, %v255_v23  ;;  %v1303_v40 = vunpack.c.2.s8 %v895_v27  ;;  %v1311_v41 = vunpack.c.3.s8 %v895_v27 }
  0xbd   :  { %v1287_v60 = vunpack.c.0.s8 %v895_v27  ;;  %v1295_v61 = vunpack.c.1.s8 %v895_v27 }
  0xbe   :  { %v268_v43 = vsel %vm260_vm2, %v255_v23, %v264_v31  ;;  %v242_v44 = vpop.f32.mrf.mxu0  ;;  %v1423_v31 = vunpack.c.1.s8 %v927_v62  ;;  %v1815_v47 = vcvt.s32.f32 %v1303_v40 }
  0xbf   :  { %v243_v49 = vadd.f32 %v242_v44, %v203_v13  ;;  %v1439_v13 = vunpack.c.3.s8 %v927_v62  ;;  %v1079_v44 = vunpack.c.2.s8 %v839_v32  ;;  %v1479_v62 = vcvt.s32.f32 %v967_v57 }
  0xc0   :  { %v1799_v4 = vcvt.s32.f32 %v1287_v60  ;;  %v1807_v5 = vcvt.s32.f32 %v1295_v61  ;;  %v856_v60 = vld [vmem:[#allocation11 + $0x188] sm:$0xff] }
  0xc1   :  { %v256_v50 = vpop.f32.mrf.mxu1  ;;  %vm261_vm3 = vcmp.gt.f32.partialorder %v243_v49, 0.0  ;;  %v265_v59 = vmul.f32 0.01, %v243_v49  ;;  %v1951_v20 = vcvt.s32.f32 %v1439_v13  ;;  %v6028_v53 = vcvt.s32.f32 %v1079_v44 }
  0xc2   :  { %v257_v54 = vadd.f32 %v256_v50, %v204_v16  ;;  %v999_v16 = vunpack.c.0.s8 %v823_v48  ;;  %v1823_v48 = vcvt.s32.f32 %v1311_v41  ;;  %v1495_v50 = vcvt.s32.f32 %v983_v35  ;;  %v832_v41 = vld [vmem:[#allocation11 + $0xc8] sm:$0xff] }
  0xc3   :  { %v269_v2 = vsel %vm261_vm3, %v243_v49, %v265_v59  ;;  %v2207_v30 = vpack.c.bf16 %v1951_v20, %v1943_v15  ;;  %v1399_v49 = vunpack.c.2.s8 %v919_v37  ;;  %v6036_v13 = vcvt.s32.f32 %v1063_v0 }
  0xc4   :  { %vm262_vm4 = vcmp.gt.f32.partialorder %v257_v54, 0.0  ;;  %v266_v63 = vmul.f32 0.01, %v257_v54  ;;  %v6005_v6 = vpack.c.bf16 %v269_v2, %v267_v39  ;;  %v1511_v23 = vcvt.s32.f32 %v999_v16  ;;  %v6032_v2 = vld [vmem:[#allocation11 + $0x1c8] sm:$0xff]  ;;  %v887_v16 = vld [vmem:[#allocation11 + $0x280] sm:$0xff] }
  0xc5   :  { %v1935_v39 = vcvt.s32.f32 %v1423_v31  ;;  %v1911_v56 = vcvt.s32.f32 %v1399_v49  ;;  %v1391_v15 = vunpack.c.1.s8 %v919_v37  ;;  %v2135_v17 = vpack.c.bf16 %v1807_v5, %v1799_v4 }
  0xc6   :  { %v270_v7 = vsel %vm262_vm4, %v257_v54, %v266_v63  ;;  %675 = vmatmul.bf16.vlgmr.msra.gmra.mxu2 %v6005_v6  ;;  %703 = vmatmul.bf16.vlgmr.msrb.gmra.mxu0 %v6005_v6  ;;  %v1991_v42 = vpack.c.bf16 %v1519_v24, %v1511_v23  ;;  %v1407_v54 = vunpack.c.3.s8 %v919_v37  ;;  %v1176_v20 = vunpack.c.2.s8 %v6032_v2 }
  0xc7   :  { %v6007_v10 = vpack.c.bf16 %v270_v7, %v268_v43  ;;  %2215 = vmatpush.bf16.msra.mxu2 %v2015_v55  ;;  %v6026_v43 = vcvt.s32.f32 %v1103_v25  ;;  %v2199_v46 = vpack.c.bf16 %v1935_v39, %v1927_v34  ;;  %v2143_v55 = vpack.c.bf16 %v1823_v48, %v1815_v47 }
  0xc8   :  { %v1919_v59 = vcvt.s32.f32 %v1407_v54  ;;  %v1383_v7 = vunpack.c.0.s8 %v919_v37  ;;  %v1184_v23 = vunpack.c.3.s8 %v6032_v2  ;;  %v951_v24 = vunpack.c.2.s8 %v807_v8 }
  0xc9   :  { %689 = vmatmul.bf16.vlgmr.msra.gmra.mxu3 %v6007_v10  ;;  %717 = vmatmul.bf16.vlgmr.msrb.gmra.mxu1 %v6007_v10  ;;  %v2039_v9 = vpack.c.bf16 %v6026_v43, %v6024_v38  ;;  %v959_v25 = vunpack.c.3.s8 %v807_v8  ;;  %v2031_v26 = vpack.c.bf16 %v6030_v58, %v6028_v53  ;;  %v1367_v34 = vunpack.c.2.s8 %v6041_v21 }
  0xca   :  { %2229 = vmatpush.bf16.msra.mxu3 %v2079_v51  ;;  %2257 = vmatpush.bf16.msrb.mxu1 %v2207_v30  ;;  %v1503_v51 = vcvt.s32.f32 %v991_v36  ;;  %v2191_v3 = vpack.c.bf16 %v1919_v59, %v1911_v56  ;;  %v1463_v31 = vcvt.s32.f32 %v951_v24  ;;  %v1375_v37 = vunpack.c.3.s8 %v6041_v21  ;;  %v879_v56 = vld [vmem:[#allocation11 + $0x240] sm:$0xff] }
  0xcb   :  { %2216 = vmatpush.bf16.msra.mxu2 %v2007_v19  ;;  %2243 = vmatpush.bf16.msrb.mxu0 %v2143_v55  ;;  %v1895_v19 = vcvt.s32.f32 %v1383_v7  ;;  %v1471_v32 = vcvt.s32.f32 %v959_v25  ;;  %v1696_v38 = vcvt.s32.f32 %v1184_v23  ;;  %v1879_v39 = vcvt.s32.f32 %v1367_v34  ;;  %v6061_v25 = vld [vmem:[#allocation10] sm:$0xf] }
  0xcc   :  { %v1983_v11 = vpack.c.bf16 %v1503_v51, %v1495_v50  ;;  %v1160_v40 = vunpack.c.0.s8 %v6032_v2  ;;  %v1887_v43 = vcvt.s32.f32 %v1375_v37  ;;  %v1168_v44 = vunpack.c.1.s8 %v6032_v2 }
  0xcd   :  { %v1255_v45 = vunpack.c.0.s8 %v887_v16  ;;  %v1447_v48 = vcvt.s32.f32 %v935_v12  ;;  %v1455_v49 = vcvt.s32.f32 %v943_v14  ;;  %v1048_v50 = vunpack.c.2.s8 %v832_v41  ;;  %v848_v12 = vld [vmem:[#allocation11 + $0x148] sm:$0xff] }
  0xce   :  { %2230 = vmatpush.bf16.msra.mxu3 %v2071_v52  ;;  %2258 = vmatpush.bf16.msrb.mxu1 %v2199_v46  ;;  %v975_v52 = vunpack.c.1.s8 %v815_v22  ;;  %v1903_v22 = vcvt.s32.f32 %v1391_v15  ;;  %v1263_v46 = vunpack.c.1.s8 %v887_v16  ;;  %v2175_v47 = vpack.c.bf16 %v1887_v43, %v1879_v39  ;;  %v928_v14 = vld [vmem:[#allocation11 + $0x3c8] sm:$0xff] }
  0xcf   :  { %2217 = vmatpush.bf16.msra.mxu2 %v1999_v29  ;;  %v1279_v29 = vunpack.c.3.s8 %v887_v16  ;;  %2244 = vmatpush.bf16.msrb.mxu0 %v2135_v17  ;;  %v1767_v53 = vcvt.s32.f32 %v1255_v45  ;;  %v1056_v55 = vunpack.c.3.s8 %v832_v41  ;;  %v1672_v57 = vcvt.s32.f32 %v1160_v40 }
  0xd0   :  { %v1487_v63 = vcvt.s32.f32 %v975_v52  ;;  %v2183_v30 = vpack.c.bf16 %v1903_v22, %v1895_v19  ;;  %v1775_v54 = vcvt.s32.f32 %v1263_v46  ;;  %v1560_v52 = vcvt.s32.f32 %v1048_v50 }
  0xd1   :  { %v1791_v36 = vcvt.s32.f32 %v1279_v29  ;;  %v1351_v58 = vunpack.c.0.s8 %v6041_v21  ;;  %v1359_v59 = vunpack.c.1.s8 %v6041_v21  ;;  %v1680_v61 = vcvt.s32.f32 %v1168_v44 }
  0xd2   :  { %2231 = vmatpush.bf16.msra.mxu3 %v2063_v18  ;;  %v6038_v18 = vcvt.s32.f32 %v1071_v1  ;;  %2259 = vmatpush.bf16.msrb.mxu1 %v2191_v3  ;;  %v1975_v27 = vpack.c.bf16 %v1487_v63, %v1479_v62  ;;  %v1959_v62 = vpack.c.bf16 %v1455_v49, %v1447_v48  ;;  %v2119_v63 = vpack.c.bf16 %v1775_v54, %v1767_v53 }
  0xd3   :  { %2218 = vmatpush.bf16.msra.mxu2 %v1991_v42  ;;  %v1568_v0 = vcvt.s32.f32 %v1056_v55  ;;  %v1863_v1 = vcvt.s32.f32 %v1351_v58  ;;  %v1871_v2 = vcvt.s32.f32 %v1359_v59  ;;  %v1239_v3 = vunpack.c.2.s8 %v879_v56 }
  0xd4   :  { %v1247_v4 = vunpack.c.3.s8 %v879_v56  ;;  %v1144_v7 = vunpack.c.2.s8 %v856_v60  ;;  %v1152_v8 = vunpack.c.3.s8 %v856_v60  ;;  %v340_v29 = vperm.slane %v6061_v25, 1 }
  0xd5   :  { %v2016_v5 = vpack.c.bf16 %v1568_v0, %v1560_v52  ;;  %v1112_v50 = vunpack.c.2.s8 %v848_v12  ;;  %v1432_v55 = vunpack.c.2.s8 %v928_v14 }
  0xd6   :  { %2232 = vmatpush.bf16.msra.mxu3 %v2055_v28  ;;  %731 = vmatmul.bf16.vlgmr.msrb.gmra.mxu2 %v6005_v6  ;;  %v1271_v28 = vunpack.c.2.s8 %v887_v16  ;;  %v1759_v15 = vcvt.s32.f32 %v1247_v4  ;;  %v1040_v16 = vunpack.c.1.s8 %v832_v41  ;;  %v1656_v21 = vcvt.s32.f32 %v1144_v7 }
  0xd7   :  { %759 = vmatmul.bf16.vlgmr.msra.gmra.mxu0 %v6005_v6  ;;  %2219 = vmatpush.bf16.msra.mxu2 %v1983_v11  ;;  %v2023_v6 = vpack.c.bf16 %v6038_v18, %v6036_v13  ;;  %v2167_v11 = vpack.c.bf16 %v1871_v2, %v1863_v1  ;;  %v1751_v13 = vcvt.s32.f32 %v1239_v3  ;;  %v1664_v22 = vcvt.s32.f32 %v1152_v8 }
  0xd8   :  { %v1783_v35 = vcvt.s32.f32 %v1271_v28  ;;  %2260 = vmatpush.bf16.msrb.mxu1 %v2183_v30  ;;  %v1552_v19 = vcvt.s32.f32 %v1040_v16  ;;  %v1128_v30 = vunpack.c.0.s8 %v856_v60  ;;  %v1096_v8 = vunpack.c.0.s8 %v848_v12 }
  0xd9   :  { %745 = vmatmul.bf16.vlgmr.msrb.gmra.mxu3 %v6007_v10  ;;  %773 = vmatmul.bf16.vlgmr.msra.gmra.mxu1 %v6007_v10  ;;  %v1688_v10 = vcvt.s32.f32 %v1176_v20  ;;  %v2111_v18 = vpack.c.bf16 %v1759_v15, %v1751_v13  ;;  %v2072_v20 = vpack.c.bf16 %v1680_v61, %v1672_v57  ;;  %v2064_v24 = vpack.c.bf16 %v1664_v22, %v1656_v21  ;;  %v896_v21 = vld [vmem:[#allocation11 + $0x2c8] sm:$0xff] }
  0xda   :  { %2233 = vmatpush.bf16.msra.mxu3 %v2047_v33  ;;  %v2127_v42 = vpack.c.bf16 %v1791_v36, %v1783_v35  ;;  %v1967_v33 = vpack.c.bf16 %v1471_v32, %v1463_v31  ;;  %v1136_v31 = vunpack.c.1.s8 %v856_v60  ;;  %v1231_v35 = vunpack.c.1.s8 %v879_v56  ;;  %v824_v36 = vld [vmem:[#allocation11 + $0x88] sm:$0xff] }
  0xdb   :  { %2220 = vmatpush.bf16.msra.mxu2 %v1975_v27  ;;  %v2080_v51 = vpack.c.bf16 %v1696_v38, %v1688_v10  ;;  %v1640_v37 = vcvt.s32.f32 %v1128_v30  ;;  %v1016_v38 = vunpack.c.2.s8 %v824_v36  ;;  %v1024_v39 = vunpack.c.3.s8 %v824_v36 }
  0xdc   :  { %2245 = vmatpush.bf16.msrb.mxu0 %v2127_v42  ;;  %2261 = vmatpush.bf16.msrb.mxu1 %v2175_v47  ;;  %v1648_v10 = vcvt.s32.f32 %v1136_v31  ;;  %v1743_v42 = vcvt.s32.f32 %v1231_v35  ;;  %v871_v47 = vld [vmem:[#allocation11 + $0x200] sm:$0xff]  ;;  %v1624_v57 = vcvt.s32.f32 %v1112_v50  ;;  %v1944_v61 = vcvt.s32.f32 %v1432_v55 }
  0xdd   :  { %v1528_v44 = vcvt.s32.f32 %v1016_v38  ;;  %v1536_v45 = vcvt.s32.f32 %v1024_v39  ;;  %v1207_v58 = vunpack.c.2.s8 %v871_v47  ;;  %v1215_v59 = vunpack.c.3.s8 %v871_v47 }
  0xde   :  { %2234 = vmatpush.bf16.msra.mxu3 %v2039_v9  ;;  %v1032_v9 = vunpack.c.0.s8 %v832_v41  ;;  %v1008_v3 = vunpack.c.1.s8 %v824_v36  ;;  %v1104_v15 = vunpack.c.1.s8 %v848_v12  ;;  %v1416_v16 = vunpack.c.0.s8 %v928_v14 }
  0xdf   :  { %2221 = vmatpush.bf16.msra.mxu2 %v1967_v33  ;;  %v2056_v33 = vpack.c.bf16 %v1648_v10, %v1640_v37  ;;  %v2000_v53 = vpack.c.bf16 %v1536_v45, %v1528_v44  ;;  %v1719_v1 = vcvt.s32.f32 %v1207_v58  ;;  %v1727_v2 = vcvt.s32.f32 %v1215_v59  ;;  %v865_v58 = vld [vmem:[#allocation11 + $0x1d0] sm:$0xff] }
  0xe0   :  { %2246 = vmatpush.bf16.msrb.mxu0 %v2119_v63  ;;  %v1544_v17 = vcvt.s32.f32 %v1032_v9  ;;  %2262 = vmatpush.bf16.msrb.mxu1 %v2167_v11  ;;  %v1000_v63 = vunpack.c.0.s8 %v824_v36  ;;  %v816_v9 = vld [vmem:[#allocation11 + $0x48] sm:$0xff]  ;;  %v1520_v13 = vcvt.s32.f32 %v1008_v3  ;;  %v1304_v36 = vunpack.c.2.s8 %v896_v21 }
  0xe1   :  { %v2095_v11 = vpack.c.bf16 %v1727_v2, %v1719_v1  ;;  %v1312_v37 = vunpack.c.3.s8 %v896_v21  ;;  %v968_v45 = vunpack.c.0.s8 %v816_v9 }
  0xe2   :  { %2235 = vmatpush.bf16.msra.mxu3 %v2031_v26  ;;  %v2008_v23 = vpack.c.bf16 %v1552_v19, %v1544_v17  ;;  %v903_v26 = vld [vmem:[#allocation11 + $0x300] sm:$0xff]  ;;  %v1512_v7 = vcvt.s32.f32 %v1000_v63  ;;  %v1608_v17 = vcvt.s32.f32 %v1096_v8  ;;  %v1191_v19 = vunpack.c.0.s8 %v871_v47  ;;  %v808_v63 = vld [vmem:[#allocation11 + $0x8] sm:$0xff] }
  0xe3   :  { %2222 = vmatpush.bf16.msra.mxu2 %v1959_v62  ;;  %v1335_v27 = vunpack.c.2.s8 %v903_v26  ;;  %v1343_v28 = vunpack.c.3.s8 %v903_v26  ;;  %v1319_v43 = vunpack.c.0.s8 %v903_v26  ;;  %v1327_v46 = vunpack.c.1.s8 %v903_v26 }
  0xe4   :  { %2247 = vmatpush.bf16.msrb.mxu0 %v2111_v18  ;;  %v1424_v18 = vunpack.c.1.s8 %v928_v14  ;;  %v1992_v22 = vpack.c.bf16 %v1520_v13, %v1512_v7  ;;  %v984_v26 = vunpack.c.2.s8 %v816_v9  ;;  %v1703_v30 = vcvt.s32.f32 %v1191_v19 }
  0xe5   :  { %v1847_v32 = vcvt.s32.f32 %v1335_v27  ;;  %v1855_v34 = vcvt.s32.f32 %v1343_v28  ;;  %v1831_v49 = vcvt.s32.f32 %v1319_v43  ;;  %v1839_v54 = vcvt.s32.f32 %v1327_v46  ;;  %v840_v27 = vld [vmem:[#allocation11 + $0x108] sm:$0xff] }
  0xe6   :  { %2236 = vmatpush.bf16.msra.mxu3 %v2023_v6  ;;  %v1223_v6 = vunpack.c.0.s8 %v879_v56  ;;  %v1440_v56 = vunpack.c.3.s8 %v928_v14  ;;  %v1936_v28 = vcvt.s32.f32 %v1424_v18  ;;  %v1496_v35 = vcvt.s32.f32 %v984_v26  ;;  %v912_v18 = vld [vmem:[#allocation11 + $0x348] sm:$0xff] }
  0xe7   :  { %2271 = vmatpush.bf16.msrb.mxu2 %v2016_v5  ;;  %v2159_v40 = vpack.c.bf16 %v1855_v34, %v1847_v32  ;;  %v2151_v60 = vpack.c.bf16 %v1839_v54, %v1831_v49  ;;  %v339_v5 = vperm.slane %v6061_v25, 0  ;;  %v992_v32 = vunpack.c.3.s8 %v816_v9  ;;  %v920_v34 = vld [vmem:[#allocation11 + $0x388] sm:$0xff] }
  0xe8   :  { %v1735_v41 = vcvt.s32.f32 %v1223_v6  ;;  %v1952_v62 = vcvt.s32.f32 %v1440_v56  ;;  %v1088_v43 = vunpack.c.3.s8 %v840_v27  ;;  %v1408_v44 = vunpack.c.3.s8 %v920_v34 }
  0xe9   :  { %2263 = vmatpush.bf16.msrb.mxu1 %v2159_v40  ;;  %v1504_v39 = vcvt.s32.f32 %v992_v32  ;;  %v1080_v40 = vunpack.c.2.s8 %v840_v27  ;;  %v976_v49 = vunpack.c.1.s8 %v816_v9  ;;  %v1296_v54 = vunpack.c.1.s8 %v896_v21 }
  0xea   :  { %2285 = vmatpush.bf16.msrb.mxu3 %v2080_v51  ;;  %v2103_v48 = vpack.c.bf16 %v1743_v42, %v1735_v41  ;;  %v1120_v51 = vunpack.c.3.s8 %v848_v12  ;;  %v2208_v4 = vpack.c.bf16 %v1952_v62, %v1944_v61  ;;  %v1816_v41 = vcvt.s32.f32 %v1304_v36 }
  0xeb   :  { %2272 = vmatpush.bf16.msrb.mxu2 %v2008_v23  ;;  %v1616_v23 = vcvt.s32.f32 %v1104_v15  ;;  %v1824_v42 = vcvt.s32.f32 %v1312_v37  ;;  %v1400_v12 = vunpack.c.2.s8 %v920_v34  ;;  %v1984_v14 = vpack.c.bf16 %v1504_v39, %v1496_v35 }
  0xec   :  { %2248 = vmatpush.bf16.msrb.mxu0 %v2103_v48  ;;  %v1632_v52 = vcvt.s32.f32 %v1120_v51  ;;  %v1920_v50 = vcvt.s32.f32 %v1408_v44  ;;  %v1480_v51 = vcvt.s32.f32 %v968_v45  ;;  %v1488_v56 = vcvt.s32.f32 %v976_v49 }
  0xed   :  { %2264 = vmatpush.bf16.msrb.mxu1 %v2151_v60  ;;  %v2040_v6 = vpack.c.bf16 %v1616_v23, %v1608_v17  ;;  %v2144_v46 = vpack.c.bf16 %v1824_v42, %v1816_v41  ;;  %v1912_v48 = vcvt.s32.f32 %v1400_v12  ;;  %v1808_v61 = vcvt.s32.f32 %v1296_v54 }
  0xee   :  { %2286 = vmatpush.bf16.msrb.mxu3 %v2072_v20  ;;  %v2048_v0 = vpack.c.bf16 %v1632_v52, %v1624_v57  ;;  %v1199_v20 = vunpack.c.1.s8 %v871_v47  ;;  %v1600_v47 = vcvt.s32.f32 %v1088_v43  ;;  %v342_v57 = vperm.slane %v6061_v25, 3 }
  0xef   :  { %2273 = vmatpush.bf16.msrb.mxu2 %v2000_v53  ;;  %v1288_v53 = vunpack.c.0.s8 %v896_v21  ;;  %v1064_v52 = vunpack.c.0.s8 %v840_v27  ;;  %v2192_v59 = vpack.c.bf16 %v1920_v50, %v1912_v48  ;;  %v1072_v62 = vunpack.c.1.s8 %v840_v27 }
  0xf0   :  { %2249 = vmatpush.bf16.msrb.mxu0 %v2095_v11  ;;  %v1711_v31 = vcvt.s32.f32 %v1199_v20  ;;  %v1384_v2 = vunpack.c.0.s8 %v920_v34  ;;  %v1392_v3 = vunpack.c.1.s8 %v920_v34  ;;  %v1177_v9 = vunpack.c.2.s8 %v865_v58 }
  0xf1   :  { %2313 = vmatpush.bf16.msra.mxu1 %v2208_v4  ;;  %v1800_v60 = vcvt.s32.f32 %v1288_v53  ;;  %v1576_v1 = vcvt.s32.f32 %v1064_v52  ;;  %v888_v4 = vld [vmem:[#allocation11 + $0x288] sm:$0xff]  ;;  %v1584_v8 = vcvt.s32.f32 %v1072_v62  ;;  %v1185_v11 = vunpack.c.3.s8 %v865_v58 }
  0xf2   :  { %2287 = vmatpush.bf16.msrb.mxu3 %v2064_v24  ;;  %v1928_v24 = vcvt.s32.f32 %v1416_v16  ;;  %v2087_v38 = vpack.c.bf16 %v1711_v31, %v1703_v30  ;;  %v1896_v13 = vcvt.s32.f32 %v1384_v2  ;;  %v1904_v15 = vcvt.s32.f32 %v1392_v3  ;;  %v6083_v2 = vld [vmem:[#allocation11 + $0x308] sm:$0xff] }
  0xf3   :  { %2274 = vmatpush.bf16.msrb.mxu2 %v1992_v22  ;;  %v2136_v7 = vpack.c.bf16 %v1808_v61, %v1800_v60  ;;  %v952_v16 = vunpack.c.2.s8 %v808_v63  ;;  %v960_v17 = vunpack.c.3.s8 %v808_v63  ;;  %v2024_v19 = vpack.c.bf16 %v1584_v8, %v1576_v1 }
  0xf4   :  { %v2200_v10 = vpack.c.bf16 %v1936_v28, %v1928_v24  ;;  %2250 = vmatpush.bf16.msrb.mxu0 %v2087_v38  ;;  %v6066_v20 = vcvt.s32.f32 %v1177_v9  ;;  %v6068_v21 = vcvt.s32.f32 %v1185_v11  ;;  %v1272_v22 = vunpack.c.2.s8 %v888_v4 }
  0xf5   :  { %v2184_v23 = vpack.c.bf16 %v1904_v15, %v1896_v13  ;;  %v1464_v24 = vcvt.s32.f32 %v952_v16  ;;  %v1472_v26 = vcvt.s32.f32 %v960_v17  ;;  %v1280_v27 = vunpack.c.3.s8 %v888_v4 }
  0xf6   :  { %2288 = vmatpush.bf16.msrb.mxu3 %v2056_v33  ;;  %2314 = vmatpush.bf16.msra.mxu1 %v2200_v10  ;;  %v1592_v33 = vcvt.s32.f32 %v1080_v40  ;;  %v2081_v28 = vpack.c.bf16 %v6068_v21, %v6066_v20  ;;  %v1784_v30 = vcvt.s32.f32 %v1272_v22  ;;  %v1368_v31 = vunpack.c.2.s8 %v912_v18  ;;  %v833_v40 = vld [vmem:[#allocation11 + $0xd0] sm:$0xff] }
  0xf7   :  { %2275 = vmatpush.bf16.msrb.mxu2 %v1984_v14  ;;  %v1376_v32 = vunpack.c.3.s8 %v912_v18  ;;  %v1968_v34 = vpack.c.bf16 %v1472_v26, %v1464_v24  ;;  %v341_v35 = vperm.slane %v6061_v25, 2  ;;  %v1161_v36 = vunpack.c.0.s8 %v865_v58 }
  0xf8   :  { %2299 = vmatpush.bf16.msra.mxu0 %v2144_v46  ;;  %v2032_v55 = vpack.c.bf16 %v1600_v47, %v1592_v33  ;;  %v1880_v37 = vcvt.s32.f32 %v1368_v31  ;;  %v1169_v38 = vunpack.c.1.s8 %v865_v58  ;;  %v936_v39 = vunpack.c.0.s8 %v808_v63  ;;  %v857_v46 = vld [vmem:[#allocation11 + $0x190] sm:$0xff] }
  0xf9   :  { %v1888_v10 = vcvt.s32.f32 %v1376_v32  ;;  %v6073_v42 = vcvt.s32.f32 %v1161_v36  ;;  %v944_v43 = vunpack.c.1.s8 %v808_v63  ;;  %v1256_v12 = vunpack.c.0.s8 %v888_v4 }
  0xfa   :  { %2289 = vmatpush.bf16.msrb.mxu3 %v2048_v0  ;;  %v1976_v0 = vpack.c.bf16 %v1488_v56, %v1480_v51  ;;  %2315 = vmatpush.bf16.msra.mxu1 %v2192_v59  ;;  %v6075_v33 = vcvt.s32.f32 %v1169_v38  ;;  %v1448_v44 = vcvt.s32.f32 %v936_v39  ;;  %v1264_v45 = vunpack.c.1.s8 %v888_v4  ;;  %v880_v56 = vld [vmem:[#allocation11 + $0x248] sm:$0xff]  ;;  %v6101_v38 = vld [vmem:[#allocation11 + $0x90] sm:$0xff] }
  0xfb   :  { %v2176_v14 = vpack.c.bf16 %v1888_v10, %v1880_v37  ;;  %v1456_v47 = vcvt.s32.f32 %v944_v43  ;;  %v1768_v48 = vcvt.s32.f32 %v1256_v12  ;;  %v1049_v49 = vunpack.c.2.s8 %v833_v40 }
  0xfc   :  { %2276 = vmatpush.bf16.msrb.mxu2 %v1976_v0  ;;  %2300 = vmatpush.bf16.msra.mxu0 %v2136_v7  ;;  %v1057_v50 = vunpack.c.3.s8 %v833_v40  ;;  %v2073_v51 = vpack.c.bf16 %v6075_v33, %v6073_v42  ;;  %v1776_v53 = vcvt.s32.f32 %v1264_v45  ;;  %v1352_v54 = vunpack.c.0.s8 %v912_v18 }
  0xfd   :  { %v1960_v52 = vpack.c.bf16 %v1456_v47, %v1448_v44  ;;  %v6079_v58 = vcvt.s32.f32 %v1049_v49  ;;  %v1145_v60 = vunpack.c.2.s8 %v857_v46  ;;  %v1153_v1 = vunpack.c.3.s8 %v857_v46 }
  0xfe   :  { %2290 = vmatpush.bf16.msrb.mxu3 %v2040_v6  ;;  %2316 = vmatpush.bf16.msra.mxu1 %v2184_v23  ;;  %v1792_v6 = vcvt.s32.f32 %v1280_v27  ;;  %v6081_v59 = vcvt.s32.f32 %v1057_v50  ;;  %v2120_v62 = vpack.c.bf16 %v1776_v53, %v1768_v48  ;;  %v1864_v63 = vcvt.s32.f32 %v1352_v54 }
  0xff   :  { %v6089_v8 = vcvt.s32.f32 %v1145_v60  ;;  %v1240_v9 = vunpack.c.2.s8 %v880_v56  ;;  %v6091_v13 = vcvt.s32.f32 %v1153_v1  ;;  %v1248_v15 = vunpack.c.3.s8 %v880_v56 }
 0x100   :  { %2277 = vmatpush.bf16.msrb.mxu2 %v1968_v34  ;;  %v2128_v41 = vpack.c.bf16 %v1792_v6, %v1784_v30  ;;  %v2017_v7 = vpack.c.bf16 %v6081_v59, %v6079_v58  ;;  %v1033_v16 = vunpack.c.0.s8 %v833_v40  ;;  %v1336_v22 = vunpack.c.2.s8 %v6083_v2  ;;  %v841_v59 = vld [vmem:[#allocation11 + $0x110] sm:$0xff] }
 0x101   :  { %v2065_v23 = vpack.c.bf16 %v6091_v13, %v6089_v8  ;;  %v1760_v24 = vcvt.s32.f32 %v1248_v15  ;;  %v1344_v27 = vunpack.c.3.s8 %v6083_v2  ;;  %v1129_v37 = vunpack.c.0.s8 %v857_v46 }
 0x102   :  { %2291 = vmatpush.bf16.msrb.mxu3 %v2032_v55  ;;  %2301 = vmatpush.bf16.msra.mxu0 %v2128_v41  ;;  %v1360_v55 = vunpack.c.1.s8 %v912_v18  ;;  %v1752_v18 = vcvt.s32.f32 %v1240_v9  ;;  %v6096_v26 = vcvt.s32.f32 %v1033_v16  ;;  %v1848_v32 = vcvt.s32.f32 %v1336_v22 }
 0x103   :  { %2317 = vmatpush.bf16.msra.mxu1 %v2176_v14  ;;  %v1856_v36 = vcvt.s32.f32 %v1344_v27  ;;  %v1137_v10 = vunpack.c.1.s8 %v857_v46  ;;  %v1224_v12 = vunpack.c.0.s8 %v880_v56  ;;  %v6107_v45 = vcvt.s32.f32 %v1129_v37  ;;  %v6132_v27 = vld [vmem:[#allocation11 + $0x208] sm:$0xff] }
 0x104   :  { %v1872_v0 = vcvt.s32.f32 %v1360_v55  ;;  %2278 = vmatpush.bf16.msrb.mxu2 %v1960_v52  ;;  %v2112_v6 = vpack.c.bf16 %v1760_v24, %v1752_v18  ;;  %v1232_v48 = vunpack.c.1.s8 %v880_v56  ;;  %v1017_v54 = vunpack.c.2.s8 %v6101_v38 }
 0x105   :  { %v2160_v44 = vpack.c.bf16 %v1856_v36, %v1848_v32  ;;  %v6109_v47 = vcvt.s32.f32 %v1137_v10  ;;  %v1736_v53 = vcvt.s32.f32 %v1224_v12  ;;  %v1025_v60 = vunpack.c.3.s8 %v6101_v38 }
 0x106   :  { %2292 = vmatpush.bf16.msrb.mxu3 %v2024_v19  ;;  %2302 = vmatpush.bf16.msra.mxu0 %v2120_v62  ;;  %v2168_v11 = vpack.c.bf16 %v1872_v0, %v1864_v63  ;;  %v1041_v19 = vunpack.c.1.s8 %v833_v40  ;;  %v1744_v52 = vcvt.s32.f32 %v1232_v48  ;;  %v6118_v62 = vld [vmem:[#allocation11 + $0x150] sm:$0xff]  ;;  %v6120_v0 = vcvt.s32.f32 %v1017_v54 }
 0x107   :  { %v2057_v55 = vpack.c.bf16 %v6109_v47, %v6107_v45  ;;  %v1113_v16 = vunpack.c.2.s8 %v6118_v62  ;;  %v1121_v22 = vunpack.c.3.s8 %v6118_v62  ;;  %v1105_v21 = vunpack.c.1.s8 %v6118_v62 }
 0x108   :  { %2318 = vmatpush.bf16.msra.mxu1 %v2168_v11  ;;  %v6099_v31 = vcvt.s32.f32 %v1041_v19  ;;  %v2104_v1 = vpack.c.bf16 %v1744_v52, %v1736_v53 }
 0x10a   :  { %v2009_v43 = vpack.c.bf16 %v6099_v31, %v6096_v26  ;;  %2303 = vmatpush.bf16.msra.mxu0 %v2112_v6 }
 0x10c   :  { %2319 = vmatpush.bf16.msra.mxu1 %v2160_v44 }
 0x10e   :  { %2304 = vmatpush.bf16.msra.mxu0 %v2104_v1 }
 0x143   :  { %v704_v61 = vpop.f32.mrf.mxu0 }
 0x144   :  { %v705_v3 = vadd.f32 %v704_v61, %v340_v29  ;;  %v1320_v61 = vunpack.c.0.s8 %v6083_v2 }
 0x146   :  { %v718_v4 = vpop.f32.mrf.mxu1  ;;  %v1832_v9 = vcvt.s32.f32 %v1320_v61 }
 0x147   :  { %v719_v17 = vadd.f32 %v718_v4, %v705_v3  ;;  %v6124_v3 = vcvt.s32.f32 %v1025_v60  ;;  %v1328_v4 = vunpack.c.1.s8 %v6083_v2 }
 0x149   :  { %vm780_vm5 = vcmp.gt.f32.partialorder %v719_v17, 0.0  ;;  %v788_v30 = vmul.f32 0.01, %v719_v17  ;;  %v676_v34 = vpop.f32.mrf.mxu2  ;;  %v2001_v18 = vpack.c.bf16 %v6124_v3, %v6120_v0  ;;  %v1840_v19 = vcvt.s32.f32 %v1328_v4 }
 0x14a   :  { %v677_v40 = vadd.f32 %v676_v34, %v339_v5  ;;  %v6136_v34 = vcvt.s32.f32 %v1113_v16 }
 0x14b   :  { %v796_v39 = vsel %vm780_vm5, %v719_v17, %v788_v30  ;;  %v706_v14 = vpop.f32.mrf.mxu0  ;;  %v2152_v10 = vpack.c.bf16 %v1840_v19, %v1832_v9 }
 0x14c   :  { %v690_v41 = vpop.f32.mrf.mxu3  ;;  %v707_v49 = vadd.f32 %v706_v14, %v340_v29  ;;  %v6122_v29 = vld [vmem:[#allocation11 + $0x3d0] sm:$0xff] }
 0x14d   :  { %v691_v46 = vadd.f32 %v690_v41, %v677_v40  ;;  %v1433_v24 = vunpack.c.2.s8 %v6122_v29  ;;  %v1441_v6 = vunpack.c.3.s8 %v6122_v29  ;;  %v6141_v40 = vcvt.s32.f32 %v1121_v22  ;;  %2320 = vmatpush.bf16.msra.mxu1 %v2152_v10  ;;  %v6195_v10 = vld [vmem:[#allocation11 + $0x2d0] sm:$0xff] }
 0x14e   :  { %v720_v50 = vpop.f32.mrf.mxu1 }
 0x14f   :  { %vm779_vm6 = vcmp.gt.f32.partialorder %v691_v46, 0.0  ;;  %v787_v56 = vmul.f32 0.01, %v691_v46  ;;  %v721_v63 = vadd.f32 %v720_v50, %v707_v49  ;;  %v6143_v41 = vcvt.s32.f32 %v1433_v24 }
 0x150   :  { %v6147_v48 = vcvt.s32.f32 %v1441_v6  ;;  %v1001_v49 = vunpack.c.0.s8 %v6101_v38  ;;  %v1009_v50 = vunpack.c.1.s8 %v6101_v38  ;;  %v1097_v38 = vunpack.c.0.s8 %v6118_v62 }
 0x151   :  { %v795_v11 = vsel %vm779_vm6, %v691_v46, %v787_v56  ;;  %vm784_vm7 = vcmp.gt.f32.partialorder %v721_v63, 0.0  ;;  %v792_v15 = vmul.f32 0.01, %v721_v63  ;;  %v678_v17 = vpop.f32.mrf.mxu2  ;;  %v1216_v46 = vunpack.c.3.s8 %v6132_v27 }
 0x152   :  { %v679_v2 = vadd.f32 %v678_v17, %v339_v5  ;;  %v1208_v5 = vunpack.c.2.s8 %v6132_v27  ;;  %v2209_v52 = vpack.c.bf16 %v6147_v48, %v6143_v41  ;;  %v6161_v56 = vcvt.s32.f32 %v1001_v49 }
 0x153   :  { %v800_v30 = vsel %vm784_vm7, %v721_v63, %v792_v15  ;;  %v1728_v61 = vcvt.s32.f32 %v1216_v46  ;;  %v6163_v63 = vcvt.s32.f32 %v1009_v50  ;;  %v1417_v24 = vunpack.c.0.s8 %v6122_v29 }
 0x154   :  { %v692_v32 = vpop.f32.mrf.mxu3  ;;  %v6139_v36 = vpack.c.bf16 %v800_v30, %v796_v39  ;;  %v760_v37 = vpop.f32.mrf.mxu0  ;;  %v2049_v39 = vpack.c.bf16 %v6141_v40, %v6136_v34  ;;  %v1720_v60 = vcvt.s32.f32 %v1208_v5  ;;  %v6182_v62 = vcvt.s32.f32 %v1105_v21 }
 0x155   :  { %v693_v12 = vadd.f32 %v692_v32, %v679_v2  ;;  %v761_v14 = vadd.f32 %v760_v37, %v342_v57  ;;  %v1993_v20 = vpack.c.bf16 %v6163_v63, %v6161_v56  ;;  %v1425_v2 = vunpack.c.1.s8 %v6122_v29 }
 0x156   :  { %v774_v44 = vpop.f32.mrf.mxu1  ;;  %2237 = vmatmul.bf16.vlgmr.msra.gmra.mxu3 %v6139_v36  ;;  %v2096_v16 = vpack.c.bf16 %v1728_v61, %v1720_v60  ;;  %v1192_v32 = vunpack.c.0.s8 %v6132_v27  ;;  %v1200_v6 = vunpack.c.1.s8 %v6132_v27  ;;  %v6192_v33 = vcvt.s32.f32 %v1417_v24 }
 0x157   :  { %vm783_vm8 = vcmp.gt.f32.partialorder %v693_v12, 0.0  ;;  %v791_v53 = vmul.f32 0.01, %v693_v12  ;;  %v775_v54 = vadd.f32 %v774_v44, %v761_v14  ;;  %2341 = vmatpush.bf16.msra.mxu3 %v2081_v28  ;;  %v6171_v28 = vld [vmem:[#allocation11 + $0x50] sm:$0xff]  ;;  %v6199_v14 = vcvt.s32.f32 %v1425_v2 }
 0x158   :  { %2305 = vmatpush.bf16.msra.mxu0 %v2096_v16  ;;  %v1704_v27 = vcvt.s32.f32 %v1192_v32  ;;  %v1712_v44 = vcvt.s32.f32 %v1200_v6  ;;  %v993_v58 = vunpack.c.3.s8 %v6171_v28  ;;  %v1305_v50 = vunpack.c.2.s8 %v6195_v10 }
 0x159   :  { %v799_v1 = vsel %vm783_vm8, %v693_v12, %v791_v53  ;;  %vm782_vm9 = vcmp.gt.f32.partialorder %v775_v54, 0.0  ;;  %v790_v4 = vmul.f32 0.01, %v775_v54  ;;  %v732_v15 = vpop.f32.mrf.mxu2  ;;  %v6210_v53 = vld [vmem:[#allocation11 + $0x390] sm:$0xff]  ;;  %v969_v45 = vunpack.c.0.s8 %v6171_v28 }
 0x15a   :  { %v6166_v9 = vpack.c.bf16 %v799_v1, %v795_v11  ;;  %v733_v19 = vadd.f32 %v732_v15, %v341_v35  ;;  %v6178_v11 = vcvt.s32.f32 %v1097_v38  ;;  %v2088_v46 = vpack.c.bf16 %v1712_v44, %v1704_v27 }
 0x15b   :  { %v798_v17 = vsel %vm782_vm9, %v775_v54, %v790_v4  ;;  %2342 = vmatpush.bf16.msra.mxu3 %v2073_v51  ;;  %v985_v51 = vunpack.c.2.s8 %v6171_v28  ;;  %v6215_v8 = vcvt.s32.f32 %v993_v58  ;;  %v1817_v61 = vcvt.s32.f32 %v1305_v50 }
 0x15c   :  { %v746_v22 = vpop.f32.mrf.mxu3  ;;  %v762_v30 = vpop.f32.mrf.mxu0  ;;  %2223 = vmatmul.bf16.vlgmr.msra.gmra.mxu2 %v6166_v9  ;;  %v2041_v29 = vpack.c.bf16 %v6182_v62, %v6178_v11  ;;  %2306 = vmatpush.bf16.msra.mxu0 %v2088_v46  ;;  %v1081_v1 = vunpack.c.2.s8 %v841_v59  ;;  %v1089_v4 = vunpack.c.3.s8 %v841_v59  ;;  %v1401_v31 = vunpack.c.2.s8 %v6210_v53 }
 0x15d   :  { %v747_v37 = vadd.f32 %v746_v22, %v733_v19  ;;  %v763_v42 = vadd.f32 %v762_v30, %v342_v57  ;;  %2327 = vmatpush.bf16.msra.mxu2 %v2017_v7  ;;  %v2201_v7 = vpack.c.bf16 %v6199_v14, %v6192_v33  ;;  %v6207_v49 = vcvt.s32.f32 %v985_v51 }
 0x15e   :  { %v776_v12 = vpop.f32.mrf.mxu1  ;;  %v1593_v19 = vcvt.s32.f32 %v1081_v1  ;;  %v1601_v22 = vcvt.s32.f32 %v1089_v4  ;;  %v1409_v25 = vunpack.c.3.s8 %v6210_v53  ;;  %v1289_v30 = vunpack.c.0.s8 %v6195_v10 }
 0x15f   :  { %vm781_vm10 = vcmp.gt.f32.partialorder %v747_v37, 0.0  ;;  %v789_v57 = vmul.f32 0.01, %v747_v37  ;;  %v777_v5 = vadd.f32 %v776_v12, %v763_v42  ;;  %2343 = vmatpush.bf16.msra.mxu3 %v2065_v23  ;;  %v1313_v23 = vunpack.c.3.s8 %v6195_v10  ;;  %v889_v12 = vld [vmem:[#allocation11 + $0x290] sm:$0xff] }
 0x160   :  { %v1985_v26 = vpack.c.bf16 %v6215_v8, %v6207_v49  ;;  %v1921_v0 = vcvt.s32.f32 %v1409_v25  ;;  %v1481_v3 = vcvt.s32.f32 %v969_v45  ;;  %v1297_v32 = vunpack.c.1.s8 %v6195_v10  ;;  %v858_v45 = vld [vmem:[#allocation11 + $0x198] sm:$0xff] }
 0x161   :  { %v797_v54 = vsel %vm781_vm10, %v747_v37, %v789_v57  ;;  %vm786_vm11 = vcmp.gt.f32.partialorder %v777_v5, 0.0  ;;  %v794_v60 = vmul.f32 0.01, %v777_v5  ;;  %2328 = vmatpush.bf16.msra.mxu2 %v2009_v43  ;;  %v734_v13 = vpop.f32.mrf.mxu2  ;;  %v1825_v21 = vcvt.s32.f32 %v1313_v23 }
 0x162   :  { %v735_v15 = vadd.f32 %v734_v13, %v341_v35  ;;  %v1913_v35 = vcvt.s32.f32 %v1401_v31  ;;  %v1801_v6 = vcvt.s32.f32 %v1289_v30  ;;  %v1065_v37 = vunpack.c.0.s8 %v841_v59 }
 0x163   :  { %v802_v38 = vsel %vm786_vm11, %v777_v5, %v794_v60  ;;  %2344 = vmatpush.bf16.msra.mxu3 %v2057_v55  ;;  %v2145_v47 = vpack.c.bf16 %v1825_v21, %v1817_v61  ;;  %v2033_v55 = vpack.c.bf16 %v1601_v22, %v1593_v19  ;;  %v1073_v34 = vunpack.c.1.s8 %v841_v59  ;;  %v913_v5 = vld [vmem:[#allocation11 + $0x350] sm:$0xff] }
 0x164   :  { %v6226_v43 = vpack.c.bf16 %v802_v38, %v798_v17  ;;  %v748_v16 = vpop.f32.mrf.mxu3  ;;  %v977_v17 = vunpack.c.1.s8 %v6171_v28  ;;  %v866_v28 = vld [vmem:[#allocation11 + $0x1d8] sm:$0xff]  ;;  %v2193_v33 = vpack.c.bf16 %v1921_v0, %v1913_v35  ;;  %v1385_v40 = vunpack.c.0.s8 %v6210_v53 }
 0x165   :  { %v749_v24 = vadd.f32 %v748_v16, %v735_v15  ;;  %2329 = vmatpush.bf16.msra.mxu2 %v2001_v18  ;;  %v1577_v51 = vcvt.s32.f32 %v1065_v37  ;;  %v1585_v10 = vcvt.s32.f32 %v1073_v34  ;;  %v1393_v56 = vunpack.c.1.s8 %v6210_v53 }
 0x166   :  { %2265 = vmatmul.bf16.vlgmr.msrb.gmra.mxu1 %v6226_v43  ;;  %2293 = vmatmul.bf16.vlgmr.msrb.gmra.mxu3 %v6139_v36  ;;  %v1489_v18 = vcvt.s32.f32 %v977_v17  ;;  %v1897_v63 = vcvt.s32.f32 %v1385_v40  ;;  %v1186_v27 = vunpack.c.3.s8 %v866_v28  ;;  %v1281_v49 = vunpack.c.3.s8 %v889_v12 }
 0x167   :  { %vm785_vm12 = vcmp.gt.f32.partialorder %v749_v24, 0.0  ;;  %v793_v2 = vmul.f32 0.01, %v749_v24  ;;  %2345 = vmatpush.bf16.msra.mxu3 %v2049_v39  ;;  %2369 = vmatpush.bf16.msrb.mxu1 %v2209_v52  ;;  %v809_v39 = vld [vmem:[#allocation11 + $0x10] sm:$0xff]  ;;  %v1809_v52 = vcvt.s32.f32 %v1297_v32  ;;  %v2025_v58 = vpack.c.bf16 %v1585_v10, %v1577_v51 }
 0x168   :  { %v1977_v48 = vpack.c.bf16 %v1489_v18, %v1481_v3  ;;  %v953_v44 = vunpack.c.2.s8 %v809_v39  ;;  %v961_v57 = vunpack.c.3.s8 %v809_v39  ;;  %v1905_v11 = vcvt.s32.f32 %v1393_v56  ;;  %v881_v32 = vld [vmem:[#allocation11 + $0x250] sm:$0xff] }
 0x169   :  { %v801_v42 = vsel %vm785_vm12, %v749_v24, %v793_v2  ;;  %2330 = vmatpush.bf16.msra.mxu2 %v1993_v20  ;;  %v1178_v20 = vunpack.c.2.s8 %v866_v28  ;;  %v2137_v14 = vpack.c.bf16 %v1809_v52, %v1801_v6  ;;  %v1698_v59 = vcvt.s32.f32 %v1186_v27 }
 0x16a   :  { %v6248_v41 = vpack.c.bf16 %v801_v42, %v797_v54  ;;  %v1473_v46 = vcvt.s32.f32 %v961_v57  ;;  %v2185_v50 = vpack.c.bf16 %v1905_v11, %v1897_v63  ;;  %v1369_v54 = vunpack.c.2.s8 %v913_v5 }
 0x16b   :  { %2346 = vmatpush.bf16.msra.mxu3 %v2041_v29  ;;  %2370 = vmatpush.bf16.msrb.mxu1 %v2201_v7  ;;  %v1690_v62 = vcvt.s32.f32 %v1178_v20  ;;  %v1273_v29 = vunpack.c.2.s8 %v889_v12  ;;  %v1465_v7 = vcvt.s32.f32 %v953_v44  ;;  %v1377_v60 = vunpack.c.3.s8 %v913_v5 }
 0x16c   :  { %2251 = vmatmul.bf16.vlgmr.msrb.gmra.mxu0 %v6248_v41  ;;  %2279 = vmatmul.bf16.vlgmr.msrb.gmra.mxu2 %v6166_v9  ;;  %v1793_v23 = vcvt.s32.f32 %v1281_v49  ;;  %v1162_v61 = vunpack.c.0.s8 %v866_v28  ;;  %v1881_v1 = vcvt.s32.f32 %v1369_v54  ;;  %v1170_v38 = vunpack.c.1.s8 %v866_v28 }
 0x16d   :  { %2331 = vmatpush.bf16.msra.mxu2 %v1985_v26  ;;  %2355 = vmatpush.bf16.msrb.mxu0 %v2145_v47  ;;  %v1785_v53 = vcvt.s32.f32 %v1273_v29  ;;  %v2082_v8 = vpack.c.bf16 %v1698_v59, %v1690_v62  ;;  %v1969_v13 = vpack.c.bf16 %v1473_v46, %v1465_v7  ;;  %v1889_v4 = vcvt.s32.f32 %v1377_v60  ;;  %v834_v26 = vld [vmem:[#allocation11 + $0xd8] sm:$0xff] }
 0x16e   :  { %v937_v15 = vunpack.c.0.s8 %v809_v39  ;;  %v1674_v16 = vcvt.s32.f32 %v1162_v61  ;;  %v945_v21 = vunpack.c.1.s8 %v809_v39  ;;  %v1257_v19 = vunpack.c.0.s8 %v889_v12  ;;  %v826_v59 = vld [vmem:[#allocation11 + $0x98] sm:$0xff] }
 0x16f   :  { %2347 = vmatpush.bf16.msra.mxu3 %v2033_v55  ;;  %2371 = vmatpush.bf16.msrb.mxu1 %v2193_v33  ;;  %v2129_v31 = vpack.c.bf16 %v1793_v23, %v1785_v53  ;;  %v2177_v22 = vpack.c.bf16 %v1889_v4, %v1881_v1  ;;  %v1682_v24 = vcvt.s32.f32 %v1170_v38  ;;  %v1265_v35 = vunpack.c.1.s8 %v889_v12 }
 0x170   :  { %v1449_v25 = vcvt.s32.f32 %v937_v15  ;;  %v1457_v47 = vcvt.s32.f32 %v945_v21  ;;  %v1769_v55 = vcvt.s32.f32 %v1257_v19  ;;  %v1050_v17 = vunpack.c.2.s8 %v834_v26 }
 0x171   :  { %2332 = vmatpush.bf16.msra.mxu2 %v1977_v48  ;;  %2356 = vmatpush.bf16.msrb.mxu0 %v2137_v14  ;;  %v1058_v30 = vunpack.c.3.s8 %v834_v26  ;;  %v2074_v2 = vpack.c.bf16 %v1682_v24, %v1674_v16  ;;  %v1777_v0 = vcvt.s32.f32 %v1265_v35  ;;  %v1353_v3 = vunpack.c.0.s8 %v913_v5  ;;  %v905_v48 = vld [vmem:[#allocation11 + $0x310] sm:$0xff]  ;;  %v930_v16 = vld [vmem:[#allocation11 + $0x3d8] sm:$0xff] }
 0x172   :  { %v1361_v18 = vunpack.c.1.s8 %v913_v5  ;;  %v1961_v6 = vpack.c.bf16 %v1457_v47, %v1449_v25  ;;  %v1562_v37 = vcvt.s32.f32 %v1050_v17  ;;  %v1146_v42 = vunpack.c.2.s8 %v858_v45  ;;  %v873_v25 = vld [vmem:[#allocation11 + $0x210] sm:$0xff] }
 0x173   :  { %2348 = vmatpush.bf16.msra.mxu3 %v2025_v58  ;;  %2372 = vmatpush.bf16.msrb.mxu1 %v2185_v50  ;;  %v1570_v28 = vcvt.s32.f32 %v1058_v30  ;;  %v2121_v33 = vpack.c.bf16 %v1777_v0, %v1769_v55  ;;  %v1865_v34 = vcvt.s32.f32 %v1353_v3  ;;  %v1154_v39 = vunpack.c.3.s8 %v858_v45 }
 0x174   :  { %v1873_v40 = vcvt.s32.f32 %v1361_v18  ;;  %v1658_v51 = vcvt.s32.f32 %v1146_v42  ;;  %v1241_v12 = vunpack.c.2.s8 %v881_v32  ;;  %v1249_v10 = vunpack.c.3.s8 %v881_v32 }
 0x175   :  { %2333 = vmatpush.bf16.msra.mxu2 %v1969_v13  ;;  %2357 = vmatpush.bf16.msrb.mxu0 %v2129_v31  ;;  %v2018_v52 = vpack.c.bf16 %v1570_v28, %v1562_v37  ;;  %v1666_v63 = vcvt.s32.f32 %v1154_v39  ;;  %v1034_v20 = vunpack.c.0.s8 %v834_v26  ;;  %v1042_v14 = vunpack.c.1.s8 %v834_v26  ;;  %v850_v13 = vld [vmem:[#allocation11 + $0x158] sm:$0xff] }
 0x176   :  { %2321 = vmatmul.bf16.vlgmr.msra.gmra.mxu1 %v6226_v43  ;;  %2349 = vmatmul.bf16.vlgmr.msra.gmra.mxu3 %v6139_v36  ;;  %v2169_v56 = vpack.c.bf16 %v1873_v40, %v1865_v34  ;;  %v1753_v27 = vcvt.s32.f32 %v1241_v12  ;;  %v1761_v44 = vcvt.s32.f32 %v1249_v10  ;;  %v1337_v57 = vunpack.c.2.s8 %v905_v48 }
 0x177   :  { %2397 = vmatpush.bf16.msrb.mxu3 %v2082_v8  ;;  %2373 = vmatpush.bf16.msrb.mxu1 %v2177_v22  ;;  %v1345_v5 = vunpack.c.3.s8 %v905_v48  ;;  %v2066_v58 = vpack.c.bf16 %v1666_v63, %v1658_v51  ;;  %v1546_v11 = vcvt.s32.f32 %v1034_v20  ;;  %v1554_v62 = vcvt.s32.f32 %v1042_v14 }
 0x178   :  { %v1130_v29 = vunpack.c.0.s8 %v858_v45  ;;  %v2113_v7 = vpack.c.bf16 %v1761_v44, %v1753_v27  ;;  %v1849_v46 = vcvt.s32.f32 %v1337_v57  ;;  %v1138_v50 = vunpack.c.1.s8 %v858_v45  ;;  %v898_v44 = vld [vmem:[#allocation11 + $0x2d8] sm:$0xff] }
 0x179   :  { %2334 = vmatpush.bf16.msra.mxu2 %v1961_v6  ;;  %2358 = vmatpush.bf16.msrb.mxu0 %v2121_v33  ;;  %v1857_v49 = vcvt.s32.f32 %v1345_v5  ;;  %v2010_v53 = vpack.c.bf16 %v1554_v62, %v1546_v11  ;;  %v1225_v60 = vunpack.c.0.s8 %v881_v32  ;;  %v1233_v8 = vunpack.c.1.s8 %v881_v32 }
 0x17a   :  { %v1642_v54 = vcvt.s32.f32 %v1130_v29  ;;  %v1650_v61 = vcvt.s32.f32 %v1138_v50  ;;  %v1018_v1 = vunpack.c.2.s8 %v826_v59  ;;  %v1026_v4 = vunpack.c.3.s8 %v826_v59 }
 0x17b   :  { %2398 = vmatpush.bf16.msrb.mxu3 %v2074_v2  ;;  %2374 = vmatpush.bf16.msrb.mxu1 %v2169_v56  ;;  %v2161_v23 = vpack.c.bf16 %v1857_v49, %v1849_v46  ;;  %v1737_v38 = vcvt.s32.f32 %v1225_v60  ;;  %v1745_v15 = vcvt.s32.f32 %v1233_v8  ;;  %v1321_v26 = vunpack.c.0.s8 %v905_v48  ;;  %v818_v56 = vld [vmem:[#allocation11 + $0x58] sm:$0xff] }
 0x17c   :  { %2307 = vmatmul.bf16.vlgmr.msra.gmra.mxu0 %v6248_v41  ;;  %2335 = vmatmul.bf16.vlgmr.msra.gmra.mxu2 %v6166_v9  ;;  %v1329_v31 = vunpack.c.1.s8 %v905_v48  ;;  %v2058_v21 = vpack.c.bf16 %v1650_v61, %v1642_v54  ;;  %v1530_v19 = vcvt.s32.f32 %v1018_v1  ;;  %v1538_v22 = vcvt.s32.f32 %v1026_v4  ;;  %v842_v46 = vld [vmem:[#allocation11 + $0x118] sm:$0xff] }
 0x17d   :  { %2383 = vmatpush.bf16.msrb.mxu2 %v2018_v52  ;;  %2359 = vmatpush.bf16.msrb.mxu0 %v2113_v7  ;;  %v1114_v24 = vunpack.c.2.s8 %v850_v13  ;;  %v2105_v35 = vpack.c.bf16 %v1745_v15, %v1737_v38  ;;  %v1833_v45 = vcvt.s32.f32 %v1321_v26  ;;  %v1122_v55 = vunpack.c.3.s8 %v850_v13  ;;  %v922_v60 = vld [vmem:[#allocation11 + $0x398] sm:$0xff] }
 0x17e   :  { %v1841_v47 = vcvt.s32.f32 %v1329_v31  ;;  %v2002_v17 = vpack.c.bf16 %v1538_v22, %v1530_v19  ;;  %v1434_v2 = vunpack.c.2.s8 %v930_v16  ;;  %v1442_v0 = vunpack.c.3.s8 %v930_v16 }
 0x17f   :  { %2399 = vmatpush.bf16.msrb.mxu3 %v2066_v58  ;;  %2375 = vmatpush.bf16.msrb.mxu1 %v2161_v23  ;;  %v1626_v30 = vcvt.s32.f32 %v1114_v24  ;;  %v1634_v18 = vcvt.s32.f32 %v1122_v55  ;;  %v1209_v32 = vunpack.c.2.s8 %v873_v25  ;;  %v1217_v6 = vunpack.c.3.s8 %v873_v25 }
 0x180   :  { %v2153_v3 = vpack.c.bf16 %v1841_v47, %v1833_v45  ;;  %v1946_v37 = vcvt.s32.f32 %v1434_v2  ;;  %v1954_v28 = vcvt.s32.f32 %v1442_v0  ;;  %v1002_v42 = vunpack.c.0.s8 %v826_v59 }
 0x181   :  { %2384 = vmatpush.bf16.msrb.mxu2 %v2010_v53  ;;  %2360 = vmatpush.bf16.msrb.mxu0 %v2105_v35  ;;  %v1010_v33 = vunpack.c.1.s8 %v826_v59  ;;  %v2050_v34 = vpack.c.bf16 %v1634_v18, %v1626_v30  ;;  %v1721_v40 = vcvt.s32.f32 %v1209_v32  ;;  %v1729_v39 = vcvt.s32.f32 %v1217_v6 }
 0x182   :  { %v1098_v48 = vunpack.c.0.s8 %v850_v13  ;;  %v2210_v52 = vpack.c.bf16 %v1954_v28, %v1946_v37  ;;  %v1514_v51 = vcvt.s32.f32 %v1002_v42  ;;  %v1106_v10 = vunpack.c.1.s8 %v850_v13  ;;  %v810_v28 = vld [vmem:[#allocation11 + $0x18] sm:$0xff] }
 0x183   :  { %2400 = vmatpush.bf16.msrb.mxu3 %v2058_v21  ;;  %2376 = vmatpush.bf16.msrb.mxu1 %v2153_v3  ;;  %v1522_v12 = vcvt.s32.f32 %v1010_v33  ;;  %v2097_v63 = vpack.c.bf16 %v1729_v39, %v1721_v40  ;;  %v1418_v14 = vunpack.c.0.s8 %v930_v16  ;;  %v1426_v27 = vunpack.c.1.s8 %v930_v16  ;;  %v867_v3 = vld [vmem:[#allocation11 + $0x1e0] sm:$0xff] }
 0x184   :  { %v1610_v20 = vcvt.s32.f32 %v1098_v48  ;;  %v1618_v5 = vcvt.s32.f32 %v1106_v10  ;;  %v1193_v58 = vunpack.c.0.s8 %v873_v25  ;;  %v1201_v11 = vunpack.c.1.s8 %v873_v25 }
 0x185   :  { %2385 = vmatpush.bf16.msrb.mxu2 %v2002_v17  ;;  %v1994_v57 = vpack.c.bf16 %v1522_v12, %v1514_v51  ;;  %2361 = vmatpush.bf16.msrb.mxu0 %v2097_v63  ;;  %v1930_v62 = vcvt.s32.f32 %v1418_v14  ;;  %v1938_v29 = vcvt.s32.f32 %v1426_v27  ;;  %v986_v59 = vunpack.c.2.s8 %v818_v56  ;;  %v890_v12 = vld [vmem:[#allocation11 + $0x298] sm:$0xff] }
 0x186   :  { %2377 = vmatmul.bf16.vlgmr.msrb.gmra.mxu1 %v6226_v43  ;;  %v994_v7 = vunpack.c.3.s8 %v818_v56  ;;  %v2042_v49 = vpack.c.bf16 %v1618_v5, %v1610_v20  ;;  %v1705_v50 = vcvt.s32.f32 %v1193_v58  ;;  %v1713_v53 = vcvt.s32.f32 %v1201_v11  ;;  %v914_v14 = vld [vmem:[#allocation11 + $0x358] sm:$0xff] }
 0x187   :  { %2401 = vmatpush.bf16.msrb.mxu3 %v2050_v34  ;;  %2425 = vmatpush.bf16.msra.mxu1 %v2210_v52  ;;  %v1306_v54 = vunpack.c.2.s8 %v898_v44  ;;  %v2202_v8 = vpack.c.bf16 %v1938_v29, %v1930_v62  ;;  %v1498_v13 = vcvt.s32.f32 %v986_v59  ;;  %v1314_v61 = vunpack.c.3.s8 %v898_v44 }
 0x188   :  { %v1506_v23 = vcvt.s32.f32 %v994_v7  ;;  %v2089_v1 = vpack.c.bf16 %v1713_v53, %v1705_v50  ;;  %v1082_v38 = vunpack.c.2.s8 %v842_v46  ;;  %v1090_v15 = vunpack.c.3.s8 %v842_v46 }
 0x189   :  { %2386 = vmatpush.bf16.msrb.mxu2 %v1994_v57  ;;  %v1818_v4 = vcvt.s32.f32 %v1306_v54  ;;  %v1826_v31 = vcvt.s32.f32 %v1314_v61  ;;  %v1402_v16 = vunpack.c.2.s8 %v922_v60  ;;  %v1410_v21 = vunpack.c.3.s8 %v922_v60 }
 0x18a   :  { %v1986_v26 = vpack.c.bf16 %v1506_v23, %v1498_v13  ;;  %2362 = vmatpush.bf16.msrb.mxu0 %v2089_v1  ;;  %v1594_v19 = vcvt.s32.f32 %v1082_v38  ;;  %v1602_v22 = vcvt.s32.f32 %v1090_v15  ;;  %v970_v24 = vunpack.c.0.s8 %v818_v56  ;;  %v835_v1 = vld [vmem:[#allocation11 + $0xe0] sm:$0xff] }
 0x18b   :  { %2402 = vmatpush.bf16.msrb.mxu3 %v2042_v49  ;;  %2426 = vmatpush.bf16.msra.mxu1 %v2202_v8  ;;  %v978_v25 = vunpack.c.1.s8 %v818_v56  ;;  %v2146_v35 = vpack.c.bf16 %v1826_v31, %v1818_v4  ;;  %v1914_v45 = vcvt.s32.f32 %v1402_v16  ;;  %v1922_v47 = vcvt.s32.f32 %v1410_v21 }
 0x18c   :  { %v1290_v55 = vunpack.c.0.s8 %v898_v44  ;;  %v2034_v17 = vpack.c.bf16 %v1602_v22, %v1594_v19  ;;  %v1482_v30 = vcvt.s32.f32 %v970_v24  ;;  %v1298_v0 = vunpack.c.1.s8 %v898_v44  ;;  %v859_v22 = vld [vmem:[#allocation11 + $0x1a0] sm:$0xff] }
 0x18d   :  { %2387 = vmatpush.bf16.msrb.mxu2 %v1986_v26  ;;  %v1490_v2 = vcvt.s32.f32 %v978_v25  ;;  %v2194_v18 = vpack.c.bf16 %v1922_v47, %v1914_v45  ;;  %v1066_v6 = vunpack.c.0.s8 %v842_v46  ;;  %v1074_v37 = vunpack.c.1.s8 %v842_v46  ;;  %2363 = vmatmul.bf16.vlgmr.msrb.gmra.mxu0 %v6248_v41 }
 0x18e   :  { %2411 = vmatpush.bf16.msra.mxu0 %v2146_v35  ;;  %v1802_v32 = vcvt.s32.f32 %v1290_v55  ;;  %v1810_v33 = vcvt.s32.f32 %v1298_v0  ;;  %v1386_v34 = vunpack.c.0.s8 %v922_v60  ;;  %v1394_v40 = vunpack.c.1.s8 %v922_v60 }
 0x18f   :  { %2403 = vmatpush.bf16.msrb.mxu3 %v2034_v17  ;;  %v1978_v42 = vpack.c.bf16 %v1490_v2, %v1482_v30  ;;  %2427 = vmatpush.bf16.msra.mxu1 %v2194_v18  ;;  %v1578_v39 = vcvt.s32.f32 %v1066_v6  ;;  %v1586_v48 = vcvt.s32.f32 %v1074_v37  ;;  %v1179_v52 = vunpack.c.2.s8 %v867_v3  ;;  %v882_v2 = vld [vmem:[#allocation11 + $0x258] sm:$0xff] }
 0x190   :  { %v1187_v51 = vunpack.c.3.s8 %v867_v3  ;;  %v2138_v10 = vpack.c.bf16 %v1810_v33, %v1802_v32  ;;  %v1898_v56 = vcvt.s32.f32 %v1386_v34  ;;  %v1906_v63 = vcvt.s32.f32 %v1394_v40  ;;  %v906_v33 = vld [vmem:[#allocation11 + $0x318] sm:$0xff] }
 0x191   :  { %2388 = vmatpush.bf16.msrb.mxu2 %v1978_v42  ;;  %v954_v20 = vunpack.c.2.s8 %v810_v28  ;;  %v2026_v27 = vpack.c.bf16 %v1586_v48, %v1578_v39  ;;  %v1691_v44 = vcvt.s32.f32 %v1179_v52  ;;  %v962_v5 = vunpack.c.3.s8 %v810_v28 }
 0x192   :  { %v1699_v57 = vcvt.s32.f32 %v1187_v51  ;;  %2412 = vmatpush.bf16.msra.mxu0 %v2138_v10  ;;  %v2186_v58 = vpack.c.bf16 %v1906_v63, %v1898_v56  ;;  %v1274_v62 = vunpack.c.2.s8 %v890_v12  ;;  %v1282_v29 = vunpack.c.3.s8 %v890_v12 }
 0x193   :  { %v1466_v11 = vcvt.s32.f32 %v954_v20  ;;  %2404 = vmatpush.bf16.msrb.mxu3 %v2026_v27  ;;  %v1474_v7 = vcvt.s32.f32 %v962_v5  ;;  %v1370_v46 = vunpack.c.2.s8 %v914_v14  ;;  %v1378_v49 = vunpack.c.3.s8 %v914_v14 }
 0x194   :  { %v2083_v59 = vpack.c.bf16 %v1699_v57, %v1691_v44  ;;  %2428 = vmatpush.bf16.msra.mxu1 %v2186_v58  ;;  %v1786_v50 = vcvt.s32.f32 %v1274_v62  ;;  %v1794_v53 = vcvt.s32.f32 %v1282_v29  ;;  %v1163_v54 = vunpack.c.0.s8 %v867_v3  ;;  %v827_v58 = vld [vmem:[#allocation11 + $0xa0] sm:$0xff] }
 0x195   :  { %v1171_v60 = vunpack.c.1.s8 %v867_v3  ;;  %v1970_v8 = vpack.c.bf16 %v1474_v7, %v1466_v11  ;;  %v1882_v13 = vcvt.s32.f32 %v1370_v46  ;;  %v1890_v23 = vcvt.s32.f32 %v1378_v49 }
 0x196   :  { %v938_v61 = vunpack.c.0.s8 %v810_v28  ;;  %v2130_v4 = vpack.c.bf16 %v1794_v53, %v1786_v50  ;;  %2405 = vmatmul.bf16.vlgmr.msrb.gmra.mxu3 %v6139_v36  ;;  %v1675_v38 = vcvt.s32.f32 %v1163_v54  ;;  %v946_v26 = vunpack.c.1.s8 %v810_v28  ;;  %v851_v53 = vld [vmem:[#allocation11 + $0x160] sm:$0xff] }
 0x197   :  { %2453 = vmatpush.bf16.msra.mxu3 %v2083_v59  ;;  %v1683_v15 = vcvt.s32.f32 %v1171_v60  ;;  %2389 = vmatpush.bf16.msrb.mxu2 %v1970_v8  ;;  %v2178_v31 = vpack.c.bf16 %v1890_v23, %v1882_v13  ;;  %v1258_v21 = vunpack.c.0.s8 %v890_v12  ;;  %v1266_v19 = vunpack.c.1.s8 %v890_v12 }
 0x198   :  { %v1450_v16 = vcvt.s32.f32 %v938_v61  ;;  %2413 = vmatpush.bf16.msra.mxu0 %v2130_v4  ;;  %v1458_v25 = vcvt.s32.f32 %v946_v26  ;;  %v1051_v35 = vunpack.c.2.s8 %v835_v1  ;;  %v1059_v45 = vunpack.c.3.s8 %v835_v1 }
 0x199   :  { %v2075_v24 = vpack.c.bf16 %v1683_v15, %v1675_v38  ;;  %2429 = vmatpush.bf16.msra.mxu1 %v2178_v31  ;;  %v1770_v47 = vcvt.s32.f32 %v1258_v21  ;;  %v1778_v55 = vcvt.s32.f32 %v1266_v19  ;;  %v1354_v17 = vunpack.c.0.s8 %v914_v14  ;;  %v931_v38 = vld [vmem:[#allocation11 + $0x3e0] sm:$0xff]  ;;  %v874_v21 = vld [vmem:[#allocation11 + $0x218] sm:$0xff] }
 0x19a   :  { %v1362_v30 = vunpack.c.1.s8 %v914_v14  ;;  %v1962_v0 = vpack.c.bf16 %v1458_v25, %v1450_v16  ;;  %v1563_v3 = vcvt.s32.f32 %v1051_v35  ;;  %v1571_v18 = vcvt.s32.f32 %v1059_v45 }
 0x19b   :  { %2454 = vmatpush.bf16.msra.mxu3 %v2075_v24  ;;  %v1147_v32 = vunpack.c.2.s8 %v859_v22  ;;  %v2122_v6 = vpack.c.bf16 %v1778_v55, %v1770_v47  ;;  %v1866_v37 = vcvt.s32.f32 %v1354_v17  ;;  %v1155_v42 = vunpack.c.3.s8 %v859_v22 }
 0x19c   :  { %v1874_v28 = vcvt.s32.f32 %v1362_v30  ;;  %2390 = vmatpush.bf16.msrb.mxu2 %v1962_v0  ;;  %v2019_v34 = vpack.c.bf16 %v1571_v18, %v1563_v3  ;;  %v1242_v39 = vunpack.c.2.s8 %v882_v2  ;;  %v1250_v48 = vunpack.c.3.s8 %v882_v2 }
 0x19d   :  { %v1659_v40 = vcvt.s32.f32 %v1147_v32  ;;  %2414 = vmatpush.bf16.msra.mxu0 %v2122_v6  ;;  %v1667_v51 = vcvt.s32.f32 %v1155_v42  ;;  %v1035_v12 = vunpack.c.0.s8 %v835_v1  ;;  %v1043_v10 = vunpack.c.1.s8 %v835_v1 }
 0x19e   :  { %v2170_v52 = vpack.c.bf16 %v1874_v28, %v1866_v37  ;;  %v1754_v56 = vcvt.s32.f32 %v1242_v39  ;;  %v1762_v63 = vcvt.s32.f32 %v1250_v48  ;;  %v1338_v20 = vunpack.c.2.s8 %v906_v33 }
 0x19f   :  { %v1346_v14 = vunpack.c.3.s8 %v906_v33  ;;  %2391 = vmatmul.bf16.vlgmr.msrb.gmra.mxu2 %v6166_v9  ;;  %v2067_v27 = vpack.c.bf16 %v1667_v51, %v1659_v40  ;;  %v1547_v44 = vcvt.s32.f32 %v1035_v12  ;;  %v1555_v57 = vcvt.s32.f32 %v1043_v10 }
 0x1a0   :  { %2439 = vmatpush.bf16.msra.mxu2 %v2019_v34  ;;  %2430 = vmatpush.bf16.msra.mxu1 %v2170_v52  ;;  %v1131_v5 = vunpack.c.0.s8 %v859_v22  ;;  %v2114_v11 = vpack.c.bf16 %v1762_v63, %v1754_v56  ;;  %v1850_v62 = vcvt.s32.f32 %v1338_v20  ;;  %v1139_v59 = vunpack.c.1.s8 %v859_v22  ;;  %v819_v52 = vld [vmem:[#allocation11 + $0x60] sm:$0xff] }
 0x1a1   :  { %v1858_v29 = vcvt.s32.f32 %v1346_v14  ;;  %2455 = vmatpush.bf16.msra.mxu3 %v2067_v27  ;;  %v2011_v7 = vpack.c.bf16 %v1555_v57, %v1547_v44  ;;  %v1226_v49 = vunpack.c.0.s8 %v882_v2  ;;  %v1234_v50 = vunpack.c.1.s8 %v882_v2  ;;  %v899_v63 = vld [vmem:[#allocation11 + $0x2e0] sm:$0xff] }
 0x1a2   :  { %v1643_v46 = vcvt.s32.f32 %v1131_v5  ;;  %2415 = vmatpush.bf16.msra.mxu0 %v2114_v11  ;;  %v1651_v60 = vcvt.s32.f32 %v1139_v59  ;;  %v1019_v8 = vunpack.c.2.s8 %v827_v58  ;;  %v1027_v13 = vunpack.c.3.s8 %v827_v58 }
 0x1a3   :  { %v2162_v54 = vpack.c.bf16 %v1858_v29, %v1850_v62  ;;  %v1738_v23 = vcvt.s32.f32 %v1226_v49  ;;  %v1746_v61 = vcvt.s32.f32 %v1234_v50  ;;  %v1322_v1 = vunpack.c.0.s8 %v906_v33  ;;  %v843_v62 = vld [vmem:[#allocation11 + $0x120] sm:$0xff] }
 0x1a4   :  { %2440 = vmatpush.bf16.msra.mxu2 %v2011_v7  ;;  %v1330_v4 = vunpack.c.1.s8 %v906_v33  ;;  %v2059_v15 = vpack.c.bf16 %v1651_v60, %v1643_v46  ;;  %v1531_v26 = vcvt.s32.f32 %v1019_v8  ;;  %v1539_v31 = vcvt.s32.f32 %v1027_v13  ;;  %v923_v49 = vld [vmem:[#allocation11 + $0x3a0] sm:$0xff] }
 0x1a5   :  { %2431 = vmatpush.bf16.msra.mxu1 %v2162_v54  ;;  %v1115_v16 = vunpack.c.2.s8 %v851_v53  ;;  %v2106_v19 = vpack.c.bf16 %v1746_v61, %v1738_v23  ;;  %v1834_v22 = vcvt.s32.f32 %v1322_v1  ;;  %v1123_v25 = vunpack.c.3.s8 %v851_v53 }
 0x1a6   :  { %v1842_v24 = vcvt.s32.f32 %v1330_v4  ;;  %2456 = vmatpush.bf16.msra.mxu3 %v2059_v15  ;;  %v2003_v35 = vpack.c.bf16 %v1539_v31, %v1531_v26  ;;  %v1435_v47 = vunpack.c.2.s8 %v931_v38  ;;  %v1443_v55 = vunpack.c.3.s8 %v931_v38 }
 0x1a7   :  { %v1627_v45 = vcvt.s32.f32 %v1115_v16  ;;  %2416 = vmatpush.bf16.msra.mxu0 %v2106_v19  ;;  %v1635_v30 = vcvt.s32.f32 %v1123_v25  ;;  %v1210_v2 = vunpack.c.2.s8 %v874_v21  ;;  %v1218_v0 = vunpack.c.3.s8 %v874_v21 }
 0x1a8   :  { %v2154_v17 = vpack.c.bf16 %v1842_v24, %v1834_v22  ;;  %2441 = vmatpush.bf16.msra.mxu2 %v2003_v35  ;;  %v1947_v3 = vcvt.s32.f32 %v1435_v47  ;;  %v1955_v18 = vcvt.s32.f32 %v1443_v55  ;;  %v1003_v32 = vunpack.c.0.s8 %v827_v58 }
 0x1a9   :  { %v1011_v6 = vunpack.c.1.s8 %v827_v58  ;;  %v2051_v37 = vpack.c.bf16 %v1635_v30, %v1627_v45  ;;  %v1722_v28 = vcvt.s32.f32 %v1210_v2  ;;  %v1730_v42 = vcvt.s32.f32 %v1218_v0 }
 0x1aa   :  { %2432 = vmatpush.bf16.msra.mxu1 %v2154_v17  ;;  %v1099_v33 = vunpack.c.0.s8 %v851_v53  ;;  %v2211_v34 = vpack.c.bf16 %v1955_v18, %v1947_v3  ;;  %v1515_v40 = vcvt.s32.f32 %v1003_v32  ;;  %v1107_v48 = vunpack.c.1.s8 %v851_v53  ;;  %v868_v17 = vld [vmem:[#allocation11 + $0x1e8] sm:$0xff]  ;;  %v811_v18 = vld [vmem:[#allocation11 + $0x20] sm:$0xff] }
 0x1ab   :  { %v1523_v39 = vcvt.s32.f32 %v1011_v6  ;;  %2457 = vmatpush.bf16.msra.mxu3 %v2051_v37  ;;  %v2098_v51 = vpack.c.bf16 %v1730_v42, %v1722_v28  ;;  %v1419_v10 = vunpack.c.0.s8 %v931_v38  ;;  %v1427_v56 = vunpack.c.1.s8 %v931_v38 }
 0x1ac   :  { %v1611_v12 = vcvt.s32.f32 %v1099_v33  ;;  %v1619_v14 = vcvt.s32.f32 %v1107_v48  ;;  %v1194_v27 = vunpack.c.0.s8 %v874_v21  ;;  %v1202_v44 = vunpack.c.1.s8 %v874_v21 }
 0x1ad   :  { %v1995_v20 = vpack.c.bf16 %v1523_v39, %v1515_v40  ;;  %2417 = vmatpush.bf16.msra.mxu0 %v2098_v51  ;;  %2433 = vmatmul.bf16.vlgmr.msra.gmra.mxu1 %v6226_v43  ;;  %v1931_v57 = vcvt.s32.f32 %v1419_v10  ;;  %v1939_v5 = vcvt.s32.f32 %v1427_v56  ;;  %v987_v58 = vunpack.c.2.s8 %v819_v52  ;;  %v891_v39 = vld [vmem:[#allocation11 + $0x2a0] sm:$0xff] }
 0x1ae   :  { %2481 = vmatpush.bf16.msrb.mxu1 %v2211_v34  ;;  %v995_v11 = vunpack.c.3.s8 %v819_v52  ;;  %v2043_v29 = vpack.c.bf16 %v1619_v14, %v1611_v12  ;;  %v1706_v59 = vcvt.s32.f32 %v1194_v27  ;;  %v1714_v7 = vcvt.s32.f32 %v1202_v44  ;;  %v915_v10 = vld [vmem:[#allocation11 + $0x360] sm:$0xff] }
 0x1af   :  { %2442 = vmatpush.bf16.msra.mxu2 %v1995_v20  ;;  %v1307_v46 = vunpack.c.2.s8 %v899_v63  ;;  %v2203_v50 = vpack.c.bf16 %v1939_v5, %v1931_v57  ;;  %v1499_v53 = vcvt.s32.f32 %v987_v58  ;;  %v1315_v60 = vunpack.c.3.s8 %v899_v63 }
 0x1b0   :  { %v1507_v54 = vcvt.s32.f32 %v995_v11  ;;  %2458 = vmatpush.bf16.msra.mxu3 %v2043_v29  ;;  %v2090_v8 = vpack.c.bf16 %v1714_v7, %v1706_v59  ;;  %v1083_v23 = vunpack.c.2.s8 %v843_v62  ;;  %v1091_v61 = vunpack.c.3.s8 %v843_v62 }
 0x1b1   :  { %v1819_v13 = vcvt.s32.f32 %v1307_v46  ;;  %v1827_v4 = vcvt.s32.f32 %v1315_v60  ;;  %v1403_v38 = vunpack.c.2.s8 %v923_v49  ;;  %v1411_v15 = vunpack.c.3.s8 %v923_v49 }
 0x1b2   :  { %2482 = vmatpush.bf16.msrb.mxu1 %v2203_v50  ;;  %v1987_v1 = vpack.c.bf16 %v1507_v54, %v1499_v53  ;;  %2418 = vmatpush.bf16.msra.mxu0 %v2090_v8  ;;  %v1595_v26 = vcvt.s32.f32 %v1083_v23  ;;  %v1603_v31 = vcvt.s32.f32 %v1091_v61  ;;  %v971_v16 = vunpack.c.0.s8 %v819_v52  ;;  %v836_v8 = vld [vmem:[#allocation11 + $0xe8] sm:$0xff] }
 0x1b3   :  { %v979_v21 = vunpack.c.1.s8 %v819_v52  ;;  %v2147_v19 = vpack.c.bf16 %v1827_v4, %v1819_v13  ;;  %v1915_v22 = vcvt.s32.f32 %v1403_v38  ;;  %v1923_v24 = vcvt.s32.f32 %v1411_v15 }
 0x1b4   :  { %2443 = vmatpush.bf16.msra.mxu2 %v1987_v1  ;;  %v1291_v25 = vunpack.c.0.s8 %v899_v63  ;;  %v2035_v35 = vpack.c.bf16 %v1603_v31, %v1595_v26  ;;  %v1483_v45 = vcvt.s32.f32 %v971_v16  ;;  %v1299_v55 = vunpack.c.1.s8 %v899_v63  ;;  %v860_v31 = vld [vmem:[#allocation11 + $0x1a8] sm:$0xff] }
 0x1b5   :  { %v1491_v47 = vcvt.s32.f32 %v979_v21  ;;  %v2195_v30 = vpack.c.bf16 %v1923_v24, %v1915_v22  ;;  %v1067_v0 = vunpack.c.0.s8 %v843_v62  ;;  %v1075_v3 = vunpack.c.1.s8 %v843_v62  ;;  %2419 = vmatmul.bf16.vlgmr.msra.gmra.mxu0 %v6248_v41 }
 0x1b6   :  { %2467 = vmatpush.bf16.msrb.mxu0 %v2147_v19  ;;  %v1803_v2 = vcvt.s32.f32 %v1291_v25  ;;  %2459 = vmatpush.bf16.msra.mxu3 %v2035_v35  ;;  %v1811_v6 = vcvt.s32.f32 %v1299_v55  ;;  %v1387_v37 = vunpack.c.0.s8 %v923_v49  ;;  %v1395_v28 = vunpack.c.1.s8 %v923_v49 }
 0x1b7   :  { %v1979_v32 = vpack.c.bf16 %v1491_v47, %v1483_v45  ;;  %2483 = vmatpush.bf16.msrb.mxu1 %v2195_v30  ;;  %v1579_v42 = vcvt.s32.f32 %v1067_v0  ;;  %v1587_v33 = vcvt.s32.f32 %v1075_v3  ;;  %v1180_v34 = vunpack.c.2.s8 %v868_v17  ;;  %v883_v47 = vld [vmem:[#allocation11 + $0x260] sm:$0xff] }
 0x1b8   :  { %v1188_v40 = vunpack.c.3.s8 %v868_v17  ;;  %v2139_v48 = vpack.c.bf16 %v1811_v6, %v1803_v2  ;;  %v1899_v52 = vcvt.s32.f32 %v1387_v37  ;;  %v1907_v51 = vcvt.s32.f32 %v1395_v28  ;;  %v907_v6 = vld [vmem:[#allocation11 + $0x320] sm:$0xff] }
 0x1b9   :  { %2444 = vmatpush.bf16.msra.mxu2 %v1979_v32  ;;  %v955_v12 = vunpack.c.2.s8 %v811_v18  ;;  %v2027_v56 = vpack.c.bf16 %v1587_v33, %v1579_v42  ;;  %v1692_v63 = vcvt.s32.f32 %v1180_v34  ;;  %v963_v14 = vunpack.c.3.s8 %v811_v18 }
 0x1ba   :  { %v1700_v20 = vcvt.s32.f32 %v1188_v40  ;;  %2468 = vmatpush.bf16.msrb.mxu0 %v2139_v48  ;;  %v2187_v27 = vpack.c.bf16 %v1907_v51, %v1899_v52  ;;  %v1275_v57 = vunpack.c.2.s8 %v891_v39  ;;  %v1283_v5 = vunpack.c.3.s8 %v891_v39 }
 0x1bb   :  { %v1467_v44 = vcvt.s32.f32 %v955_v12  ;;  %2460 = vmatpush.bf16.msra.mxu3 %v2027_v56  ;;  %v1475_v11 = vcvt.s32.f32 %v963_v14  ;;  %v1371_v62 = vunpack.c.2.s8 %v915_v10  ;;  %v1379_v29 = vunpack.c.3.s8 %v915_v10 }
 0x1bc   :  { %v2084_v58 = vpack.c.bf16 %v1700_v20, %v1692_v63  ;;  %2484 = vmatpush.bf16.msrb.mxu1 %v2187_v27  ;;  %v1787_v59 = vcvt.s32.f32 %v1275_v57  ;;  %v1795_v7 = vcvt.s32.f32 %v1283_v5  ;;  %v1164_v46 = vunpack.c.0.s8 %v868_v17  ;;  %v828_v27 = vld [vmem:[#allocation11 + $0xa8] sm:$0xff] }
 0x1bd   :  { %v1172_v49 = vunpack.c.1.s8 %v868_v17  ;;  %v1971_v50 = vpack.c.bf16 %v1475_v11, %v1467_v44  ;;  %v1883_v53 = vcvt.s32.f32 %v1371_v62  ;;  %v1891_v54 = vcvt.s32.f32 %v1379_v29 }
 0x1be   :  { %v939_v60 = vunpack.c.0.s8 %v811_v18  ;;  %v2131_v13 = vpack.c.bf16 %v1795_v7, %v1787_v59  ;;  %2461 = vmatmul.bf16.vlgmr.msra.gmra.mxu3 %v6139_v36  ;;  %v1676_v23 = vcvt.s32.f32 %v1164_v46  ;;  %v947_v1 = vunpack.c.1.s8 %v811_v18  ;;  %v852_v7 = vld [vmem:[#allocation11 + $0x168] sm:$0xff] }
 0x1bf   :  { %2509 = vmatpush.bf16.msrb.mxu3 %v2084_v58  ;;  %v1684_v61 = vcvt.s32.f32 %v1172_v49  ;;  %2445 = vmatpush.bf16.msra.mxu2 %v1971_v50  ;;  %v2179_v4 = vpack.c.bf16 %v1891_v54, %v1883_v53  ;;  %v1259_v15 = vunpack.c.0.s8 %v891_v39  ;;  %v1267_v26 = vunpack.c.1.s8 %v891_v39 }
 0x1c0   :  { %v1451_v38 = vcvt.s32.f32 %v939_v60  ;;  %2469 = vmatpush.bf16.msrb.mxu0 %v2131_v13  ;;  %v1459_v21 = vcvt.s32.f32 %v947_v1  ;;  %v1052_v19 = vunpack.c.2.s8 %v836_v8  ;;  %v1060_v22 = vunpack.c.3.s8 %v836_v8 }
 0x1c1   :  { %v2076_v16 = vpack.c.bf16 %v1684_v61, %v1676_v23  ;;  %2485 = vmatpush.bf16.msrb.mxu1 %v2179_v4  ;;  %v1771_v24 = vcvt.s32.f32 %v1259_v15  ;;  %v1779_v25 = vcvt.s32.f32 %v1267_v26  ;;  %v1355_v35 = vunpack.c.0.s8 %v915_v10  ;;  %v932_v23 = vld [vmem:[#allocation11 + $0x3e8] sm:$0xff]  ;;  %v875_v15 = vld [vmem:[#allocation11 + $0x220] sm:$0xff] }
 0x1c2   :  { %v1363_v45 = vunpack.c.1.s8 %v915_v10  ;;  %v1963_v55 = vpack.c.bf16 %v1459_v21, %v1451_v38  ;;  %v1564_v17 = vcvt.s32.f32 %v1052_v19  ;;  %v1572_v30 = vcvt.s32.f32 %v1060_v22 }
 0x1c3   :  { %2510 = vmatpush.bf16.msrb.mxu3 %v2076_v16  ;;  %v1148_v2 = vunpack.c.2.s8 %v860_v31  ;;  %v2123_v0 = vpack.c.bf16 %v1779_v25, %v1771_v24  ;;  %v1867_v3 = vcvt.s32.f32 %v1355_v35  ;;  %v1156_v32 = vunpack.c.3.s8 %v860_v31 }
 0x1c4   :  { %v1875_v18 = vcvt.s32.f32 %v1363_v45  ;;  %2446 = vmatpush.bf16.msra.mxu2 %v1963_v55  ;;  %v2020_v37 = vpack.c.bf16 %v1572_v30, %v1564_v17  ;;  %v1243_v42 = vunpack.c.2.s8 %v883_v47  ;;  %v1251_v33 = vunpack.c.3.s8 %v883_v47 }
 0x1c5   :  { %v1660_v28 = vcvt.s32.f32 %v1148_v2  ;;  %2470 = vmatpush.bf16.msrb.mxu0 %v2123_v0  ;;  %v1668_v40 = vcvt.s32.f32 %v1156_v32  ;;  %v1036_v39 = vunpack.c.0.s8 %v836_v8  ;;  %v1044_v48 = vunpack.c.1.s8 %v836_v8 }
 0x1c6   :  { %v2171_v34 = vpack.c.bf16 %v1875_v18, %v1867_v3  ;;  %v1755_v52 = vcvt.s32.f32 %v1243_v42  ;;  %v1763_v51 = vcvt.s32.f32 %v1251_v33  ;;  %v1339_v12 = vunpack.c.2.s8 %v907_v6 }
 0x1c7   :  { %v1347_v10 = vunpack.c.3.s8 %v907_v6  ;;  %2447 = vmatmul.bf16.vlgmr.msra.gmra.mxu2 %v6166_v9  ;;  %v2068_v56 = vpack.c.bf16 %v1668_v40, %v1660_v28  ;;  %v1548_v63 = vcvt.s32.f32 %v1036_v39  ;;  %v1556_v20 = vcvt.s32.f32 %v1044_v48 }
 0x1c8   :  { %2495 = vmatpush.bf16.msrb.mxu2 %v2020_v37  ;;  %2486 = vmatpush.bf16.msrb.mxu1 %v2171_v34  ;;  %v1132_v14 = vunpack.c.0.s8 %v860_v31  ;;  %v2115_v44 = vpack.c.bf16 %v1763_v51, %v1755_v52  ;;  %v1851_v57 = vcvt.s32.f32 %v1339_v12  ;;  %v1140_v58 = vunpack.c.1.s8 %v860_v31  ;;  %v820_v34 = vld [vmem:[#allocation11 + $0x68] sm:$0xff] }
 0x1c9   :  { %v1859_v5 = vcvt.s32.f32 %v1347_v10  ;;  %2511 = vmatpush.bf16.msrb.mxu3 %v2068_v56  ;;  %v2012_v11 = vpack.c.bf16 %v1556_v20, %v1548_v63  ;;  %v1227_v29 = vunpack.c.0.s8 %v883_v47  ;;  %v1235_v59 = vunpack.c.1.s8 %v883_v47  ;;  %v900_v51 = vld [vmem:[#allocation11 + $0x2e8] sm:$0xff] }
 0x1ca   :  { %v1644_v62 = vcvt.s32.f32 %v1132_v14  ;;  %2471 = vmatpush.bf16.msrb.mxu0 %v2115_v44  ;;  %v1652_v49 = vcvt.s32.f32 %v1140_v58  ;;  %v1020_v50 = vunpack.c.2.s8 %v828_v27  ;;  %v1028_v53 = vunpack.c.3.s8 %v828_v27 }
 0x1cb   :  { %v2163_v46 = vpack.c.bf16 %v1859_v5, %v1851_v57  ;;  %v1739_v54 = vcvt.s32.f32 %v1227_v29  ;;  %v1747_v60 = vcvt.s32.f32 %v1235_v59  ;;  %v1323_v8 = vunpack.c.0.s8 %v907_v6  ;;  %v844_v57 = vld [vmem:[#allocation11 + $0x128] sm:$0xff] }
 0x1cc   :  { %2496 = vmatpush.bf16.msrb.mxu2 %v2012_v11  ;;  %v1331_v13 = vunpack.c.1.s8 %v907_v6  ;;  %v2060_v61 = vpack.c.bf16 %v1652_v49, %v1644_v62  ;;  %v1532_v1 = vcvt.s32.f32 %v1020_v50  ;;  %v1540_v4 = vcvt.s32.f32 %v1028_v53  ;;  %v924_v29 = vld [vmem:[#allocation11 + $0x3a8] sm:$0xff] }
 0x1cd   :  { %2487 = vmatpush.bf16.msrb.mxu1 %v2163_v46  ;;  %v1116_v38 = vunpack.c.2.s8 %v852_v7  ;;  %v2107_v26 = vpack.c.bf16 %v1747_v60, %v1739_v54  ;;  %v1835_v31 = vcvt.s32.f32 %v1323_v8  ;;  %v1124_v21 = vunpack.c.3.s8 %v852_v7 }
 0x1ce   :  { %v1843_v16 = vcvt.s32.f32 %v1331_v13  ;;  %2512 = vmatpush.bf16.msrb.mxu3 %v2060_v61  ;;  %v2004_v19 = vpack.c.bf16 %v1540_v4, %v1532_v1  ;;  %v1436_v24 = vunpack.c.2.s8 %v932_v23  ;;  %v1444_v25 = vunpack.c.3.s8 %v932_v23 }
 0x1cf   :  { %v1628_v22 = vcvt.s32.f32 %v1116_v38  ;;  %2472 = vmatpush.bf16.msrb.mxu0 %v2107_v26  ;;  %v1636_v45 = vcvt.s32.f32 %v1124_v21  ;;  %v1211_v47 = vunpack.c.2.s8 %v875_v15  ;;  %v1219_v55 = vunpack.c.3.s8 %v875_v15 }
 0x1d0   :  { %v2155_v35 = vpack.c.bf16 %v1843_v16, %v1835_v31  ;;  %2497 = vmatpush.bf16.msrb.mxu2 %v2004_v19  ;;  %v1948_v17 = vcvt.s32.f32 %v1436_v24  ;;  %v1956_v30 = vcvt.s32.f32 %v1444_v25  ;;  %v1004_v2 = vunpack.c.0.s8 %v828_v27 }
 0x1d1   :  { %v1012_v0 = vunpack.c.1.s8 %v828_v27  ;;  %v2052_v3 = vpack.c.bf16 %v1636_v45, %v1628_v22  ;;  %v1723_v18 = vcvt.s32.f32 %v1211_v47  ;;  %v1731_v32 = vcvt.s32.f32 %v1219_v55 }
 0x1d2   :  { %2488 = vmatpush.bf16.msrb.mxu1 %v2155_v35  ;;  %v1100_v6 = vunpack.c.0.s8 %v852_v7  ;;  %v2212_v37 = vpack.c.bf16 %v1956_v30, %v1948_v17  ;;  %v1516_v28 = vcvt.s32.f32 %v1004_v2  ;;  %v1108_v33 = vunpack.c.1.s8 %v852_v7  ;;  %v869_v35 = vld [vmem:[#allocation11 + $0x1f0] sm:$0xff]  ;;  %v812_v30 = vld [vmem:[#allocation11 + $0x28] sm:$0xff] }
 0x1d3   :  { %v1524_v42 = vcvt.s32.f32 %v1012_v0  ;;  %2513 = vmatpush.bf16.msrb.mxu3 %v2052_v3  ;;  %v2099_v40 = vpack.c.bf16 %v1731_v32, %v1723_v18  ;;  %v1420_v48 = vunpack.c.0.s8 %v932_v23  ;;  %v1428_v52 = vunpack.c.1.s8 %v932_v23 }
 0x1d4   :  { %v1612_v39 = vcvt.s32.f32 %v1100_v6  ;;  %v1620_v10 = vcvt.s32.f32 %v1108_v33  ;;  %v1195_v56 = vunpack.c.0.s8 %v875_v15  ;;  %v1203_v63 = vunpack.c.1.s8 %v875_v15 }
 0x1d5   :  { %v1996_v12 = vpack.c.bf16 %v1524_v42, %v1516_v28  ;;  %2473 = vmatpush.bf16.msrb.mxu0 %v2099_v40  ;;  %2489 = vmatmul.bf16.vlgmr.msrb.gmra.mxu1 %v6226_v43  ;;  %v1932_v20 = vcvt.s32.f32 %v1420_v48  ;;  %v1940_v14 = vcvt.s32.f32 %v1428_v52  ;;  %v988_v27 = vunpack.c.2.s8 %v820_v34  ;;  %v892_v42 = vld [vmem:[#allocation11 + $0x2a8] sm:$0xff] }
 0x1d6   :  { %2537 = vmatpush.bf16.msra.mxu1 %v2212_v37  ;;  %v996_v44 = vunpack.c.3.s8 %v820_v34  ;;  %v2044_v5 = vpack.c.bf16 %v1620_v10, %v1612_v39  ;;  %v1707_v58 = vcvt.s32.f32 %v1195_v56  ;;  %v1715_v11 = vcvt.s32.f32 %v1203_v63  ;;  %v916_v48 = vld [vmem:[#allocation11 + $0x368] sm:$0xff] }
 0x1d7   :  { %2498 = vmatpush.bf16.msrb.mxu2 %v1996_v12  ;;  %v1308_v62 = vunpack.c.2.s8 %v900_v51  ;;  %v2204_v59 = vpack.c.bf16 %v1940_v14, %v1932_v20  ;;  %v1500_v7 = vcvt.s32.f32 %v988_v27  ;;  %v1316_v49 = vunpack.c.3.s8 %v900_v51 }
 0x1d8   :  { %v1508_v46 = vcvt.s32.f32 %v996_v44  ;;  %2514 = vmatpush.bf16.msrb.mxu3 %v2044_v5  ;;  %v2091_v50 = vpack.c.bf16 %v1715_v11, %v1707_v58  ;;  %v1084_v54 = vunpack.c.2.s8 %v844_v57  ;;  %v1092_v60 = vunpack.c.3.s8 %v844_v57 }
 0x1d9   :  { %v1820_v53 = vcvt.s32.f32 %v1308_v62  ;;  %v1828_v13 = vcvt.s32.f32 %v1316_v49  ;;  %v1404_v23 = vunpack.c.2.s8 %v924_v29  ;;  %v1412_v61 = vunpack.c.3.s8 %v924_v29 }
 0x1da   :  { %2538 = vmatpush.bf16.msra.mxu1 %v2204_v59  ;;  %v1988_v8 = vpack.c.bf16 %v1508_v46, %v1500_v7  ;;  %2474 = vmatpush.bf16.msrb.mxu0 %v2091_v50  ;;  %v1596_v1 = vcvt.s32.f32 %v1084_v54  ;;  %v1604_v4 = vcvt.s32.f32 %v1092_v60  ;;  %v972_v38 = vunpack.c.0.s8 %v820_v34  ;;  %v837_v50 = vld [vmem:[#allocation11 + $0xf0] sm:$0xff] }
 0x1db   :  { %v980_v15 = vunpack.c.1.s8 %v820_v34  ;;  %v2148_v26 = vpack.c.bf16 %v1828_v13, %v1820_v53  ;;  %v1916_v31 = vcvt.s32.f32 %v1404_v23  ;;  %v1924_v16 = vcvt.s32.f32 %v1412_v61 }
 0x1dc   :  { %2499 = vmatpush.bf16.msrb.mxu2 %v1988_v8  ;;  %v1292_v21 = vunpack.c.0.s8 %v900_v51  ;;  %v2036_v19 = vpack.c.bf16 %v1604_v4, %v1596_v1  ;;  %v1484_v22 = vcvt.s32.f32 %v972_v38  ;;  %v1300_v25 = vunpack.c.1.s8 %v900_v51  ;;  %v861_v4 = vld [vmem:[#allocation11 + $0x1b0] sm:$0xff] }
 0x1dd   :  { %v1492_v24 = vcvt.s32.f32 %v980_v15  ;;  %v2196_v45 = vpack.c.bf16 %v1924_v16, %v1916_v31  ;;  %v1068_v55 = vunpack.c.0.s8 %v844_v57  ;;  %v1076_v17 = vunpack.c.1.s8 %v844_v57  ;;  %2475 = vmatmul.bf16.vlgmr.msrb.gmra.mxu0 %v6248_v41 }
 0x1de   :  { %2523 = vmatpush.bf16.msra.mxu0 %v2148_v26  ;;  %v1804_v47 = vcvt.s32.f32 %v1292_v21  ;;  %2515 = vmatpush.bf16.msrb.mxu3 %v2036_v19  ;;  %v1812_v0 = vcvt.s32.f32 %v1300_v25  ;;  %v1388_v3 = vunpack.c.0.s8 %v924_v29  ;;  %v1396_v18 = vunpack.c.1.s8 %v924_v29 }
 0x1df   :  { %v1980_v2 = vpack.c.bf16 %v1492_v24, %v1484_v22  ;;  %2539 = vmatpush.bf16.msra.mxu1 %v2196_v45  ;;  %v1580_v32 = vcvt.s32.f32 %v1068_v55  ;;  %v1588_v6 = vcvt.s32.f32 %v1076_v17  ;;  %v1181_v37 = vunpack.c.2.s8 %v869_v35  ;;  %v884_v24 = vld [vmem:[#allocation11 + $0x268] sm:$0xff] }
 0x1e0   :  { %v1189_v28 = vunpack.c.3.s8 %v869_v35  ;;  %v2140_v33 = vpack.c.bf16 %v1812_v0, %v1804_v47  ;;  %v1900_v34 = vcvt.s32.f32 %v1388_v3  ;;  %v1908_v40 = vcvt.s32.f32 %v1396_v18  ;;  %v908_v0 = vld [vmem:[#allocation11 + $0x328] sm:$0xff] }
 0x1e1   :  { %2500 = vmatpush.bf16.msrb.mxu2 %v1980_v2  ;;  %v956_v39 = vunpack.c.2.s8 %v812_v30  ;;  %v2028_v52 = vpack.c.bf16 %v1588_v6, %v1580_v32  ;;  %v1693_v51 = vcvt.s32.f32 %v1181_v37  ;;  %v964_v10 = vunpack.c.3.s8 %v812_v30 }
 0x1e2   :  { %v1701_v12 = vcvt.s32.f32 %v1189_v28  ;;  %2524 = vmatpush.bf16.msra.mxu0 %v2140_v33  ;;  %v2188_v56 = vpack.c.bf16 %v1908_v40, %v1900_v34  ;;  %v1276_v20 = vunpack.c.2.s8 %v892_v42  ;;  %v1284_v14 = vunpack.c.3.s8 %v892_v42 }
 0x1e3   :  { %v1468_v63 = vcvt.s32.f32 %v956_v39  ;;  %2516 = vmatpush.bf16.msrb.mxu3 %v2028_v52  ;;  %v1476_v44 = vcvt.s32.f32 %v964_v10  ;;  %v1372_v57 = vunpack.c.2.s8 %v916_v48  ;;  %v1380_v5 = vunpack.c.3.s8 %v916_v48 }
 0x1e4   :  { %v2085_v27 = vpack.c.bf16 %v1701_v12, %v1693_v51  ;;  %2540 = vmatpush.bf16.msra.mxu1 %v2188_v56  ;;  %v1788_v58 = vcvt.s32.f32 %v1276_v20  ;;  %v1796_v11 = vcvt.s32.f32 %v1284_v14  ;;  %v1165_v62 = vunpack.c.0.s8 %v869_v35  ;;  %v829_v56 = vld [vmem:[#allocation11 + $0xb0] sm:$0xff] }
 0x1e5   :  { %v1173_v29 = vunpack.c.1.s8 %v869_v35  ;;  %v1972_v59 = vpack.c.bf16 %v1476_v44, %v1468_v63  ;;  %v1884_v7 = vcvt.s32.f32 %v1372_v57  ;;  %v1892_v46 = vcvt.s32.f32 %v1380_v5 }
 0x1e6   :  { %v940_v49 = vunpack.c.0.s8 %v812_v30  ;;  %v2132_v53 = vpack.c.bf16 %v1796_v11, %v1788_v58  ;;  %2517 = vmatmul.bf16.vlgmr.msrb.gmra.mxu3 %v6139_v36  ;;  %v1677_v54 = vcvt.s32.f32 %v1165_v62  ;;  %v948_v8 = vunpack.c.1.s8 %v812_v30  ;;  %v853_v11 = vld [vmem:[#allocation11 + $0x170] sm:$0xff] }
 0x1e7   :  { %2565 = vmatpush.bf16.msra.mxu3 %v2085_v27  ;;  %v1685_v60 = vcvt.s32.f32 %v1173_v29  ;;  %2501 = vmatpush.bf16.msrb.mxu2 %v1972_v59  ;;  %v2180_v13 = vpack.c.bf16 %v1892_v46, %v1884_v7  ;;  %v1260_v61 = vunpack.c.0.s8 %v892_v42  ;;  %v1268_v1 = vunpack.c.1.s8 %v892_v42 }
 0x1e8   :  { %v1452_v23 = vcvt.s32.f32 %v940_v49  ;;  %2525 = vmatpush.bf16.msra.mxu0 %v2132_v53  ;;  %v1460_v15 = vcvt.s32.f32 %v948_v8  ;;  %v1053_v26 = vunpack.c.2.s8 %v837_v50  ;;  %v1061_v31 = vunpack.c.3.s8 %v837_v50 }
 0x1e9   :  { %v2077_v38 = vpack.c.bf16 %v1685_v60, %v1677_v54  ;;  %2541 = vmatpush.bf16.msra.mxu1 %v2180_v13  ;;  %v1772_v16 = vcvt.s32.f32 %v1260_v61  ;;  %v1780_v21 = vcvt.s32.f32 %v1268_v1  ;;  %v1356_v19 = vunpack.c.0.s8 %v916_v48  ;;  %v933_v54 = vld [vmem:[#allocation11 + $0x3f0] sm:$0xff]  ;;  %v876_v61 = vld [vmem:[#allocation11 + $0x228] sm:$0xff] }
 0x1ea   :  { %v1364_v22 = vunpack.c.1.s8 %v916_v48  ;;  %v1964_v25 = vpack.c.bf16 %v1460_v15, %v1452_v23  ;;  %v1565_v35 = vcvt.s32.f32 %v1053_v26  ;;  %v1573_v45 = vcvt.s32.f32 %v1061_v31 }
 0x1eb   :  { %2566 = vmatpush.bf16.msra.mxu3 %v2077_v38  ;;  %v1149_v47 = vunpack.c.2.s8 %v861_v4  ;;  %v2124_v55 = vpack.c.bf16 %v1780_v21, %v1772_v16  ;;  %v1868_v17 = vcvt.s32.f32 %v1356_v19  ;;  %v1157_v2 = vunpack.c.3.s8 %v861_v4 }
 0x1ec   :  { %v1876_v30 = vcvt.s32.f32 %v1364_v22  ;;  %2502 = vmatpush.bf16.msrb.mxu2 %v1964_v25  ;;  %v2021_v3 = vpack.c.bf16 %v1573_v45, %v1565_v35  ;;  %v1244_v32 = vunpack.c.2.s8 %v884_v24  ;;  %v1252_v6 = vunpack.c.3.s8 %v884_v24 }
 0x1ed   :  { %v1661_v18 = vcvt.s32.f32 %v1149_v47  ;;  %2526 = vmatpush.bf16.msra.mxu0 %v2124_v55  ;;  %v1669_v28 = vcvt.s32.f32 %v1157_v2  ;;  %v1037_v42 = vunpack.c.0.s8 %v837_v50  ;;  %v1045_v33 = vunpack.c.1.s8 %v837_v50 }
 0x1ee   :  { %v2172_v37 = vpack.c.bf16 %v1876_v30, %v1868_v17  ;;  %v1756_v34 = vcvt.s32.f32 %v1244_v32  ;;  %v1764_v40 = vcvt.s32.f32 %v1252_v6  ;;  %v1340_v39 = vunpack.c.2.s8 %v908_v0 }
 0x1ef   :  { %v1348_v48 = vunpack.c.3.s8 %v908_v0  ;;  %2503 = vmatmul.bf16.vlgmr.msrb.gmra.mxu2 %v6166_v9  ;;  %v2069_v52 = vpack.c.bf16 %v1669_v28, %v1661_v18  ;;  %v1549_v51 = vcvt.s32.f32 %v1037_v42  ;;  %v1557_v12 = vcvt.s32.f32 %v1045_v33  ;;  %v821_v28 = vld [vmem:[#allocation11 + $0x70] sm:$0xff]  ;;  %v2238_v42 = vpop.f32.mrf.mxu3 }
 0x1f0   :  { %2551 = vmatpush.bf16.msra.mxu2 %v2021_v3  ;;  %2542 = vmatpush.bf16.msra.mxu1 %v2172_v37  ;;  %v1133_v10 = vunpack.c.0.s8 %v861_v4  ;;  %v2116_v63 = vpack.c.bf16 %v1764_v40, %v1756_v34  ;;  %v1852_v20 = vcvt.s32.f32 %v1340_v39  ;;  %v1141_v27 = vunpack.c.1.s8 %v861_v4  ;;  %v2224_v3 = vpop.f32.mrf.mxu2 }
 0x1f1   :  { %v1860_v14 = vcvt.s32.f32 %v1348_v48  ;;  %2567 = vmatpush.bf16.msra.mxu3 %v2069_v52  ;;  %v2013_v44 = vpack.c.bf16 %v1557_v12, %v1549_v51  ;;  %v1228_v5 = vunpack.c.0.s8 %v884_v24  ;;  %v1236_v58 = vunpack.c.1.s8 %v884_v24  ;;  %v901_v48 = vld [vmem:[#allocation11 + $0x2f0] sm:$0xff] }
 0x1f2   :  { %v1645_v57 = vcvt.s32.f32 %v1133_v10  ;;  %2527 = vmatpush.bf16.msra.mxu0 %v2116_v63  ;;  %v1653_v29 = vcvt.s32.f32 %v1141_v27  ;;  %v1021_v59 = vunpack.c.2.s8 %v829_v56  ;;  %v1029_v7 = vunpack.c.3.s8 %v829_v56  ;;  %v845_v27 = vld [vmem:[#allocation11 + $0x130] sm:$0xff] }
 0x1f3   :  { %v2164_v62 = vpack.c.bf16 %v1860_v14, %v1852_v20  ;;  %v1740_v46 = vcvt.s32.f32 %v1228_v5  ;;  %v1748_v49 = vcvt.s32.f32 %v1236_v58  ;;  %v1324_v50 = vunpack.c.0.s8 %v908_v0 }
 0x1f4   :  { %2552 = vmatpush.bf16.msra.mxu2 %v2013_v44  ;;  %v1332_v53 = vunpack.c.1.s8 %v908_v0  ;;  %v2061_v60 = vpack.c.bf16 %v1653_v29, %v1645_v57  ;;  %v1533_v8 = vcvt.s32.f32 %v1021_v59  ;;  %v1541_v13 = vcvt.s32.f32 %v1029_v7 }
 0x1f5   :  { %2543 = vmatpush.bf16.msra.mxu1 %v2164_v62  ;;  %v1117_v23 = vunpack.c.2.s8 %v853_v11  ;;  %v2108_v1 = vpack.c.bf16 %v1748_v49, %v1740_v46  ;;  %v1836_v4 = vcvt.s32.f32 %v1324_v50  ;;  %v1125_v15 = vunpack.c.3.s8 %v853_v11 }
 0x1f6   :  { %v1844_v38 = vcvt.s32.f32 %v1332_v53  ;;  %2568 = vmatpush.bf16.msra.mxu3 %v2061_v60  ;;  %v2005_v26 = vpack.c.bf16 %v1541_v13, %v1533_v8  ;;  %v1437_v16 = vunpack.c.2.s8 %v933_v54  ;;  %v1445_v21 = vunpack.c.3.s8 %v933_v54 }
 0x1f7   :  { %v1629_v31 = vcvt.s32.f32 %v1117_v23  ;;  %2528 = vmatpush.bf16.msra.mxu0 %v2108_v1  ;;  %v1637_v22 = vcvt.s32.f32 %v1125_v15  ;;  %v1212_v24 = vunpack.c.2.s8 %v876_v61  ;;  %v1220_v25 = vunpack.c.3.s8 %v876_v61 }
 0x1f8   :  { %v2156_v19 = vpack.c.bf16 %v1844_v38, %v1836_v4  ;;  %2553 = vmatpush.bf16.msra.mxu2 %v2005_v26  ;;  %v1949_v35 = vcvt.s32.f32 %v1437_v16  ;;  %v1957_v45 = vcvt.s32.f32 %v1445_v21  ;;  %v1005_v47 = vunpack.c.0.s8 %v829_v56 }
 0x1f9   :  { %v1013_v55 = vunpack.c.1.s8 %v829_v56  ;;  %v2053_v17 = vpack.c.bf16 %v1637_v22, %v1629_v31  ;;  %v1724_v30 = vcvt.s32.f32 %v1212_v24  ;;  %v1732_v2 = vcvt.s32.f32 %v1220_v25  ;;  %v2226_v24 = vpop.f32.mrf.mxu2 }
 0x1fa   :  { %2544 = vmatpush.bf16.msra.mxu1 %v2156_v19  ;;  %v1101_v0 = vunpack.c.0.s8 %v853_v11  ;;  %v2213_v18 = vpack.c.bf16 %v1957_v45, %v1949_v35  ;;  %v1517_v32 = vcvt.s32.f32 %v1005_v47  ;;  %v1109_v37 = vunpack.c.1.s8 %v853_v11  ;;  %v925_v11 = vld [vmem:[#allocation11 + $0x3b0] sm:$0xff] }
 0x1fb   :  { %v1525_v6 = vcvt.s32.f32 %v1013_v55  ;;  %2569 = vmatpush.bf16.msra.mxu3 %v2053_v17  ;;  %v2100_v33 = vpack.c.bf16 %v1732_v2, %v1724_v30  ;;  %v1421_v40 = vunpack.c.0.s8 %v933_v54  ;;  %v1429_v39 = vunpack.c.1.s8 %v933_v54  ;;  %v6275_v55 = vld [vmem:[#allocation11 + $0x1f8] sm:$0xff]  ;;  %v2240_v17 = vpop.f32.mrf.mxu3 }
 0x1fc   :  { %v1613_v34 = vcvt.s32.f32 %v1101_v0  ;;  %v1621_v51 = vcvt.s32.f32 %v1109_v37  ;;  %v6272_v12 = vadd.f32 %v2238_v42, %v2224_v3  ;;  %v1196_v10 = vunpack.c.0.s8 %v876_v61  ;;  %v6280_v42 = vld [vmem:[#allocation11 + $0x2b0] sm:$0xff] }
 0x1fd   :  { %v1997_v52 = vpack.c.bf16 %v1525_v6, %v1517_v32  ;;  %2529 = vmatpush.bf16.msra.mxu0 %v2100_v33  ;;  %2545 = vmatmul.bf16.vlgmr.msra.gmra.mxu1 %v6226_v43  ;;  %v1933_v56 = vcvt.s32.f32 %v1421_v40  ;;  %v1941_v63 = vcvt.s32.f32 %v1429_v39  ;;  %v1204_v20 = vunpack.c.1.s8 %v876_v61 }
 0x1fe   :  { %2593 = vmatpush.bf16.msrb.mxu1 %v2213_v18  ;;  %v989_v14 = vunpack.c.2.s8 %v821_v28  ;;  %v2045_v44 = vpack.c.bf16 %v1621_v51, %v1613_v34  ;;  %v1708_v57 = vcvt.s32.f32 %v1196_v10  ;;  %v997_v5 = vunpack.c.3.s8 %v821_v28  ;;  %v813_v18 = vld [vmem:[#allocation11 + $0x30] sm:$0xff] }
 0x1ff   :  { %2554 = vmatpush.bf16.msra.mxu2 %v1997_v52  ;;  %v1309_v58 = vunpack.c.2.s8 %v901_v48  ;;  %v2205_v62 = vpack.c.bf16 %v1941_v63, %v1933_v56  ;;  %v1716_v29 = vcvt.s32.f32 %v1204_v20  ;;  %v1317_v7 = vunpack.c.3.s8 %v901_v48  ;;  %v6284_v63 = vld [vmem:[#allocation13] sm:$0xff]  ;;  %v6286_v20 = vld [vmem:[#allocation14] sm:$0xff] }
 0x200   :  { %v1501_v59 = vcvt.s32.f32 %v989_v14  ;;  %2570 = vmatpush.bf16.msra.mxu3 %v2045_v44  ;;  %v1509_v46 = vcvt.s32.f32 %v997_v5  ;;  %v1085_v50 = vunpack.c.2.s8 %v845_v27  ;;  %v1093_v53 = vunpack.c.3.s8 %v845_v27  ;;  %v917_v5 = vld [vmem:[#allocation11 + $0x370] sm:$0xff] }
 0x201   :  { %v1821_v49 = vcvt.s32.f32 %v1309_v58  ;;  %v2092_v54 = vpack.c.bf16 %v1716_v29, %v1708_v57  ;;  %v1829_v60 = vcvt.s32.f32 %v1317_v7  ;;  %v1405_v8 = vunpack.c.2.s8 %v925_v11 }
 0x202   :  { %2594 = vmatpush.bf16.msrb.mxu1 %v2205_v62  ;;  %v1413_v13 = vunpack.c.3.s8 %v925_v11  ;;  %v1989_v23 = vpack.c.bf16 %v1509_v46, %v1501_v59  ;;  %v1597_v61 = vcvt.s32.f32 %v1085_v50  ;;  %v1605_v1 = vcvt.s32.f32 %v1093_v53  ;;  %v2266_v59 = vpop.f32.mrf.mxu1 }
 0x203   :  { %v973_v4 = vunpack.c.0.s8 %v821_v28  ;;  %2530 = vmatpush.bf16.msra.mxu0 %v2092_v54  ;;  %v2149_v38 = vpack.c.bf16 %v1829_v60, %v1821_v49  ;;  %v1917_v15 = vcvt.s32.f32 %v1405_v8  ;;  %v981_v31 = vunpack.c.1.s8 %v821_v28 }
 0x204   :  { %v1925_v26 = vcvt.s32.f32 %v1413_v13  ;;  %2555 = vmatpush.bf16.msra.mxu2 %v1989_v23  ;;  %v2037_v16 = vpack.c.bf16 %v1605_v1, %v1597_v61  ;;  %v1293_v19 = vunpack.c.0.s8 %v901_v48  ;;  %v1301_v22 = vunpack.c.1.s8 %v901_v48  ;;  %v2252_v48 = vpop.f32.mrf.mxu0 }
 0x205   :  { %v1485_v21 = vcvt.s32.f32 %v973_v4  ;;  %v1493_v35 = vcvt.s32.f32 %v981_v31  ;;  %v1069_v45 = vunpack.c.0.s8 %v845_v27  ;;  %v1077_v47 = vunpack.c.1.s8 %v845_v27 }
 0x206   :  { %v2197_v25 = vpack.c.bf16 %v1925_v26, %v1917_v15  ;;  %2531 = vmatmul.bf16.vlgmr.msra.gmra.mxu0 %v6248_v41  ;;  %2571 = vmatpush.bf16.msra.mxu3 %v2037_v16  ;;  %v1805_v30 = vcvt.s32.f32 %v1293_v19  ;;  %v1813_v2 = vcvt.s32.f32 %v1301_v22  ;;  %v1389_v0 = vunpack.c.0.s8 %v925_v11  ;;  %v6298_v26 = vld [vmem:[#allocation11 + $0xf8] sm:$0xff] }
 0x207   :  { %2579 = vmatpush.bf16.msrb.mxu0 %v2149_v38  ;;  %v1397_v3 = vunpack.c.1.s8 %v925_v11  ;;  %v1981_v32 = vpack.c.bf16 %v1493_v35, %v1485_v21  ;;  %v1581_v6 = vcvt.s32.f32 %v1069_v45  ;;  %v1589_v37 = vcvt.s32.f32 %v1077_v47  ;;  %v2280_v45 = vpop.f32.mrf.mxu2 }
 0x208   :  { %2595 = vmatpush.bf16.msrb.mxu1 %v2197_v25  ;;  %v6278_v28 = vadd.f32 %v2240_v17, %v2226_v24  ;;  %v2141_v33 = vpack.c.bf16 %v1813_v2, %v1805_v30  ;;  %v1901_v34 = vcvt.s32.f32 %v1389_v0  ;;  %v1182_v39 = vunpack.c.2.s8 %v6275_v55  ;;  %v862_v2 = vld [vmem:[#allocation11 + $0x1b8] sm:$0xff] }
 0x209   :  { %v1909_v40 = vcvt.s32.f32 %v1397_v3  ;;  %2556 = vmatpush.bf16.msra.mxu2 %v1981_v32  ;;  %v2029_v52 = vpack.c.bf16 %v1589_v37, %v1581_v6  ;;  %v1190_v51 = vunpack.c.3.s8 %v6275_v55  ;;  %v957_v10 = vunpack.c.2.s8 %v813_v18  ;;  %v2294_v3 = vpop.f32.mrf.mxu3  ;;  %v885_v37 = vld [vmem:[#allocation11 + $0x270] sm:$0xff] }
 0x20a   :  { %v965_v56 = vunpack.c.3.s8 %v813_v18  ;;  %v1694_v27 = vcvt.s32.f32 %v1182_v39  ;;  %v1277_v44 = vunpack.c.2.s8 %v6280_v42  ;;  %v1285_v57 = vunpack.c.3.s8 %v6280_v42 }
 0x20b   :  { %2580 = vmatpush.bf16.msrb.mxu0 %v2141_v33  ;;  %v2189_v14 = vpack.c.bf16 %v1909_v40, %v1901_v34  ;;  %2572 = vmatpush.bf16.msra.mxu3 %v2029_v52  ;;  %v1702_v58 = vcvt.s32.f32 %v1190_v51  ;;  %v1469_v11 = vcvt.s32.f32 %v957_v10  ;;  %v2253_v29 = vadd.f32 %v2252_v48, %v6272_v12 }
 0x20c   :  { %v1477_v62 = vcvt.s32.f32 %v965_v56  ;;  %v1789_v7 = vcvt.s32.f32 %v1277_v44  ;;  %v1797_v46 = vcvt.s32.f32 %v1285_v57  ;;  %v2665_v49 = vperm.slane %v6284_v63, 0  ;;  %v2254_v39 = vpop.f32.mrf.mxu0  ;;  %v6313_v57 = vld [vmem:[#allocation11 + $0x330] sm:$0xff] }
 0x20d   :  { %2596 = vmatpush.bf16.msrb.mxu1 %v2189_v14  ;;  %v2699_v50 = vperm.slane %v6286_v20, 0  ;;  %v2086_v53 = vpack.c.bf16 %v1702_v58, %v1694_v27  ;;  %v2267_v60 = vadd.f32 %v2266_v59, %v2253_v29  ;;  %v1373_v8 = vunpack.c.2.s8 %v917_v5  ;;  %v2268_v29 = vpop.f32.mrf.mxu1 }
 0x20e   :  { %v1973_v54 = vpack.c.bf16 %v1477_v62, %v1469_v11  ;;  %v2133_v13 = vpack.c.bf16 %v1797_v46, %v1789_v7  ;;  %2573 = vmatmul.bf16.vlgmr.msra.gmra.mxu3 %v6139_v36  ;;  %v1381_v23 = vunpack.c.3.s8 %v917_v5  ;;  %v1166_v61 = vunpack.c.0.s8 %v6275_v55 }
 0x20f   :  { %v1174_v12 = vunpack.c.1.s8 %v6275_v55  ;;  %2621 = vmatpush.bf16.msrb.mxu3 %v2086_v53  ;;  %v2681_v1 = vmul.f32 %v2665_v49, %v2267_v60  ;;  %v1885_v4 = vcvt.s32.f32 %v1373_v8  ;;  %v941_v38 = vunpack.c.0.s8 %v813_v18 }
 0x210   :  { %2557 = vmatpush.bf16.msra.mxu2 %v1973_v54  ;;  %v949_v15 = vunpack.c.1.s8 %v813_v18  ;;  %2581 = vmatpush.bf16.msrb.mxu0 %v2133_v13  ;;  %v1893_v31 = vcvt.s32.f32 %v1381_v23  ;;  %v1678_v16 = vcvt.s32.f32 %v1166_v61  ;;  %v1261_v19 = vunpack.c.0.s8 %v6280_v42 }
 0x211   :  { %v1686_v21 = vcvt.s32.f32 %v1174_v12  ;;  %v6303_v22 = vadd.f32 %v2699_v50, %v2681_v1  ;;  %v1453_v24 = vcvt.s32.f32 %v941_v38  ;;  %v1269_v35 = vunpack.c.1.s8 %v6280_v42  ;;  %v6321_v1 = vld [vmem:[#allocation11 + $0xb8] sm:$0xff] }
 0x212   :  { %v1461_v25 = vcvt.s32.f32 %v949_v15  ;;  %v2181_v47 = vpack.c.bf16 %v1893_v31, %v1885_v4  ;;  %v1773_v17 = vcvt.s32.f32 %v1261_v19  ;;  %v1054_v30 = vunpack.c.2.s8 %v6298_v26 }
 0x213   :  { %v2078_v55 = vpack.c.bf16 %v1686_v21, %v1678_v16  ;;  %v6308_v0 = vmul.f32 0.01, %v6303_v22  ;;  %v1781_v32 = vcvt.s32.f32 %v1269_v35  ;;  %v1062_v6 = vunpack.c.3.s8 %v6298_v26 }
 0x214   :  { %v1965_v18 = vpack.c.bf16 %v1461_v25, %v1453_v24  ;;  %2597 = vmatpush.bf16.msrb.mxu1 %v2181_v47  ;;  %v1566_v33 = vcvt.s32.f32 %v1054_v30  ;;  %v1357_v42 = vunpack.c.0.s8 %v917_v5  ;;  %v1365_v34 = vunpack.c.1.s8 %v917_v5  ;;  %v2282_v47 = vpop.f32.mrf.mxu2 }
 0x215   :  { %2622 = vmatpush.bf16.msrb.mxu3 %v2078_v55  ;;  %v6311_v40 = vadd.f32 %v2294_v3, %v2280_v45  ;;  %v2125_v48 = vpack.c.bf16 %v1781_v32, %v1773_v17  ;;  %v1574_v52 = vcvt.s32.f32 %v1062_v6  ;;  %v1150_v51 = vunpack.c.2.s8 %v862_v2  ;;  %v6331_v3 = vld [vmem:[#allocation11 + $0x3f8] sm:$0xff]  ;;  %v2296_v32 = vpop.f32.mrf.mxu3 }
 0x216   :  { %2558 = vmatpush.bf16.msra.mxu2 %v1965_v18  ;;  %v1158_v10 = vunpack.c.3.s8 %v862_v2  ;;  %v1869_v56 = vcvt.s32.f32 %v1357_v42  ;;  %v1877_v14 = vcvt.s32.f32 %v1365_v34  ;;  %v1245_v27 = vunpack.c.2.s8 %v885_v37 }
 0x217   :  { %v1253_v44 = vunpack.c.3.s8 %v885_v37  ;;  %2582 = vmatpush.bf16.msrb.mxu0 %v2125_v48  ;;  %v2022_v58 = vpack.c.bf16 %v1574_v52, %v1566_v33  ;;  %v1662_v11 = vcvt.s32.f32 %v1150_v51  ;;  %v2255_v5 = vadd.f32 %v2254_v39, %v6278_v28  ;;  %v6337_v33 = vld [vmem:[#allocation11 + $0x230] sm:$0xff] }
 0x218   :  { %v1670_v62 = vcvt.s32.f32 %v1158_v10  ;;  %v2173_v59 = vpack.c.bf16 %v1877_v14, %v1869_v56  ;;  %v1757_v7 = vcvt.s32.f32 %v1245_v27  ;;  %v1038_v53 = vunpack.c.0.s8 %v6298_v26  ;;  %v2308_v14 = vpop.f32.mrf.mxu0 }
 0x219   :  { %2559 = vmatmul.bf16.vlgmr.msra.gmra.mxu2 %v6166_v9  ;;  %v1765_v46 = vcvt.s32.f32 %v1253_v44  ;;  %v2269_v60 = vadd.f32 %v2268_v29, %v2255_v5  ;;  %v1046_v8 = vunpack.c.1.s8 %v6298_v26  ;;  %v1341_v13 = vunpack.c.2.s8 %v6313_v57 }
 0x21a   :  { %2607 = vmatpush.bf16.msrb.mxu2 %v2022_v58  ;;  %v2070_v54 = vpack.c.bf16 %v1670_v62, %v1662_v11  ;;  %2598 = vmatpush.bf16.msrb.mxu1 %v2173_v59  ;;  %v1550_v61 = vcvt.s32.f32 %v1038_v53  ;;  %v1349_v28 = vunpack.c.3.s8 %v6313_v57  ;;  %v1134_v12 = vunpack.c.0.s8 %v862_v2 }
 0x21b   :  { %v2117_v23 = vpack.c.bf16 %v1765_v46, %v1757_v7  ;;  %v2689_v4 = vmul.f32 %v2665_v49, %v2269_v60  ;;  %v1558_v38 = vcvt.s32.f32 %v1046_v8  ;;  %v1853_v15 = vcvt.s32.f32 %v1341_v13 }
 0x21c   :  { %2623 = vmatpush.bf16.msrb.mxu3 %v2070_v54  ;;  %v1142_v31 = vunpack.c.1.s8 %v862_v2  ;;  %v1861_v16 = vcvt.s32.f32 %v1349_v28  ;;  %v1646_v26 = vcvt.s32.f32 %v1134_v12  ;;  %v1229_v21 = vunpack.c.0.s8 %v885_v37  ;;  %v854_v2 = vld [vmem:[#allocation11 + $0x178] sm:$0xff]  ;;  %v2322_v54 = vpop.f32.mrf.mxu1 }
 0x21d   :  { %2583 = vmatpush.bf16.msrb.mxu0 %v2117_v23  ;;  %v1237_v19 = vunpack.c.1.s8 %v885_v37  ;;  %v6327_v24 = vadd.f32 %v2699_v50, %v2689_v4  ;;  %v2014_v25 = vpack.c.bf16 %v1558_v38, %v1550_v61  ;;  %v1022_v45 = vunpack.c.2.s8 %v6321_v1 }
 0x21e   :  { %v1654_v35 = vcvt.s32.f32 %v1142_v31  ;;  %v2165_v55 = vpack.c.bf16 %v1861_v16, %v1853_v15  ;;  %v1741_v17 = vcvt.s32.f32 %v1229_v21  ;;  %v1030_v30 = vunpack.c.3.s8 %v6321_v1 }
 0x21f   :  { %v1749_v49 = vcvt.s32.f32 %v1237_v19  ;;  %v6334_v18 = vmul.f32 0.01, %v6327_v24  ;;  %2608 = vmatpush.bf16.msrb.mxu2 %v2014_v25  ;;  %v1534_v6 = vcvt.s32.f32 %v1022_v45  ;;  %v1325_v37 = vunpack.c.0.s8 %v6313_v57  ;;  %v822_v25 = vld [vmem:[#allocation11 + $0x78] sm:$0xff] }
 0x220   :  { %v2062_v50 = vpack.c.bf16 %v1654_v35, %v1646_v26  ;;  %2599 = vmatpush.bf16.msrb.mxu1 %v2165_v55  ;;  %v1542_v34 = vcvt.s32.f32 %v1030_v30  ;;  %v1333_v39 = vunpack.c.1.s8 %v6313_v57  ;;  %v6340_v48 = vadd.f32 %v2296_v32, %v2282_v47  ;;  %v6357_v55 = vld [vmem:[#allocation11 + $0x2f8] sm:$0xff] }
 0x221   :  { %v2109_v42 = vpack.c.bf16 %v1749_v49, %v1741_v17  ;;  %v1837_v52 = vcvt.s32.f32 %v1325_v37  ;;  %v1118_v51 = vunpack.c.2.s8 %v854_v2  ;;  %v1126_v10 = vunpack.c.3.s8 %v854_v2 }
 0x222   :  { %2624 = vmatpush.bf16.msrb.mxu3 %v2062_v50  ;;  %v1438_v56 = vunpack.c.2.s8 %v6331_v3  ;;  %v2006_v27 = vpack.c.bf16 %v1542_v34, %v1534_v6  ;;  %v1845_v44 = vcvt.s32.f32 %v1333_v39  ;;  %v1446_v58 = vunpack.c.3.s8 %v6331_v3  ;;  %v2350_v39 = vpop.f32.mrf.mxu3 }
 0x223   :  { %2584 = vmatpush.bf16.msrb.mxu0 %v2109_v42  ;;  %v1213_v11 = vunpack.c.2.s8 %v6337_v33  ;;  %v1630_v62 = vcvt.s32.f32 %v1118_v51  ;;  %v1638_v5 = vcvt.s32.f32 %v1126_v10  ;;  %v1221_v57 = vunpack.c.3.s8 %v6337_v33  ;;  %v846_v42 = vld [vmem:[#allocation11 + $0x138] sm:$0xff] }
 0x224   :  { %v1950_v29 = vcvt.s32.f32 %v1438_v56  ;;  %2609 = vmatpush.bf16.msrb.mxu2 %v2006_v27  ;;  %v2157_v59 = vpack.c.bf16 %v1845_v44, %v1837_v52  ;;  %v1958_v7 = vcvt.s32.f32 %v1446_v58  ;;  %v2309_v53 = vadd.f32 %v2308_v14, %v6311_v40  ;;  %v926_v56 = vld [vmem:[#allocation11 + $0x3b8] sm:$0xff]  ;;  %v2310_v58 = vpop.f32.mrf.mxu0 }
 0x225   :  { %v1725_v46 = vcvt.s32.f32 %v1213_v11  ;;  %v2054_v60 = vpack.c.bf16 %v1638_v5, %v1630_v62  ;;  %v1733_v8 = vcvt.s32.f32 %v1221_v57  ;;  %v2666_v13 = vperm.slane %v6284_v63, 1 }
 0x226   :  { %v2700_v23 = vperm.slane %v6286_v20, 1  ;;  %2600 = vmatpush.bf16.msrb.mxu1 %v2157_v59  ;;  %v2214_v61 = vpack.c.bf16 %v1958_v7, %v1950_v29  ;;  %v2323_v28 = vadd.f32 %v2322_v54, %v2309_v53  ;;  %v1006_v12 = vunpack.c.0.s8 %v6321_v1 }
 0x227   :  { %v1014_v4 = vunpack.c.1.s8 %v6321_v1  ;;  %2625 = vmatpush.bf16.msrb.mxu3 %v2054_v60  ;;  %v2101_v38 = vpack.c.bf16 %v1733_v8, %v1725_v46  ;;  %v1102_v15 = vunpack.c.0.s8 %v854_v2  ;;  %v1110_v31 = vunpack.c.1.s8 %v854_v2 }
 0x228   :  { %v1422_v40 = vunpack.c.0.s8 %v6331_v3  ;;  %v2682_v16 = vmul.f32 %v2666_v13, %v2323_v28  ;;  %v1518_v26 = vcvt.s32.f32 %v1006_v12  ;;  %v1430_v19 = vunpack.c.1.s8 %v6331_v3  ;;  %v2336_v3 = vpop.f32.mrf.mxu2 }
 0x229   :  { %v1526_v21 = vcvt.s32.f32 %v1014_v4  ;;  %2585 = vmatpush.bf16.msrb.mxu0 %v2101_v38  ;;  %2601 = vmatmul.bf16.vlgmr.msrb.gmra.mxu1 %v6226_v43  ;;  %v1614_v35 = vcvt.s32.f32 %v1102_v15  ;;  %v1622_v1 = vcvt.s32.f32 %v1110_v31  ;;  %v1197_v47 = vunpack.c.0.s8 %v6337_v33 }
 0x22a   :  { %2649 = vmatpush.bf16.msra.mxu1 %v2214_v61  ;;  %v1934_v45 = vcvt.s32.f32 %v1422_v40  ;;  %v6361_v17 = vadd.f32 %v2700_v23, %v2682_v16  ;;  %v1942_v30 = vcvt.s32.f32 %v1430_v19  ;;  %v1205_v2 = vunpack.c.1.s8 %v6337_v33  ;;  %v2324_v61 = vpop.f32.mrf.mxu1 }
 0x22b   :  { %v1998_v49 = vpack.c.bf16 %v1526_v21, %v1518_v26  ;;  %v2046_v32 = vpack.c.bf16 %v1622_v1, %v1614_v35  ;;  %v1709_v50 = vcvt.s32.f32 %v1197_v47  ;;  %v990_v6 = vunpack.c.2.s8 %v822_v25  ;;  %v2815_v1 = vld [vmem:[#allocation16 + $0xe0] sm:$0xff] }
 0x22c   :  { %v998_v37 = vunpack.c.3.s8 %v822_v25  ;;  %v6365_v34 = vmul.f32 0.01, %v6361_v17  ;;  %v2206_v52 = vpack.c.bf16 %v1942_v30, %v1934_v45  ;;  %v1717_v51 = vcvt.s32.f32 %v1205_v2 }
 0x22d   :  { %2610 = vmatpush.bf16.msrb.mxu2 %v1998_v49  ;;  %v1310_v10 = vunpack.c.2.s8 %v6357_v55  ;;  %2626 = vmatpush.bf16.msrb.mxu3 %v2046_v32  ;;  %v1502_v14 = vcvt.s32.f32 %v990_v6  ;;  %v1318_v33 = vunpack.c.3.s8 %v6357_v55  ;;  %v6369_v44 = vadd.f32 %v2350_v39, %v2336_v3  ;;  %v6377_v49 = vld [vmem:[#allocation11 + $0x38] sm:$0xff] }
 0x22e   :  { %v1510_v27 = vcvt.s32.f32 %v998_v37  ;;  %2650 = vmatpush.bf16.msra.mxu1 %v2206_v52  ;;  %v2093_v11 = vpack.c.bf16 %v1717_v51, %v1709_v50  ;;  %v1086_v5 = vunpack.c.2.s8 %v846_v42  ;;  %v1094_v29 = vunpack.c.3.s8 %v846_v42  ;;  %v894_v39 = vld [vmem:[#allocation11 + $0x2b8] sm:$0xff] }
 0x22f   :  { %v1822_v62 = vcvt.s32.f32 %v1310_v10  ;;  %v1830_v59 = vcvt.s32.f32 %v1318_v33  ;;  %v1406_v7 = vunpack.c.2.s8 %v926_v56  ;;  %v1414_v46 = vunpack.c.3.s8 %v926_v56 }
 0x230   :  { %v1990_v57 = vpack.c.bf16 %v1510_v27, %v1502_v14  ;;  %2586 = vmatpush.bf16.msrb.mxu0 %v2093_v11  ;;  %v1598_v53 = vcvt.s32.f32 %v1086_v5  ;;  %v1606_v54 = vcvt.s32.f32 %v1094_v29  ;;  %v2311_v60 = vadd.f32 %v2310_v58, %v6340_v48  ;;  %v2338_v10 = vpop.f32.mrf.mxu2  ;;  %v6384_v14 = vld [vmem:[#allocation11 + $0x378] sm:$0xff]  ;;  %v2352_v58 = vpop.f32.mrf.mxu3 }
 0x231   :  { %v974_v8 = vunpack.c.0.s8 %v822_v25  ;;  %v2150_v28 = vpack.c.bf16 %v1830_v59, %v1822_v62  ;;  %v1918_v12 = vcvt.s32.f32 %v1406_v7  ;;  %v1926_v4 = vcvt.s32.f32 %v1414_v46 }
 0x232   :  { %2611 = vmatpush.bf16.msrb.mxu2 %v1990_v57  ;;  %v982_v38 = vunpack.c.1.s8 %v822_v25  ;;  %v2038_v15 = vpack.c.bf16 %v1606_v54, %v1598_v53  ;;  %v2325_v31 = vadd.f32 %v2324_v61, %v2311_v60  ;;  %v1294_v16 = vunpack.c.0.s8 %v6357_v55  ;;  %v2364_v53 = vpop.f32.mrf.mxu0 }
 0x233   :  { %v1486_v40 = vcvt.s32.f32 %v974_v8  ;;  %v2198_v26 = vpack.c.bf16 %v1926_v4, %v1918_v12  ;;  %v1302_v19 = vunpack.c.1.s8 %v6357_v55  ;;  %v1070_v35 = vunpack.c.0.s8 %v846_v42  ;;  %2587 = vmatmul.bf16.vlgmr.msrb.gmra.mxu0 %v6248_v41 }
 0x234   :  { %2635 = vmatpush.bf16.msra.mxu0 %v2150_v28  ;;  %v1494_v21 = vcvt.s32.f32 %v982_v38  ;;  %2627 = vmatpush.bf16.msrb.mxu3 %v2038_v15  ;;  %v2690_v48 = vmul.f32 %v2666_v13, %v2325_v31  ;;  %v1806_v45 = vcvt.s32.f32 %v1294_v16  ;;  %v1078_v25 = vunpack.c.1.s8 %v846_v42 }
 0x235   :  { %v1390_v47 = vunpack.c.0.s8 %v926_v56  ;;  %2651 = vmatpush.bf16.msra.mxu1 %v2198_v26  ;;  %v1814_v2 = vcvt.s32.f32 %v1302_v19  ;;  %v1582_v3 = vcvt.s32.f32 %v1070_v35  ;;  %v1398_v32 = vunpack.c.1.s8 %v926_v56  ;;  %v2799_v26 = vld [vmem:[#allocation16 + $0x60] sm:$0xff] }
 0x236   :  { %v1982_v30 = vpack.c.bf16 %v1494_v21, %v1486_v40  ;;  %v6381_v55 = vadd.f32 %v2700_v23, %v2690_v48  ;;  %v1590_v50 = vcvt.s32.f32 %v1078_v25  ;;  %v3035_v37 = vunpack.c.2.s8 %v2815_v1  ;;  %v2378_v21 = vpop.f32.mrf.mxu1 }
 0x237   :  { %v1902_v6 = vcvt.s32.f32 %v1390_v47  ;;  %v2142_v13 = vpack.c.bf16 %v1814_v2, %v1806_v45  ;;  %v1910_v52 = vcvt.s32.f32 %v1398_v32  ;;  %v3039_v42 = vunpack.c.3.s8 %v2815_v1 }
 0x238   :  { %2612 = vmatpush.bf16.msrb.mxu2 %v1982_v30  ;;  %v958_v51 = vunpack.c.2.s8 %v6377_v49  ;;  %v6387_v27 = vmul.f32 0.01, %v6381_v55  ;;  %v2030_v56 = vpack.c.bf16 %v1590_v50, %v1582_v3  ;;  %v3547_v33 = vcvt.s32.f32 %v3035_v37  ;;  %v2811_v50 = vld [vmem:[#allocation16 + $0xc0] sm:$0xff] }
 0x239   :  { %v966_v23 = vunpack.c.3.s8 %v6377_v49  ;;  %2636 = vmatpush.bf16.msra.mxu0 %v2142_v13  ;;  %v2190_v11 = vpack.c.bf16 %v1910_v52, %v1902_v6  ;;  %v3551_v62 = vcvt.s32.f32 %v3039_v42  ;;  %v1278_v29 = vunpack.c.2.s8 %v894_v39 }
 0x23a   :  { %v1470_v5 = vcvt.s32.f32 %v958_v51  ;;  %2628 = vmatpush.bf16.msrb.mxu3 %v2030_v56  ;;  %v1286_v59 = vunpack.c.3.s8 %v894_v39  ;;  %v6390_v7 = vadd.f32 %v2352_v58, %v2338_v10  ;;  %v1374_v46 = vunpack.c.2.s8 %v6384_v14  ;;  %v886_v10 = vld [vmem:[#allocation11 + $0x278] sm:$0xff] }
 0x23b   :  { %v1478_v57 = vcvt.s32.f32 %v966_v23  ;;  %2652 = vmatpush.bf16.msra.mxu1 %v2190_v11  ;;  %v3999_v54 = vpack.c.bf16 %v3551_v62, %v3547_v33  ;;  %v1790_v60 = vcvt.s32.f32 %v1278_v29  ;;  %v1382_v8 = vunpack.c.3.s8 %v6384_v14  ;;  %v910_v29 = vld [vmem:[#allocation11 + $0x338] sm:$0xff] }
 0x23c   :  { %v3027_v61 = vunpack.c.0.s8 %v2815_v1  ;;  %v1798_v12 = vcvt.s32.f32 %v1286_v59  ;;  %v1886_v4 = vcvt.s32.f32 %v1374_v46  ;;  %v3031_v38 = vunpack.c.1.s8 %v2815_v1 }
 0x23d   :  { %v1974_v28 = vpack.c.bf16 %v1478_v57, %v1470_v5  ;;  %v1894_v15 = vcvt.s32.f32 %v1382_v8  ;;  %v2365_v40 = vadd.f32 %v2364_v53, %v6369_v44  ;;  %v2667_v16 = vperm.slane %v6284_v63, 2  ;;  %2629 = vmatmul.bf16.vlgmr.msrb.gmra.mxu3 %v6139_v36 }
 0x23e   :  { %4209 = vmatpush.bf16.msra.mxu3 %v3999_v54  ;;  %v3539_v31 = vcvt.s32.f32 %v3027_v61  ;;  %v2134_v19 = vpack.c.bf16 %v1798_v12, %v1790_v60  ;;  %v3543_v35 = vcvt.s32.f32 %v3031_v38  ;;  %v2701_v48 = vperm.slane %v6286_v20, 2  ;;  %v2366_v38 = vpop.f32.mrf.mxu0 }
 0x23f   :  { %2613 = vmatpush.bf16.msrb.mxu2 %v1974_v28  ;;  %v942_v45 = vunpack.c.0.s8 %v6377_v49  ;;  %v2182_v25 = vpack.c.bf16 %v1894_v15, %v1886_v4  ;;  %v2379_v1 = vadd.f32 %v2378_v21, %v2365_v40  ;;  %v950_v47 = vunpack.c.1.s8 %v6377_v49 }
 0x240   :  { %v1262_v30 = vunpack.c.0.s8 %v894_v39  ;;  %2637 = vmatpush.bf16.msra.mxu0 %v2134_v19  ;;  %v3995_v44 = vpack.c.bf16 %v3543_v35, %v3539_v31  ;;  %v1270_v3 = vunpack.c.1.s8 %v894_v39  ;;  %v2971_v32 = vunpack.c.2.s8 %v2799_v26 }
 0x241   :  { %v1454_v2 = vcvt.s32.f32 %v942_v45  ;;  %2653 = vmatpush.bf16.msra.mxu1 %v2182_v25  ;;  %v2683_v36 = vmul.f32 %v2667_v16, %v2379_v1  ;;  %v1462_v6 = vcvt.s32.f32 %v950_v47  ;;  %v2975_v13 = vunpack.c.3.s8 %v2799_v26  ;;  %v2795_v1 = vld [vmem:[#allocation16 + $0x40] sm:$0xff] }
 0x242   :  { %v1774_v37 = vcvt.s32.f32 %v1262_v30  ;;  %4210 = vmatpush.bf16.msra.mxu3 %v3995_v44  ;;  %v1782_v52 = vcvt.s32.f32 %v1270_v3  ;;  %v3483_v42 = vcvt.s32.f32 %v2971_v32  ;;  %v1358_v51 = vunpack.c.0.s8 %v6384_v14 }
 0x243   :  { %v1366_v49 = vunpack.c.1.s8 %v6384_v14  ;;  %v6406_v39 = vadd.f32 %v2701_v48, %v2683_v36  ;;  %v1966_v56 = vpack.c.bf16 %v1462_v6, %v1454_v2  ;;  %v3487_v33 = vcvt.s32.f32 %v2975_v13  ;;  %v2380_v2 = vpop.f32.mrf.mxu1  ;;  %v2807_v6 = vld [vmem:[#allocation16 + $0xa0] sm:$0xff] }
 0x244   :  { %v3019_v23 = vunpack.c.2.s8 %v2811_v50  ;;  %v2126_v58 = vpack.c.bf16 %v1782_v52, %v1774_v37  ;;  %v1870_v11 = vcvt.s32.f32 %v1358_v51  ;;  %v3023_v5 = vunpack.c.3.s8 %v2811_v50 }
 0x245   :  { %v1878_v62 = vcvt.s32.f32 %v1366_v49  ;;  %v6409_v57 = vmul.f32 0.01, %v6406_v39  ;;  %2614 = vmatpush.bf16.msrb.mxu2 %v1966_v56  ;;  %v3967_v59 = vpack.c.bf16 %v3487_v33, %v3483_v42  ;;  %v1246_v14 = vunpack.c.2.s8 %v886_v10  ;;  %v878_v33 = vld [vmem:[#allocation11 + $0x238] sm:$0xff] }
 0x246   :  { %v3531_v46 = vcvt.s32.f32 %v3019_v23  ;;  %2638 = vmatpush.bf16.msra.mxu0 %v2126_v58  ;;  %v3535_v54 = vcvt.s32.f32 %v3023_v5  ;;  %v1254_v60 = vunpack.c.3.s8 %v886_v10  ;;  %v2963_v8 = vunpack.c.0.s8 %v2799_v26 }
 0x247   :  { %v2174_v53 = vpack.c.bf16 %v1878_v62, %v1870_v11  ;;  %v1758_v61 = vcvt.s32.f32 %v1246_v14  ;;  %v2967_v28 = vunpack.c.1.s8 %v2799_v26  ;;  %v1342_v12 = vunpack.c.2.s8 %v910_v29 }
 0x248   :  { %v1350_v4 = vunpack.c.3.s8 %v910_v29  ;;  %2615 = vmatmul.bf16.vlgmr.msrb.gmra.mxu2 %v6166_v9  ;;  %v3991_v15 = vpack.c.bf16 %v3535_v54, %v3531_v46  ;;  %v1766_v31 = vcvt.s32.f32 %v1254_v60  ;;  %v3475_v40 = vcvt.s32.f32 %v2963_v8 }
 0x249   :  { %4195 = vmatpush.bf16.msra.mxu2 %v3967_v59  ;;  %2654 = vmatpush.bf16.msra.mxu1 %v2174_v53  ;;  %v3011_v21 = vunpack.c.0.s8 %v2811_v50  ;;  %v3479_v19 = vcvt.s32.f32 %v2967_v28  ;;  %v1854_v35 = vcvt.s32.f32 %v1342_v12  ;;  %v3015_v25 = vunpack.c.1.s8 %v2811_v50 }
 0x24a   :  { %v1862_v45 = vcvt.s32.f32 %v1350_v4  ;;  %4211 = vmatpush.bf16.msra.mxu3 %v3991_v15  ;;  %v2118_v47 = vpack.c.bf16 %v1766_v31, %v1758_v61  ;;  %v2367_v26 = vadd.f32 %v2366_v38, %v6390_v7  ;;  %v1230_v44 = vunpack.c.0.s8 %v886_v10  ;;  %v2791_v38 = vld [vmem:[#allocation16 + $0x20] sm:$0xff] }
 0x24b   :  { %v3523_v30 = vcvt.s32.f32 %v3011_v21  ;;  %v3963_v3 = vpack.c.bf16 %v3479_v19, %v3475_v40  ;;  %v3527_v36 = vcvt.s32.f32 %v3015_v25  ;;  %v1238_v9 = vunpack.c.1.s8 %v886_v10  ;;  %v2831_v21 = vld [vmem:[#allocation16 + $0x160] sm:$0xff] }
 0x24c   :  { %v2166_v32 = vpack.c.bf16 %v1862_v45, %v1854_v35  ;;  %2639 = vmatpush.bf16.msra.mxu0 %v2118_v47  ;;  %v2381_v37 = vadd.f32 %v2380_v2, %v2367_v26  ;;  %v1742_v13 = vcvt.s32.f32 %v1230_v44  ;;  %v2955_v52 = vunpack.c.2.s8 %v2795_v1  ;;  %v2392_v2 = vpop.f32.mrf.mxu2 }
 0x24d   :  { %v2959_v42 = vunpack.c.3.s8 %v2795_v1  ;;  %4196 = vmatpush.bf16.msra.mxu2 %v3963_v3  ;;  %v3987_v50 = vpack.c.bf16 %v3527_v36, %v3523_v30  ;;  %v1750_v51 = vcvt.s32.f32 %v1238_v9  ;;  %v1326_v49 = vunpack.c.0.s8 %v910_v29  ;;  %v2803_v3 = vld [vmem:[#allocation16 + $0x80] sm:$0xff] }
 0x24e   :  { %2655 = vmatpush.bf16.msra.mxu1 %v2166_v32  ;;  %v1334_v56 = vunpack.c.1.s8 %v910_v29  ;;  %v2691_v7 = vmul.f32 %v2667_v16, %v2381_v37  ;;  %v3467_v23 = vcvt.s32.f32 %v2955_v52  ;;  %v3003_v11 = vunpack.c.2.s8 %v2807_v6  ;;  %v2847_v37 = vld [vmem:[#allocation16 + $0x1e0] sm:$0xff] }
 0x24f   :  { %v3471_v58 = vcvt.s32.f32 %v2959_v42  ;;  %4212 = vmatpush.bf16.msra.mxu3 %v3987_v50  ;;  %v2110_v10 = vpack.c.bf16 %v1750_v51, %v1742_v13  ;;  %v1838_v62 = vcvt.s32.f32 %v1326_v49  ;;  %v3007_v59 = vunpack.c.3.s8 %v2807_v6 }
 0x250   :  { %v1846_v5 = vcvt.s32.f32 %v1334_v56  ;;  %v6417_v46 = vadd.f32 %v2701_v48, %v2691_v7  ;;  %v3515_v53 = vcvt.s32.f32 %v3003_v11  ;;  %v1214_v54 = vunpack.c.2.s8 %v878_v33 }
 0x251   :  { %v3959_v14 = vpack.c.bf16 %v3471_v58, %v3467_v23  ;;  %2640 = vmatpush.bf16.msra.mxu0 %v2110_v10  ;;  %v3519_v60 = vcvt.s32.f32 %v3007_v59  ;;  %v1222_v8 = vunpack.c.3.s8 %v878_v33  ;;  %v2947_v16 = vunpack.c.0.s8 %v2795_v1 }
 0x252   :  { %v2158_v29 = vpack.c.bf16 %v1846_v5, %v1838_v62  ;;  %v6420_v61 = vmul.f32 0.01, %v6417_v46  ;;  %v1726_v28 = vcvt.s32.f32 %v1214_v54  ;;  %v2951_v12 = vunpack.c.1.s8 %v2795_v1 }
 0x253   :  { %4197 = vmatpush.bf16.msra.mxu2 %v3959_v14  ;;  %v2995_v4 = vunpack.c.0.s8 %v2807_v6  ;;  %v3983_v15 = vpack.c.bf16 %v3519_v60, %v3515_v53  ;;  %v1734_v48 = vcvt.s32.f32 %v1222_v8  ;;  %v3459_v31 = vcvt.s32.f32 %v2947_v16 }
 0x254   :  { %2656 = vmatpush.bf16.msra.mxu1 %v2158_v29  ;;  %v2999_v40 = vunpack.c.1.s8 %v2807_v6  ;;  %v3463_v19 = vcvt.s32.f32 %v2951_v12  ;;  %v1198_v45 = vunpack.c.0.s8 %v878_v33  ;;  %v1206_v25 = vunpack.c.1.s8 %v878_v33  ;;  %v2406_v6 = vpop.f32.mrf.mxu3 }
 0x255   :  { %v3507_v35 = vcvt.s32.f32 %v2995_v4  ;;  %4213 = vmatpush.bf16.msra.mxu3 %v3983_v15  ;;  %v2102_v47 = vpack.c.bf16 %v1734_v48, %v1726_v28  ;;  %v2939_v26 = vunpack.c.2.s8 %v2791_v38  ;;  %v2943_v44 = vunpack.c.3.s8 %v2791_v38  ;;  %v6425_v28 = vld [vmem:[#allocation16] sm:$0xff] }
 0x256   :  { %v3511_v30 = vcvt.s32.f32 %v2999_v40  ;;  %v3955_v1 = vpack.c.bf16 %v3463_v19, %v3459_v31  ;;  %v1710_v32 = vcvt.s32.f32 %v1198_v45  ;;  %v1718_v36 = vcvt.s32.f32 %v1206_v25  ;;  %v6427_v31 = vld [vmem:[#allocation16 + $0x140] sm:$0xff] }
 0x257   :  { %2657 = vmatmul.bf16.vlgmr.msra.gmra.mxu1 %v6226_v43  ;;  %v3099_v9 = vunpack.c.2.s8 %v2831_v21  ;;  %2641 = vmatpush.bf16.msra.mxu0 %v2102_v47  ;;  %v3451_v52 = vcvt.s32.f32 %v2939_v26  ;;  %v3455_v42 = vcvt.s32.f32 %v2943_v44  ;;  %v3103_v50 = vunpack.c.3.s8 %v2831_v21 }
 0x258   :  { %v3979_v13 = vpack.c.bf16 %v3511_v30, %v3507_v35  ;;  %4198 = vmatpush.bf16.msra.mxu2 %v3955_v1  ;;  %v2094_v51 = vpack.c.bf16 %v1718_v36, %v1710_v32  ;;  %v6423_v56 = vadd.f32 %v2406_v6, %v2392_v2  ;;  %v2987_v33 = vunpack.c.2.s8 %v2803_v3  ;;  %v2394_v30 = vpop.f32.mrf.mxu2  ;;  %v2843_v6 = vld [vmem:[#allocation16 + $0x1c0] sm:$0xff] }
 0x259   :  { %v3611_v49 = vcvt.s32.f32 %v3099_v9  ;;  %v3951_v7 = vpack.c.bf16 %v3455_v42, %v3451_v52  ;;  %v3615_v43 = vcvt.s32.f32 %v3103_v50  ;;  %v2991_v23 = vunpack.c.3.s8 %v2803_v3  ;;  %v2420_v42 = vpop.f32.mrf.mxu0 }
 0x25a   :  { %4214 = vmatpush.bf16.msra.mxu3 %v3979_v13  ;;  %v3163_v58 = vunpack.c.2.s8 %v2847_v37  ;;  %v3499_v11 = vcvt.s32.f32 %v2987_v33  ;;  %v3167_v10 = vunpack.c.3.s8 %v2847_v37  ;;  %v2931_v62 = vunpack.c.0.s8 %v2791_v38 }
 0x25b   :  { %v2935_v5 = vunpack.c.1.s8 %v2791_v38  ;;  %2642 = vmatpush.bf16.msra.mxu0 %v2094_v51  ;;  %v4031_v59 = vpack.c.bf16 %v3615_v43, %v3611_v49  ;;  %v3503_v14 = vcvt.s32.f32 %v2991_v23  ;;  %v3091_v54 = vunpack.c.0.s8 %v2831_v21 }
 0x25c   :  { %v3675_v53 = vcvt.s32.f32 %v3163_v58  ;;  %4199 = vmatpush.bf16.msra.mxu2 %v3951_v7  ;;  %v3679_v29 = vcvt.s32.f32 %v3167_v10  ;;  %v3443_v60 = vcvt.s32.f32 %v2931_v62  ;;  %v3095_v16 = vunpack.c.1.s8 %v2831_v21 }
 0x25d   :  { %v3447_v8 = vcvt.s32.f32 %v2935_v5  ;;  %v3975_v12 = vpack.c.bf16 %v3503_v14, %v3499_v11  ;;  %v3603_v4 = vcvt.s32.f32 %v3091_v54  ;;  %v2979_v15 = vunpack.c.0.s8 %v2803_v3  ;;  %v2863_v5 = vld [vmem:[#allocation16 + $0x260] sm:$0xff] }
 0x25e   :  { %v2983_v48 = vunpack.c.1.s8 %v2803_v3  ;;  %2643 = vmatmul.bf16.vlgmr.msra.gmra.mxu0 %v6248_v41  ;;  %v4063_v38 = vpack.c.bf16 %v3679_v29, %v3675_v53  ;;  %v3607_v19 = vcvt.s32.f32 %v3095_v16  ;;  %v3155_v35 = vunpack.c.0.s8 %v2847_v37  ;;  %v2408_v41 = vpop.f32.mrf.mxu3 }
 0x25f   :  { %4223 = vmatpush.bf16.msrb.mxu0 %v4031_v59  ;;  %v3947_v40 = vpack.c.bf16 %v3447_v8, %v3443_v60  ;;  %4215 = vmatpush.bf16.msra.mxu3 %v3975_v12  ;;  %v3491_v45 = vcvt.s32.f32 %v2979_v15  ;;  %v3159_v47 = vunpack.c.1.s8 %v2847_v37  ;;  %v2923_v21 = vunpack.c.2.s8 %v6425_v28  ;;  %v2434_v59 = vpop.f32.mrf.mxu1 }
 0x260   :  { %v3495_v25 = vcvt.s32.f32 %v2983_v48  ;;  %4237 = vmatpush.bf16.msrb.mxu1 %v4063_v38  ;;  %v4027_v26 = vpack.c.bf16 %v3607_v19, %v3603_v4  ;;  %v3667_v44 = vcvt.s32.f32 %v3155_v35  ;;  %v2927_v2 = vunpack.c.3.s8 %v6425_v28 }
 0x261   :  { %4200 = vmatpush.bf16.msra.mxu2 %v3947_v40  ;;  %v3083_v3 = vunpack.c.2.s8 %v6427_v31  ;;  %v3671_v32 = vcvt.s32.f32 %v3159_v47  ;;  %v3435_v36 = vcvt.s32.f32 %v2923_v21  ;;  %v3087_v9 = vunpack.c.3.s8 %v6427_v31 }
 0x262   :  { %v3971_v1 = vpack.c.bf16 %v3495_v25, %v3491_v45  ;;  %v3439_v37 = vcvt.s32.f32 %v2927_v2  ;;  %v6434_v52 = vadd.f32 %v2408_v41, %v2394_v30  ;;  %vm2732_vm13 = vcmp.gt.f32.partialorder %v6361_v17, 0.0 }
 0x263   :  { %4224 = vmatpush.bf16.msrb.mxu0 %v4027_v26  ;;  %v3595_v13 = vcvt.s32.f32 %v3083_v3  ;;  %v4059_v50 = vpack.c.bf16 %v3671_v32, %v3667_v44  ;;  %v3599_v51 = vcvt.s32.f32 %v3087_v9  ;;  %vm2740_vm14 = vcmp.gt.f32.partialorder %v6381_v55, 0.0  ;;  %v2839_v26 = vld [vmem:[#allocation16 + $0x1a0] sm:$0xff] }
 0x264   :  { %4216 = vmatpush.bf16.msra.mxu3 %v3971_v1  ;;  %v2764_v49 = vsel %vm2732_vm13, %v6361_v17, %v6365_v34  ;;  %v3943_v33 = vpack.c.bf16 %v3439_v37, %v3435_v36  ;;  %v2772_v7 = vsel %vm2740_vm14, %v6381_v55, %v6387_v27  ;;  %v3147_v43 = vunpack.c.2.s8 %v2843_v6  ;;  %v2422_v1 = vpop.f32.mrf.mxu0 }
 0x265   :  { %v3151_v23 = vunpack.c.3.s8 %v2843_v6  ;;  %4238 = vmatpush.bf16.msrb.mxu1 %v4059_v50  ;;  %v4023_v58 = vpack.c.bf16 %v3599_v51, %v3595_v13  ;;  %v6442_v11 = vpack.c.bf16 %v2772_v7, %v2764_v49  ;;  %v2421_v10 = vadd.f32 %v2420_v42, %v6423_v56  ;;  %v2859_v51 = vld [vmem:[#allocation16 + $0x240] sm:$0xff] }
 0x266   :  { %v2668_v62 = vperm.slane %v6284_v63, 3  ;;  %4201 = vmatpush.bf16.msra.mxu2 %v3943_v33  ;;  %v3659_v14 = vcvt.s32.f32 %v3147_v43  ;;  %v2702_v17 = vperm.slane %v6286_v20, 3  ;;  %v2915_v34 = vunpack.c.0.s8 %v6425_v28 }
 0x267   :  { %v3663_v53 = vcvt.s32.f32 %v3151_v23  ;;  %4225 = vmatpush.bf16.msrb.mxu0 %v4023_v58  ;;  %4217 = vmatmul.bf16.vlgmr.msra.gmra.mxu3 %v6442_v11  ;;  %v2435_v55 = vadd.f32 %v2434_v59, %v2421_v10  ;;  %v2919_v27 = vunpack.c.1.s8 %v6425_v28  ;;  %v3075_v54 = vunpack.c.0.s8 %v6427_v31  ;;  %v2823_v28 = vld [vmem:[#allocation16 + $0x120] sm:$0xff]  ;;  %v2436_v49 = vpop.f32.mrf.mxu1 }
 0x268   :  { %v3079_v56 = vunpack.c.1.s8 %v6427_v31  ;;  %v3427_v60 = vcvt.s32.f32 %v2915_v34  ;;  %v3227_v8 = vunpack.c.2.s8 %v2863_v5  ;;  %v3231_v16 = vunpack.c.3.s8 %v2863_v5 }
 0x269   :  { %v4055_v29 = vpack.c.bf16 %v3663_v53, %v3659_v14  ;;  %v2684_v12 = vmul.f32 %v2668_v62, %v2435_v55  ;;  %v3431_v4 = vcvt.s32.f32 %v2919_v27  ;;  %v3587_v15 = vcvt.s32.f32 %v3075_v54  ;;  %v2819_v14 = vld [vmem:[#allocation16 + $0x100] sm:$0xff] }
 0x26a   :  { %v3591_v48 = vcvt.s32.f32 %v3079_v56  ;;  %v3739_v38 = vcvt.s32.f32 %v3227_v8  ;;  %v3743_v40 = vcvt.s32.f32 %v3231_v16  ;;  %v3139_v19 = vunpack.c.0.s8 %v2843_v6 }
 0x26b   :  { %4239 = vmatpush.bf16.msrb.mxu1 %v4055_v29  ;;  %v3143_v35 = vunpack.c.1.s8 %v2843_v6  ;;  %v6456_v45 = vadd.f32 %v2702_v17, %v2684_v12  ;;  %v3939_v31 = vpack.c.bf16 %v3431_v4, %v3427_v60  ;;  %vm2731_vm15 = vcmp.gt.f32.partialorder %v6303_v22, 0.0  ;;  %v2835_v4 = vld [vmem:[#allocation16 + $0x180] sm:$0xff] }
 0x26c   :  { %v4019_v25 = vpack.c.bf16 %v3591_v48, %v3587_v15  ;;  %v4095_v47 = vpack.c.bf16 %v3743_v40, %v3739_v38  ;;  %v3651_v21 = vcvt.s32.f32 %v3139_v19  ;;  %vm2739_vm0 = vcmp.gt.f32.partialorder %v6327_v24, 0.0 }
 0x26d   :  { %v3655_v30 = vcvt.s32.f32 %v3143_v35  ;;  %v6461_v44 = vmul.f32 0.01, %v6456_v45  ;;  %4202 = vmatpush.bf16.msra.mxu2 %v3939_v31  ;;  %v2763_v2 = vsel %vm2731_vm15, %v6303_v22, %v6308_v0  ;;  %v2771_v3 = vsel %vm2739_vm0, %v6327_v24, %v6334_v18  ;;  %v2448_v31 = vpop.f32.mrf.mxu2 }
 0x26e   :  { %4226 = vmatpush.bf16.msrb.mxu0 %v4019_v25  ;;  %v3067_v41 = vunpack.c.2.s8 %v2823_v28  ;;  %v6467_v36 = vpack.c.bf16 %v2771_v3, %v2763_v2  ;;  %v3071_v9 = vunpack.c.3.s8 %v2823_v28  ;;  %v3219_v6 = vunpack.c.0.s8 %v2863_v5 }
 0x26f   :  { %v4051_v32 = vpack.c.bf16 %v3655_v30, %v3651_v21  ;;  %v3223_v13 = vunpack.c.1.s8 %v2863_v5  ;;  %v3131_v42 = vunpack.c.2.s8 %v2839_v26  ;;  %v3135_v50 = vunpack.c.3.s8 %v2839_v26 }
 0x270   :  { %v3579_v37 = vcvt.s32.f32 %v3067_v41  ;;  %4203 = vmatmul.bf16.vlgmr.msra.gmra.mxu2 %v6467_v36  ;;  %v3583_v22 = vcvt.s32.f32 %v3071_v9  ;;  %v3731_v0 = vcvt.s32.f32 %v3219_v6  ;;  %v2423_v24 = vadd.f32 %v2422_v1, %v6434_v52 }
 0x271   :  { %4251 = vmatpush.bf16.msrb.mxu2 %v4095_v47  ;;  %4240 = vmatpush.bf16.msrb.mxu1 %v4051_v32  ;;  %v3059_v18 = vunpack.c.0.s8 %v2823_v28  ;;  %v3735_v33 = vcvt.s32.f32 %v3223_v13  ;;  %v3643_v7 = vcvt.s32.f32 %v3131_v42  ;;  %v3647_v43 = vcvt.s32.f32 %v3135_v50 }
 0x272   :  { %v3063_v23 = vunpack.c.1.s8 %v2823_v28  ;;  %v4015_v58 = vpack.c.bf16 %v3583_v22, %v3579_v37  ;;  %v2437_v10 = vadd.f32 %v2436_v49, %v2423_v24  ;;  %v3211_v5 = vunpack.c.2.s8 %v2859_v51  ;;  %v2855_v28 = vld [vmem:[#allocation16 + $0x220] sm:$0xff] }
 0x273   :  { %v3571_v59 = vcvt.s32.f32 %v3059_v18  ;;  %v4091_v53 = vpack.c.bf16 %v3735_v33, %v3731_v0  ;;  %v4047_v34 = vpack.c.bf16 %v3647_v43, %v3643_v7  ;;  %v3215_v27 = vunpack.c.3.s8 %v2859_v51 }
 0x274   :  { %v3575_v55 = vcvt.s32.f32 %v3063_v23  ;;  %4227 = vmatpush.bf16.msrb.mxu0 %v4015_v58  ;;  %v2692_v54 = vmul.f32 %v2668_v62, %v2437_v10  ;;  %v3723_v52 = vcvt.s32.f32 %v3211_v5  ;;  %v3123_v56 = vunpack.c.0.s8 %v2839_v26  ;;  %v2879_v23 = vld [vmem:[#allocation16 + $0x2e0] sm:$0xff] }
 0x275   :  { %v3127_v29 = vunpack.c.1.s8 %v2839_v26  ;;  %4252 = vmatpush.bf16.msrb.mxu2 %v4091_v53  ;;  %4241 = vmatpush.bf16.msrb.mxu1 %v4047_v34  ;;  %v3727_v8 = vcvt.s32.f32 %v3215_v27  ;;  %v3051_v16 = vunpack.c.2.s8 %v2819_v14  ;;  %v3055_v12 = vunpack.c.3.s8 %v2819_v14  ;;  %v2462_v26 = vpop.f32.mrf.mxu3 }
 0x276   :  { %v4011_v60 = vpack.c.bf16 %v3575_v55, %v3571_v59  ;;  %v2726_v15 = vadd.f32 %v2702_v17, %v2692_v54  ;;  %v3635_v48 = vcvt.s32.f32 %v3123_v56  ;;  %v3203_v40 = vunpack.c.0.s8 %v2859_v51  ;;  %v2851_v59 = vld [vmem:[#allocation16 + $0x200] sm:$0xff]  ;;  %v2476_v55 = vpop.f32.mrf.mxu0 }
 0x277   :  { %v3639_v38 = vcvt.s32.f32 %v3127_v29  ;;  %v4087_v19 = vpack.c.bf16 %v3727_v8, %v3723_v52  ;;  %v3563_v35 = vcvt.s32.f32 %v3051_v16  ;;  %v3567_v63 = vcvt.s32.f32 %v3055_v12 }
 0x278   :  { %v3207_v62 = vunpack.c.1.s8 %v2859_v51  ;;  %v2758_v25 = vmul.f32 0.01, %v2726_v15  ;;  %4228 = vmatpush.bf16.msrb.mxu0 %v4011_v60  ;;  %v3715_v21 = vcvt.s32.f32 %v3203_v40  ;;  %v3115_v30 = vunpack.c.2.s8 %v2835_v4 }
 0x279   :  { %v4043_v47 = vpack.c.bf16 %v3639_v38, %v3635_v48  ;;  %4253 = vmatpush.bf16.msrb.mxu2 %v4087_v19  ;;  %v4007_v2 = vpack.c.bf16 %v3567_v63, %v3563_v35  ;;  %v3119_v20 = vunpack.c.3.s8 %v2835_v4  ;;  %v3043_v17 = vunpack.c.0.s8 %v2819_v14 }
 0x27a   :  { %v3719_v3 = vcvt.s32.f32 %v3207_v62  ;;  %v3627_v41 = vcvt.s32.f32 %v3115_v30  ;;  %v3047_v1 = vunpack.c.1.s8 %v2819_v14  ;;  %v3195_v32 = vunpack.c.2.s8 %v2855_v28  ;;  %v2875_v62 = vld [vmem:[#allocation16 + $0x2c0] sm:$0xff]  ;;  %v6493_v30 = vld [vmem:[#allocation14] sm:$0xff] }
 0x27b   :  { %4242 = vmatpush.bf16.msrb.mxu1 %v4043_v47  ;;  %v3199_v9 = vunpack.c.3.s8 %v2855_v28  ;;  %v3631_v37 = vcvt.s32.f32 %v3119_v20  ;;  %v3555_v13 = vcvt.s32.f32 %v3043_v17  ;;  %v2463_v42 = vadd.f32 %v2462_v26, %v2448_v31  ;;  %v6490_v47 = vld [vmem:[#allocation13] sm:$0xff] }
 0x27c   :  { %v4083_v6 = vpack.c.bf16 %v3719_v3, %v3715_v21  ;;  %4229 = vmatpush.bf16.msrb.mxu0 %v4007_v2  ;;  %v3559_v50 = vcvt.s32.f32 %v3047_v1  ;;  %v3707_v51 = vcvt.s32.f32 %v3195_v32  ;;  %v3107_v0 = vunpack.c.0.s8 %v2835_v4 }
 0x27d   :  { %v3711_v22 = vcvt.s32.f32 %v3199_v9  ;;  %v4039_v24 = vpack.c.bf16 %v3631_v37, %v3627_v41  ;;  %v3111_v18 = vunpack.c.1.s8 %v2835_v4  ;;  %vm2733_vm1 = vcmp.gt.f32.partialorder %v6406_v39, 0.0  ;;  %v2464_v60 = vpop.f32.mrf.mxu3  ;;  %v2490_v4 = vpop.f32.mrf.mxu1 }
 0x27e   :  { %4254 = vmatpush.bf16.msrb.mxu2 %v4083_v6  ;;  %vm2741_vm2 = vcmp.gt.f32.partialorder %v6417_v46, 0.0  ;;  %v4003_v49 = vpack.c.bf16 %v3559_v50, %v3555_v13  ;;  %v3619_v7 = vcvt.s32.f32 %v3107_v0  ;;  %v2765_v43 = vsel %vm2733_vm1, %v6406_v39, %v6409_v57 }
 0x27f   :  { %v4079_v33 = vpack.c.bf16 %v3711_v22, %v3707_v51  ;;  %4243 = vmatpush.bf16.msrb.mxu1 %v4039_v24  ;;  %v3623_v58 = vcvt.s32.f32 %v3111_v18  ;;  %v2773_v10 = vsel %vm2741_vm2, %v6417_v46, %v6420_v61  ;;  %vm2734_vm3 = vcmp.gt.f32.partialorder %v6456_v45, 0.0  ;;  %v2450_v46 = vpop.f32.mrf.mxu2  ;;  %v2478_v24 = vpop.f32.mrf.mxu0  ;;  %v2871_v18 = vld [vmem:[#allocation16 + $0x2a0] sm:$0xff] }
 0x280   :  { %vm2742_vm4 = vcmp.gt.f32.partialorder %v2726_v15, 0.0  ;;  %4230 = vmatpush.bf16.msrb.mxu0 %v4003_v49  ;;  %v6482_v5 = vpack.c.bf16 %v2773_v10, %v2765_v43  ;;  %v2766_v14 = vsel %vm2734_vm3, %v6456_v45, %v6461_v44  ;;  %v3187_v34 = vunpack.c.0.s8 %v2855_v28 }
 0x281   :  { %v2774_v53 = vsel %vm2742_vm4, %v2726_v15, %v2758_v25  ;;  %v4035_v39 = vpack.c.bf16 %v3623_v58, %v3619_v7  ;;  %v3191_v27 = vunpack.c.1.s8 %v2855_v28  ;;  %v3291_v54 = vunpack.c.2.s8 %v2879_v23  ;;  %v2800_v28 = vld [vmem:[#allocation16 + $0x68] sm:$0xff] }
 0x282   :  { %4255 = vmatpush.bf16.msrb.mxu2 %v4079_v33  ;;  %v6486_v57 = vpack.c.bf16 %v2774_v53, %v2766_v14  ;;  %v3699_v61 = vcvt.s32.f32 %v3187_v34  ;;  %v3295_v52 = vunpack.c.3.s8 %v2879_v23  ;;  %v3179_v56 = vunpack.c.2.s8 %v2851_v59 }
 0x283   :  { %v3183_v29 = vunpack.c.3.s8 %v2851_v59  ;;  %4244 = vmatpush.bf16.msrb.mxu1 %v4035_v39  ;;  %4231 = vmatmul.bf16.vlgmr.msrb.gmra.mxu0 %v6482_v5  ;;  %v3703_v8 = vcvt.s32.f32 %v3191_v27  ;;  %v3803_v45 = vcvt.s32.f32 %v3291_v54  ;;  %v3283_v44 = vunpack.c.0.s8 %v2879_v23 }
 0x284   :  { %v3287_v16 = vunpack.c.1.s8 %v2879_v23  ;;  %v3807_v12 = vcvt.s32.f32 %v3295_v52  ;;  %v3691_v15 = vcvt.s32.f32 %v3179_v56  ;;  %v2465_v38 = vadd.f32 %v2464_v60, %v2450_v46  ;;  %v2796_v23 = vld [vmem:[#allocation16 + $0x48] sm:$0xff] }
 0x285   :  { %v3695_v48 = vcvt.s32.f32 %v3183_v29  ;;  %v4075_v40 = vpack.c.bf16 %v3703_v8, %v3699_v61  ;;  %v3795_v19 = vcvt.s32.f32 %v3283_v44  ;;  %v2477_v63 = vadd.f32 %v2476_v55, %v2463_v42  ;;  %v2492_v27 = vpop.f32.mrf.mxu1 }
 0x286   :  { %v3799_v35 = vcvt.s32.f32 %v3287_v16  ;;  %4245 = vmatmul.bf16.vlgmr.msrb.gmra.mxu1 %v6486_v57  ;;  %v4127_v31 = vpack.c.bf16 %v3807_v12, %v3803_v45  ;;  %v2669_v21 = vperm.slane %v6490_v47, 4  ;;  %v2703_v26 = vperm.slane %v6493_v30, 4  ;;  %v2867_v45 = vld [vmem:[#allocation16 + $0x280] sm:$0xff] }
 0x287   :  { %v4071_v25 = vpack.c.bf16 %v3695_v48, %v3691_v15  ;;  %4256 = vmatpush.bf16.msrb.mxu2 %v4075_v40  ;;  %v2491_v3 = vadd.f32 %v2490_v4, %v2477_v63  ;;  %v3171_v20 = vunpack.c.0.s8 %v2851_v59  ;;  %v3175_v17 = vunpack.c.1.s8 %v2851_v59 }
 0x288   :  { %v4123_v2 = vpack.c.bf16 %v3799_v35, %v3795_v19  ;;  %4265 = vmatpush.bf16.msrb.mxu3 %v4127_v31  ;;  %v3275_v41 = vunpack.c.2.s8 %v2875_v62  ;;  %v3279_v1 = vunpack.c.3.s8 %v2875_v62  ;;  %v2972_v32 = vunpack.c.2.s8 %v2800_v28  ;;  %v2792_v19 = vld [vmem:[#allocation16 + $0x28] sm:$0xff]  ;;  %v2504_v31 = vpop.f32.mrf.mxu2 }
 0x289   :  { %v2976_v9 = vunpack.c.3.s8 %v2800_v28  ;;  %v2685_v6 = vmul.f32 %v2669_v21, %v2491_v3  ;;  %v3683_v37 = vcvt.s32.f32 %v3171_v20  ;;  %v3687_v13 = vcvt.s32.f32 %v3175_v17  ;;  %v2518_v17 = vpop.f32.mrf.mxu3 }
 0x28a   :  { %v3267_v42 = vunpack.c.0.s8 %v2875_v62  ;;  %v3787_v50 = vcvt.s32.f32 %v3275_v41  ;;  %v3791_v51 = vcvt.s32.f32 %v3279_v1  ;;  %v3484_v22 = vcvt.s32.f32 %v2972_v32 }
 0x28b   :  { %v3488_v0 = vcvt.s32.f32 %v2976_v9  ;;  %4257 = vmatpush.bf16.msrb.mxu2 %v4071_v25  ;;  %v6498_v49 = vadd.f32 %v2703_v26, %v2685_v6  ;;  %v4067_v33 = vpack.c.bf16 %v3687_v13, %v3683_v37  ;;  %v3271_v7 = vunpack.c.1.s8 %v2875_v62 }
 0x28c   :  { %v3779_v43 = vcvt.s32.f32 %v3267_v42  ;;  %4266 = vmatpush.bf16.msrb.mxu3 %v4123_v2  ;;  %v4119_v58 = vpack.c.bf16 %v3791_v51, %v3787_v50  ;;  %v2964_v59 = vunpack.c.0.s8 %v2800_v28  ;;  %v2968_v14 = vunpack.c.1.s8 %v2800_v28 }
 0x28d   :  { %v3968_v10 = vpack.c.bf16 %v3488_v0, %v3484_v22  ;;  %v2751_v53 = vmul.f32 0.01, %v6498_v49  ;;  %v3783_v34 = vcvt.s32.f32 %v3271_v7  ;;  %v2479_v55 = vadd.f32 %v2478_v24, %v2465_v38  ;;  %v2895_v0 = vld [vmem:[#allocation16 + $0x360] sm:$0xff] }
 0x28e   :  { %v3259_v39 = vunpack.c.2.s8 %v2871_v18  ;;  %v3476_v54 = vcvt.s32.f32 %v2964_v59  ;;  %v3480_v46 = vcvt.s32.f32 %v2968_v14  ;;  %v3263_v61 = vunpack.c.3.s8 %v2871_v18 }
 0x28f   :  { %v2956_v52 = vunpack.c.2.s8 %v2796_v23  ;;  %4258 = vmatpush.bf16.msrb.mxu2 %v4067_v33  ;;  %v4115_v56 = vpack.c.bf16 %v3783_v34, %v3779_v43  ;;  %v2493_v29 = vadd.f32 %v2492_v27, %v2479_v55  ;;  %v2960_v8 = vunpack.c.3.s8 %v2796_v23 }
 0x290   :  { %v3771_v60 = vcvt.s32.f32 %v3259_v39  ;;  %4267 = vmatpush.bf16.msrb.mxu3 %v4119_v58  ;;  %v3964_v44 = vpack.c.bf16 %v3480_v46, %v3476_v54  ;;  %v3775_v16 = vcvt.s32.f32 %v3263_v61  ;;  %v3251_v4 = vunpack.c.0.s8 %v2871_v18  ;;  %v2788_v54 = vld [vmem:[#allocation16 + $0x8] sm:$0xff] }
 0x291   :  { %v3468_v12 = vcvt.s32.f32 %v2956_v52  ;;  %v2693_v15 = vmul.f32 %v2669_v21, %v2493_v29  ;;  %v3472_v48 = vcvt.s32.f32 %v2960_v8  ;;  %v3255_v38 = vunpack.c.1.s8 %v2871_v18  ;;  %v2816_v18 = vld [vmem:[#allocation16 + $0xe8] sm:$0xff] }
 0x292   :  { %v2948_v40 = vunpack.c.0.s8 %v2796_v23  ;;  %v4111_v35 = vpack.c.bf16 %v3775_v16, %v3771_v60  ;;  %v3763_v63 = vcvt.s32.f32 %v3251_v4  ;;  %v2952_v62 = vunpack.c.1.s8 %v2796_v23  ;;  %v2532_v4 = vpop.f32.mrf.mxu0 }
 0x293   :  { %4307 = vmatpush.bf16.msra.mxu2 %v3968_v10  ;;  %v3243_v28 = vunpack.c.2.s8 %v2867_v45  ;;  %v2727_v25 = vadd.f32 %v2703_v26, %v2693_v15  ;;  %v3960_v2 = vpack.c.bf16 %v3472_v48, %v3468_v12  ;;  %v3767_v3 = vcvt.s32.f32 %v3255_v38  ;;  %v2506_v12 = vpop.f32.mrf.mxu2 }
 0x294   :  { %v3460_v20 = vcvt.s32.f32 %v2948_v40  ;;  %4268 = vmatpush.bf16.msrb.mxu3 %v4115_v56  ;;  %v3464_v41 = vcvt.s32.f32 %v2952_v62  ;;  %v3247_v21 = vunpack.c.3.s8 %v2867_v45  ;;  %v2940_v32 = vunpack.c.2.s8 %v2792_v19 }
 0x295   :  { %v3755_v1 = vcvt.s32.f32 %v3243_v28  ;;  %v2759_v9 = vmul.f32 0.01, %v2727_v25  ;;  %v4107_v6 = vpack.c.bf16 %v3767_v3, %v3763_v63  ;;  %v2944_v37 = vunpack.c.3.s8 %v2792_v19 }
 0x296   :  { %v2519_v13 = vadd.f32 %v2518_v17, %v2504_v31  ;;  %v3956_v42 = vpack.c.bf16 %v3464_v41, %v3460_v20  ;;  %v3759_v50 = vcvt.s32.f32 %v3247_v21  ;;  %v3452_v51 = vcvt.s32.f32 %v2940_v32  ;;  %v2891_v31 = vld [vmem:[#allocation16 + $0x340] sm:$0xff]  ;;  %v2812_v17 = vld [vmem:[#allocation16 + $0xc8] sm:$0xff]  ;;  %v2546_v41 = vpop.f32.mrf.mxu1 }
 0x297   :  { %4308 = vmatpush.bf16.msra.mxu2 %v3964_v44  ;;  %v3235_v22 = vunpack.c.0.s8 %v2867_v45  ;;  %v3456_v26 = vcvt.s32.f32 %v2944_v37  ;;  %v3239_v24 = vunpack.c.1.s8 %v2867_v45  ;;  %vm2735_vm5 = vcmp.gt.f32.partialorder %v6498_v49, 0.0 }
 0x298   :  { %vm2743_vm6 = vcmp.gt.f32.partialorder %v2727_v25, 0.0  ;;  %4269 = vmatpush.bf16.msrb.mxu3 %v4111_v35  ;;  %v4103_v33 = vpack.c.bf16 %v3759_v50, %v3755_v1  ;;  %v2767_v43 = vsel %vm2735_vm5, %v6498_v49, %v2751_v53  ;;  %v3355_v14 = vunpack.c.2.s8 %v2895_v0 }
 0x299   :  { %v3747_v7 = vcvt.s32.f32 %v3235_v22  ;;  %v2775_v23 = vsel %vm2743_vm6, %v2727_v25, %v2759_v9  ;;  %v3952_v58 = vpack.c.bf16 %v3456_v26, %v3452_v51  ;;  %v3751_v10 = vcvt.s32.f32 %v3239_v24  ;;  %v2864_v51 = vld [vmem:[#allocation16 + $0x268] sm:$0xff] }
 0x29a   :  { %v6505_v59 = vpack.c.bf16 %v2775_v23, %v2767_v43  ;;  %v3359_v34 = vunpack.c.3.s8 %v2895_v0  ;;  %v2932_v55 = vunpack.c.0.s8 %v2792_v19  ;;  %v2936_v39 = vunpack.c.1.s8 %v2792_v19  ;;  %v2520_v19 = vpop.f32.mrf.mxu3 }
 0x29b   :  { %4309 = vmatpush.bf16.msra.mxu2 %v3960_v2  ;;  %v3036_v27 = vunpack.c.2.s8 %v2816_v18  ;;  %v4099_v46 = vpack.c.bf16 %v3751_v10, %v3747_v7  ;;  %v3867_v61 = vcvt.s32.f32 %v3355_v14  ;;  %v3040_v52 = vunpack.c.3.s8 %v2816_v18 }
 0x29c   :  { %4259 = vmatmul.bf16.vlgmr.msrb.gmra.mxu2 %v6505_v59  ;;  %v3347_v56 = vunpack.c.0.s8 %v2895_v0  ;;  %4270 = vmatpush.bf16.msrb.mxu3 %v4107_v6  ;;  %v3871_v49 = vcvt.s32.f32 %v3359_v34  ;;  %v3444_v53 = vcvt.s32.f32 %v2932_v55  ;;  %v3448_v29 = vcvt.s32.f32 %v2936_v39 }
 0x29d   :  { %v3548_v60 = vcvt.s32.f32 %v3036_v27  ;;  %v3552_v8 = vcvt.s32.f32 %v3040_v52  ;;  %v3351_v45 = vunpack.c.1.s8 %v2895_v0  ;;  %v2924_v16 = vunpack.c.2.s8 %v2788_v54  ;;  %v2534_v52 = vpop.f32.mrf.mxu0 }
 0x29e   :  { %v3859_v44 = vcvt.s32.f32 %v3347_v56  ;;  %v4159_v15 = vpack.c.bf16 %v3871_v49, %v3867_v61  ;;  %v3948_v48 = vpack.c.bf16 %v3448_v29, %v3444_v53  ;;  %v2928_v38 = vunpack.c.3.s8 %v2788_v54 }
 0x29f   :  { %4310 = vmatpush.bf16.msra.mxu2 %v3956_v42  ;;  %v3028_v40 = vunpack.c.0.s8 %v2816_v18  ;;  %v4000_v35 = vpack.c.bf16 %v3552_v8, %v3548_v60  ;;  %v3863_v63 = vcvt.s32.f32 %v3351_v45  ;;  %v3436_v62 = vcvt.s32.f32 %v2924_v16  ;;  %v2887_v60 = vld [vmem:[#allocation16 + $0x320] sm:$0xff] }
 0x2a0   :  { %v3032_v28 = vunpack.c.1.s8 %v2816_v18  ;;  %4271 = vmatpush.bf16.msrb.mxu3 %v4103_v33  ;;  %v3440_v25 = vcvt.s32.f32 %v2928_v38  ;;  %v2521_v3 = vadd.f32 %v2520_v19, %v2506_v12  ;;  %v2533_v20 = vadd.f32 %v2532_v4, %v2519_v13  ;;  %4279 = vmatpush.bf16.msra.mxu0 %v4159_v15  ;;  %v2808_v12 = vld [vmem:[#allocation16 + $0xa8] sm:$0xff]  ;;  %v2548_v19 = vpop.f32.mrf.mxu1 }
 0x2a1   :  { %v3540_v2 = vcvt.s32.f32 %v3028_v40  ;;  %v4155_v21 = vpack.c.bf16 %v3863_v63, %v3859_v44  ;;  %v2670_v32 = vperm.slane %v6490_v47, 5  ;;  %v2704_v9 = vperm.slane %v6493_v30, 5  ;;  %v2860_v40 = vld [vmem:[#allocation16 + $0x248] sm:$0xff] }
 0x2a2   :  { %v3544_v1 = vcvt.s32.f32 %v3032_v28  ;;  %v3944_v6 = vpack.c.bf16 %v3440_v25, %v3436_v62  ;;  %v2547_v37 = vadd.f32 %v2546_v41, %v2533_v20  ;;  %v3339_v42 = vunpack.c.2.s8 %v2891_v31 }
 0x2a3   :  { %4311 = vmatpush.bf16.msra.mxu2 %v3952_v58  ;;  %v3343_v50 = vunpack.c.3.s8 %v2891_v31  ;;  %v2916_v0 = vunpack.c.0.s8 %v2788_v54  ;;  %v2920_v26 = vunpack.c.1.s8 %v2788_v54  ;;  %v3020_v24 = vunpack.c.2.s8 %v2812_v17 }
 0x2a4   :  { %v3996_v22 = vpack.c.bf16 %v3544_v1, %v3540_v2  ;;  %4272 = vmatpush.bf16.msrb.mxu3 %v4099_v46  ;;  %v2686_v13 = vmul.f32 %v2670_v32, %v2547_v37  ;;  %v3851_v18 = vcvt.s32.f32 %v3339_v42  ;;  %v3024_v7 = vunpack.c.3.s8 %v2812_v17  ;;  %4280 = vmatpush.bf16.msra.mxu0 %v4155_v21 }
 0x2a5   :  { %v3855_v33 = vcvt.s32.f32 %v3343_v50  ;;  %v3428_v43 = vcvt.s32.f32 %v2916_v0  ;;  %v3432_v23 = vcvt.s32.f32 %v2920_v26  ;;  %v3532_v58 = vcvt.s32.f32 %v3020_v24 }
 0x2a6   :  { %v3228_v10 = vunpack.c.2.s8 %v2864_v51  ;;  %v6514_v14 = vadd.f32 %v2704_v9, %v2686_v13  ;;  %v3536_v55 = vcvt.s32.f32 %v3024_v7  ;;  %v3232_v39 = vunpack.c.3.s8 %v2864_v51 }
 0x2a7   :  { %4312 = vmatpush.bf16.msra.mxu2 %v3948_v48  ;;  %v4151_v34 = vpack.c.bf16 %v3855_v33, %v3851_v18  ;;  %v3940_v27 = vpack.c.bf16 %v3432_v23, %v3428_v43  ;;  %v3331_v46 = vunpack.c.0.s8 %v2891_v31  ;;  %v3335_v61 = vunpack.c.1.s8 %v2891_v31  ;;  %v2883_v33 = vld [vmem:[#allocation16 + $0x300] sm:$0xff] }
 0x2a8   :  { %4321 = vmatpush.bf16.msra.mxu3 %v4000_v35  ;;  %v3740_v54 = vcvt.s32.f32 %v3228_v10  ;;  %v6517_v56 = vmul.f32 0.01, %v6514_v14  ;;  %v3992_v49 = vpack.c.bf16 %v3536_v55, %v3532_v58  ;;  %v3744_v53 = vcvt.s32.f32 %v3232_v39  ;;  %v2804_v58 = vld [vmem:[#allocation16 + $0x88] sm:$0xff] }
 0x2a9   :  { %v3012_v29 = vunpack.c.0.s8 %v2812_v17  ;;  %4281 = vmatpush.bf16.msra.mxu0 %v4151_v34  ;;  %v3843_v8 = vcvt.s32.f32 %v3331_v46  ;;  %v3847_v45 = vcvt.s32.f32 %v3335_v61  ;;  %v3016_v44 = vunpack.c.1.s8 %v2812_v17  ;;  %v6527_v61 = vld [vmem:[#allocation16 + $0x228] sm:$0xff] }
 0x2aa   :  { %v3220_v16 = vunpack.c.0.s8 %v2864_v51  ;;  %v4096_v4 = vpack.c.bf16 %v3744_v53, %v3740_v54  ;;  %v3224_v48 = vunpack.c.1.s8 %v2864_v51  ;;  %v2535_v38 = vadd.f32 %v2534_v52, %v2521_v3 }
 0x2ab   :  { %4313 = vmatpush.bf16.msra.mxu2 %v3944_v6  ;;  %v3524_v15 = vcvt.s32.f32 %v3012_v29  ;;  %v4147_v35 = vpack.c.bf16 %v3847_v45, %v3843_v8  ;;  %v3528_v63 = vcvt.s32.f32 %v3016_v44  ;;  %v3323_v28 = vunpack.c.2.s8 %v2887_v60 }
 0x2ac   :  { %4322 = vmatpush.bf16.msra.mxu3 %v3996_v22  ;;  %v3732_v62 = vcvt.s32.f32 %v3220_v16  ;;  %v3736_v31 = vcvt.s32.f32 %v3224_v48  ;;  %v2549_v25 = vadd.f32 %v2548_v19, %v2535_v38  ;;  %v3327_v2 = vunpack.c.3.s8 %v2887_v60 }
 0x2ad   :  { %v3004_v20 = vunpack.c.2.s8 %v2808_v12  ;;  %v3988_v17 = vpack.c.bf16 %v3528_v63, %v3524_v15  ;;  %v3835_v41 = vcvt.s32.f32 %v3323_v28  ;;  %v3008_v21 = vunpack.c.3.s8 %v2808_v12  ;;  %4282 = vmatpush.bf16.msra.mxu0 %v4147_v35 }
 0x2ae   :  { %v3212_v1 = vunpack.c.2.s8 %v2860_v40  ;;  %v4092_v6 = vpack.c.bf16 %v3736_v31, %v3732_v62  ;;  %v2694_v3 = vmul.f32 %v2670_v32, %v2549_v25  ;;  %v3839_v37 = vcvt.s32.f32 %v3327_v2 }
 0x2af   :  { %4314 = vmatpush.bf16.msra.mxu2 %v3940_v27  ;;  %v3516_v42 = vcvt.s32.f32 %v3004_v20  ;;  %v3520_v50 = vcvt.s32.f32 %v3008_v21  ;;  %v3216_v51 = vunpack.c.3.s8 %v2860_v40  ;;  %v3315_v0 = vunpack.c.0.s8 %v2887_v60  ;;  %v2911_v21 = vld [vmem:[#allocation16 + $0x3e0] sm:$0xff] }
 0x2b0   :  { %4323 = vmatpush.bf16.msra.mxu3 %v3992_v49  ;;  %v3724_v22 = vcvt.s32.f32 %v3212_v1  ;;  %v6524_v26 = vadd.f32 %v2704_v9, %v2694_v3  ;;  %v4143_v24 = vpack.c.bf16 %v3839_v37, %v3835_v41  ;;  %v3319_v13 = vunpack.c.1.s8 %v2887_v60  ;;  %v2560_v60 = vpop.f32.mrf.mxu2  ;;  %v2832_v3 = vld [vmem:[#allocation16 + $0x168] sm:$0xff] }
 0x2b1   :  { %v2996_v18 = vunpack.c.0.s8 %v2808_v12  ;;  %v3984_v7 = vpack.c.bf16 %v3520_v50, %v3516_v42  ;;  %v3728_v32 = vcvt.s32.f32 %v3216_v51  ;;  %v3827_v43 = vcvt.s32.f32 %v3315_v0 }
 0x2b2   :  { %4315 = vmatmul.bf16.vlgmr.msra.gmra.mxu2 %v6467_v36  ;;  %v3000_v23 = vunpack.c.1.s8 %v2808_v12  ;;  %v2760_v10 = vmul.f32 0.01, %v6524_v26  ;;  %4283 = vmatpush.bf16.msra.mxu0 %v4143_v24  ;;  %v3831_v34 = vcvt.s32.f32 %v3319_v13  ;;  %v3204_v39 = vunpack.c.0.s8 %v2860_v40  ;;  %v2574_v12 = vpop.f32.mrf.mxu3 }
 0x2b3   :  { %4363 = vmatpush.bf16.msrb.mxu2 %v4096_v4  ;;  %v3508_v55 = vcvt.s32.f32 %v2996_v18  ;;  %v4088_v27 = vpack.c.bf16 %v3728_v32, %v3724_v22  ;;  %v3208_v54 = vunpack.c.1.s8 %v2860_v40  ;;  %v3307_v46 = vunpack.c.2.s8 %v2883_v33  ;;  %v2880_v22 = vld [vmem:[#allocation16 + $0x2e8] sm:$0xff] }
 0x2b4   :  { %4324 = vmatpush.bf16.msra.mxu3 %v3988_v17  ;;  %v3512_v9 = vcvt.s32.f32 %v3000_v23  ;;  %v4139_v52 = vpack.c.bf16 %v3831_v34, %v3827_v43  ;;  %v3716_v49 = vcvt.s32.f32 %v3204_v39  ;;  %v3311_v53 = vunpack.c.3.s8 %v2883_v33  ;;  %v6543_v39 = vld [vmem:[#allocation16 + $0x208] sm:$0xff] }
 0x2b5   :  { %v2988_v29 = vunpack.c.2.s8 %v2804_v58  ;;  %v3720_v45 = vcvt.s32.f32 %v3208_v54  ;;  %v3819_v44 = vcvt.s32.f32 %v3307_v46  ;;  %v2992_v16 = vunpack.c.3.s8 %v2804_v58 }
 0x2b6   :  { %v3980_v8 = vpack.c.bf16 %v3512_v9, %v3508_v55  ;;  %4284 = vmatpush.bf16.msra.mxu0 %v4139_v52  ;;  %v3823_v4 = vcvt.s32.f32 %v3311_v53  ;;  %v3196_v48 = vunpack.c.2.s8 %v6527_v61  ;;  %v3200_v38 = vunpack.c.3.s8 %v6527_v61 }
 0x2b7   :  { %4364 = vmatpush.bf16.msrb.mxu2 %v4092_v6  ;;  %v3500_v15 = vcvt.s32.f32 %v2988_v29  ;;  %v4084_v40 = vpack.c.bf16 %v3720_v45, %v3716_v49  ;;  %v3504_v19 = vcvt.s32.f32 %v2992_v16  ;;  %v6531_v35 = vadd.f32 %v2574_v12, %v2560_v60  ;;  %v2588_v16 = vpop.f32.mrf.mxu0 }
 0x2b8   :  { %4325 = vmatpush.bf16.msra.mxu3 %v3984_v7  ;;  %v3299_v63 = vunpack.c.0.s8 %v2883_v33  ;;  %v4135_v62 = vpack.c.bf16 %v3823_v4, %v3819_v44  ;;  %v3708_v28 = vcvt.s32.f32 %v3196_v48  ;;  %v3712_v31 = vcvt.s32.f32 %v3200_v38  ;;  %v2562_v44 = vpop.f32.mrf.mxu2 }
 0x2b9   :  { %v3303_v25 = vunpack.c.1.s8 %v2883_v33  ;;  %v3976_v2 = vpack.c.bf16 %v3504_v19, %v3500_v15  ;;  %v2980_v17 = vunpack.c.0.s8 %v2804_v58  ;;  %v2984_v41 = vunpack.c.1.s8 %v2804_v58 }
 0x2ba   :  { %v3811_v20 = vcvt.s32.f32 %v3299_v63  ;;  %4285 = vmatpush.bf16.msra.mxu0 %v4135_v62  ;;  %v4080_v1 = vpack.c.bf16 %v3712_v31, %v3708_v28  ;;  %vm2736_vm7 = vcmp.gt.f32.partialorder %v6514_v14, 0.0  ;;  %vm2744_vm8 = vcmp.gt.f32.partialorder %v6524_v26, 0.0  ;;  %v2576_v38 = vpop.f32.mrf.mxu3  ;;  %v2907_v28 = vld [vmem:[#allocation16 + $0x3c0] sm:$0xff] }
 0x2bb   :  { %4365 = vmatpush.bf16.msrb.mxu2 %v4088_v27  ;;  %v3815_v6 = vcvt.s32.f32 %v3303_v25  ;;  %v3492_v37 = vcvt.s32.f32 %v2980_v17  ;;  %v3496_v42 = vcvt.s32.f32 %v2984_v41  ;;  %v2768_v50 = vsel %vm2736_vm7, %v6514_v14, %v6517_v56  ;;  %v2828_v17 = vld [vmem:[#allocation16 + $0x148] sm:$0xff]  ;;  %v2602_v41 = vpop.f32.mrf.mxu1 }
 0x2bc   :  { %4326 = vmatpush.bf16.msra.mxu3 %v3980_v8  ;;  %v2776_v51 = vsel %vm2744_vm8, %v6524_v26, %v2760_v10  ;;  %v3419_v13 = vunpack.c.2.s8 %v2911_v21  ;;  %v3423_v18 = vunpack.c.3.s8 %v2911_v21  ;;  %v3100_v7 = vunpack.c.2.s8 %v2832_v3 }
 0x2bd   :  { %v4131_v0 = vpack.c.bf16 %v3815_v6, %v3811_v20  ;;  %v6538_v24 = vpack.c.bf16 %v2776_v51, %v2768_v50  ;;  %v3972_v33 = vpack.c.bf16 %v3496_v42, %v3492_v37  ;;  %v3104_v32 = vunpack.c.3.s8 %v2832_v3 }
 0x2be   :  { %v3188_v43 = vunpack.c.0.s8 %v6527_v61  ;;  %v3931_v23 = vcvt.s32.f32 %v3419_v13  ;;  %v3935_v14 = vcvt.s32.f32 %v3423_v18  ;;  %v3192_v56 = vunpack.c.1.s8 %v6527_v61 }
 0x2bf   :  { %4366 = vmatpush.bf16.msrb.mxu2 %v4084_v40  ;;  %4286 = vmatpush.bf16.msra.mxu0 %v4131_v0  ;;  %v3292_v26 = vunpack.c.2.s8 %v2880_v22  ;;  %v3612_v58 = vcvt.s32.f32 %v3100_v7  ;;  %v3616_v10 = vcvt.s32.f32 %v3104_v32  ;;  %v3296_v55 = vunpack.c.3.s8 %v2880_v22 }
 0x2c0   :  { %4327 = vmatpush.bf16.msra.mxu3 %v3976_v2  ;;  %v3700_v34 = vcvt.s32.f32 %v3188_v43  ;;  %v4191_v27 = vpack.c.bf16 %v3935_v14, %v3931_v23  ;;  %v3704_v9 = vcvt.s32.f32 %v3192_v56  ;;  %v3411_v46 = vunpack.c.0.s8 %v2911_v21  ;;  %v2801_v23 = vld [vmem:[#allocation16 + $0x70] sm:$0xff] }
 0x2c1   :  { %4273 = vmatmul.bf16.vlgmr.msrb.gmra.mxu3 %v6538_v24  ;;  %v3804_v54 = vcvt.s32.f32 %v3292_v26  ;;  %v4032_v52 = vpack.c.bf16 %v3616_v10, %v3612_v58  ;;  %v3808_v49 = vcvt.s32.f32 %v3296_v55  ;;  %v3415_v53 = vunpack.c.1.s8 %v2911_v21 }
 0x2c2   :  { %v3092_v29 = vunpack.c.0.s8 %v2832_v3  ;;  %4293 = vmatpush.bf16.msra.mxu1 %v4191_v27  ;;  %v4076_v60 = vpack.c.bf16 %v3704_v9, %v3700_v34  ;;  %v3923_v8 = vcvt.s32.f32 %v3411_v46  ;;  %v3096_v61 = vunpack.c.1.s8 %v2832_v3 }
 0x2c3   :  { %4367 = vmatpush.bf16.msrb.mxu2 %v4080_v1  ;;  %v3180_v45 = vunpack.c.2.s8 %v6543_v39  ;;  %4335 = vmatpush.bf16.msrb.mxu0 %v4032_v52  ;;  %v4128_v12 = vpack.c.bf16 %v3808_v49, %v3804_v54  ;;  %v3927_v4 = vcvt.s32.f32 %v3415_v53  ;;  %v3184_v48 = vunpack.c.3.s8 %v6543_v39 }
 0x2c4   :  { %4328 = vmatpush.bf16.msra.mxu3 %v3972_v33  ;;  %v3604_v15 = vcvt.s32.f32 %v3092_v29  ;;  %v3608_v40 = vcvt.s32.f32 %v3096_v61  ;;  %v3284_v63 = vunpack.c.0.s8 %v2880_v22  ;;  %v3288_v62 = vunpack.c.1.s8 %v2880_v22  ;;  %v2876_v22 = vld [vmem:[#allocation16 + $0x2c8] sm:$0xff] }
 0x2c5   :  { %v3692_v19 = vcvt.s32.f32 %v3180_v45  ;;  %v4187_v31 = vpack.c.bf16 %v3927_v4, %v3923_v8  ;;  %v3696_v25 = vcvt.s32.f32 %v3184_v48  ;;  %v6547_v2 = vadd.f32 %v2576_v38, %v2562_v44 }
 0x2c6   :  { %v2589_v20 = vadd.f32 %v2588_v16, %v6531_v35  ;;  %v4028_v21 = vpack.c.bf16 %v3608_v40, %v3604_v15  ;;  %v3796_v1 = vcvt.s32.f32 %v3284_v63  ;;  %v3800_v6 = vcvt.s32.f32 %v3288_v62  ;;  %v2590_v40 = vpop.f32.mrf.mxu0 }
 0x2c7   :  { %4368 = vmatpush.bf16.msrb.mxu2 %v4076_v60  ;;  %v2671_v3 = vperm.slane %v6490_v47, 6  ;;  %4294 = vmatpush.bf16.msra.mxu1 %v4187_v31  ;;  %v4072_v37 = vpack.c.bf16 %v3696_v25, %v3692_v19  ;;  %v2705_v50 = vperm.slane %v6493_v30, 6  ;;  %v3403_v51 = vunpack.c.2.s8 %v2907_v28  ;;  %v2903_v25 = vld [vmem:[#allocation16 + $0x3a0] sm:$0xff] }
 0x2c8   :  { %4377 = vmatpush.bf16.msrb.mxu3 %v4128_v12  ;;  %v2603_v42 = vadd.f32 %v2602_v41, %v2589_v20  ;;  %4336 = vmatpush.bf16.msrb.mxu0 %v4028_v21  ;;  %v4124_v0 = vpack.c.bf16 %v3800_v6, %v3796_v1  ;;  %v3407_v13 = vunpack.c.3.s8 %v2907_v28  ;;  %v3084_v18 = vunpack.c.2.s8 %v2828_v17  ;;  %v6564_v1 = vld [vmem:[#allocation16 + $0x2a8] sm:$0xff] }
 0x2c9   :  { %v3088_v33 = vunpack.c.3.s8 %v2828_v17  ;;  %v3915_v7 = vcvt.s32.f32 %v3403_v51  ;;  %v3172_v32 = vunpack.c.0.s8 %v6543_v39  ;;  %v3176_v43 = vunpack.c.1.s8 %v6543_v39 }
 0x2ca   :  { %v2687_v35 = vmul.f32 %v2671_v3, %v2603_v42  ;;  %v3919_v14 = vcvt.s32.f32 %v3407_v13  ;;  %v3596_v56 = vcvt.s32.f32 %v3084_v18  ;;  %v3276_v58 = vunpack.c.2.s8 %v2876_v22 }
 0x2cb   :  { %4369 = vmatpush.bf16.msrb.mxu2 %v4072_v37  ;;  %v3600_v26 = vcvt.s32.f32 %v3088_v33  ;;  %v3684_v34 = vcvt.s32.f32 %v3172_v32  ;;  %v3688_v55 = vcvt.s32.f32 %v3176_v43  ;;  %v3280_v27 = vunpack.c.3.s8 %v2876_v22 }
 0x2cc   :  { %4378 = vmatpush.bf16.msrb.mxu3 %v4124_v0  ;;  %v2721_v10 = vadd.f32 %v2705_v50, %v2687_v35  ;;  %v4183_v9 = vpack.c.bf16 %v3919_v14, %v3915_v7  ;;  %v3788_v46 = vcvt.s32.f32 %v3276_v58  ;;  %v2973_v52 = vunpack.c.2.s8 %v2801_v23  ;;  %v2604_v0 = vpop.f32.mrf.mxu1 }
 0x2cd   :  { %v4024_v54 = vpack.c.bf16 %v3600_v26, %v3596_v56  ;;  %v4068_v53 = vpack.c.bf16 %v3688_v55, %v3684_v34  ;;  %v3792_v39 = vcvt.s32.f32 %v3280_v27  ;;  %v2977_v29 = vunpack.c.3.s8 %v2801_v23 }
 0x2ce   :  { %vm2737_vm9 = vcmp.gt.f32.partialorder %v2721_v10, 0.0  ;;  %v2753_v49 = vmul.f32 0.01, %v2721_v10  ;;  %4295 = vmatpush.bf16.msra.mxu1 %v4183_v9  ;;  %v3485_v60 = vcvt.s32.f32 %v2973_v52  ;;  %v3395_v8 = vunpack.c.0.s8 %v2907_v28 }
 0x2cf   :  { %4337 = vmatpush.bf16.msrb.mxu0 %v4024_v54  ;;  %v3399_v61 = vunpack.c.1.s8 %v2907_v28  ;;  %4370 = vmatpush.bf16.msrb.mxu2 %v4068_v53  ;;  %v4120_v44 = vpack.c.bf16 %v3792_v39, %v3788_v46  ;;  %v3076_v16 = vunpack.c.0.s8 %v2828_v17  ;;  %v3080_v12 = vunpack.c.1.s8 %v2828_v17  ;;  %v6561_v28 = vld [vmem:[#allocation16 + $0x128] sm:$0xff] }
 0x2d0   :  { %v6558_v45 = vsel %vm2737_vm9, %v2721_v10, %v2753_v49  ;;  %v3489_v4 = vcvt.s32.f32 %v2977_v29  ;;  %v3907_v15 = vcvt.s32.f32 %v3395_v8  ;;  %v3268_v38 = vunpack.c.0.s8 %v2876_v22 }
 0x2d1   :  { %4329 = vmatmul.bf16.vlgmr.msra.gmra.mxu3 %v6442_v11  ;;  %v3911_v48 = vcvt.s32.f32 %v3399_v61  ;;  %v3588_v19 = vcvt.s32.f32 %v3076_v16  ;;  %v3592_v63 = vcvt.s32.f32 %v3080_v12  ;;  %v3272_v62 = vunpack.c.1.s8 %v2876_v22  ;;  %v2899_v16 = vld [vmem:[#allocation16 + $0x380] sm:$0xff] }
 0x2d2   :  { %4379 = vmatpush.bf16.msrb.mxu3 %v4120_v44  ;;  %v2965_v31 = vunpack.c.0.s8 %v2801_v23  ;;  %v3969_v20 = vpack.c.bf16 %v3489_v4, %v3485_v60  ;;  %4371 = vmatmul.bf16.vlgmr.msrb.gmra.mxu2 %v6505_v59  ;;  %v3780_v17 = vcvt.s32.f32 %v3268_v38  ;;  %v2969_v21 = vunpack.c.1.s8 %v2801_v23  ;;  %v2797_v23 = vld [vmem:[#allocation16 + $0x50] sm:$0xff] }
 0x2d3   :  { %v4179_v41 = vpack.c.bf16 %v3911_v48, %v3907_v15  ;;  %v4020_v6 = vpack.c.bf16 %v3592_v63, %v3588_v19  ;;  %v3784_v37 = vcvt.s32.f32 %v3272_v62  ;;  %v2591_v51 = vadd.f32 %v2590_v40, %v6547_v2  ;;  %v2820_v15 = vld [vmem:[#allocation16 + $0x108] sm:$0xff] }
 0x2d4   :  { %v3477_v42 = vcvt.s32.f32 %v2965_v31  ;;  %4419 = vmatpush.bf16.msra.mxu2 %v3969_v20  ;;  %v3481_v22 = vcvt.s32.f32 %v2969_v21  ;;  %v3387_v13 = vunpack.c.2.s8 %v2903_v25  ;;  %v3391_v18 = vunpack.c.3.s8 %v2903_v25  ;;  %v2868_v20 = vld [vmem:[#allocation16 + $0x288] sm:$0xff] }
 0x2d5   :  { %4296 = vmatpush.bf16.msra.mxu1 %v4179_v41  ;;  %v3068_v33 = vunpack.c.2.s8 %v6561_v28  ;;  %4338 = vmatpush.bf16.msrb.mxu0 %v4020_v6  ;;  %v4116_v35 = vpack.c.bf16 %v3784_v37, %v3780_v17  ;;  %v2605_v7 = vadd.f32 %v2604_v0, %v2591_v51  ;;  %v3072_v32 = vunpack.c.3.s8 %v6561_v28  ;;  %v6579_v6 = vld [vmem:[#allocation16 + $0x30] sm:$0xff] }
 0x2d6   :  { %v3260_v43 = vunpack.c.2.s8 %v6564_v1  ;;  %v3965_v14 = vpack.c.bf16 %v3481_v22, %v3477_v42  ;;  %v3899_v56 = vcvt.s32.f32 %v3387_v13  ;;  %v3903_v26 = vcvt.s32.f32 %v3391_v18  ;;  %v2616_v22 = vpop.f32.mrf.mxu2 }
 0x2d7   :  { %v3580_v2 = vcvt.s32.f32 %v3068_v33  ;;  %4380 = vmatpush.bf16.msrb.mxu3 %v4116_v35  ;;  %v2695_v58 = vmul.f32 %v2671_v3, %v2605_v7  ;;  %v3584_v10 = vcvt.s32.f32 %v3072_v32  ;;  %v3264_v34 = vunpack.c.3.s8 %v6564_v1  ;;  %v2630_v35 = vpop.f32.mrf.mxu3 }
 0x2d8   :  { %v3772_v55 = vcvt.s32.f32 %v3260_v43  ;;  %4420 = vmatpush.bf16.msra.mxu2 %v3965_v14  ;;  %v4175_v27 = vpack.c.bf16 %v3903_v26, %v3899_v56  ;;  %v2957_v9 = vunpack.c.2.s8 %v2797_v23  ;;  %v2961_v54 = vunpack.c.3.s8 %v2797_v23 }
 0x2d9   :  { %v3379_v46 = vunpack.c.0.s8 %v2903_v25  ;;  %v2729_v52 = vadd.f32 %v2705_v50, %v2695_v58  ;;  %v4016_v49 = vpack.c.bf16 %v3584_v10, %v3580_v2  ;;  %v3776_v53 = vcvt.s32.f32 %v3264_v34 }
 0x2da   :  { %v3383_v39 = vunpack.c.1.s8 %v2903_v25  ;;  %4297 = vmatpush.bf16.msra.mxu1 %v4175_v27  ;;  %v3469_v29 = vcvt.s32.f32 %v2957_v9  ;;  %v3473_v60 = vcvt.s32.f32 %v2961_v54  ;;  %v3060_v3 = vunpack.c.0.s8 %v6561_v28 }
 0x2db   :  { %v3891_v47 = vcvt.s32.f32 %v3379_v46  ;;  %vm2745_vm10 = vcmp.gt.f32.partialorder %v2729_v52, 0.0  ;;  %v2761_v8 = vmul.f32 0.01, %v2729_v52  ;;  %4339 = vmatpush.bf16.msrb.mxu0 %v4016_v49  ;;  %v4112_v61 = vpack.c.bf16 %v3776_v53, %v3772_v55 }
 0x2dc   :  { %v3895_v44 = vcvt.s32.f32 %v3383_v39  ;;  %v3961_v12 = vpack.c.bf16 %v3473_v60, %v3469_v29  ;;  %v3064_v4 = vunpack.c.1.s8 %v6561_v28  ;;  %v3572_v30 = vcvt.s32.f32 %v3060_v3  ;;  %v2896_v60 = vld [vmem:[#allocation16 + $0x368] sm:$0xff] }
 0x2dd   :  { %v3252_v50 = vunpack.c.0.s8 %v6564_v1  ;;  %v2777_v48 = vsel %vm2745_vm10, %v2729_v52, %v2761_v8  ;;  %4381 = vmatpush.bf16.msrb.mxu3 %v4112_v61  ;;  %v3256_v40 = vunpack.c.1.s8 %v6564_v1  ;;  %v2949_v19 = vunpack.c.0.s8 %v2797_v23  ;;  %v2848_v52 = vld [vmem:[#allocation16 + $0x1e8] sm:$0xff] }
 0x2de   :  { %v4171_v38 = vpack.c.bf16 %v3895_v44, %v3891_v47  ;;  %4421 = vmatpush.bf16.msra.mxu2 %v3961_v12  ;;  %v3576_v63 = vcvt.s32.f32 %v3064_v4  ;;  %v2953_v31 = vunpack.c.1.s8 %v2797_v23  ;;  %v3371_v25 = vunpack.c.2.s8 %v2899_v16 }
 0x2df   :  { %v3764_v62 = vcvt.s32.f32 %v3252_v50  ;;  %v3768_v41 = vcvt.s32.f32 %v3256_v40  ;;  %v3461_v17 = vcvt.s32.f32 %v2949_v19  ;;  %v3375_v28 = vunpack.c.3.s8 %v2899_v16 }
 0x2e0   :  { %4298 = vmatpush.bf16.msra.mxu1 %v4171_v38  ;;  %v3052_v21 = vunpack.c.2.s8 %v2820_v15  ;;  %v4012_v37 = vpack.c.bf16 %v3576_v63, %v3572_v30  ;;  %v3465_v42 = vcvt.s32.f32 %v2953_v31  ;;  %v3883_v51 = vcvt.s32.f32 %v3371_v25  ;;  %v2817_v30 = vld [vmem:[#allocation16 + $0xf0] sm:$0xff] }
 0x2e1   :  { %v3056_v0 = vunpack.c.3.s8 %v2820_v15  ;;  %v4108_v1 = vpack.c.bf16 %v3768_v41, %v3764_v62  ;;  %v3887_v13 = vcvt.s32.f32 %v3375_v28  ;;  %v3244_v33 = vunpack.c.2.s8 %v2868_v20 }
 0x2e2   :  { %v3564_v18 = vcvt.s32.f32 %v3052_v21  ;;  %4340 = vmatpush.bf16.msrb.mxu0 %v4012_v37  ;;  %v3957_v7 = vpack.c.bf16 %v3465_v42, %v3461_v17  ;;  %v3248_v43 = vunpack.c.3.s8 %v2868_v20  ;;  %v2941_v23 = vunpack.c.2.s8 %v6579_v6  ;;  %v6591_v37 = vld [vmem:[#allocation16 + $0x10] sm:$0xff] }
 0x2e3   :  { %v3568_v32 = vcvt.s32.f32 %v3056_v0  ;;  %4382 = vmatpush.bf16.msrb.mxu3 %v4108_v1  ;;  %v4167_v14 = vpack.c.bf16 %v3887_v13, %v3883_v51  ;;  %v3756_v56 = vcvt.s32.f32 %v3244_v33  ;;  %v2945_v26 = vunpack.c.3.s8 %v6579_v6 }
 0x2e4   :  { %v6583_v2 = vadd.f32 %v2630_v35, %v2616_v22  ;;  %4422 = vmatpush.bf16.msra.mxu2 %v3957_v7  ;;  %v3760_v10 = vcvt.s32.f32 %v3248_v43  ;;  %v3453_v34 = vcvt.s32.f32 %v2941_v23  ;;  %v3363_v55 = vunpack.c.0.s8 %v2899_v16  ;;  %v2644_v43 = vpop.f32.mrf.mxu0 }
 0x2e5   :  { %v4008_v58 = vpack.c.bf16 %v3568_v32, %v3564_v18  ;;  %4299 = vmatpush.bf16.msra.mxu1 %v4167_v14  ;;  %v3457_v27 = vcvt.s32.f32 %v2945_v26  ;;  %v3367_v9 = vunpack.c.1.s8 %v2899_v16  ;;  %v3044_v54 = vunpack.c.0.s8 %v2820_v15 }
 0x2e6   :  { %v3048_v46 = vunpack.c.1.s8 %v2820_v15  ;;  %v4104_v49 = vpack.c.bf16 %v3760_v10, %v3756_v56  ;;  %v3875_v53 = vcvt.s32.f32 %v3363_v55  ;;  %v3236_v39 = vunpack.c.0.s8 %v2868_v20 }
 0x2e7   :  { %4341 = vmatpush.bf16.msrb.mxu0 %v4008_v58  ;;  %v3240_v29 = vunpack.c.1.s8 %v2868_v20  ;;  %v3953_v47 = vpack.c.bf16 %v3457_v27, %v3453_v34  ;;  %v3879_v3 = vcvt.s32.f32 %v3367_v9  ;;  %v3556_v8 = vcvt.s32.f32 %v3044_v54  ;;  %v6596_v27 = vld [vmem:[#allocation16 + $0x1c8] sm:$0xff] }
 0x2e8   :  { %v3560_v61 = vcvt.s32.f32 %v3048_v46  ;;  %4383 = vmatpush.bf16.msrb.mxu3 %v4104_v49  ;;  %v3748_v44 = vcvt.s32.f32 %v3236_v39  ;;  %v6586_v4 = vpack.c.bf16 %v2777_v48, %v6558_v45  ;;  %v3164_v16 = vunpack.c.2.s8 %v2848_v52  ;;  %v2658_v49 = vpop.f32.mrf.mxu1 }
 0x2e9   :  { %v3752_v12 = vcvt.s32.f32 %v3240_v29  ;;  %4423 = vmatpush.bf16.msra.mxu2 %v3953_v47  ;;  %v4163_v50 = vpack.c.bf16 %v3879_v3, %v3875_v53  ;;  %v3168_v38 = vunpack.c.3.s8 %v2848_v52  ;;  %v3356_v40 = vunpack.c.2.s8 %v2896_v60  ;;  %v6601_v29 = vld [vmem:[#allocation13] sm:$0xff]  ;;  %v6604_v47 = vld [vmem:[#allocation14] sm:$0xff] }
 0x2ea   :  { %v4004_v15 = vpack.c.bf16 %v3560_v61, %v3556_v8  ;;  %4287 = vmatmul.bf16.vlgmr.msra.gmra.mxu0 %v6586_v4  ;;  %v3676_v63 = vcvt.s32.f32 %v3164_v16  ;;  %v3360_v62 = vunpack.c.3.s8 %v2896_v60  ;;  %v2933_v31 = vunpack.c.0.s8 %v6579_v6 }
 0x2eb   :  { %v4100_v19 = vpack.c.bf16 %v3752_v12, %v3748_v44  ;;  %4300 = vmatpush.bf16.msra.mxu1 %v4163_v50  ;;  %v3680_v25 = vcvt.s32.f32 %v3168_v38  ;;  %v3868_v20 = vcvt.s32.f32 %v3356_v40  ;;  %v2937_v45 = vunpack.c.1.s8 %v6579_v6  ;;  %v6609_v12 = vld [vmem:[#allocation16 + $0xd0] sm:$0xff] }
 0x2ec   :  { %4342 = vmatpush.bf16.msrb.mxu0 %v4004_v15  ;;  %v3037_v48 = vunpack.c.2.s8 %v2817_v30  ;;  %v3872_v41 = vcvt.s32.f32 %v3360_v62  ;;  %v3445_v17 = vcvt.s32.f32 %v2933_v31  ;;  %v3041_v28 = vunpack.c.3.s8 %v2817_v30  ;;  %v2865_v62 = vld [vmem:[#allocation16 + $0x270] sm:$0xff]  ;;  %v2618_v31 = vpop.f32.mrf.mxu2 }
 0x2ed   :  { %4384 = vmatpush.bf16.msrb.mxu3 %v4100_v19  ;;  %v3156_v21 = vunpack.c.0.s8 %v2848_v52  ;;  %v4064_v42 = vpack.c.bf16 %v3680_v25, %v3676_v63  ;;  %v3449_v51 = vcvt.s32.f32 %v2937_v45  ;;  %v3160_v22 = vunpack.c.1.s8 %v2848_v52  ;;  %v6599_v52 = vld [vmem:[#allocation16 + $0x348] sm:$0xff] }
 0x2ee   :  { %v3549_v0 = vcvt.s32.f32 %v3037_v48  ;;  %v4160_v1 = vpack.c.bf16 %v3872_v41, %v3868_v20  ;;  %v3553_v13 = vcvt.s32.f32 %v3041_v28  ;;  %v3348_v33 = vunpack.c.0.s8 %v2896_v60 }
 0x2ef   :  { %v3668_v18 = vcvt.s32.f32 %v3156_v21  ;;  %4349 = vmatpush.bf16.msrb.mxu1 %v4064_v42  ;;  %v3949_v35 = vpack.c.bf16 %v3449_v51, %v3445_v17  ;;  %v3672_v6 = vcvt.s32.f32 %v3160_v22  ;;  %v3352_v7 = vunpack.c.1.s8 %v2896_v60  ;;  %v2632_v42 = vpop.f32.mrf.mxu3 }
 0x2f0   :  { %4385 = vmatmul.bf16.vlgmr.msrb.gmra.mxu3 %v6538_v24  ;;  %v2925_v32 = vunpack.c.2.s8 %v6591_v37  ;;  %4391 = vmatpush.bf16.msra.mxu0 %v4160_v1  ;;  %v4001_v23 = vpack.c.bf16 %v3553_v13, %v3549_v0  ;;  %v3860_v14 = vcvt.s32.f32 %v3348_v33  ;;  %v2929_v56 = vunpack.c.3.s8 %v6591_v37 }
 0x2f1   :  { %v3029_v26 = vunpack.c.0.s8 %v2817_v30  ;;  %4424 = vmatpush.bf16.msra.mxu2 %v3949_v35  ;;  %v4060_v58 = vpack.c.bf16 %v3672_v6, %v3668_v18  ;;  %v3864_v10 = vcvt.s32.f32 %v3352_v7  ;;  %v3033_v55 = vunpack.c.1.s8 %v2817_v30 }
 0x2f2   :  { %v3437_v34 = vcvt.s32.f32 %v2925_v32  ;;  %4433 = vmatpush.bf16.msra.mxu3 %v4001_v23  ;;  %v3441_v9 = vcvt.s32.f32 %v2929_v56  ;;  %v2645_v46 = vadd.f32 %v2644_v43, %v6583_v2  ;;  %v2672_v60 = vperm.slane %v6601_v29, 7  ;;  %v2646_v56 = vpop.f32.mrf.mxu0 }
 0x2f3   :  { %v3541_v54 = vcvt.s32.f32 %v3029_v26  ;;  %4350 = vmatpush.bf16.msrb.mxu1 %v4060_v58  ;;  %v4156_v53 = vpack.c.bf16 %v3864_v10, %v3860_v14  ;;  %v3545_v39 = vcvt.s32.f32 %v3033_v55  ;;  %v2706_v3 = vperm.slane %v6604_v47, 7  ;;  %v2840_v55 = vld [vmem:[#allocation16 + $0x1a8] sm:$0xff] }
 0x2f4   :  { %v3945_v8 = vpack.c.bf16 %v3441_v9, %v3437_v34  ;;  %v2659_v61 = vadd.f32 %v2658_v49, %v2645_v46  ;;  %v3148_v44 = vunpack.c.2.s8 %v6596_v27  ;;  %v3152_v2 = vunpack.c.3.s8 %v6596_v27  ;;  %v2888_v49 = vld [vmem:[#allocation16 + $0x328] sm:$0xff] }
 0x2f5   :  { %4392 = vmatpush.bf16.msra.mxu0 %v4156_v53  ;;  %v3997_v16 = vpack.c.bf16 %v3545_v39, %v3541_v54  ;;  %v3340_v30 = vunpack.c.2.s8 %v6599_v52  ;;  %v3344_v50 = vunpack.c.3.s8 %v6599_v52  ;;  %v2917_v15 = vunpack.c.0.s8 %v6591_v37 }
 0x2f6   :  { %4425 = vmatpush.bf16.msra.mxu2 %v3945_v8  ;;  %v2688_v38 = vmul.f32 %v2672_v60, %v2659_v61  ;;  %v3660_v40 = vcvt.s32.f32 %v3148_v44  ;;  %v3664_v19 = vcvt.s32.f32 %v3152_v2  ;;  %v2921_v63 = vunpack.c.1.s8 %v6591_v37  ;;  %v2660_v44 = vpop.f32.mrf.mxu1 }
 0x2f7   :  { %4434 = vmatpush.bf16.msra.mxu3 %v3997_v16  ;;  %v3852_v25 = vcvt.s32.f32 %v3340_v30  ;;  %v3856_v20 = vcvt.s32.f32 %v3344_v50  ;;  %v3429_v45 = vcvt.s32.f32 %v2917_v15  ;;  %v3021_v48 = vunpack.c.2.s8 %v6609_v12 }
 0x2f8   :  { %v6620_v41 = vadd.f32 %v2706_v3, %v2688_v38  ;;  %v4056_v17 = vpack.c.bf16 %v3664_v19, %v3660_v40  ;;  %v3433_v28 = vcvt.s32.f32 %v2921_v63  ;;  %v3025_v21 = vunpack.c.3.s8 %v6609_v12  ;;  %v2861_v19 = vld [vmem:[#allocation16 + $0x250] sm:$0xff] }
 0x2f9   :  { %v4152_v51 = vpack.c.bf16 %v3856_v20, %v3852_v25  ;;  %v3533_v0 = vcvt.s32.f32 %v3021_v48  ;;  %v3229_v37 = vunpack.c.2.s8 %v2865_v62  ;;  %v3233_v22 = vunpack.c.3.s8 %v2865_v62 }
 0x2fa   :  { %v2633_v1 = vadd.f32 %v2632_v42, %v2618_v31  ;;  %4351 = vmatpush.bf16.msrb.mxu1 %v4056_v17  ;;  %v3941_v13 = vpack.c.bf16 %v3433_v28, %v3429_v45  ;;  %v3537_v18 = vcvt.s32.f32 %v3025_v21  ;;  %4343 = vmatmul.bf16.vlgmr.msrb.gmra.mxu0 %v6482_v5  ;;  %v3140_v6 = vunpack.c.0.s8 %v6596_v27 }
 0x2fb   :  { %4393 = vmatpush.bf16.msra.mxu0 %v4152_v51  ;;  %v3741_v33 = vcvt.s32.f32 %v3229_v37  ;;  %v3745_v35 = vcvt.s32.f32 %v3233_v22  ;;  %v3144_v7 = vunpack.c.1.s8 %v6596_v27  ;;  %vm2738_vm11 = vcmp.gt.f32.partialorder %v6620_v41, 0.0 }
 0x2fc   :  { %v2754_v32 = vmul.f32 0.01, %v6620_v41  ;;  %4426 = vmatpush.bf16.msra.mxu2 %v3941_v13  ;;  %v3993_v43 = vpack.c.bf16 %v3537_v18, %v3533_v0  ;;  %v3332_v23 = vunpack.c.0.s8 %v6599_v52  ;;  %v3336_v14 = vunpack.c.1.s8 %v6599_v52  ;;  %v2809_v52 = vld [vmem:[#allocation16 + $0xb0] sm:$0xff] }
 0x2fd   :  { %v4097_v26 = vpack.c.bf16 %v3745_v35, %v3741_v33  ;;  %v3652_v58 = vcvt.s32.f32 %v3140_v6  ;;  %v3656_v10 = vcvt.s32.f32 %v3144_v7  ;;  %v3013_v34 = vunpack.c.0.s8 %v6609_v12 }
 0x2fe   :  { %4435 = vmatpush.bf16.msra.mxu3 %v3993_v43  ;;  %v3844_v9 = vcvt.s32.f32 %v3332_v23  ;;  %v3848_v27 = vcvt.s32.f32 %v3336_v14  ;;  %v3017_v54 = vunpack.c.1.s8 %v6609_v12  ;;  %v3221_v46 = vunpack.c.0.s8 %v2865_v62  ;;  %v2836_v23 = vld [vmem:[#allocation16 + $0x188] sm:$0xff] }
 0x2ff   :  { %v4052_v53 = vpack.c.bf16 %v3656_v10, %v3652_v58  ;;  %v3525_v39 = vcvt.s32.f32 %v3013_v34  ;;  %v3225_v8 = vunpack.c.1.s8 %v2865_v62  ;;  %v2647_v61 = vadd.f32 %v2646_v56, %v2633_v1  ;;  %4427 = vmatmul.bf16.vlgmr.msra.gmra.mxu2 %v6467_v36  ;;  %v2884_v10 = vld [vmem:[#allocation16 + $0x308] sm:$0xff] }
 0x300   :  { %4475 = vmatpush.bf16.msrb.mxu2 %v4097_v26  ;;  %v4148_v2 = vpack.c.bf16 %v3848_v27, %v3844_v9  ;;  %v3529_v16 = vcvt.s32.f32 %v3017_v54  ;;  %v3733_v30 = vcvt.s32.f32 %v3221_v46  ;;  %v3132_v50 = vunpack.c.2.s8 %v2840_v55 }
 0x301   :  { %4352 = vmatpush.bf16.msrb.mxu1 %v4052_v53  ;;  %v3737_v15 = vcvt.s32.f32 %v3225_v8  ;;  %v2661_v38 = vadd.f32 %v2660_v44, %v2647_v61  ;;  %v3136_v40 = vunpack.c.3.s8 %v2840_v55  ;;  %v3324_v12 = vunpack.c.2.s8 %v2888_v49  ;;  %v2805_v53 = vld [vmem:[#allocation16 + $0x90] sm:$0xff] }
 0x302   :  { %4394 = vmatpush.bf16.msra.mxu0 %v4148_v2  ;;  %v3989_v63 = vpack.c.bf16 %v3529_v16, %v3525_v39  ;;  %v3644_v31 = vcvt.s32.f32 %v3132_v50  ;;  %v3328_v25 = vunpack.c.3.s8 %v2888_v49  ;;  %v3005_v62 = vunpack.c.2.s8 %v2809_v52  ;;  %v6642_v44 = vld [vmem:[#allocation16 + $0x230] sm:$0xff] }
 0x303   :  { %v4093_v20 = vpack.c.bf16 %v3737_v15, %v3733_v30  ;;  %v2696_v45 = vmul.f32 %v2672_v60, %v2661_v38  ;;  %v3648_v48 = vcvt.s32.f32 %v3136_v40  ;;  %v3836_v17 = vcvt.s32.f32 %v3324_v12 }
 0x304   :  { %4436 = vmatpush.bf16.msra.mxu3 %v3989_v63  ;;  %v3840_v28 = vcvt.s32.f32 %v3328_v25  ;;  %v3009_v21 = vunpack.c.3.s8 %v2809_v52  ;;  %v3517_v42 = vcvt.s32.f32 %v3005_v62  ;;  %v3213_v51 = vunpack.c.2.s8 %v2861_v19 }
 0x305   :  { %4476 = vmatpush.bf16.msrb.mxu2 %v4093_v20  ;;  %v2730_v0 = vadd.f32 %v2706_v3, %v2696_v45  ;;  %v4048_v37 = vpack.c.bf16 %v3648_v48, %v3644_v31  ;;  %v3217_v22 = vunpack.c.3.s8 %v2861_v19  ;;  %v3124_v1 = vunpack.c.0.s8 %v2840_v55 }
 0x306   :  { %v4144_v13 = vpack.c.bf16 %v3840_v28, %v3836_v17  ;;  %v3521_v18 = vcvt.s32.f32 %v3009_v21  ;;  %v3725_v33 = vcvt.s32.f32 %v3213_v51  ;;  %v3128_v35 = vunpack.c.1.s8 %v2840_v55 }
 0x307   :  { %v6640_v29 = vsel %vm2738_vm11, %v6620_v41, %v2754_v32  ;;  %vm2746_vm12 = vcmp.gt.f32.partialorder %v2730_v0, 0.0  ;;  %4353 = vmatpush.bf16.msrb.mxu1 %v4048_v37  ;;  %v3729_v60 = vcvt.s32.f32 %v3217_v22  ;;  %v3636_v6 = vcvt.s32.f32 %v3124_v1  ;;  %v2912_v1 = vld [vmem:[#allocation16 + $0x3e8] sm:$0xff] }
 0x308   :  { %4395 = vmatpush.bf16.msra.mxu0 %v4144_v13  ;;  %v3985_v7 = vpack.c.bf16 %v3521_v18, %v3517_v42  ;;  %v3640_v47 = vcvt.s32.f32 %v3128_v35  ;;  %v3316_v3 = vunpack.c.0.s8 %v2888_v49  ;;  %v3320_v43 = vunpack.c.1.s8 %v2888_v49 }
 0x309   :  { %v2762_v14 = vmul.f32 0.01, %v2730_v0  ;;  %v4089_v56 = vpack.c.bf16 %v3729_v60, %v3725_v33  ;;  %v2997_v26 = vunpack.c.0.s8 %v2809_v52  ;;  %v3001_v58 = vunpack.c.1.s8 %v2809_v52 }
 0x30a   :  { %4437 = vmatpush.bf16.msra.mxu3 %v3985_v7  ;;  %v4044_v34 = vpack.c.bf16 %v3640_v47, %v3636_v6  ;;  %v3828_v55 = vcvt.s32.f32 %v3316_v3  ;;  %v3832_v41 = vcvt.s32.f32 %v3320_v43  ;;  %v3205_v32 = vunpack.c.0.s8 %v2861_v19 }
 0x30b   :  { %4477 = vmatpush.bf16.msrb.mxu2 %v4089_v56  ;;  %v3509_v9 = vcvt.s32.f32 %v2997_v26  ;;  %v3513_v27 = vcvt.s32.f32 %v3001_v58  ;;  %v3209_v54 = vunpack.c.1.s8 %v2861_v19  ;;  %v3116_v46 = vunpack.c.2.s8 %v2836_v23  ;;  %v2881_v56 = vld [vmem:[#allocation16 + $0x2f0] sm:$0xff] }
 0x30c   :  { %4354 = vmatpush.bf16.msrb.mxu1 %v4044_v34  ;;  %v4140_v39 = vpack.c.bf16 %v3832_v41, %v3828_v55  ;;  %v3717_v49 = vcvt.s32.f32 %v3205_v32  ;;  %v3120_v8 = vunpack.c.3.s8 %v2836_v23  ;;  %v3308_v61 = vunpack.c.2.s8 %v2884_v10 }
 0x30d   :  { %v3981_v52 = vpack.c.bf16 %v3513_v27, %v3509_v9  ;;  %v3721_v2 = vcvt.s32.f32 %v3209_v54  ;;  %v3628_v16 = vcvt.s32.f32 %v3116_v46  ;;  %v3312_v30 = vunpack.c.3.s8 %v2884_v10 }
 0x30e   :  { %4396 = vmatpush.bf16.msra.mxu0 %v4140_v39  ;;  %v3632_v50 = vcvt.s32.f32 %v3120_v8  ;;  %v3820_v15 = vcvt.s32.f32 %v3308_v61  ;;  %v2989_v38 = vunpack.c.2.s8 %v2805_v53  ;;  %v2993_v40 = vunpack.c.3.s8 %v2805_v53  ;;  %v2853_v61 = vld [vmem:[#allocation16 + $0x210] sm:$0xff] }
 0x30f   :  { %4438 = vmatpush.bf16.msra.mxu3 %v3981_v52  ;;  %v4085_v12 = vpack.c.bf16 %v3721_v2, %v3717_v49  ;;  %v3824_v19 = vcvt.s32.f32 %v3312_v30  ;;  %v3197_v63 = vunpack.c.2.s8 %v6642_v44  ;;  %v3201_v31 = vunpack.c.3.s8 %v6642_v44 }
 0x310   :  { %v2778_v25 = vsel %vm2746_vm12, %v2730_v0, %v2762_v14  ;;  %v4040_v62 = vpack.c.bf16 %v3632_v50, %v3628_v16  ;;  %v3501_v20 = vcvt.s32.f32 %v2989_v38  ;;  %v3505_v45 = vcvt.s32.f32 %v2993_v40  ;;  %v2833_v0 = vld [vmem:[#allocation16 + $0x170] sm:$0xff] }
 0x311   :  { %4478 = vmatpush.bf16.msrb.mxu2 %v4085_v12  ;;  %v4136_v48 = vpack.c.bf16 %v3824_v19, %v3820_v15  ;;  %v3709_v17 = vcvt.s32.f32 %v3197_v63  ;;  %v3713_v28 = vcvt.s32.f32 %v3201_v31  ;;  %v3108_v21 = vunpack.c.0.s8 %v2836_v23 }
 0x312   :  { %4355 = vmatpush.bf16.msrb.mxu1 %v4040_v62  ;;  %v3977_v42 = vpack.c.bf16 %v3505_v45, %v3501_v20  ;;  %v3112_v51 = vunpack.c.1.s8 %v2836_v23  ;;  %v3300_v37 = vunpack.c.0.s8 %v2884_v10  ;;  %v3304_v22 = vunpack.c.1.s8 %v2884_v10  ;;  %v2908_v45 = vld [vmem:[#allocation16 + $0x3c8] sm:$0xff] }
 0x313   :  { %4397 = vmatpush.bf16.msra.mxu0 %v4136_v48  ;;  %v4081_v13 = vpack.c.bf16 %v3713_v28, %v3709_v17  ;;  %v3620_v18 = vcvt.s32.f32 %v3108_v21  ;;  %v2981_v33 = vunpack.c.0.s8 %v2805_v53  ;;  %v2985_v35 = vunpack.c.1.s8 %v2805_v53 }
 0x314   :  { %4439 = vmatpush.bf16.msra.mxu3 %v3977_v42  ;;  %v3624_v60 = vcvt.s32.f32 %v3112_v51  ;;  %v3812_v6 = vcvt.s32.f32 %v3300_v37  ;;  %v3816_v7 = vcvt.s32.f32 %v3304_v22  ;;  %v6648_v47 = vpack.c.bf16 %v2778_v25, %v6640_v29  ;;  %v2829_v42 = vld [vmem:[#allocation16 + $0x150] sm:$0xff] }
 0x315   :  { %4479 = vmatpush.bf16.msrb.mxu2 %v4081_v13  ;;  %v3493_v3 = vcvt.s32.f32 %v2981_v33  ;;  %v3497_v43 = vcvt.s32.f32 %v2985_v35  ;;  %v3420_v23 = vunpack.c.2.s8 %v2912_v1  ;;  %v3424_v14 = vunpack.c.3.s8 %v2912_v1  ;;  %v2877_v22 = vld [vmem:[#allocation16 + $0x2d0] sm:$0xff] }
 0x316   :  { %v4036_v26 = vpack.c.bf16 %v3624_v60, %v3620_v18  ;;  %v4132_v58 = vpack.c.bf16 %v3816_v7, %v3812_v6  ;;  %4301 = vmatmul.bf16.vlgmr.msra.gmra.mxu1 %v6648_v47  ;;  %v3101_v10 = vunpack.c.2.s8 %v2833_v0  ;;  %v3105_v34 = vunpack.c.3.s8 %v2833_v0 }
 0x317   :  { %v3973_v55 = vpack.c.bf16 %v3497_v43, %v3493_v3  ;;  %v3932_v41 = vcvt.s32.f32 %v3420_v23  ;;  %v3936_v32 = vcvt.s32.f32 %v3424_v14  ;;  %v3189_v9 = vunpack.c.0.s8 %v6642_v44  ;;  %v2802_v14 = vld [vmem:[#allocation16 + $0x78] sm:$0xff] }
 0x318   :  { %4356 = vmatpush.bf16.msrb.mxu1 %v4036_v26  ;;  %4398 = vmatpush.bf16.msra.mxu0 %v4132_v58  ;;  %v3613_v29 = vcvt.s32.f32 %v3101_v10  ;;  %v3617_v27 = vcvt.s32.f32 %v3105_v34  ;;  %v3193_v54 = vunpack.c.1.s8 %v6642_v44  ;;  %v3293_v46 = vunpack.c.2.s8 %v2881_v56 }
 0x319   :  { %4440 = vmatpush.bf16.msra.mxu3 %v3973_v55  ;;  %v4192_v53 = vpack.c.bf16 %v3936_v32, %v3932_v41  ;;  %v3701_v39 = vcvt.s32.f32 %v3189_v9  ;;  %v3297_v49 = vunpack.c.3.s8 %v2881_v56  ;;  %v3412_v8 = vunpack.c.0.s8 %v2912_v1 }
 0x31a   :  { %v4033_v52 = vpack.c.bf16 %v3617_v27, %v3613_v29  ;;  %v3705_v2 = vcvt.s32.f32 %v3193_v54  ;;  %v3805_v16 = vcvt.s32.f32 %v3293_v46  ;;  %v3416_v30 = vunpack.c.1.s8 %v2912_v1 }
 0x31b   :  { %v3809_v50 = vcvt.s32.f32 %v3297_v49  ;;  %4399 = vmatmul.bf16.vlgmr.msra.gmra.mxu0 %v6586_v4  ;;  %v3924_v15 = vcvt.s32.f32 %v3412_v8  ;;  %v3093_v38 = vunpack.c.0.s8 %v2833_v0  ;;  %v3097_v40 = vunpack.c.1.s8 %v2833_v0 }
 0x31c   :  { %4405 = vmatpush.bf16.msra.mxu1 %v4192_v53  ;;  %4447 = vmatpush.bf16.msrb.mxu0 %v4033_v52  ;;  %v4077_v44 = vpack.c.bf16 %v3705_v2, %v3701_v39  ;;  %v3928_v12 = vcvt.s32.f32 %v3416_v30  ;;  %v3181_v19 = vunpack.c.2.s8 %v2853_v61  ;;  %v3185_v63 = vunpack.c.3.s8 %v2853_v61 }
 0x31d   :  { %4441 = vmatmul.bf16.vlgmr.msra.gmra.mxu3 %v6442_v11  ;;  %v4129_v31 = vpack.c.bf16 %v3809_v50, %v3805_v16  ;;  %v3605_v25 = vcvt.s32.f32 %v3093_v38  ;;  %v3609_v62 = vcvt.s32.f32 %v3097_v40  ;;  %v3285_v20 = vunpack.c.0.s8 %v2881_v56 }
 0x31e   :  { %4480 = vmatpush.bf16.msrb.mxu2 %v4077_v44  ;;  %v4188_v48 = vpack.c.bf16 %v3928_v12, %v3924_v15  ;;  %v3693_v17 = vcvt.s32.f32 %v3181_v19  ;;  %v3697_v28 = vcvt.s32.f32 %v3185_v63  ;;  %v3289_v21 = vunpack.c.1.s8 %v2881_v56  ;;  %v2904_v15 = vld [vmem:[#allocation16 + $0x3a8] sm:$0xff]  ;;  %v2825_v19 = vld [vmem:[#allocation16 + $0x130] sm:$0xff] }
 0x31f   :  { %4489 = vmatpush.bf16.msrb.mxu3 %v4129_v31  ;;  %v4029_v51 = vpack.c.bf16 %v3609_v62, %v3605_v25  ;;  %v3797_v37 = vcvt.s32.f32 %v3285_v20  ;;  %v3404_v18 = vunpack.c.2.s8 %v2908_v45  ;;  %v3408_v33 = vunpack.c.3.s8 %v2908_v45  ;;  %v2873_v62 = vld [vmem:[#allocation16 + $0x2b0] sm:$0xff] }
 0x320   :  { %4406 = vmatpush.bf16.msra.mxu1 %v4188_v48  ;;  %v4073_v1 = vpack.c.bf16 %v3697_v28, %v3693_v17  ;;  %v3801_v13 = vcvt.s32.f32 %v3289_v21  ;;  %v3085_v35 = vunpack.c.2.s8 %v2829_v42  ;;  %v3089_v0 = vunpack.c.3.s8 %v2829_v42 }
 0x321   :  { %4448 = vmatpush.bf16.msrb.mxu0 %v4029_v51  ;;  %v3173_v60 = vunpack.c.0.s8 %v2853_v61  ;;  %v3177_v6 = vunpack.c.1.s8 %v2853_v61  ;;  %v3916_v3 = vcvt.s32.f32 %v3404_v18  ;;  %v3920_v43 = vcvt.s32.f32 %v3408_v33 }
 0x322   :  { %4481 = vmatpush.bf16.msrb.mxu2 %v4073_v1  ;;  %v4125_v7 = vpack.c.bf16 %v3801_v13, %v3797_v37  ;;  %v3277_v23 = vunpack.c.2.s8 %v2877_v22  ;;  %v3597_v56 = vcvt.s32.f32 %v3085_v35  ;;  %v3601_v26 = vcvt.s32.f32 %v3089_v0  ;;  %v2798_v37 = vld [vmem:[#allocation16 + $0x58] sm:$0xff] }
 0x323   :  { %v3685_v58 = vcvt.s32.f32 %v3173_v60  ;;  %v3689_v10 = vcvt.s32.f32 %v3177_v6  ;;  %v4184_v34 = vpack.c.bf16 %v3920_v43, %v3916_v3  ;;  %v3281_v55 = vunpack.c.3.s8 %v2877_v22 }
 0x324   :  { %4490 = vmatpush.bf16.msrb.mxu3 %v4125_v7  ;;  %v3789_v41 = vcvt.s32.f32 %v3277_v23  ;;  %v4025_v32 = vpack.c.bf16 %v3601_v26, %v3597_v56  ;;  %v2974_v29 = vunpack.c.2.s8 %v2802_v14  ;;  %v2978_v27 = vunpack.c.3.s8 %v2802_v14 }
 0x325   :  { %v4069_v9 = vpack.c.bf16 %v3689_v10, %v3685_v58  ;;  %4407 = vmatpush.bf16.msra.mxu1 %v4184_v34  ;;  %v3793_v54 = vcvt.s32.f32 %v3281_v55  ;;  %v3396_v46 = vunpack.c.0.s8 %v2908_v45  ;;  %v3400_v53 = vunpack.c.1.s8 %v2908_v45 }
 0x326   :  { %v3077_v39 = vunpack.c.0.s8 %v2829_v42  ;;  %4449 = vmatpush.bf16.msrb.mxu0 %v4025_v32  ;;  %v3486_v49 = vcvt.s32.f32 %v2974_v29  ;;  %v3490_v8 = vcvt.s32.f32 %v2978_v27  ;;  %v3081_v61 = vunpack.c.1.s8 %v2829_v42  ;;  %4357 = vmatmul.bf16.vlgmr.msrb.gmra.mxu1 %v6486_v57  ;;  %v2900_v29 = vld [vmem:[#allocation16 + $0x388] sm:$0xff] }
 0x327   :  { %4482 = vmatpush.bf16.msrb.mxu2 %v4069_v9  ;;  %v3269_v52 = vunpack.c.0.s8 %v2877_v22  ;;  %v4121_v2 = vpack.c.bf16 %v3793_v54, %v3789_v41  ;;  %v3908_v16 = vcvt.s32.f32 %v3396_v46  ;;  %v3912_v30 = vcvt.s32.f32 %v3400_v53 }
 0x328   :  { %v3589_v50 = vcvt.s32.f32 %v3077_v39  ;;  %v3970_v38 = vpack.c.bf16 %v3490_v8, %v3486_v49  ;;  %v3593_v40 = vcvt.s32.f32 %v3081_v61  ;;  %v3273_v44 = vunpack.c.1.s8 %v2877_v22  ;;  %v2821_v39 = vld [vmem:[#allocation16 + $0x110] sm:$0xff] }
 0x329   :  { %v3781_v12 = vcvt.s32.f32 %v3269_v52  ;;  %4491 = vmatpush.bf16.msrb.mxu3 %v4121_v2  ;;  %v4180_v63 = vpack.c.bf16 %v3912_v30, %v3908_v16  ;;  %v2966_v31 = vunpack.c.0.s8 %v2802_v14  ;;  %v2970_v25 = vunpack.c.1.s8 %v2802_v14  ;;  %v2869_v2 = vld [vmem:[#allocation16 + $0x290] sm:$0xff] }
 0x32a   :  { %4483 = vmatmul.bf16.vlgmr.msrb.gmra.mxu2 %v6505_v59  ;;  %v4021_v20 = vpack.c.bf16 %v3593_v40, %v3589_v50  ;;  %v3785_v45 = vcvt.s32.f32 %v3273_v44  ;;  %v3388_v48 = vunpack.c.2.s8 %v2904_v15  ;;  %v3392_v17 = vunpack.c.3.s8 %v2904_v15 }
 0x32b   :  { %4531 = vmatpush.bf16.msra.mxu2 %v3970_v38  ;;  %4408 = vmatpush.bf16.msra.mxu1 %v4180_v63  ;;  %v3478_v28 = vcvt.s32.f32 %v2966_v31  ;;  %v3482_v21 = vcvt.s32.f32 %v2970_v25  ;;  %v3069_v42 = vunpack.c.2.s8 %v2825_v19  ;;  %v3073_v51 = vunpack.c.3.s8 %v2825_v19 }
 0x32c   :  { %4450 = vmatpush.bf16.msrb.mxu0 %v4021_v20  ;;  %v4117_v22 = vpack.c.bf16 %v3785_v45, %v3781_v12  ;;  %v3900_v1 = vcvt.s32.f32 %v3388_v48  ;;  %v3904_v13 = vcvt.s32.f32 %v3392_v17  ;;  %v3261_v18 = vunpack.c.2.s8 %v2873_v62 }
 0x32d   :  { %v3966_v33 = vpack.c.bf16 %v3482_v21, %v3478_v28  ;;  %v3581_v35 = vcvt.s32.f32 %v3069_v42  ;;  %v3585_v0 = vcvt.s32.f32 %v3073_v51  ;;  %v3265_v60 = vunpack.c.3.s8 %v2873_v62 }
 0x32e   :  { %4492 = vmatpush.bf16.msrb.mxu3 %v4117_v22  ;;  %v4176_v6 = vpack.c.bf16 %v3904_v13, %v3900_v1  ;;  %v3773_v7 = vcvt.s32.f32 %v3261_v18  ;;  %v2958_v3 = vunpack.c.2.s8 %v2798_v37  ;;  %v2962_v14 = vunpack.c.3.s8 %v2798_v37 }
 0x32f   :  { %4532 = vmatpush.bf16.msra.mxu2 %v3966_v33  ;;  %v4017_v43 = vpack.c.bf16 %v3585_v0, %v3581_v35  ;;  %v3777_v23 = vcvt.s32.f32 %v3265_v60  ;;  %v3380_v56 = vunpack.c.0.s8 %v2904_v15  ;;  %v3384_v58 = vunpack.c.1.s8 %v2904_v15  ;;  %v2849_v60 = vld [vmem:[#allocation16 + $0x1f0] sm:$0xff] }
 0x330   :  { %4409 = vmatpush.bf16.msra.mxu1 %v4176_v6  ;;  %v3470_v26 = vcvt.s32.f32 %v2958_v3  ;;  %v3061_v10 = vunpack.c.0.s8 %v2825_v19  ;;  %v3065_v34 = vunpack.c.1.s8 %v2825_v19  ;;  %v3474_v41 = vcvt.s32.f32 %v2962_v14  ;;  %v6657_v19 = vld [vmem:[#allocation16 + $0x38] sm:$0xff] }
 0x331   :  { %4451 = vmatpush.bf16.msrb.mxu0 %v4017_v43  ;;  %v4113_v55 = vpack.c.bf16 %v3777_v23, %v3773_v7  ;;  %v3892_v32 = vcvt.s32.f32 %v3380_v56  ;;  %v3253_v9 = vunpack.c.0.s8 %v2873_v62  ;;  %v3896_v27 = vcvt.s32.f32 %v3384_v58  ;;  %v2897_v23 = vld [vmem:[#allocation16 + $0x370] sm:$0xff] }
 0x332   :  { %v3573_v54 = vcvt.s32.f32 %v3061_v10  ;;  %v3577_v46 = vcvt.s32.f32 %v3065_v34  ;;  %v3257_v53 = vunpack.c.1.s8 %v2873_v62  ;;  %v3962_v49 = vpack.c.bf16 %v3474_v41, %v3470_v26 }
 0x333   :  { %4493 = vmatpush.bf16.msrb.mxu3 %v4113_v55  ;;  %v3765_v8 = vcvt.s32.f32 %v3253_v9  ;;  %v2950_v61 = vunpack.c.0.s8 %v2798_v37  ;;  %v2954_v52 = vunpack.c.1.s8 %v2798_v37  ;;  %v4172_v16 = vpack.c.bf16 %v3896_v27, %v3892_v32 }
 0x334   :  { %v4013_v30 = vpack.c.bf16 %v3577_v46, %v3573_v54  ;;  %v3769_v50 = vcvt.s32.f32 %v3257_v53  ;;  %v3372_v15 = vunpack.c.2.s8 %v2900_v29  ;;  %4533 = vmatpush.bf16.msra.mxu2 %v3962_v49  ;;  %v3376_v44 = vunpack.c.3.s8 %v2900_v29  ;;  %v2818_v54 = vld [vmem:[#allocation16 + $0xf8] sm:$0xff] }
 0x335   :  { %v3462_v38 = vcvt.s32.f32 %v2950_v61  ;;  %v3466_v40 = vcvt.s32.f32 %v2954_v52  ;;  %v3053_v12 = vunpack.c.2.s8 %v2821_v39  ;;  %4410 = vmatpush.bf16.msra.mxu1 %v4172_v16  ;;  %v3057_v25 = vunpack.c.3.s8 %v2821_v39 }
 0x336   :  { %4452 = vmatpush.bf16.msrb.mxu0 %v4013_v30  ;;  %v4109_v63 = vpack.c.bf16 %v3769_v50, %v3765_v8  ;;  %v3884_v31 = vcvt.s32.f32 %v3372_v15  ;;  %v3245_v62 = vunpack.c.2.s8 %v2869_v2  ;;  %v3888_v45 = vcvt.s32.f32 %v3376_v44 }
 0x337   :  { %v3958_v20 = vpack.c.bf16 %v3466_v40, %v3462_v38  ;;  %v3565_v48 = vcvt.s32.f32 %v3053_v12  ;;  %v3249_v17 = vunpack.c.3.s8 %v2869_v2  ;;  %v3569_v28 = vcvt.s32.f32 %v3057_v25  ;;  %v2790_v38 = vld [vmem:[#allocation16 + $0x18] sm:$0xff] }
 0x338   :  { %4494 = vmatpush.bf16.msrb.mxu3 %v4109_v63  ;;  %v3757_v21 = vcvt.s32.f32 %v3245_v62  ;;  %v2942_v42 = vunpack.c.2.s8 %v6657_v19  ;;  %v2946_v51 = vunpack.c.3.s8 %v6657_v19  ;;  %v4168_v37 = vpack.c.bf16 %v3888_v45, %v3884_v31 }
 0x339   :  { %4534 = vmatpush.bf16.msra.mxu2 %v3958_v20  ;;  %v3761_v22 = vcvt.s32.f32 %v3249_v17  ;;  %v3364_v1 = vunpack.c.0.s8 %v2900_v29  ;;  %v3368_v13 = vunpack.c.1.s8 %v2900_v29  ;;  %v4009_v18 = vpack.c.bf16 %v3569_v28, %v3565_v48  ;;  %v2845_v28 = vld [vmem:[#allocation16 + $0x1d0] sm:$0xff] }
 0x33a   :  { %v3454_v33 = vcvt.s32.f32 %v2942_v42  ;;  %v3458_v35 = vcvt.s32.f32 %v2946_v51  ;;  %v3045_v0 = vunpack.c.0.s8 %v2821_v39  ;;  %4411 = vmatpush.bf16.msra.mxu1 %v4168_v37  ;;  %v3049_v43 = vunpack.c.1.s8 %v2821_v39 }
 0x33b   :  { %v4105_v6 = vpack.c.bf16 %v3761_v22, %v3757_v21  ;;  %v3876_v7 = vcvt.s32.f32 %v3364_v1  ;;  %v3880_v3 = vcvt.s32.f32 %v3368_v13  ;;  %4453 = vmatpush.bf16.msrb.mxu0 %v4009_v18  ;;  %v3237_v26 = vunpack.c.0.s8 %v2869_v2  ;;  %v2893_v22 = vld [vmem:[#allocation16 + $0x350] sm:$0xff] }
 0x33c   :  { %v3954_v14 = vpack.c.bf16 %v3458_v35, %v3454_v33  ;;  %v3557_v56 = vcvt.s32.f32 %v3045_v0  ;;  %v3241_v58 = vunpack.c.1.s8 %v2869_v2  ;;  %v3561_v34 = vcvt.s32.f32 %v3049_v43 }
 0x33d   :  { %4495 = vmatpush.bf16.msrb.mxu3 %v4105_v6  ;;  %v4164_v10 = vpack.c.bf16 %v3880_v3, %v3876_v7  ;;  %v3165_v55 = vunpack.c.2.s8 %v2849_v60  ;;  %v3169_v41 = vunpack.c.3.s8 %v2849_v60  ;;  %v3749_v32 = vcvt.s32.f32 %v3237_v26 }
 0x33e   :  { %4535 = vmatpush.bf16.msra.mxu2 %v3954_v14  ;;  %v3753_v9 = vcvt.s32.f32 %v3241_v58  ;;  %v3357_v29 = vunpack.c.2.s8 %v2897_v23  ;;  %v3361_v27 = vunpack.c.3.s8 %v2897_v23  ;;  %v4005_v46 = vpack.c.bf16 %v3561_v34, %v3557_v56  ;;  %v2814_v14 = vld [vmem:[#allocation16 + $0xd8] sm:$0xff] }
 0x33f   :  { %4412 = vmatpush.bf16.msra.mxu1 %v4164_v10  ;;  %v3677_v53 = vcvt.s32.f32 %v3165_v55  ;;  %v3681_v39 = vcvt.s32.f32 %v3169_v41  ;;  %v2934_v49 = vunpack.c.0.s8 %v6657_v19  ;;  %v2938_v2 = vunpack.c.1.s8 %v6657_v19  ;;  %v2866_v34 = vld [vmem:[#allocation16 + $0x278] sm:$0xff] }
 0x340   :  { %v4101_v8 = vpack.c.bf16 %v3753_v9, %v3749_v32  ;;  %v3869_v61 = vcvt.s32.f32 %v3357_v29  ;;  %v3873_v52 = vcvt.s32.f32 %v3361_v27  ;;  %4454 = vmatpush.bf16.msrb.mxu0 %v4005_v46  ;;  %v3038_v50 = vunpack.c.2.s8 %v2818_v54 }
 0x341   :  { %v4065_v16 = vpack.c.bf16 %v3681_v39, %v3677_v53  ;;  %v3446_v30 = vcvt.s32.f32 %v2934_v49  ;;  %v3042_v15 = vunpack.c.3.s8 %v2818_v54  ;;  %v3450_v44 = vcvt.s32.f32 %v2938_v2 }
 0x342   :  { %4496 = vmatpush.bf16.msrb.mxu3 %v4101_v8  ;;  %v4161_v40 = vpack.c.bf16 %v3873_v52, %v3869_v61  ;;  %4413 = vmatmul.bf16.vlgmr.msra.gmra.mxu1 %v6648_v47  ;;  %v3157_v12 = vunpack.c.0.s8 %v2849_v60  ;;  %v3161_v63 = vunpack.c.1.s8 %v2849_v60  ;;  %v3550_v31 = vcvt.s32.f32 %v3038_v50 }
 0x343   :  { %4461 = vmatpush.bf16.msrb.mxu1 %v4065_v16  ;;  %v3554_v25 = vcvt.s32.f32 %v3042_v15  ;;  %v3349_v62 = vunpack.c.0.s8 %v2897_v23  ;;  %v3353_v20 = vunpack.c.1.s8 %v2897_v23  ;;  %v3950_v19 = vpack.c.bf16 %v3450_v44, %v3446_v30  ;;  %4455 = vmatmul.bf16.vlgmr.msrb.gmra.mxu0 %v6482_v5 }
 0x344   :  { %4503 = vmatpush.bf16.msra.mxu0 %v4161_v40  ;;  %v3669_v45 = vcvt.s32.f32 %v3157_v12  ;;  %v3673_v48 = vcvt.s32.f32 %v3161_v63  ;;  %v2926_v17 = vunpack.c.2.s8 %v2790_v38  ;;  %v2930_v37 = vunpack.c.3.s8 %v2790_v38 }
 0x345   :  { %v4002_v21 = vpack.c.bf16 %v3554_v25, %v3550_v31  ;;  %4497 = vmatmul.bf16.vlgmr.msrb.gmra.mxu3 %v6538_v24  ;;  %v3861_v42 = vcvt.s32.f32 %v3349_v62  ;;  %v3865_v51 = vcvt.s32.f32 %v3353_v20  ;;  %4536 = vmatpush.bf16.msra.mxu2 %v3950_v19  ;;  %v3030_v18 = vunpack.c.0.s8 %v2818_v54  ;;  %v2841_v31 = vld [vmem:[#allocation16 + $0x1b0] sm:$0xff] }
 0x346   :  { %v4061_v1 = vpack.c.bf16 %v3673_v48, %v3669_v45  ;;  %v3438_v13 = vcvt.s32.f32 %v2926_v17  ;;  %v3034_v33 = vunpack.c.1.s8 %v2818_v54  ;;  %v3442_v0 = vcvt.s32.f32 %v2930_v37 }
 0x347   :  { %4545 = vmatpush.bf16.msra.mxu3 %v4002_v21  ;;  %v4157_v35 = vpack.c.bf16 %v3865_v51, %v3861_v42  ;;  %v3149_v60 = vunpack.c.2.s8 %v2845_v28  ;;  %v3153_v6 = vunpack.c.3.s8 %v2845_v28  ;;  %v3542_v7 = vcvt.s32.f32 %v3030_v18  ;;  %v2889_v21 = vld [vmem:[#allocation16 + $0x330] sm:$0xff] }
 0x348   :  { %4462 = vmatpush.bf16.msrb.mxu1 %v4061_v1  ;;  %v3546_v3 = vcvt.s32.f32 %v3034_v33  ;;  %v3341_v43 = vunpack.c.2.s8 %v2893_v22  ;;  %v3345_v23 = vunpack.c.3.s8 %v2893_v22  ;;  %v3946_v56 = vpack.c.bf16 %v3442_v0, %v3438_v13  ;;  %v2810_v1 = vld [vmem:[#allocation16 + $0xb8] sm:$0xff] }
 0x349   :  { %4504 = vmatpush.bf16.msra.mxu0 %v4157_v35  ;;  %v3661_v26 = vcvt.s32.f32 %v3149_v60  ;;  %v3665_v58 = vcvt.s32.f32 %v3153_v6  ;;  %v2918_v10 = vunpack.c.0.s8 %v2790_v38  ;;  %v2922_v9 = vunpack.c.1.s8 %v2790_v38  ;;  %v2862_v35 = vld [vmem:[#allocation16 + $0x258] sm:$0xff] }
 0x34a   :  { %v3998_v55 = vpack.c.bf16 %v3546_v3, %v3542_v7  ;;  %v3853_v41 = vcvt.s32.f32 %v3341_v43  ;;  %v3857_v32 = vcvt.s32.f32 %v3345_v23  ;;  %4537 = vmatpush.bf16.msra.mxu2 %v3946_v56  ;;  %v3022_v54 = vunpack.c.2.s8 %v2814_v14 }
 0x34b   :  { %v4057_v29 = vpack.c.bf16 %v3665_v58, %v3661_v26  ;;  %v3430_v27 = vcvt.s32.f32 %v2918_v10  ;;  %v3026_v46 = vunpack.c.3.s8 %v2814_v14  ;;  %v3434_v39 = vcvt.s32.f32 %v2922_v9 }
 0x34c   :  { %4546 = vmatpush.bf16.msra.mxu3 %v3998_v55  ;;  %v4153_v53 = vpack.c.bf16 %v3857_v32, %v3853_v41  ;;  %v3230_v49 = vunpack.c.2.s8 %v2866_v34  ;;  %v3234_v8 = vunpack.c.3.s8 %v2866_v34  ;;  %v3534_v61 = vcvt.s32.f32 %v3022_v54 }
 0x34d   :  { %4463 = vmatpush.bf16.msrb.mxu1 %v4057_v29  ;;  %v3538_v52 = vcvt.s32.f32 %v3026_v46  ;;  %v3141_v2 = vunpack.c.0.s8 %v2845_v28  ;;  %v3145_v16 = vunpack.c.1.s8 %v2845_v28  ;;  %v3942_v30 = vpack.c.bf16 %v3434_v39, %v3430_v27 }
 0x34e   :  { %4505 = vmatpush.bf16.msra.mxu0 %v4153_v53  ;;  %v3742_v50 = vcvt.s32.f32 %v3230_v49  ;;  %v3746_v15 = vcvt.s32.f32 %v3234_v8  ;;  %v3333_v38 = vunpack.c.0.s8 %v2893_v22  ;;  %v3337_v63 = vunpack.c.1.s8 %v2893_v22 }
 0x34f   :  { %v3994_v40 = vpack.c.bf16 %v3538_v52, %v3534_v61  ;;  %v3653_v44 = vcvt.s32.f32 %v3141_v2  ;;  %v3657_v12 = vcvt.s32.f32 %v3145_v16  ;;  %4538 = vmatpush.bf16.msra.mxu2 %v3942_v30  ;;  %v3014_v20 = vunpack.c.0.s8 %v2814_v14  ;;  %v2837_v2 = vld [vmem:[#allocation16 + $0x190] sm:$0xff] }
 0x350   :  { %v4098_v25 = vpack.c.bf16 %v3746_v15, %v3742_v50  ;;  %v3845_v62 = vcvt.s32.f32 %v3333_v38  ;;  %v3018_v19 = vunpack.c.1.s8 %v2814_v14  ;;  %v3849_v48 = vcvt.s32.f32 %v3337_v63  ;;  %v2885_v38 = vld [vmem:[#allocation16 + $0x310] sm:$0xff]  ;;  %v2806_v63 = vld [vmem:[#allocation16 + $0x98] sm:$0xff] }
 0x351   :  { %4547 = vmatpush.bf16.msra.mxu3 %v3994_v40  ;;  %v4053_v45 = vpack.c.bf16 %v3657_v12, %v3653_v44  ;;  %v3222_v17 = vunpack.c.0.s8 %v2866_v34  ;;  %v3226_v28 = vunpack.c.1.s8 %v2866_v34  ;;  %v3526_v42 = vcvt.s32.f32 %v3014_v20 }
 0x352   :  { %v3530_v51 = vcvt.s32.f32 %v3018_v19  ;;  %v3133_v37 = vunpack.c.2.s8 %v2841_v31  ;;  %4539 = vmatmul.bf16.vlgmr.msra.gmra.mxu2 %v6467_v36  ;;  %v4149_v22 = vpack.c.bf16 %v3849_v48, %v3845_v62  ;;  %v3137_v33 = vunpack.c.3.s8 %v2841_v31  ;;  %v6667_v19 = vld [vmem:[#allocation16 + $0x238] sm:$0xff] }
 0x353   :  { %4587 = vmatpush.bf16.msrb.mxu2 %v4098_v25  ;;  %4464 = vmatpush.bf16.msrb.mxu1 %v4053_v45  ;;  %v3734_v13 = vcvt.s32.f32 %v3222_v17  ;;  %v3738_v18 = vcvt.s32.f32 %v3226_v28  ;;  %v3325_v6 = vunpack.c.2.s8 %v2889_v21  ;;  %v3329_v7 = vunpack.c.3.s8 %v2889_v21 }
 0x354   :  { %v3990_v0 = vpack.c.bf16 %v3530_v51, %v3526_v42  ;;  %v3645_v60 = vcvt.s32.f32 %v3133_v37  ;;  %4506 = vmatpush.bf16.msra.mxu0 %v4149_v22  ;;  %v3649_v43 = vcvt.s32.f32 %v3137_v33  ;;  %v3006_v23 = vunpack.c.2.s8 %v2810_v1 }
 0x355   :  { %v4094_v3 = vpack.c.bf16 %v3738_v18, %v3734_v13  ;;  %v3010_v14 = vunpack.c.3.s8 %v2810_v1  ;;  %v3837_v56 = vcvt.s32.f32 %v3325_v6  ;;  %v3841_v26 = vcvt.s32.f32 %v3329_v7 }
 0x356   :  { %4548 = vmatpush.bf16.msra.mxu3 %v3990_v0  ;;  %v3214_v58 = vunpack.c.2.s8 %v2862_v35  ;;  %v3218_v36 = vunpack.c.3.s8 %v2862_v35  ;;  %v4049_v10 = vpack.c.bf16 %v3649_v43, %v3645_v60  ;;  %v3518_v34 = vcvt.s32.f32 %v3006_v23  ;;  %v2913_v23 = vld [vmem:[#allocation16 + $0x3f0] sm:$0xff] }
 0x357   :  { %4588 = vmatpush.bf16.msrb.mxu2 %v4094_v3  ;;  %v3522_v55 = vcvt.s32.f32 %v3010_v14  ;;  %v3125_v41 = vunpack.c.0.s8 %v2841_v31  ;;  %v4145_v32 = vpack.c.bf16 %v3841_v26, %v3837_v56  ;;  %v3129_v27 = vunpack.c.1.s8 %v2841_v31 }
 0x358   :  { %v3726_v9 = vcvt.s32.f32 %v3214_v58  ;;  %v3730_v29 = vcvt.s32.f32 %v3218_v36  ;;  %4465 = vmatpush.bf16.msrb.mxu1 %v4049_v10  ;;  %v3317_v53 = vunpack.c.0.s8 %v2889_v21  ;;  %v3321_v39 = vunpack.c.1.s8 %v2889_v21 }
 0x359   :  { %v3986_v54 = vpack.c.bf16 %v3522_v55, %v3518_v34  ;;  %v3637_v46 = vcvt.s32.f32 %v3125_v41  ;;  %4507 = vmatpush.bf16.msra.mxu0 %v4145_v32  ;;  %v3641_v8 = vcvt.s32.f32 %v3129_v27  ;;  %v2998_v61 = vunpack.c.0.s8 %v2810_v1  ;;  %v2834_v41 = vld [vmem:[#allocation16 + $0x178] sm:$0xff] }
 0x35a   :  { %v4090_v49 = vpack.c.bf16 %v3730_v29, %v3726_v9  ;;  %v3002_v52 = vunpack.c.1.s8 %v2810_v1  ;;  %v3829_v16 = vcvt.s32.f32 %v3317_v53  ;;  %v3833_v30 = vcvt.s32.f32 %v3321_v39 }
 0x35b   :  { %4549 = vmatpush.bf16.msra.mxu3 %v3986_v54  ;;  %v3206_v50 = vunpack.c.0.s8 %v2862_v35  ;;  %v3210_v15 = vunpack.c.1.s8 %v2862_v35  ;;  %v4045_v40 = vpack.c.bf16 %v3641_v8, %v3637_v46  ;;  %v3510_v44 = vcvt.s32.f32 %v2998_v61 }
 0x35c   :  { %4589 = vmatpush.bf16.msrb.mxu2 %v4090_v49  ;;  %v3514_v12 = vcvt.s32.f32 %v3002_v52  ;;  %v4141_v31 = vpack.c.bf16 %v3833_v30, %v3829_v16  ;;  %v3117_v20 = vunpack.c.2.s8 %v2837_v2  ;;  %v3121_v48 = vunpack.c.3.s8 %v2837_v2  ;;  %v2882_v49 = vld [vmem:[#allocation16 + $0x2f8] sm:$0xff] }
 0x35d   :  { %v3718_v25 = vcvt.s32.f32 %v3206_v50  ;;  %v3722_v62 = vcvt.s32.f32 %v3210_v15  ;;  %4466 = vmatpush.bf16.msrb.mxu1 %v4045_v40  ;;  %v3309_v17 = vunpack.c.2.s8 %v2885_v38  ;;  %v3313_v28 = vunpack.c.3.s8 %v2885_v38 }
 0x35e   :  { %v3982_v45 = vpack.c.bf16 %v3514_v12, %v3510_v44  ;;  %4508 = vmatpush.bf16.msra.mxu0 %v4141_v31  ;;  %v3629_v42 = vcvt.s32.f32 %v3117_v20  ;;  %v2990_v51 = vunpack.c.2.s8 %v2806_v63  ;;  %v2994_v37 = vunpack.c.3.s8 %v2806_v63  ;;  %v2854_v20 = vld [vmem:[#allocation16 + $0x218] sm:$0xff] }
 0x35f   :  { %v4086_v21 = vpack.c.bf16 %v3722_v62, %v3718_v25  ;;  %v3633_v1 = vcvt.s32.f32 %v3121_v48  ;;  %v3821_v22 = vcvt.s32.f32 %v3309_v17  ;;  %v3825_v13 = vcvt.s32.f32 %v3313_v28 }
 0x360   :  { %4550 = vmatpush.bf16.msra.mxu3 %v3982_v45  ;;  %v3198_v18 = vunpack.c.2.s8 %v6667_v19  ;;  %v3502_v33 = vcvt.s32.f32 %v2990_v51  ;;  %v3506_v35 = vcvt.s32.f32 %v2994_v37  ;;  %v3202_v0 = vunpack.c.3.s8 %v6667_v19  ;;  %v2909_v37 = vld [vmem:[#allocation16 + $0x3d0] sm:$0xff] }
 0x361   :  { %4590 = vmatpush.bf16.msrb.mxu2 %v4086_v21  ;;  %v3109_v60 = vunpack.c.0.s8 %v2837_v2  ;;  %v4041_v6 = vpack.c.bf16 %v3633_v1, %v3629_v42  ;;  %v4137_v7 = vpack.c.bf16 %v3825_v13, %v3821_v22  ;;  %v3113_v43 = vunpack.c.1.s8 %v2837_v2 }
 0x362   :  { %v3710_v3 = vcvt.s32.f32 %v3198_v18  ;;  %v3978_v14 = vpack.c.bf16 %v3506_v35, %v3502_v33  ;;  %v3714_v56 = vcvt.s32.f32 %v3202_v0  ;;  %v3301_v58 = vunpack.c.0.s8 %v2885_v38 }
 0x363   :  { %v3621_v26 = vcvt.s32.f32 %v3109_v60  ;;  %4467 = vmatpush.bf16.msrb.mxu1 %v4041_v6  ;;  %4509 = vmatpush.bf16.msra.mxu0 %v4137_v7  ;;  %v3625_v36 = vcvt.s32.f32 %v3113_v43  ;;  %v3305_v10 = vunpack.c.1.s8 %v2885_v38  ;;  %v2982_v34 = vunpack.c.0.s8 %v2806_v63  ;;  %v2830_v6 = vld [vmem:[#allocation16 + $0x158] sm:$0xff] }
 0x364   :  { %v2986_v55 = vunpack.c.1.s8 %v2806_v63  ;;  %4551 = vmatpush.bf16.msra.mxu3 %v3978_v14  ;;  %v4082_v32 = vpack.c.bf16 %v3714_v56, %v3710_v3  ;;  %v3813_v9 = vcvt.s32.f32 %v3301_v58  ;;  %v3421_v29 = vunpack.c.2.s8 %v2913_v23  ;;  %v2878_v58 = vld [vmem:[#allocation16 + $0x2d8] sm:$0xff] }
 0x365   :  { %v3425_v27 = vunpack.c.3.s8 %v2913_v23  ;;  %v4037_v54 = vpack.c.bf16 %v3625_v36, %v3621_v26  ;;  %v3817_v46 = vcvt.s32.f32 %v3305_v10  ;;  %v3494_v53 = vcvt.s32.f32 %v2982_v34 }
 0x366   :  { %v3498_v39 = vcvt.s32.f32 %v2986_v55  ;;  %4591 = vmatpush.bf16.msrb.mxu2 %v4082_v32  ;;  %v3933_v8 = vcvt.s32.f32 %v3421_v29  ;;  %v3102_v52 = vunpack.c.2.s8 %v2834_v41  ;;  %v3106_v2 = vunpack.c.3.s8 %v2834_v41 }
 0x367   :  { %v3937_v61 = vcvt.s32.f32 %v3425_v27  ;;  %4468 = vmatpush.bf16.msrb.mxu1 %v4037_v54  ;;  %v4133_v16 = vpack.c.bf16 %v3817_v46, %v3813_v9  ;;  %v3190_v50 = vunpack.c.0.s8 %v6667_v19  ;;  %v3194_v15 = vunpack.c.1.s8 %v6667_v19 }
 0x368   :  { %v3974_v30 = vpack.c.bf16 %v3498_v39, %v3494_v53  ;;  %v3614_v40 = vcvt.s32.f32 %v3102_v52  ;;  %v3618_v44 = vcvt.s32.f32 %v3106_v2  ;;  %v3294_v12 = vunpack.c.2.s8 %v2882_v49 }
 0x369   :  { %v4193_v38 = vpack.c.bf16 %v3937_v61, %v3933_v8  ;;  %4510 = vmatpush.bf16.msra.mxu0 %v4133_v16  ;;  %v3702_v63 = vcvt.s32.f32 %v3190_v50  ;;  %v3706_v31 = vcvt.s32.f32 %v3194_v15  ;;  %v3298_v25 = vunpack.c.3.s8 %v2882_v49  ;;  %v2905_v50 = vld [vmem:[#allocation16 + $0x3b0] sm:$0xff] }
 0x36a   :  { %4552 = vmatpush.bf16.msra.mxu3 %v3974_v30  ;;  %v3413_v62 = vunpack.c.0.s8 %v2913_v23  ;;  %v4034_v45 = vpack.c.bf16 %v3618_v44, %v3614_v40  ;;  %v3806_v48 = vcvt.s32.f32 %v3294_v12  ;;  %v3417_v17 = vunpack.c.1.s8 %v2913_v23  ;;  %4469 = vmatmul.bf16.vlgmr.msrb.gmra.mxu1 %v6486_v57 }
 0x36b   :  { %4517 = vmatpush.bf16.msra.mxu1 %v4193_v38  ;;  %v3094_v28 = vunpack.c.0.s8 %v2834_v41  ;;  %v4078_v21 = vpack.c.bf16 %v3706_v31, %v3702_v63  ;;  %v3810_v42 = vcvt.s32.f32 %v3298_v25  ;;  %v3098_v51 = vunpack.c.1.s8 %v2834_v41 }
 0x36c   :  { %v3925_v19 = vcvt.s32.f32 %v3413_v62  ;;  %v3929_v1 = vcvt.s32.f32 %v3417_v17  ;;  %v3182_v13 = vunpack.c.2.s8 %v2854_v20  ;;  %v3186_v18 = vunpack.c.3.s8 %v2854_v20  ;;  %4511 = vmatmul.bf16.vlgmr.msra.gmra.mxu0 %v6586_v4  ;;  %v2826_v62 = vld [vmem:[#allocation16 + $0x138] sm:$0xff] }
 0x36d   :  { %4559 = vmatpush.bf16.msrb.mxu0 %v4034_v45  ;;  %4553 = vmatmul.bf16.vlgmr.msra.gmra.mxu3 %v6442_v11  ;;  %v3606_v22 = vcvt.s32.f32 %v3094_v28  ;;  %v4130_v33 = vpack.c.bf16 %v3810_v42, %v3806_v48  ;;  %v3610_v35 = vcvt.s32.f32 %v3098_v51  ;;  %v3286_v0 = vunpack.c.0.s8 %v2882_v49  ;;  %v2874_v17 = vld [vmem:[#allocation16 + $0x2b8] sm:$0xff]  ;;  %v4204_v51 = vpop.f32.mrf.mxu2 }
 0x36e   :  { %4592 = vmatpush.bf16.msrb.mxu2 %v4078_v21  ;;  %v3290_v60 = vunpack.c.1.s8 %v2882_v49  ;;  %v4189_v7 = vpack.c.bf16 %v3929_v1, %v3925_v19  ;;  %v3694_v3 = vcvt.s32.f32 %v3182_v13  ;;  %v3698_v43 = vcvt.s32.f32 %v3186_v18 }
 0x36f   :  { %v3405_v23 = vunpack.c.2.s8 %v2909_v37  ;;  %4601 = vmatpush.bf16.msrb.mxu3 %v4130_v33  ;;  %v4030_v14 = vpack.c.bf16 %v3610_v35, %v3606_v22  ;;  %v3798_v56 = vcvt.s32.f32 %v3286_v0  ;;  %v3409_v26 = vunpack.c.3.s8 %v2909_v37 }
 0x370   :  { %v3802_v11 = vcvt.s32.f32 %v3290_v60  ;;  %4518 = vmatpush.bf16.msra.mxu1 %v4189_v7  ;;  %v4074_v36 = vpack.c.bf16 %v3698_v43, %v3694_v3  ;;  %v3086_v34 = vunpack.c.2.s8 %v2830_v6  ;;  %v3090_v55 = vunpack.c.3.s8 %v2830_v6  ;;  %v4218_v43 = vpop.f32.mrf.mxu3 }
 0x371   :  { %v3917_v10 = vcvt.s32.f32 %v3405_v23  ;;  %4560 = vmatpush.bf16.msrb.mxu0 %v4030_v14  ;;  %v3921_v32 = vcvt.s32.f32 %v3409_v26  ;;  %v3174_v9 = vunpack.c.0.s8 %v2854_v20  ;;  %v3178_v29 = vunpack.c.1.s8 %v2854_v20  ;;  %v2901_v26 = vld [vmem:[#allocation16 + $0x390] sm:$0xff] }
 0x372   :  { %v4126_v41 = vpack.c.bf16 %v3802_v11, %v3798_v56  ;;  %4593 = vmatpush.bf16.msrb.mxu2 %v4074_v36  ;;  %v3598_v27 = vcvt.s32.f32 %v3086_v34  ;;  %v3602_v54 = vcvt.s32.f32 %v3090_v55  ;;  %v3278_v46 = vunpack.c.2.s8 %v2878_v58  ;;  %v2822_v34 = vld [vmem:[#allocation16 + $0x118] sm:$0xff] }
 0x373   :  { %v3282_v53 = vunpack.c.3.s8 %v2878_v58  ;;  %v4185_v39 = vpack.c.bf16 %v3921_v32, %v3917_v10  ;;  %v3686_v49 = vcvt.s32.f32 %v3174_v9  ;;  %v3690_v8 = vcvt.s32.f32 %v3178_v29  ;;  %v2870_v29 = vld [vmem:[#allocation16 + $0x298] sm:$0xff] }
 0x374   :  { %4602 = vmatpush.bf16.msrb.mxu3 %v4126_v41  ;;  %v3397_v61 = vunpack.c.0.s8 %v2909_v37  ;;  %v4026_v52 = vpack.c.bf16 %v3602_v54, %v3598_v27  ;;  %v3790_v2 = vcvt.s32.f32 %v3278_v46  ;;  %v3401_v30 = vunpack.c.1.s8 %v2909_v37 }
 0x375   :  { %v3794_v16 = vcvt.s32.f32 %v3282_v53  ;;  %4519 = vmatpush.bf16.msra.mxu1 %v4185_v39  ;;  %v4070_v15 = vpack.c.bf16 %v3690_v8, %v3686_v49  ;;  %v3078_v40 = vunpack.c.0.s8 %v2830_v6  ;;  %v3082_v44 = vunpack.c.1.s8 %v2830_v6  ;;  %v6679_v39 = vpop.f32.mrf.mxu0 }
 0x376   :  { %v3909_v38 = vcvt.s32.f32 %v3397_v61  ;;  %4561 = vmatpush.bf16.msrb.mxu0 %v4026_v52  ;;  %v3913_v63 = vcvt.s32.f32 %v3401_v30  ;;  %v3270_v31 = vunpack.c.0.s8 %v2878_v58  ;;  %v3274_v25 = vunpack.c.1.s8 %v2878_v58 }
 0x377   :  { %v4122_v12 = vpack.c.bf16 %v3794_v16, %v3790_v2  ;;  %4594 = vmatpush.bf16.msrb.mxu2 %v4070_v15  ;;  %v3590_v20 = vcvt.s32.f32 %v3078_v40  ;;  %v3594_v45 = vcvt.s32.f32 %v3082_v44  ;;  %v3389_v48 = vunpack.c.2.s8 %v2905_v50 }
 0x378   :  { %v4181_v28 = vpack.c.bf16 %v3913_v63, %v3909_v38  ;;  %v3782_v21 = vcvt.s32.f32 %v3270_v31  ;;  %v3786_v42 = vcvt.s32.f32 %v3274_v25  ;;  %v3393_v19 = vunpack.c.3.s8 %v2905_v50 }
 0x379   :  { %4603 = vmatpush.bf16.msrb.mxu3 %v4122_v12  ;;  %v4022_v37 = vpack.c.bf16 %v3594_v45, %v3590_v20  ;;  %v3901_v1 = vcvt.s32.f32 %v3389_v48  ;;  %v3070_v22 = vunpack.c.2.s8 %v2826_v62  ;;  %v3074_v13 = vunpack.c.3.s8 %v2826_v62  ;;  %v4206_v12 = vpop.f32.mrf.mxu2  ;;  %v6681_v20 = vpop.f32.mrf.mxu1 }
 0x37a   :  { %4595 = vmatmul.bf16.vlgmr.msrb.gmra.mxu2 %v6505_v59  ;;  %4520 = vmatpush.bf16.msra.mxu1 %v4181_v28  ;;  %v4118_v18 = vpack.c.bf16 %v3786_v42, %v3782_v21  ;;  %v3905_v33 = vcvt.s32.f32 %v3393_v19  ;;  %v3262_v35 = vunpack.c.2.s8 %v2874_v17  ;;  %v3266_v0 = vunpack.c.3.s8 %v2874_v17  ;;  %v2850_v21 = vld [vmem:[#allocation16 + $0x1f8] sm:$0xff] }
 0x37b   :  { %4562 = vmatpush.bf16.msrb.mxu0 %v4022_v37  ;;  %v3582_v60 = vcvt.s32.f32 %v3070_v22  ;;  %v3586_v6 = vcvt.s32.f32 %v3074_v13  ;;  %v3381_v7 = vunpack.c.0.s8 %v2905_v50  ;;  %v3385_v3 = vunpack.c.1.s8 %v2905_v50  ;;  %v4220_v22 = vpop.f32.mrf.mxu3 }
 0x37c   :  { %v4177_v23 = vpack.c.bf16 %v3905_v33, %v3901_v1  ;;  %v3774_v14 = vcvt.s32.f32 %v3262_v35  ;;  %v3778_v56 = vcvt.s32.f32 %v3266_v0  ;;  %v3062_v11 = vunpack.c.0.s8 %v2826_v62  ;;  %v2898_v1 = vld [vmem:[#allocation16 + $0x378] sm:$0xff] }
 0x37d   :  { %4604 = vmatpush.bf16.msrb.mxu3 %v4118_v18  ;;  %v4018_v58 = vpack.c.bf16 %v3586_v6, %v3582_v60  ;;  %v3893_v36 = vcvt.s32.f32 %v3381_v7  ;;  %v3897_v59 = vcvt.s32.f32 %v3385_v3  ;;  %v3066_v10 = vunpack.c.1.s8 %v2826_v62  ;;  %v5526_v0 = vld [vmem:[#allocation17 + $0x38] sm:$0xff] }
 0x37e   :  { %4521 = vmatpush.bf16.msra.mxu1 %v4177_v23  ;;  %v4114_v55 = vpack.c.bf16 %v3778_v56, %v3774_v14  ;;  %v3574_v41 = vcvt.s32.f32 %v3062_v11  ;;  %v3254_v32 = vunpack.c.0.s8 %v2874_v17  ;;  %v3258_v9 = vunpack.c.1.s8 %v2874_v17  ;;  %4967 = vmatpush.bf16.msra.mxu2 %v5526_v0  ;;  %v5523_v0 = vld [vmem:[#allocation17 + $0x20] sm:$0xff] }
 0x37f   :  { %v6677_v27 = vadd.f32 %v4218_v43, %v4204_v51  ;;  %4563 = vmatpush.bf16.msrb.mxu0 %v4018_v58  ;;  %v4173_v54 = vpack.c.bf16 %v3897_v59, %v3893_v36  ;;  %v3578_v46 = vcvt.s32.f32 %v3066_v10  ;;  %v3373_v53 = vunpack.c.2.s8 %v2901_v26  ;;  %v2846_v59 = vld [vmem:[#allocation16 + $0x1d8] sm:$0xff]  ;;  %v4234_v10 = vpop.f32.mrf.mxu0 }
 0x380   :  { %v3766_v49 = vcvt.s32.f32 %v3254_v32  ;;  %v3770_v8 = vcvt.s32.f32 %v3258_v9  ;;  %v3377_v61 = vunpack.c.3.s8 %v2901_v26  ;;  %v3054_v52 = vunpack.c.2.s8 %v2822_v34  ;;  %v2894_v9 = vld [vmem:[#allocation16 + $0x358] sm:$0xff] }
 0x381   :  { %4605 = vmatpush.bf16.msrb.mxu3 %v4114_v55  ;;  %v4014_v2 = vpack.c.bf16 %v3578_v46, %v3574_v41  ;;  %v3885_v16 = vcvt.s32.f32 %v3373_v53  ;;  %v3058_v30 = vunpack.c.3.s8 %v2822_v34  ;;  %v3246_v50 = vunpack.c.2.s8 %v2870_v29 }
 0x382   :  { %4522 = vmatpush.bf16.msra.mxu1 %v4173_v54  ;;  %v4110_v15 = vpack.c.bf16 %v3770_v8, %v3766_v49  ;;  %v3889_v38 = vcvt.s32.f32 %v3377_v61  ;;  %v3566_v40 = vcvt.s32.f32 %v3054_v52  ;;  %v3250_v44 = vunpack.c.3.s8 %v2870_v29  ;;  %v5525_v8 = vld [vmem:[#allocation17 + $0x30] sm:$0xff] }
 0x383   :  { %4564 = vmatpush.bf16.msrb.mxu0 %v4014_v2  ;;  %v3570_v63 = vcvt.s32.f32 %v3058_v30  ;;  %v3758_v31 = vcvt.s32.f32 %v3246_v50  ;;  %v3365_v25 = vunpack.c.0.s8 %v2901_v26  ;;  %v3369_v62 = vunpack.c.1.s8 %v2901_v26  ;;  %4968 = vmatpush.bf16.msra.mxu2 %v5525_v8 }
 0x384   :  { %v4169_v45 = vpack.c.bf16 %v3889_v38, %v3885_v16  ;;  %v3762_v48 = vcvt.s32.f32 %v3250_v44  ;;  %v3046_v17 = vunpack.c.0.s8 %v2822_v34  ;;  %v3050_v28 = vunpack.c.1.s8 %v2822_v34  ;;  %v4248_v44 = vpop.f32.mrf.mxu1 }
 0x385   :  { %4606 = vmatpush.bf16.msrb.mxu3 %v4110_v15  ;;  %v4010_v42 = vpack.c.bf16 %v3570_v63, %v3566_v40  ;;  %v3877_v19 = vcvt.s32.f32 %v3365_v25  ;;  %v3881_v51 = vcvt.s32.f32 %v3369_v62  ;;  %v3238_v37 = vunpack.c.0.s8 %v2870_v29  ;;  %v2842_v62 = vld [vmem:[#allocation16 + $0x1b8] sm:$0xff] }
 0x386   :  { %4523 = vmatpush.bf16.msra.mxu1 %v4169_v45  ;;  %v4106_v13 = vpack.c.bf16 %v3762_v48, %v3758_v31  ;;  %v3558_v18 = vcvt.s32.f32 %v3046_v17  ;;  %v3562_v33 = vcvt.s32.f32 %v3050_v28  ;;  %v3242_v35 = vunpack.c.1.s8 %v2870_v29  ;;  %v6683_v29 = vpop.f32.mrf.mxu2  ;;  %v5524_v45 = vld [vmem:[#allocation17 + $0x28] sm:$0xff] }
 0x387   :  { %4565 = vmatpush.bf16.msrb.mxu0 %v4010_v42  ;;  %v4165_v60 = vpack.c.bf16 %v3881_v51, %v3877_v19  ;;  %v3750_v6 = vcvt.s32.f32 %v3238_v37  ;;  %v3166_v7 = vunpack.c.2.s8 %v2850_v21  ;;  %v3170_v3 = vunpack.c.3.s8 %v2850_v21  ;;  %v2890_v42 = vld [vmem:[#allocation16 + $0x338] sm:$0xff]  ;;  %4969 = vmatpush.bf16.msra.mxu2 %v5524_v45 }
 0x388   :  { %v4006_v43 = vpack.c.bf16 %v3562_v33, %v3558_v18  ;;  %v3754_v23 = vcvt.s32.f32 %v3242_v35  ;;  %v3358_v14 = vunpack.c.2.s8 %v2898_v1  ;;  %v3362_v56 = vunpack.c.3.s8 %v2898_v1  ;;  %v4288_v18 = vpop.f32.mrf.mxu0 }
 0x389   :  { %4607 = vmatpush.bf16.msrb.mxu3 %v4106_v13  ;;  %v4221_v11 = vadd.f32 %v4220_v22, %v4206_v12  ;;  %v3678_v26 = vcvt.s32.f32 %v3166_v7  ;;  %v3682_v58 = vcvt.s32.f32 %v3170_v3  ;;  %v3158_v36 = vunpack.c.0.s8 %v2850_v21  ;;  %v4274_v12 = vpop.f32.mrf.mxu3 }
 0x38a   :  { %4524 = vmatpush.bf16.msra.mxu1 %v4165_v60  ;;  %v4102_v34 = vpack.c.bf16 %v3754_v23, %v3750_v6  ;;  %v3870_v55 = vcvt.s32.f32 %v3358_v14  ;;  %v3874_v41 = vcvt.s32.f32 %v3362_v56  ;;  %v3162_v32 = vunpack.c.1.s8 %v2850_v21  ;;  %v2838_v14 = vld [vmem:[#allocation16 + $0x198] sm:$0xff] }
 0x38b   :  { %4566 = vmatpush.bf16.msrb.mxu0 %v4006_v43  ;;  %v4066_v54 = vpack.c.bf16 %v3682_v58, %v3678_v26  ;;  %v3670_v46 = vcvt.s32.f32 %v3158_v36  ;;  %v3350_v53 = vunpack.c.0.s8 %v2898_v1  ;;  %v3354_v49 = vunpack.c.1.s8 %v2898_v1  ;;  %4970 = vmatpush.bf16.msra.mxu2 %v5523_v0 }
 0x38c   :  { %v4162_v61 = vpack.c.bf16 %v3874_v41, %v3870_v55  ;;  %v3674_v52 = vcvt.s32.f32 %v3162_v32  ;;  %v3150_v2 = vunpack.c.2.s8 %v2846_v59  ;;  %v3154_v16 = vunpack.c.3.s8 %v2846_v59 }
 0x38d   :  { %4608 = vmatpush.bf16.msrb.mxu3 %v4102_v34  ;;  %v3862_v30 = vcvt.s32.f32 %v3350_v53  ;;  %v3866_v50 = vcvt.s32.f32 %v3354_v49  ;;  %v3342_v15 = vunpack.c.2.s8 %v2894_v9  ;;  %v3346_v38 = vunpack.c.3.s8 %v2894_v9  ;;  %4525 = vmatmul.bf16.vlgmr.msra.gmra.mxu1 %v6648_v47 }
 0x38e   :  { %4573 = vmatpush.bf16.msrb.mxu1 %v4066_v54  ;;  %v4233_v40 = vadd.f32 %v6679_v39, %v6677_v27  ;;  %v4062_v63 = vpack.c.bf16 %v3674_v52, %v3670_v46  ;;  %v3662_v31 = vcvt.s32.f32 %v3150_v2  ;;  %v3666_v25 = vcvt.s32.f32 %v3154_v16  ;;  %4567 = vmatmul.bf16.vlgmr.msrb.gmra.mxu0 %v6482_v5  ;;  %v4262_v56 = vpop.f32.mrf.mxu2 }
 0x38f   :  { %4615 = vmatpush.bf16.msra.mxu0 %v4162_v61  ;;  %v4235_v48 = vadd.f32 %v4234_v10, %v4221_v11  ;;  %v4158_v17 = vpack.c.bf16 %v3866_v50, %v3862_v30  ;;  %v3854_v28 = vcvt.s32.f32 %v3342_v15  ;;  %v3858_v21 = vcvt.s32.f32 %v3346_v38 }
 0x390   :  { %4609 = vmatmul.bf16.vlgmr.msrb.gmra.mxu3 %v6538_v24  ;;  %v4058_v27 = vpack.c.bf16 %v3666_v25, %v3662_v31  ;;  %v3142_v39 = vunpack.c.0.s8 %v2846_v59  ;;  %v3146_v19 = vunpack.c.1.s8 %v2846_v59  ;;  %v3334_v51 = vunpack.c.0.s8 %v2894_v9  ;;  %v2886_v59 = vld [vmem:[#allocation16 + $0x318] sm:$0xff] }
 0x391   :  { %v4154_v37 = vpack.c.bf16 %v3858_v21, %v3854_v28  ;;  %v3338_v1 = vunpack.c.1.s8 %v2894_v9  ;;  %v3134_v22 = vunpack.c.2.s8 %v2842_v62  ;;  %v3138_v13 = vunpack.c.3.s8 %v2842_v62  ;;  %v5522_v9 = vld [vmem:[#allocation17 + $0x18] sm:$0xff]  ;;  %v4276_v49 = vpop.f32.mrf.mxu3 }
 0x392   :  { %4574 = vmatpush.bf16.msrb.mxu1 %v4062_v63  ;;  %v3654_v33 = vcvt.s32.f32 %v3142_v39  ;;  %v3658_v5 = vcvt.s32.f32 %v3146_v19  ;;  %v3846_v35 = vcvt.s32.f32 %v3334_v51  ;;  %v3326_v24 = vunpack.c.2.s8 %v2890_v42  ;;  %4971 = vmatpush.bf16.msra.mxu2 %v5522_v9  ;;  %v6695_v39 = vld [vmem:[%s6732_s9] sm:$0xf] }
 0x393   :  { %4616 = vmatpush.bf16.msra.mxu0 %v4158_v17  ;;  %v3850_v60 = vcvt.s32.f32 %v3338_v1  ;;  %v3330_v6 = vunpack.c.3.s8 %v2890_v42  ;;  %v4247_v7 = vadd.f32 %v6681_v20, %v4233_v40  ;;  %v4249_v3 = vadd.f32 %v4248_v44, %v4235_v48  ;;  %v4302_v32 = vpop.f32.mrf.mxu1  ;;  %v2914_v40 = vld [vmem:[#allocation16 + $0x3f8] sm:$0xff]  ;;  %v5521_v44 = vld [vmem:[#allocation17 + $0x10] sm:$0xff]  ;;  %v5520_v1 = vld [vmem:[#allocation17 + $0x8] sm:$0xff] }
 0x394   :  { %v3646_v43 = vcvt.s32.f32 %v3134_v22  ;;  %v3650_v23 = vcvt.s32.f32 %v3138_v13  ;;  %v4054_v11 = vpack.c.bf16 %v3658_v5, %v3654_v33  ;;  %v3838_v26 = vcvt.s32.f32 %v3326_v24 }
 0x395   :  { %v3126_v58 = vunpack.c.0.s8 %v2842_v62  ;;  %v3130_v36 = vunpack.c.1.s8 %v2842_v62  ;;  %v4150_v10 = vpack.c.bf16 %v3850_v60, %v3846_v35  ;;  %v3842_v34 = vcvt.s32.f32 %v3330_v6  ;;  %v4290_v62 = vpop.f32.mrf.mxu0 }
 0x396   :  { %4575 = vmatpush.bf16.msrb.mxu1 %v4058_v27  ;;  %v3318_v55 = vunpack.c.0.s8 %v2890_v42  ;;  %v3322_v41 = vunpack.c.1.s8 %v2890_v42  ;;  %v4261_v20 = vadd.f32 %v6683_v29, %v4247_v7  ;;  %v3118_v54 = vunpack.c.2.s8 %v2838_v14  ;;  %4972 = vmatpush.bf16.msra.mxu2 %v5521_v44  ;;  %v4316_v33 = vpop.f32.mrf.mxu2  ;;  %v2906_v44 = vld [vmem:[#allocation16 + $0x3b8] sm:$0xff] }
 0x397   :  { %4617 = vmatpush.bf16.msra.mxu0 %v4154_v37  ;;  %v3122_v46 = vunpack.c.3.s8 %v2838_v14  ;;  %v4263_v53 = vadd.f32 %v4262_v56, %v4249_v3  ;;  %v3310_v8 = vunpack.c.2.s8 %v2886_v59  ;;  %v3314_v61 = vunpack.c.3.s8 %v2886_v59  ;;  %v6700_v37 = vld [vmem:[%s6733_s10] sm:$0xf] }
 0x398   :  { %v4275_v52 = vadd.f32 %v4274_v12, %v4261_v20  ;;  %v4050_v2 = vpack.c.bf16 %v3650_v23, %v3646_v43  ;;  %v3638_v16 = vcvt.s32.f32 %v3126_v58  ;;  %v3642_v30 = vcvt.s32.f32 %v3130_v36  ;;  %v5519_v36 = vld [vmem:[#allocation17] sm:$0xff] }
 0x399   :  { %v4146_v50 = vpack.c.bf16 %v3842_v34, %v3838_v26  ;;  %v3830_v15 = vcvt.s32.f32 %v3318_v55  ;;  %v3834_v38 = vcvt.s32.f32 %v3322_v41  ;;  %v4277_v63 = vadd.f32 %v4276_v49, %v4263_v53  ;;  %v4330_v23 = vpop.f32.mrf.mxu3  ;;  %v2910_v26 = vld [vmem:[#allocation16 + $0x3d8] sm:$0xff] }
 0x39a   :  { %4576 = vmatpush.bf16.msrb.mxu1 %v4054_v11  ;;  %v4289_v29 = vadd.f32 %v4288_v18, %v4275_v52  ;;  %v3630_v31 = vcvt.s32.f32 %v3118_v54  ;;  %v3634_v25 = vcvt.s32.f32 %v3122_v46  ;;  %v3822_v45 = vcvt.s32.f32 %v3310_v8  ;;  %4973 = vmatpush.bf16.msra.mxu2 %v5520_v1  ;;  %v5534_v49 = vld [vmem:[#allocation17 + $0x78] sm:$0xff] }
 0x39b   :  { %4618 = vmatpush.bf16.msra.mxu0 %v4150_v10  ;;  %v3826_v48 = vcvt.s32.f32 %v3314_v61  ;;  %v3110_v17 = vunpack.c.0.s8 %v2838_v14  ;;  %v3114_v12 = vunpack.c.1.s8 %v2838_v14  ;;  %v4046_v28 = vpack.c.bf16 %v3642_v30, %v3638_v16  ;;  %v4304_v60 = vpop.f32.mrf.mxu1  ;;  %4981 = vmatpush.bf16.msra.mxu3 %v5534_v49  ;;  %v5533_v16 = vld [vmem:[#allocation17 + $0x70] sm:$0xff] }
 0x39c   :  { %v3302_v21 = vunpack.c.0.s8 %v2886_v59  ;;  %v3306_v42 = vunpack.c.1.s8 %v2886_v59  ;;  %v3422_v27 = vunpack.c.2.s8 %v2914_v40  ;;  %v4142_v19 = vpack.c.bf16 %v3834_v38, %v3830_v15 }
 0x39d   :  { %v3426_v51 = vunpack.c.3.s8 %v2914_v40  ;;  %v4291_v22 = vadd.f32 %v4290_v62, %v4277_v63  ;;  %v4042_v13 = vpack.c.bf16 %v3634_v25, %v3630_v31  ;;  %v4303_v18 = vadd.f32 %v4302_v32, %v4289_v29  ;;  %v4344_v9 = vpop.f32.mrf.mxu0 }
 0x39e   :  { %4577 = vmatpush.bf16.msrb.mxu1 %v4050_v2  ;;  %v4138_v5 = vpack.c.bf16 %v3826_v48, %v3822_v45  ;;  %v3622_v35 = vcvt.s32.f32 %v3110_v17  ;;  %v3626_v24 = vcvt.s32.f32 %v3114_v12  ;;  %v4645_v0 = vperm.slane %v6695_v39, 0  ;;  %4974 = vmatpush.bf16.msra.mxu2 %v5519_v36  ;;  %v4318_v30 = vpop.f32.mrf.mxu2  ;;  %v5532_v45 = vld [vmem:[#allocation17 + $0x68] sm:$0xff] }
 0x39f   :  { %4619 = vmatpush.bf16.msra.mxu0 %v4146_v50  ;;  %v3814_v6 = vcvt.s32.f32 %v3302_v21  ;;  %v3818_v7 = vcvt.s32.f32 %v3306_v42  ;;  %v3934_v3 = vcvt.s32.f32 %v3422_v27  ;;  %v4663_v43 = vperm.slane %v6700_v37, 0  ;;  %4982 = vmatpush.bf16.msra.mxu3 %v5533_v16  ;;  %v5527_v16 = vld [vmem:[#allocation17 + $0x40] sm:$0xff] }
 0x3a0   :  { %v3938_v14 = vcvt.s32.f32 %v3426_v51  ;;  %v3414_v56 = vunpack.c.0.s8 %v2914_v40  ;;  %v3418_v11 = vunpack.c.1.s8 %v2914_v40  ;;  %v4653_v58 = vmul.f32 %v4645_v0, %v4303_v18  ;;  %v5531_v51 = vld [vmem:[#allocation17 + $0x60] sm:$0xff] }
 0x3a1   :  { %v4305_v59 = vadd.f32 %v4304_v60, %v4291_v22  ;;  %v4038_v34 = vpack.c.bf16 %v3626_v24, %v3622_v35  ;;  %v4134_v55 = vpack.c.bf16 %v3818_v7, %v3814_v6  ;;  %v3406_v41 = vunpack.c.2.s8 %v2910_v26  ;;  %v4332_v25 = vpop.f32.mrf.mxu3  ;;  %v5530_v24 = vld [vmem:[#allocation17 + $0x58] sm:$0xff] }
 0x3a2   :  { %4578 = vmatpush.bf16.msrb.mxu1 %v4046_v28  ;;  %v4671_v10 = vadd.f32 %v4663_v43, %v4653_v58  ;;  %v4194_v20 = vpack.c.bf16 %v3938_v14, %v3934_v3  ;;  %v3926_v54 = vcvt.s32.f32 %v3414_v56  ;;  %v3930_v46 = vcvt.s32.f32 %v3418_v11  ;;  %v5529_v11 = vld [vmem:[#allocation17 + $0x50] sm:$0xff] }
 0x3a3   :  { %4620 = vmatpush.bf16.msra.mxu0 %v4142_v19  ;;  %v4657_v32 = vmul.f32 %v4645_v0, %v4305_v59  ;;  %v3410_v53 = vunpack.c.3.s8 %v2910_v26  ;;  %v3918_v52 = vcvt.s32.f32 %v3406_v41  ;;  %v3398_v38 = vunpack.c.0.s8 %v2910_v26  ;;  %v4358_v63 = vpop.f32.mrf.mxu1  ;;  %4983 = vmatpush.bf16.msra.mxu3 %v5532_v45 }
 0x3a4   :  { %v4687_v8 = vmul.f32 0.01, %v4671_v10  ;;  %vm4679_vm13 = vcmp.gt.f32.partialorder %v4671_v10, 0.0  ;;  %v4190_v50 = vpack.c.bf16 %v3930_v46, %v3926_v54  ;;  %v3402_v40 = vunpack.c.1.s8 %v2910_v26 }
 0x3a5   :  { %v4675_v61 = vadd.f32 %v4663_v43, %v4657_v32  ;;  %v3922_v15 = vcvt.s32.f32 %v3410_v53  ;;  %v4331_v48 = vadd.f32 %v4330_v23, %v4316_v33  ;;  %v3390_v17 = vunpack.c.2.s8 %v2906_v44  ;;  %v4346_v19 = vpop.f32.mrf.mxu0 }
 0x3a6   :  { %4579 = vmatpush.bf16.msrb.mxu1 %v4042_v13  ;;  %v4695_v29 = vsel %vm4679_vm13, %v4671_v10, %v4687_v8  ;;  %v3910_v28 = vcvt.s32.f32 %v3398_v38  ;;  %v3914_v21 = vcvt.s32.f32 %v3402_v40  ;;  %v3394_v42 = vunpack.c.3.s8 %v2906_v44 }
 0x3a7   :  { %4621 = vmatpush.bf16.msra.mxu0 %v4138_v5  ;;  %vm4683_vm14 = vcmp.gt.f32.partialorder %v4675_v61, 0.0  ;;  %v4691_v2 = vmul.f32 0.01, %v4675_v61  ;;  %v4186_v12 = vpack.c.bf16 %v3922_v15, %v3918_v52  ;;  %v4345_v27 = vadd.f32 %v4344_v9, %v4331_v48  ;;  %4984 = vmatpush.bf16.msra.mxu3 %v5531_v51  ;;  %v5528_v9 = vld [vmem:[#allocation17 + $0x48] sm:$0xff] }
 0x3a8   :  { %v3902_v1 = vcvt.s32.f32 %v3390_v17  ;;  %v4182_v13 = vpack.c.bf16 %v3914_v21, %v3910_v28  ;;  %v3906_v18 = vcvt.s32.f32 %v3394_v42  ;;  %v3382_v33 = vunpack.c.0.s8 %v2906_v44  ;;  %v5542_v21 = vld [vmem:[#allocation17 + $0xb8] sm:$0xff]  ;;  %v5541_v42 = vld [vmem:[#allocation17 + $0xb0] sm:$0xff] }
 0x3a9   :  { %v4699_v31 = vsel %vm4683_vm14, %v4675_v61, %v4691_v2  ;;  %v4359_v22 = vadd.f32 %v4358_v63, %v4345_v27  ;;  %v3386_v5 = vunpack.c.1.s8 %v2906_v44  ;;  %v4333_v0 = vadd.f32 %v4332_v25, %v4318_v30  ;;  %v4386_v7 = vpop.f32.mrf.mxu3  ;;  %v5540_v27 = vld [vmem:[#allocation17 + $0xa8] sm:$0xff] }
 0x3aa   :  { %4580 = vmatpush.bf16.msrb.mxu1 %v4038_v34  ;;  %v4703_v62 = vpack.c.bf16 %v4699_v31, %v4695_v29  ;;  %v4178_v3 = vpack.c.bf16 %v3906_v18, %v3902_v1  ;;  %v3894_v43 = vcvt.s32.f32 %v3382_v33  ;;  %v4646_v52 = vperm.slane %v6695_v39, 1  ;;  %v5536_v18 = vld [vmem:[#allocation17 + $0x88] sm:$0xff] }
 0x3ab   :  { %4622 = vmatpush.bf16.msra.mxu0 %v4134_v55  ;;  %v4360_v35 = vpop.f32.mrf.mxu1  ;;  %v3898_v23 = vcvt.s32.f32 %v3386_v5  ;;  %v4347_v56 = vadd.f32 %v4346_v19, %v4333_v0  ;;  %4985 = vmatpush.bf16.msra.mxu3 %v5530_v24  ;;  %v4664_v38 = vperm.slane %v6700_v37, 1  ;;  %v5539_v19 = vld [vmem:[#allocation17 + $0xa0] sm:$0xff] }
 0x3ac   :  { %4975 = vmatmul.bf16.vlgmr.msra.gmra.mxu2 %v4703_v62  ;;  %v5535_v24 = vld [vmem:[#allocation17 + $0x80] sm:$0xff] }
 0x3ad   :  { %4581 = vmatmul.bf16.vlgmr.msrb.gmra.mxu1 %v6486_v57  ;;  %v4372_v57 = vpop.f32.mrf.mxu2  ;;  %v4361_v58 = vadd.f32 %v4360_v35, %v4347_v56  ;;  %v4400_v59 = vpop.f32.mrf.mxu0  ;;  %v4174_v10 = vpack.c.bf16 %v3898_v23, %v3894_v43 }
 0x3ae   :  { %4629 = vmatpush.bf16.msra.mxu1 %v4194_v20  ;;  %4623 = vmatmul.bf16.vlgmr.msra.gmra.mxu0 %v6586_v4  ;;  %v2902_v4 = vld [vmem:[#allocation16 + $0x398] sm:$0xff]  ;;  %v4373_v6 = vadd.f32 %v4372_v57, %v4359_v22  ;;  %v5537_v22 = vld [vmem:[#allocation17 + $0x90] sm:$0xff] }
 0x3af   :  { %v3374_v60 = vunpack.c.2.s8 %v2902_v4  ;;  %v3378_v14 = vunpack.c.3.s8 %v2902_v4  ;;  %v3366_v55 = vunpack.c.0.s8 %v2902_v4  ;;  %v3370_v41 = vunpack.c.1.s8 %v2902_v4  ;;  %4986 = vmatpush.bf16.msra.mxu3 %v5529_v11  ;;  %4995 = vmatpush.bf16.msrb.mxu0 %v5542_v21 }
 0x3b0   :  { %v4387_v36 = vadd.f32 %v4386_v7, %v4373_v6 }
 0x3b1   :  { %v3886_v26 = vcvt.s32.f32 %v3374_v60  ;;  %v3890_v34 = vcvt.s32.f32 %v3378_v14  ;;  %v3878_v53 = vcvt.s32.f32 %v3366_v55  ;;  %v3882_v49 = vcvt.s32.f32 %v3370_v41  ;;  %v4388_v2 = vpop.f32.mrf.mxu3 }
 0x3b2   :  { %4630 = vmatpush.bf16.msra.mxu1 %v4190_v50  ;;  %v4401_v54 = vadd.f32 %v4400_v59, %v4387_v36  ;;  %v4647_v55 = vperm.slane %v6695_v39, 2 }
 0x3b3   :  { %v4170_v46 = vpack.c.bf16 %v3890_v34, %v3886_v26  ;;  %4987 = vmatpush.bf16.msra.mxu3 %v5528_v9  ;;  %v4166_v50 = vpack.c.bf16 %v3882_v49, %v3878_v53  ;;  %4996 = vmatpush.bf16.msrb.mxu0 %v5541_v42  ;;  %v5543_v42 = vld [vmem:[#allocation17 + $0xc0] sm:$0xff] }
 0x3b5   :  { %v4374_v32 = vpop.f32.mrf.mxu2  ;;  %v4402_v40 = vpop.f32.mrf.mxu0 }
 0x3b6   :  { %4631 = vmatpush.bf16.msra.mxu1 %v4186_v12  ;;  %v4375_v20 = vadd.f32 %v4374_v32, %v4361_v58 }
 0x3b7   :  { %4988 = vmatpush.bf16.msra.mxu3 %v5527_v16  ;;  %4997 = vmatpush.bf16.msrb.mxu0 %v5540_v27  ;;  %v5550_v16 = vld [vmem:[#allocation17 + $0xf8] sm:$0xff] }
 0x3b8   :  { %v4389_v30 = vadd.f32 %v4388_v2, %v4375_v20  ;;  %v4665_v20 = vperm.slane %v6700_v37, 2 }
 0x3b9   :  { %v4442_v1 = vpop.f32.mrf.mxu3 }
 0x3ba   :  { %4632 = vmatpush.bf16.msra.mxu1 %v4182_v13  ;;  %v4403_v44 = vadd.f32 %v4402_v40, %v4389_v30 }
 0x3bb   :  { %4998 = vmatpush.bf16.msrb.mxu0 %v5539_v19 }
 0x3bd   :  { %v4428_v51 = vpop.f32.mrf.mxu2 }
 0x3be   :  { %4633 = vmatpush.bf16.msra.mxu1 %v4178_v3  ;;  %v4443_v5 = vadd.f32 %v4442_v1, %v4428_v51 }
 0x3bf   :  { %v4414_v8 = vpop.f32.mrf.mxu1 }
 0x3c0   :  { %v4415_v61 = vadd.f32 %v4414_v8, %v4401_v54  ;;  %v4456_v57 = vpop.f32.mrf.mxu0 }
 0x3c1   :  { %v4444_v4 = vpop.f32.mrf.mxu3  ;;  %v4457_v35 = vadd.f32 %v4456_v57, %v4443_v5 }
 0x3c2   :  { %4634 = vmatpush.bf16.msra.mxu1 %v4174_v10  ;;  %v4654_v15 = vmul.f32 %v4646_v52, %v4415_v61 }
 0x3c4   :  { %v4672_v29 = vadd.f32 %v4664_v38, %v4654_v15 }
 0x3c5   :  { %v4430_v13 = vpop.f32.mrf.mxu2 }
 0x3c6   :  { %4635 = vmatpush.bf16.msra.mxu1 %v4170_v46  ;;  %v4688_v62 = vmul.f32 0.01, %v4672_v29  ;;  %vm4680_vm15 = vcmp.gt.f32.partialorder %v4672_v29, 0.0  ;;  %v4445_v7 = vadd.f32 %v4444_v4, %v4430_v13 }
 0x3c7   :  { %v4416_v63 = vpop.f32.mrf.mxu1 }
 0x3c8   :  { %v4417_v31 = vadd.f32 %v4416_v63, %v4403_v44  ;;  %v4696_v17 = vsel %vm4680_vm15, %v4672_v29, %v4688_v62  ;;  %v4458_v6 = vpop.f32.mrf.mxu0  ;;  %v5548_v44 = vld [vmem:[#allocation17 + $0xe8] sm:$0xff]  ;;  %v5547_v63 = vld [vmem:[#allocation17 + $0xe0] sm:$0xff]  ;;  %v5545_v62 = vld [vmem:[#allocation17 + $0xd0] sm:$0xff] }
 0x3c9   :  { %v4498_v43 = vpop.f32.mrf.mxu3  ;;  %v4459_v14 = vadd.f32 %v4458_v6, %v4445_v7  ;;  %v4648_v7 = vperm.slane %v6695_v39, 3 }
 0x3ca   :  { %4636 = vmatpush.bf16.msra.mxu1 %v4166_v50  ;;  %v4658_v25 = vmul.f32 %v4646_v52, %v4417_v31  ;;  %v5549_v50 = vld [vmem:[#allocation17 + $0xf0] sm:$0xff]  ;;  %v5546_v31 = vld [vmem:[#allocation17 + $0xd8] sm:$0xff] }
 0x3cc   :  { %v4676_v45 = vadd.f32 %v4664_v38, %v4658_v25 }
 0x3cd   :  { %4637 = vmatmul.bf16.vlgmr.msra.gmra.mxu1 %v6648_v47  ;;  %v5538_v47 = vld [vmem:[#allocation17 + $0x98] sm:$0xff]  ;;  %v4484_v60 = vpop.f32.mrf.mxu2 }
 0x3ce   :  { %vm4684_vm0 = vcmp.gt.f32.partialorder %v4676_v45, 0.0  ;;  %v4692_v48 = vmul.f32 0.01, %v4676_v45  ;;  %4999 = vmatpush.bf16.msrb.mxu0 %v5538_v47  ;;  %5009 = vmatpush.bf16.msrb.mxu1 %v5550_v16 }
 0x3d0   :  { %v4700_v12 = vsel %vm4684_vm0, %v4676_v45, %v4692_v48 }
 0x3d1   :  { %v4704_v28 = vpack.c.bf16 %v4700_v12, %v4696_v17  ;;  %v4500_v41 = vpop.f32.mrf.mxu3  ;;  %v5544_v17 = vld [vmem:[#allocation17 + $0xc8] sm:$0xff] }
 0x3d2   :  { %5000 = vmatpush.bf16.msrb.mxu0 %v5537_v22  ;;  %5010 = vmatpush.bf16.msrb.mxu1 %v5549_v50 }
 0x3d3   :  { %4989 = vmatmul.bf16.vlgmr.msra.gmra.mxu3 %v4704_v28 }
 0x3d5   :  { %v4486_v58 = vpop.f32.mrf.mxu2 }
 0x3d6   :  { %5001 = vmatpush.bf16.msrb.mxu0 %v5536_v18  ;;  %5011 = vmatpush.bf16.msrb.mxu1 %v5548_v44 }
 0x3da   :  { %5002 = vmatpush.bf16.msrb.mxu0 %v5535_v24  ;;  %5012 = vmatpush.bf16.msrb.mxu1 %v5547_v63 }
 0x3dd   :  { %v4540_v29 = vpop.f32.mrf.mxu2 }
 0x3de   :  { %5013 = vmatpush.bf16.msrb.mxu1 %v5546_v31 }
 0x3e2   :  { %5014 = vmatpush.bf16.msrb.mxu1 %v5545_v62 }
 0x3e5   :  { %v4542_v48 = vpop.f32.mrf.mxu2 }
 0x3e6   :  { %5015 = vmatpush.bf16.msrb.mxu1 %v5544_v17 }
 0x3e7   :  { %v4470_v33 = vpop.f32.mrf.mxu1 }
 0x3e8   :  { %v4471_v0 = vadd.f32 %v4470_v33, %v4457_v35 }
 0x3e9   :  { %v4512_v26 = vpop.f32.mrf.mxu0 }
 0x3ea   :  { %v4485_v3 = vadd.f32 %v4484_v60, %v4471_v0  ;;  %5016 = vmatpush.bf16.msrb.mxu1 %v5543_v42 }
 0x3ec   :  { %v4499_v56 = vadd.f32 %v4498_v43, %v4485_v3 }
 0x3ee   :  { %v4513_v36 = vadd.f32 %v4512_v26, %v4499_v56 }
 0x3ef   :  { %v4472_v23 = vpop.f32.mrf.mxu1 }
 0x3f0   :  { %v4473_v11 = vadd.f32 %v4472_v23, %v4459_v14  ;;  %v4554_v25 = vpop.f32.mrf.mxu3  ;;  %v4666_v14 = vperm.slane %v6700_v37, 3  ;;  %v5571_v37 = vld [vmem:[%s6735_s12] ss:$0 sm:$0xff] }
 0x3f1   :  { %v4514_v54 = vpop.f32.mrf.mxu0  ;;  %v4555_v28 = vadd.f32 %v4554_v25, %v4540_v29 }
 0x3f2   :  { %v4487_v59 = vadd.f32 %v4486_v58, %v4473_v11 }
 0x3f4   :  { %v4501_v32 = vadd.f32 %v4500_v41, %v4487_v59 }
 0x3f6   :  { %v4515_v46 = vadd.f32 %v4514_v54, %v4501_v32 }
 0x3f8   :  { %v4556_v21 = vpop.f32.mrf.mxu3 }
 0x3f9   :  { %v4557_v1 = vadd.f32 %v4556_v21, %v4542_v48 }
 0x3fd   :  { %v4596_v51 = vpop.f32.mrf.mxu2 }
 0x405   :  { %v4598_v35 = vpop.f32.mrf.mxu2 }
 0x40a   :  { %v4526_v10 = vpop.f32.mrf.mxu1 }
 0x40b   :  { %v4527_v34 = vadd.f32 %v4526_v10, %v4513_v36  ;;  %v4568_v45 = vpop.f32.mrf.mxu0 }
 0x40c   :  { %v4569_v27 = vadd.f32 %v4568_v45, %v4555_v28 }
 0x40d   :  { %v4655_v9 = vmul.f32 %v4647_v55, %v4527_v34 }
 0x40f   :  { %v4673_v49 = vadd.f32 %v4665_v20, %v4655_v9 }
 0x411   :  { %v4689_v52 = vmul.f32 0.01, %v4673_v49  ;;  %vm4681_vm1 = vcmp.gt.f32.partialorder %v4673_v49, 0.0 }
 0x412   :  { %v4528_v53 = vpop.f32.mrf.mxu1 }
 0x413   :  { %v4529_v8 = vadd.f32 %v4528_v53, %v4515_v46  ;;  %v4697_v15 = vsel %vm4681_vm1, %v4673_v49, %v4689_v52  ;;  %v4570_v47 = vpop.f32.mrf.mxu0  ;;  %v4610_v57 = vpop.f32.mrf.mxu3 }
 0x414   :  { %v4571_v18 = vadd.f32 %v4570_v47, %v4557_v1 }
 0x415   :  { %v4659_v61 = vmul.f32 %v4647_v55, %v4529_v8 }
 0x417   :  { %v4677_v2 = vadd.f32 %v4665_v20, %v4659_v61 }
 0x419   :  { %vm4685_vm2 = vcmp.gt.f32.partialorder %v4677_v2, 0.0  ;;  %v4693_v30 = vmul.f32 0.01, %v4677_v2 }
 0x41b   :  { %v4701_v38 = vsel %vm4685_vm2, %v4677_v2, %v4693_v30  ;;  %v4612_v3 = vpop.f32.mrf.mxu3 }
 0x41c   :  { %v4705_v40 = vpack.c.bf16 %v4701_v38, %v4697_v15 }
 0x41e   :  { %5003 = vmatmul.bf16.vlgmr.msrb.gmra.mxu0 %v4705_v40 }
 0x42a   :  { %v4582_v12 = vpop.f32.mrf.mxu1 }
 0x42b   :  { %v4583_v19 = vadd.f32 %v4582_v12, %v4569_v27  ;;  %v4624_v4 = vpop.f32.mrf.mxu0 }
 0x42d   :  { %v4597_v22 = vadd.f32 %v4596_v51, %v4583_v19 }
 0x42f   :  { %v4611_v33 = vadd.f32 %v4610_v57, %v4597_v22  ;;  %v4976_v39 = vpop.f32.mrf.mxu2 }
 0x430   :  { %v4977_v46 = vadd.f32 %v5571_v37, %v4976_v39 }
 0x431   :  { %v4625_v24 = vadd.f32 %v4624_v4, %v4611_v33 }
 0x432   :  { %v4584_v13 = vpop.f32.mrf.mxu1 }
 0x433   :  { %v4585_v5 = vadd.f32 %v4584_v13, %v4571_v18  ;;  %v4626_v56 = vpop.f32.mrf.mxu0 }
 0x435   :  { %v4599_v0 = vadd.f32 %v4598_v35, %v4585_v5 }
 0x437   :  { %v4613_v43 = vadd.f32 %v4612_v3, %v4599_v0  ;;  %v4978_v8 = vpop.f32.mrf.mxu2 }
 0x438   :  { %v4979_v16 = vadd.f32 %v5571_v37, %v4978_v8 }
 0x439   :  { %v4627_v11 = vadd.f32 %v4626_v56, %v4613_v43 }
 0x44a   :  { %v4638_v60 = vpop.f32.mrf.mxu1 }
 0x44b   :  { %v4639_v6 = vadd.f32 %v4638_v60, %v4625_v24 }
 0x44d   :  { %v4656_v23 = vmul.f32 %v4648_v7, %v4639_v6 }
 0x44f   :  { %v4674_v58 = vadd.f32 %v4666_v14, %v4656_v23 }
 0x451   :  { %v4690_v10 = vmul.f32 0.01, %v4674_v58  ;;  %vm4682_vm3 = vcmp.gt.f32.partialorder %v4674_v58, 0.0 }
 0x452   :  { %v4640_v26 = vpop.f32.mrf.mxu1 }
 0x453   :  { %v4641_v36 = vadd.f32 %v4640_v26, %v4627_v11  ;;  %v4698_v41 = vsel %vm4682_vm3, %v4674_v58, %v4690_v10 }
 0x455   :  { %v4660_v59 = vmul.f32 %v4648_v7, %v4641_v36 }
 0x456   :  { %v4990_v20 = vpop.f32.mrf.mxu3 }
 0x457   :  { %v4678_v34 = vadd.f32 %v4666_v14, %v4660_v59  ;;  %v4991_v53 = vadd.f32 %v4990_v20, %v4977_v46 }
 0x459   :  { %vm4686_vm4 = vcmp.gt.f32.partialorder %v4678_v34, 0.0  ;;  %v4694_v55 = vmul.f32 0.01, %v4678_v34 }
 0x45b   :  { %v4702_v32 = vsel %vm4686_vm4, %v4678_v34, %v4694_v55 }
 0x45c   :  { %v4706_v9 = vpack.c.bf16 %v4702_v32, %v4698_v41 }
 0x45e   :  { %5017 = vmatmul.bf16.vlgmr.msrb.gmra.mxu1 %v4706_v9  ;;  %v4992_v2 = vpop.f32.mrf.mxu3 }
 0x45f   :  { %v4993_v50 = vadd.f32 %v4992_v2, %v4979_v16 }
 0x49b   :  { %v5004_v54 = vpop.f32.mrf.mxu0 }
 0x49c   :  { %v5005_v49 = vadd.f32 %v5004_v54, %v4991_v53 }
 0x4a3   :  { %v5006_v30 = vpop.f32.mrf.mxu0 }
 0x4a4   :  { %v5007_v15 = vadd.f32 %v5006_v30, %v4993_v50 }
 0x4db   :  { %v5018_v61 = vpop.f32.mrf.mxu1 }
 0x4dc   :  { %v5019_v52 = vadd.f32 %v5018_v61, %v5005_v49 }
 0x4de   :  { %5023 = vst [vmem:[#allocation19] sm:$0xff] %v5019_v52 }
 0x4e3   :  { %v5020_v38 = vpop.f32.mrf.mxu1 }
 0x4e4   :  { %v5021_v40 = vadd.f32 %v5020_v38, %v5007_v15 }
 0x4e6   :  { %5024 = vst [vmem:[#allocation19 + $0x8] sm:$0xff] %v5021_v40 }
 0x4e7   :  { %5037 = dma.vmem_to_hbm [thread:$0]  %s5030_s25, 256, %s5032_s28, [#allocation4], %s5855_s16, %s5855_s16, %s5856_s17  }
 0x4e8   :  { %5852 = dma.done.wait [#allocation4], 256  }
 0x4e9   :  { %5853 = vsyncadd [#allocation4], 4294967040 }
 0x4ea   :  { %5042 = vsyncpa [#allocation3], 1 }
 0x4eb   :  { %5043 = vsyncpa [#allocation6], 1 }
 0x4ec   :  { %5044 = vsyncpa [#allocation9], 1 }
 0x4ed   :  { %5045 = vsyncpa [#allocation12], 1 }
 0x4ee   :  { %5046 = vsyncpa [#allocation15], 1 }
 0x4ef   :  { %5047 = vsyncpa [#allocation18], 1 }
 0x4f0   :  { %5048 = vsyncpa [#allocation4], 1 }

</bundles_post_ra>
